<compile_context>
chip_gen: v7x
topology: tpu7x:2x2x1
jax: 0.10.0
libtpu: 0.0.40
codegen_flags: <defaults>
</compile_context>

<pallas_src>
import math
import functools

import jax
import jax.numpy as jnp
from jax.experimental import pallas as pl
from jax.experimental.pallas import tpu as pltpu


# ----------------------------- math helpers ----------------------------------

_SQRT_2_OVER_PI = math.sqrt(2.0 / math.pi)


def _gelu(x):
    # matches PositionwiseFeedForward.gelu (tanh approximation)
    return 0.5 * x * (1.0 + jnp.tanh(_SQRT_2_OVER_PI * (x + 0.044715 * x * x * x)))


def _layer_norm(x, w, b, eps=1e-6):        # nn.LayerNorm(d_model, eps=1e-6)
    mean = jnp.mean(x, axis=-1, keepdims=True)
    var = jnp.mean((x - mean) ** 2, axis=-1, keepdims=True)
    return (x - mean) * jax.lax.rsqrt(var + eps) * w + b


def _round_up(x, m):
    return ((x + m - 1) // m) * m


def _chip_generation():
    try:
        kind = jax.devices()[0].device_kind.lower()
    except Exception:
        return 6
    for gen in (7, 6, 5, 4, 3, 2):
        if f"v{gen}" in kind:
            return gen
    return 6


def _vmem_limit_bytes():
    """Per-generation scoped-VMEM limit with headroom for compiler scratch."""
    try:
        cap = int(pltpu.get_tpu_info().vmem_capacity_bytes)
    except Exception:
        cap = 64 * 1024 * 1024            # conservative: v7x per-TC VMEM
    return max(32 * 1024 * 1024, int(0.75 * cap))


def _const_spec(shape, single_buffer):
    """BlockSpec for a grid-invariant operand (weights / biases / LN params).

    With single_buffer=True the block is kept single-buffered
    (pipeline_mode=pl.Buffered(1)) - the block index never changes, so this
    halves resident weight VMEM at zero DMA cost (matters on v7x's 64 MiB).
    """
    index_map = lambda *_: (0,) * len(shape)
    if single_buffer and hasattr(pl, "Buffered"):
        try:
            return pl.BlockSpec(shape, index_map, pipeline_mode=pl.Buffered(1))
        except Exception:
            pass
    return pl.BlockSpec(shape, index_map)


# ---------------- kernel 1: (optional ln0) + fused QKV projection -------------

def qkv_project_kernel(x_ref, ln_w_ref, ln_b_ref,
                       wq_ref, bq_ref, wk_ref, bk_ref, wv_ref, bv_ref,
                       q_out, k_out, v_out, *, heads, do_norm):
    x = x_ref[0]                                        # (TR, D) f32
    xn = _layer_norm(x, ln_w_ref[0], ln_b_ref[0]) if do_norm else x
    xb = xn.astype(jnp.bfloat16)

    def project(w_ref, b_ref):
        y = jnp.dot(xb, w_ref[...], preferred_element_type=jnp.float32) + b_ref[0]
        tr, d = y.shape
        dh = d // heads
        # (TR, D) -> (H, TR, dh): one-time head split so the flash kernel gets
        # clean leading-batch batched-matmul operands (no per-step reshapes).
        return jnp.transpose(y.reshape(tr, heads, dh), (1, 0, 2)).astype(jnp.bfloat16)

    q_out[0] = project(wq_ref, bq_ref)     # 1/sqrt(dh) already folded into wq/bq
    k_out[0] = project(wk_ref, bk_ref)
    v_out[0] = project(wv_ref, bv_ref)


# -------- kernel 2: flash attention + output projection + residual ------------

def flash_attn_kernel(q_ref, k_ref, v_ref, bias_ref, wo_ref, bo_ref, x_ref,
                      out_ref, m_sc, l_sc, acc_sc, *, exp_dtype):
    ki = pl.program_id(2)
    nk = pl.num_programs(2)

    @pl.when(ki == 0)
    def _init():
        m_sc[...] = jnp.full(m_sc.shape, -1e30, jnp.float32)
        l_sc[...] = jnp.zeros(l_sc.shape, jnp.float32)
        acc_sc[...] = jnp.zeros(acc_sc.shape, jnp.float32)

    q = q_ref[0]                         # (H, TQ, dh) bf16, pre-scaled
    k = k_ref[0]                         # (H, TK, dh) bf16
    v = v_ref[0]                         # (H, TK, dh) bf16

    s = jnp.einsum('hqd,hkd->hqk', q, k,
                   preferred_element_type=jnp.float32)     # (H, TQ, TK) f32
    s = s + bias_ref[...]                # (1, 1, TK) additive mask: 0 / -1e18

    m_prev = m_sc[...]                                     # (H, TQ) f32
    m_new = jnp.maximum(m_prev, jnp.max(s, axis=-1))
    alpha = jnp.exp(m_prev - m_new)
    # bf16 exp on chips with a bf16 EUP (v6e/v7x), f32 on older chips; the
    # running max / sum stay in f32 to avoid drift.
    p = jnp.exp((s - m_new[..., None]).astype(exp_dtype))
    l_sc[...] = alpha * l_sc[...] + jnp.sum(p.astype(jnp.float32), axis=-1)
    acc_sc[...] = alpha[..., None] * acc_sc[...] + jnp.einsum(
        'hqk,hkd->hqd', p.astype(jnp.bfloat16), v,
        preferred_element_type=jnp.float32)
    m_sc[...] = m_new

    @pl.when(ki == nk - 1)
    def _finalize():
        # Exact divide: runs once per (batch, query tile) - approx buys nothing.
        ctx = acc_sc[...] / l_sc[...][..., None]           # (H, TQ, dh) f32
        h, tq, dh = ctx.shape
        # One-time head merge per query tile (amortized over nk key steps).
        ctx = jnp.transpose(ctx, (1, 0, 2)).reshape(tq, h * dh)
        attn = jnp.dot(ctx.astype(jnp.bfloat16), wo_ref[...],
                       preferred_element_type=jnp.float32) + bo_ref[0]
        # dropout == identity (eval); residual uses the un-normalized input.
        out_ref[0] = (attn + x_ref[0]).astype(out_ref.dtype)


# ---------------- kernel 3: positionwise FFN (ln1 + W1/GELU/W2 + res) ---------

def ffn_kernel(x_ref, ln_w_ref, ln_b_ref, w1_ref, b1_ref, w2_ref, b2_ref, out_ref):
    x = x_ref[0]                                        # (TR, D) f32
    h = _layer_norm(x, ln_w_ref[0], ln_b_ref[0])
    inter = _gelu(jnp.dot(h.astype(jnp.bfloat16), w1_ref[...],
                          preferred_element_type=jnp.float32) + b1_ref[0])
    y = jnp.dot(inter.astype(jnp.bfloat16), w2_ref[...],
                preferred_element_type=jnp.float32) + b2_ref[0]
    out_ref[0] = (y + x).astype(out_ref.dtype)


# ----------------------------- wrapper ----------------------------------------

def transformer_encoder_layer(iter_idx, inputs, mask, params, heads, *,
                              tile=None, single_buffer_weights=True):
    """TransformerEncoderLayer.forward (eval mode).

    inputs: (B, S, D) f32; mask: (B, S) f32 with 1.0 == masked key.
    iter_idx must be a static Python int (selects the input LayerNorm branch).
    """
    B, S, D = inputs.shape
    assert D % heads == 0
    dh = D // heads
    d_ff = params['w1'].shape[1]
    do_norm = (int(iter_idx) != 0)

    gen = _chip_generation()
    if tile is None:
        # 256 better fills the 2x256x256 MXU on v6e/v7x; 128 elsewhere / small S.
        tile = 256 if (gen >= 6 and S >= 256) else 128

    # Pad the sequence to a tile multiple (keeps flash tiling for any S).
    S_pad = _round_up(S, tile)
    nt = S_pad // tile
    if S_pad != S:
        x = jnp.pad(inputs, ((0, 0), (0, S_pad - S), (0, 0)))
        m = jnp.pad(mask.astype(jnp.float32), ((0, 0), (0, S_pad - S)),
                    constant_values=1.0)        # padded keys are masked out
    else:
        x = inputs
        m = mask.astype(jnp.float32)

    # Additive mask bias: 0.0 where visible, -1e18 where masked (== masked_fill).
    mask_bias = (m * (-1e18)).reshape(B, 1, S_pad)

    # Fold 1/sqrt(dh) into Wq/bq once; weights bf16 for the MXU, biases f32.
    scale = 1.0 / math.sqrt(dh)
    wq = (params['wq'] * scale).astype(jnp.bfloat16)
    bq = (params['bq'] * scale).astype(jnp.float32)
    wk = params['wk'].astype(jnp.bfloat16)
    wv = params['wv'].astype(jnp.bfloat16)
    wo = params['wo'].astype(jnp.bfloat16)
    w1 = params['w1'].astype(jnp.bfloat16)
    w2 = params['w2'].astype(jnp.bfloat16)

    vmem_limit = _vmem_limit_bytes()
    const = functools.partial(_const_spec, single_buffer=single_buffer_weights)

    # ---- kernel 1: (optional ln0) + QKV projection, head-split bf16 output ----
    q, k, v = pl.pallas_call(
        functools.partial(qkv_project_kernel, heads=heads, do_norm=do_norm),
        out_shape=tuple(jax.ShapeDtypeStruct((B, heads, S_pad, dh), jnp.bfloat16)
                        for _ in range(3)),
        grid_spec=pltpu.PrefetchScalarGridSpec(
            num_scalar_prefetch=0,
            grid=(B, nt),
            in_specs=[
                pl.BlockSpec((1, tile, D), lambda b, r: (b, r, 0)),
                const((1, D)), const((1, D)),                    # ln0 w, b
                const((D, D)), const((1, D)),                    # Wq (scaled), bq
                const((D, D)), const((1, D)),                    # Wk, bk
                const((D, D)), const((1, D)),                    # Wv, bv
            ],
            out_specs=tuple(
                pl.BlockSpec((1, heads, tile, dh), lambda b, r: (b, 0, r, 0))
                for _ in range(3)),
        ),
        compiler_params=pltpu.CompilerParams(
            dimension_semantics=("parallel", "parallel"),
            vmem_limit_bytes=vmem_limit),
    )(x, params['ln0_w'], params['ln0_b'],
      wq, bq, wk, params['bk'].astype(jnp.float32),
      wv, params['bv'].astype(jnp.float32))

    # ---- kernel 2: flash attention + Wo projection + residual -----------------
    exp_dtype = jnp.bfloat16 if gen >= 6 else jnp.float32
    attn_out = pl.pallas_call(
        functools.partial(flash_attn_kernel, exp_dtype=exp_dtype),
        out_shape=jax.ShapeDtypeStruct((B, S_pad, D), jnp.float32),
        grid_spec=pltpu.PrefetchScalarGridSpec(
            num_scalar_prefetch=0,
            grid=(B, nt, nt),
            in_specs=[
                pl.BlockSpec((1, heads, tile, dh), lambda b, qi, ki: (b, 0, qi, 0)),
                pl.BlockSpec((1, heads, tile, dh), lambda b, qi, ki: (b, 0, ki, 0)),
                pl.BlockSpec((1, heads, tile, dh), lambda b, qi, ki: (b, 0, ki, 0)),
                pl.BlockSpec((1, 1, tile), lambda b, qi, ki: (b, 0, ki)),
                const((D, D)), const((1, D)),                    # Wo, bo
                pl.BlockSpec((1, tile, D), lambda b, qi, ki: (b, qi, 0)),  # residual
            ],
            out_specs=pl.BlockSpec((1, tile, D), lambda b, qi, ki: (b, qi, 0)),
            scratch_shapes=[
                pltpu.VMEM((heads, tile), jnp.float32),          # running max
                pltpu.VMEM((heads, tile), jnp.float32),          # running sum
                pltpu.VMEM((heads, tile, dh), jnp.float32),      # PV accumulator
            ],
        ),
        compiler_params=pltpu.CompilerParams(
            dimension_semantics=("parallel", "parallel", "arbitrary"),
            vmem_limit_bytes=vmem_limit),
    )(q, k, v, mask_bias, wo, params['bo'].astype(jnp.float32), x)

    # ---- kernel 3: positionwise FFN ------------------------------------------
    out = pl.pallas_call(
        ffn_kernel,
        out_shape=jax.ShapeDtypeStruct((B, S_pad, D), jnp.float32),
        grid_spec=pltpu.PrefetchScalarGridSpec(
            num_scalar_prefetch=0,
            grid=(B, nt),
            in_specs=[
                pl.BlockSpec((1, tile, D), lambda b, r: (b, r, 0)),
                const((1, D)), const((1, D)),                    # ln1 w, b
                const((D, d_ff)), const((1, d_ff)),              # W1, b1
                const((d_ff, D)), const((1, D)),                 # W2, b2
            ],
            out_specs=pl.BlockSpec((1, tile, D), lambda b, r: (b, r, 0)),
        ),
        compiler_params=pltpu.CompilerParams(
            dimension_semantics=("parallel", "parallel"),
            vmem_limit_bytes=vmem_limit),
    )(attn_out, params['ln1_w'], params['ln1_b'],
      w1, params['b1'].astype(jnp.float32), w2, params['b2'].astype(jnp.float32))

    return out[:, :S, :] if S_pad != S else out


# ----------------------------- pure-JAX (f32) reference ------------------------

def reference(iter_idx, inputs, mask, p, heads):
    B, S, D = inputs.shape
    dh = D // heads
    x = inputs
    xn = _layer_norm(x, p['ln0_w'][0], p['ln0_b'][0]) if iter_idx != 0 else x
    q = xn @ p['wq'] + p['bq'][0]
    k = xn @ p['wk'] + p['bk'][0]
    v = xn @ p['wv'] + p['bv'][0]
    q = q.reshape(B, S, heads, dh).transpose(0, 2, 1, 3) / math.sqrt(dh)
    k = k.reshape(B, S, heads, dh).transpose(0, 2, 1, 3)
    v = v.reshape(B, S, heads, dh).transpose(0, 2, 1, 3)
    scores = jnp.einsum('bhqd,bhkd->bhqk', q, k)
    scores = jnp.where(mask[:, None, None, :] > 0.5, -1e18, scores)
    attn = jax.nn.softmax(scores, axis=-1)
    ctx = jnp.einsum('bhqk,bhkd->bhqd', attn, v).transpose(0, 2, 1, 3).reshape(B, S, D)
    out1 = ctx @ p['wo'] + p['bo'][0] + x
    h = _layer_norm(out1, p['ln1_w'][0], p['ln1_b'][0])
    inter = _gelu(h @ p['w1'] + p['b1'][0])
    return inter @ p['w2'] + p['b2'][0] + out1


# ----------------------------- main --------------------------------------------

if __name__ == "__main__":
    B, S, D, H, DFF = 2, 16, 32, 4, 64

    key = jax.random.PRNGKey(0)
    keys = jax.random.split(key, 16)

    def w(k_, shape, scale=0.1):
        return (scale * jax.random.normal(k_, shape)).astype(jnp.float32)

    params = {
        'ln0_w': jnp.ones((1, D), jnp.float32),
        'ln0_b': jnp.zeros((1, D), jnp.float32),
        'wq': w(keys[0], (D, D)), 'bq': w(keys[1], (1, D)),
        'wk': w(keys[2], (D, D)), 'bk': w(keys[3], (1, D)),
        'wv': w(keys[4], (D, D)), 'bv': w(keys[5], (1, D)),
        'wo': w(keys[6], (D, D)), 'bo': w(keys[7], (1, D)),
        'ln1_w': jnp.ones((1, D), jnp.float32),
        'ln1_b': jnp.zeros((1, D), jnp.float32),
        'w1': w(keys[8], (D, DFF)), 'b1': w(keys[9], (1, DFF)),
        'w2': w(keys[10], (DFF, D)), 'b2': w(keys[11], (1, D)),
    }

    inputs = jax.random.normal(keys[12], (B, S, D), jnp.float32)
    # mask the last 3 positions of each sequence (1.0 = masked)
    mask = jnp.zeros((B, S), jnp.float32).at[:, -3:].set(1.0)

    iter_idx = 1  # exercise the input layer-norm branch (iter != 0)

    def run(single_buffer):
        return transformer_encoder_layer(iter_idx, inputs, mask, params, H,
                                         single_buffer_weights=single_buffer)

    try:
        out = jax.block_until_ready(run(True))
    except Exception:
        # pl.Buffered(1) single-buffered weights unsupported on this build —
        # retry with default double-buffered weight blocks.
        out = jax.block_until_ready(run(False))

    ref = reference(iter_idx, inputs, mask, params, H)
    assert out.shape == (B, S, D)
    max_err = float(jnp.max(jnp.abs(out - ref)))
    # bf16 MXU operands + bf16 softmax exp => relaxed tolerance vs f32 reference
    assert jnp.allclose(out, ref, atol=5e-2, rtol=5e-2), max_err

    print("KERNEL_OK")
</pallas_src>

<mosaic_0001>
module attributes {stable_mosaic.version = 11 : i64} {
  func.func @qkv_project_kernel(%arg0: i32, %arg1: i32, %arg2: memref<1x128x32xf32, #tpu.memory_space<vmem>>, %arg3: memref<1x32xf32, #tpu.memory_space<vmem>>, %arg4: memref<1x32xf32, #tpu.memory_space<vmem>>, %arg5: memref<32x32xbf16, #tpu.memory_space<vmem>>, %arg6: memref<1x32xf32, #tpu.memory_space<vmem>>, %arg7: memref<32x32xbf16, #tpu.memory_space<vmem>>, %arg8: memref<1x32xf32, #tpu.memory_space<vmem>>, %arg9: memref<32x32xbf16, #tpu.memory_space<vmem>>, %arg10: memref<1x32xf32, #tpu.memory_space<vmem>>, %arg11: memref<1x4x128x8xbf16, #tpu.memory_space<vmem>>, %arg12: memref<1x4x128x8xbf16, #tpu.memory_space<vmem>>, %arg13: memref<1x4x128x8xbf16, #tpu.memory_space<vmem>>) attributes {dimension_semantics = [#tpu.dimension_semantics<parallel>, #tpu.dimension_semantics<parallel>], iteration_bounds = array<i64: 2, 1>, scalar_prefetch = 0 : i64, scratch_operands = 0 : i64, tpu.core_type = #tpu.core_type<tc>, window_params = [{transform_indices = @transform_0, window_bounds = array<i64: 1, 128, 32>}, {pipeline_mode = #tpu.pipeline_mode<synchronous>, transform_indices = @transform_1, window_bounds = array<i64: 1, 32>}, {pipeline_mode = #tpu.pipeline_mode<synchronous>, transform_indices = @transform_2, window_bounds = array<i64: 1, 32>}, {pipeline_mode = #tpu.pipeline_mode<synchronous>, transform_indices = @transform_3, window_bounds = array<i64: 32, 32>}, {pipeline_mode = #tpu.pipeline_mode<synchronous>, transform_indices = @transform_4, window_bounds = array<i64: 1, 32>}, {pipeline_mode = #tpu.pipeline_mode<synchronous>, transform_indices = @transform_5, window_bounds = array<i64: 32, 32>}, {pipeline_mode = #tpu.pipeline_mode<synchronous>, transform_indices = @transform_6, window_bounds = array<i64: 1, 32>}, {pipeline_mode = #tpu.pipeline_mode<synchronous>, transform_indices = @transform_7, window_bounds = array<i64: 32, 32>}, {pipeline_mode = #tpu.pipeline_mode<synchronous>, transform_indices = @transform_8, window_bounds = array<i64: 1, 32>}, {transform_indices = @transform_9, window_bounds = array<i64: 1, 4, 128, 8>}, {transform_indices = @transform_10, window_bounds = array<i64: 1, 4, 128, 8>}, {transform_indices = @transform_11, window_bounds = array<i64: 1, 4, 128, 8>}]} {
    %c0 = arith.constant 0 : index
    %c0_0 = arith.constant 0 : index
    %c0_1 = arith.constant 0 : index
    %0 = vector.load %arg2[%c0, %c0_0, %c0_1] : memref<1x128x32xf32, #tpu.memory_space<vmem>>, vector<1x128x32xf32>
    %1 = vector.shape_cast %0 : vector<1x128x32xf32> to vector<128x32xf32>
    %c0_2 = arith.constant 0 : index
    %c0_3 = arith.constant 0 : index
    %2 = vector.load %arg3[%c0_2, %c0_3] : memref<1x32xf32, #tpu.memory_space<vmem>>, vector<1x32xf32>
    %3 = vector.shape_cast %2 : vector<1x32xf32> to vector<32xf32>
    %c0_4 = arith.constant 0 : index
    %c0_5 = arith.constant 0 : index
    %4 = vector.load %arg4[%c0_4, %c0_5] : memref<1x32xf32, #tpu.memory_space<vmem>>, vector<1x32xf32>
    %5 = vector.shape_cast %4 : vector<1x32xf32> to vector<32xf32>
    %cst = arith.constant dense<0.000000e+00> : vector<128xf32>
    %6 = vector.multi_reduction <add>, %1, %cst [1] : vector<128x32xf32> to vector<128xf32>
    %7 = vector.shape_cast %6 : vector<128xf32> to vector<128x1xf32>
    %cst_6 = arith.constant 3.200000e+01 : f32
    %8 = vector.broadcast %cst_6 : f32 to vector<128x1xf32>
    %9 = arith.divf %7, %8 : vector<128x1xf32>
    %10 = vector.broadcast %9 : vector<128x1xf32> to vector<128x32xf32>
    %11 = arith.subf %1, %10 : vector<128x32xf32>
    %12 = arith.mulf %11, %11 : vector<128x32xf32>
    %cst_7 = arith.constant dense<0.000000e+00> : vector<128xf32>
    %13 = vector.multi_reduction <add>, %12, %cst_7 [1] : vector<128x32xf32> to vector<128xf32>
    %14 = vector.shape_cast %13 : vector<128xf32> to vector<128x1xf32>
    %cst_8 = arith.constant 3.200000e+01 : f32
    %15 = vector.broadcast %cst_8 : f32 to vector<128x1xf32>
    %16 = arith.divf %14, %15 : vector<128x1xf32>
    %17 = vector.broadcast %9 : vector<128x1xf32> to vector<128x32xf32>
    %18 = arith.subf %1, %17 : vector<128x32xf32>
    %cst_9 = arith.constant 9.99999997E-7 : f32
    %19 = vector.broadcast %cst_9 : f32 to vector<128x1xf32>
    %20 = arith.addf %16, %19 : vector<128x1xf32>
    %21 = math.rsqrt %20 : vector<128x1xf32>
    %22 = vector.broadcast %21 : vector<128x1xf32> to vector<128x32xf32>
    %23 = arith.mulf %18, %22 : vector<128x32xf32>
    %24 = vector.shape_cast %3 : vector<32xf32> to vector<1x32xf32>
    %25 = vector.broadcast %24 : vector<1x32xf32> to vector<128x32xf32>
    %26 = arith.mulf %23, %25 : vector<128x32xf32>
    %27 = vector.shape_cast %5 : vector<32xf32> to vector<1x32xf32>
    %28 = vector.broadcast %27 : vector<1x32xf32> to vector<128x32xf32>
    %29 = arith.addf %26, %28 : vector<128x32xf32>
    %30 = arith.truncf %29 : vector<128x32xf32> to vector<128x32xbf16>
    %c0_10 = arith.constant 0 : index
    %c0_11 = arith.constant 0 : index
    %31 = vector.load %arg5[%c0_10, %c0_11] : memref<32x32xbf16, #tpu.memory_space<vmem>>, vector<32x32xbf16>
    %cst_12 = arith.constant dense<0.000000e+00> : vector<128x32xf32>
    %32 = tpu.matmul %30, %31, %cst_12 {dimension_numbers = #tpu.dot_dimension_numbers<[1], [0], [0], [1], [0, 0, 1, 1], [], []>} : vector<128x32xbf16>, vector<32x32xbf16>, vector<128x32xf32> -> vector<128x32xf32>
    %c0_13 = arith.constant 0 : index
    %c0_14 = arith.constant 0 : index
    %33 = vector.load %arg6[%c0_13, %c0_14] : memref<1x32xf32, #tpu.memory_space<vmem>>, vector<1x32xf32>
    %34 = vector.shape_cast %33 : vector<1x32xf32> to vector<32xf32>
    %35 = vector.shape_cast %34 : vector<32xf32> to vector<1x32xf32>
    %36 = vector.broadcast %35 : vector<1x32xf32> to vector<128x32xf32>
    %37 = arith.addf %32, %36 : vector<128x32xf32>
    %38 = vector.shape_cast %37 : vector<128x32xf32> to vector<128x4x8xf32>
    %39 = tpu.transpose %38, [1, 0, 2] : vector<128x4x8xf32> -> vector<4x128x8xf32>
    %40 = arith.truncf %39 : vector<4x128x8xf32> to vector<4x128x8xbf16>
    %c0_15 = arith.constant 0 : index
    %c0_16 = arith.constant 0 : index
    %c0_17 = arith.constant 0 : index
    %c0_18 = arith.constant 0 : index
    %41 = vector.load %arg11[%c0_15, %c0_16, %c0_17, %c0_18] : memref<1x4x128x8xbf16, #tpu.memory_space<vmem>>, vector<1x4x128x8xbf16>
    %42 = vector.shape_cast %41 : vector<1x4x128x8xbf16> to vector<4x128x8xbf16>
    %43 = vector.shape_cast %40 : vector<4x128x8xbf16> to vector<1x4x128x8xbf16>
    tpu.vector_store %arg11[%c0_15, %c0_16, %c0_17, %c0_18], %43 {strides = array<i32>} : memref<1x4x128x8xbf16, #tpu.memory_space<vmem>>, vector<1x4x128x8xbf16>,
    %c0_19 = arith.constant 0 : index
    %c0_20 = arith.constant 0 : index
    %44 = vector.load %arg7[%c0_19, %c0_20] : memref<32x32xbf16, #tpu.memory_space<vmem>>, vector<32x32xbf16>
    %cst_21 = arith.constant dense<0.000000e+00> : vector<128x32xf32>
    %45 = tpu.matmul %30, %44, %cst_21 {dimension_numbers = #tpu.dot_dimension_numbers<[1], [0], [0], [1], [0, 0, 1, 1], [], []>} : vector<128x32xbf16>, vector<32x32xbf16>, vector<128x32xf32> -> vector<128x32xf32>
    %c0_22 = arith.constant 0 : index
    %c0_23 = arith.constant 0 : index
    %46 = vector.load %arg8[%c0_22, %c0_23] : memref<1x32xf32, #tpu.memory_space<vmem>>, vector<1x32xf32>
    %47 = vector.shape_cast %46 : vector<1x32xf32> to vector<32xf32>
    %48 = vector.shape_cast %47 : vector<32xf32> to vector<1x32xf32>
    %49 = vector.broadcast %48 : vector<1x32xf32> to vector<128x32xf32>
    %50 = arith.addf %45, %49 : vector<128x32xf32>
    %51 = vector.shape_cast %50 : vector<128x32xf32> to vector<128x4x8xf32>
    %52 = tpu.transpose %51, [1, 0, 2] : vector<128x4x8xf32> -> vector<4x128x8xf32>
    %53 = arith.truncf %52 : vector<4x128x8xf32> to vector<4x128x8xbf16>
    %c0_24 = arith.constant 0 : index
    %c0_25 = arith.constant 0 : index
    %c0_26 = arith.constant 0 : index
    %c0_27 = arith.constant 0 : index
    %54 = vector.load %arg12[%c0_24, %c0_25, %c0_26, %c0_27] : memref<1x4x128x8xbf16, #tpu.memory_space<vmem>>, vector<1x4x128x8xbf16>
    %55 = vector.shape_cast %54 : vector<1x4x128x8xbf16> to vector<4x128x8xbf16>
    %56 = vector.shape_cast %53 : vector<4x128x8xbf16> to vector<1x4x128x8xbf16>
    tpu.vector_store %arg12[%c0_24, %c0_25, %c0_26, %c0_27], %56 {strides = array<i32>} : memref<1x4x128x8xbf16, #tpu.memory_space<vmem>>, vector<1x4x128x8xbf16>,
    %c0_28 = arith.constant 0 : index
    %c0_29 = arith.constant 0 : index
    %57 = vector.load %arg9[%c0_28, %c0_29] : memref<32x32xbf16, #tpu.memory_space<vmem>>, vector<32x32xbf16>
    %cst_30 = arith.constant dense<0.000000e+00> : vector<128x32xf32>
    %58 = tpu.matmul %30, %57, %cst_30 {dimension_numbers = #tpu.dot_dimension_numbers<[1], [0], [0], [1], [0, 0, 1, 1], [], []>} : vector<128x32xbf16>, vector<32x32xbf16>, vector<128x32xf32> -> vector<128x32xf32>
    %c0_31 = arith.constant 0 : index
    %c0_32 = arith.constant 0 : index
    %59 = vector.load %arg10[%c0_31, %c0_32] : memref<1x32xf32, #tpu.memory_space<vmem>>, vector<1x32xf32>
    %60 = vector.shape_cast %59 : vector<1x32xf32> to vector<32xf32>
    %61 = vector.shape_cast %60 : vector<32xf32> to vector<1x32xf32>
    %62 = vector.broadcast %61 : vector<1x32xf32> to vector<128x32xf32>
    %63 = arith.addf %58, %62 : vector<128x32xf32>
    %64 = vector.shape_cast %63 : vector<128x32xf32> to vector<128x4x8xf32>
    %65 = tpu.transpose %64, [1, 0, 2] : vector<128x4x8xf32> -> vector<4x128x8xf32>
    %66 = arith.truncf %65 : vector<4x128x8xf32> to vector<4x128x8xbf16>
    %c0_33 = arith.constant 0 : index
    %c0_34 = arith.constant 0 : index
    %c0_35 = arith.constant 0 : index
    %c0_36 = arith.constant 0 : index
    %67 = vector.load %arg13[%c0_33, %c0_34, %c0_35, %c0_36] : memref<1x4x128x8xbf16, #tpu.memory_space<vmem>>, vector<1x4x128x8xbf16>
    %68 = vector.shape_cast %67 : vector<1x4x128x8xbf16> to vector<4x128x8xbf16>
    %69 = vector.shape_cast %66 : vector<4x128x8xbf16> to vector<1x4x128x8xbf16>
    tpu.vector_store %arg13[%c0_33, %c0_34, %c0_35, %c0_36], %69 {strides = array<i32>} : memref<1x4x128x8xbf16, #tpu.memory_space<vmem>>, vector<1x4x128x8xbf16>,
    return
  }
  func.func @transform_0(%arg0: i32, %arg1: i32) -> (i32, i32, i32) {
    %c0_i32 = arith.constant 0 : i32
    %c0_i32_0 = arith.constant 0 : i32
    return %arg0, %arg1, %c0_i32 : i32, i32, i32
  }
  func.func @transform_1(%arg0: i32, %arg1: i32) -> (i32, i32) {
    %c0_i32 = arith.constant 0 : i32
    %c0_i32_0 = arith.constant 0 : i32
    %c0_i32_1 = arith.constant 0 : i32
    return %c0_i32, %c0_i32_0 : i32, i32
  }
  func.func @transform_2(%arg0: i32, %arg1: i32) -> (i32, i32) {
    %c0_i32 = arith.constant 0 : i32
    %c0_i32_0 = arith.constant 0 : i32
    %c0_i32_1 = arith.constant 0 : i32
    return %c0_i32, %c0_i32_0 : i32, i32
  }
  func.func @transform_3(%arg0: i32, %arg1: i32) -> (i32, i32) {
    %c0_i32 = arith.constant 0 : i32
    %c0_i32_0 = arith.constant 0 : i32
    %c0_i32_1 = arith.constant 0 : i32
    return %c0_i32, %c0_i32_0 : i32, i32
  }
  func.func @transform_4(%arg0: i32, %arg1: i32) -> (i32, i32) {
    %c0_i32 = arith.constant 0 : i32
    %c0_i32_0 = arith.constant 0 : i32
    %c0_i32_1 = arith.constant 0 : i32
    return %c0_i32, %c0_i32_0 : i32, i32
  }
  func.func @transform_5(%arg0: i32, %arg1: i32) -> (i32, i32) {
    %c0_i32 = arith.constant 0 : i32
    %c0_i32_0 = arith.constant 0 : i32
    %c0_i32_1 = arith.constant 0 : i32
    return %c0_i32, %c0_i32_0 : i32, i32
  }
  func.func @transform_6(%arg0: i32, %arg1: i32) -> (i32, i32) {
    %c0_i32 = arith.constant 0 : i32
    %c0_i32_0 = arith.constant 0 : i32
    %c0_i32_1 = arith.constant 0 : i32
    return %c0_i32, %c0_i32_0 : i32, i32
  }
  func.func @transform_7(%arg0: i32, %arg1: i32) -> (i32, i32) {
    %c0_i32 = arith.constant 0 : i32
    %c0_i32_0 = arith.constant 0 : i32
    %c0_i32_1 = arith.constant 0 : i32
    return %c0_i32, %c0_i32_0 : i32, i32
  }
  func.func @transform_8(%arg0: i32, %arg1: i32) -> (i32, i32) {
    %c0_i32 = arith.constant 0 : i32
    %c0_i32_0 = arith.constant 0 : i32
    %c0_i32_1 = arith.constant 0 : i32
    return %c0_i32, %c0_i32_0 : i32, i32
  }
  func.func @transform_9(%arg0: i32, %arg1: i32) -> (i32, i32, i32, i32) {
    %c0_i32 = arith.constant 0 : i32
    %c0_i32_0 = arith.constant 0 : i32
    %c0_i32_1 = arith.constant 0 : i32
    return %arg0, %c0_i32, %arg1, %c0_i32_0 : i32, i32, i32, i32
  }
  func.func @transform_10(%arg0: i32, %arg1: i32) -> (i32, i32, i32, i32) {
    %c0_i32 = arith.constant 0 : i32
    %c0_i32_0 = arith.constant 0 : i32
    %c0_i32_1 = arith.constant 0 : i32
    return %arg0, %c0_i32, %arg1, %c0_i32_0 : i32, i32, i32, i32
  }
  func.func @transform_11(%arg0: i32, %arg1: i32) -> (i32, i32, i32, i32) {
    %c0_i32 = arith.constant 0 : i32
    %c0_i32_0 = arith.constant 0 : i32
    %c0_i32_1 = arith.constant 0 : i32
    return %arg0, %c0_i32, %arg1, %c0_i32_0 : i32, i32, i32, i32
  }
}

module attributes {stable_mosaic.version = 11 : i64} {
  func.func @qkv_project_kernel(%arg0: i32, %arg1: i32, %arg2: memref<1x128x32xf32, #tpu.memory_space<vmem>>, %arg3: memref<1x32xf32, #tpu.memory_space<vmem>>, %arg4: memref<1x32xf32, #tpu.memory_space<vmem>>, %arg5: memref<32x32xbf16, #tpu.memory_space<vmem>>, %arg6: memref<1x32xf32, #tpu.memory_space<vmem>>, %arg7: memref<32x32xbf16, #tpu.memory_space<vmem>>, %arg8: memref<1x32xf32, #tpu.memory_space<vmem>>, %arg9: memref<32x32xbf16, #tpu.memory_space<vmem>>, %arg10: memref<1x32xf32, #tpu.memory_space<vmem>>, %arg11: memref<1x4x128x8xbf16, #tpu.memory_space<vmem>>, %arg12: memref<1x4x128x8xbf16, #tpu.memory_space<vmem>>, %arg13: memref<1x4x128x8xbf16, #tpu.memory_space<vmem>>) attributes {dimension_semantics = [#tpu.dimension_semantics<parallel>, #tpu.dimension_semantics<parallel>], iteration_bounds = array<i64: 2, 1>, scalar_prefetch = 0 : i64, scratch_operands = 0 : i64, tpu.core_type = #tpu.core_type<tc>, window_params = [{transform_indices = @transform_0, window_bounds = array<i64: 1, 128, 32>}, {pipeline_mode = #tpu.pipeline_mode<synchronous>, transform_indices = @transform_1, window_bounds = array<i64: 1, 32>}, {pipeline_mode = #tpu.pipeline_mode<synchronous>, transform_indices = @transform_2, window_bounds = array<i64: 1, 32>}, {pipeline_mode = #tpu.pipeline_mode<synchronous>, transform_indices = @transform_3, window_bounds = array<i64: 32, 32>}, {pipeline_mode = #tpu.pipeline_mode<synchronous>, transform_indices = @transform_4, window_bounds = array<i64: 1, 32>}, {pipeline_mode = #tpu.pipeline_mode<synchronous>, transform_indices = @transform_5, window_bounds = array<i64: 32, 32>}, {pipeline_mode = #tpu.pipeline_mode<synchronous>, transform_indices = @transform_6, window_bounds = array<i64: 1, 32>}, {pipeline_mode = #tpu.pipeline_mode<synchronous>, transform_indices = @transform_7, window_bounds = array<i64: 32, 32>}, {pipeline_mode = #tpu.pipeline_mode<synchronous>, transform_indices = @transform_8, window_bounds = array<i64: 1, 32>}, {transform_indices = @transform_9, window_bounds = array<i64: 1, 4, 128, 8>}, {transform_indices = @transform_10, window_bounds = array<i64: 1, 4, 128, 8>}, {transform_indices = @transform_11, window_bounds = array<i64: 1, 4, 128, 8>}]} {
    %c0 = arith.constant 0 : index
    %c0_0 = arith.constant 0 : index
    %c0_1 = arith.constant 0 : index
    %0 = vector.load %arg2[%c0, %c0_0, %c0_1] : memref<1x128x32xf32, #tpu.memory_space<vmem>>, vector<1x128x32xf32>
    %1 = vector.shape_cast %0 : vector<1x128x32xf32> to vector<128x32xf32>
    %c0_2 = arith.constant 0 : index
    %c0_3 = arith.constant 0 : index
    %2 = vector.load %arg3[%c0_2, %c0_3] : memref<1x32xf32, #tpu.memory_space<vmem>>, vector<1x32xf32>
    %3 = vector.shape_cast %2 : vector<1x32xf32> to vector<32xf32>
    %c0_4 = arith.constant 0 : index
    %c0_5 = arith.constant 0 : index
    %4 = vector.load %arg4[%c0_4, %c0_5] : memref<1x32xf32, #tpu.memory_space<vmem>>, vector<1x32xf32>
    %5 = vector.shape_cast %4 : vector<1x32xf32> to vector<32xf32>
    %cst = arith.constant dense<0.000000e+00> : vector<128xf32>
    %6 = vector.multi_reduction <add>, %1, %cst [1] : vector<128x32xf32> to vector<128xf32>
    %7 = vector.shape_cast %6 : vector<128xf32> to vector<128x1xf32>
    %cst_6 = arith.constant 3.200000e+01 : f32
    %8 = vector.broadcast %cst_6 : f32 to vector<128x1xf32>
    %9 = arith.divf %7, %8 : vector<128x1xf32>
    %10 = vector.broadcast %9 : vector<128x1xf32> to vector<128x32xf32>
    %11 = arith.subf %1, %10 : vector<128x32xf32>
    %12 = arith.mulf %11, %11 : vector<128x32xf32>
    %cst_7 = arith.constant dense<0.000000e+00> : vector<128xf32>
    %13 = vector.multi_reduction <add>, %12, %cst_7 [1] : vector<128x32xf32> to vector<128xf32>
    %14 = vector.shape_cast %13 : vector<128xf32> to vector<128x1xf32>
    %cst_8 = arith.constant 3.200000e+01 : f32
    %15 = vector.broadcast %cst_8 : f32 to vector<128x1xf32>
    %16 = arith.divf %14, %15 : vector<128x1xf32>
    %17 = vector.broadcast %9 : vector<128x1xf32> to vector<128x32xf32>
    %18 = arith.subf %1, %17 : vector<128x32xf32>
    %cst_9 = arith.constant 9.99999997E-7 : f32
    %19 = vector.broadcast %cst_9 : f32 to vector<128x1xf32>
    %20 = arith.addf %16, %19 : vector<128x1xf32>
    %21 = math.rsqrt %20 : vector<128x1xf32>
    %22 = vector.broadcast %21 : vector<128x1xf32> to vector<128x32xf32>
    %23 = arith.mulf %18, %22 : vector<128x32xf32>
    %24 = vector.shape_cast %3 : vector<32xf32> to vector<1x32xf32>
    %25 = vector.broadcast %24 : vector<1x32xf32> to vector<128x32xf32>
    %26 = arith.mulf %23, %25 : vector<128x32xf32>
    %27 = vector.shape_cast %5 : vector<32xf32> to vector<1x32xf32>
    %28 = vector.broadcast %27 : vector<1x32xf32> to vector<128x32xf32>
    %29 = arith.addf %26, %28 : vector<128x32xf32>
    %30 = arith.truncf %29 : vector<128x32xf32> to vector<128x32xbf16>
    %c0_10 = arith.constant 0 : index
    %c0_11 = arith.constant 0 : index
    %31 = vector.load %arg5[%c0_10, %c0_11] : memref<32x32xbf16, #tpu.memory_space<vmem>>, vector<32x32xbf16>
    %cst_12 = arith.constant dense<0.000000e+00> : vector<128x32xf32>
    %32 = tpu.matmul %30, %31, %cst_12 {dimension_numbers = #tpu.dot_dimension_numbers<[1], [0], [0], [1], [0, 0, 1, 1], [], []>} : vector<128x32xbf16>, vector<32x32xbf16>, vector<128x32xf32> -> vector<128x32xf32>
    %c0_13 = arith.constant 0 : index
    %c0_14 = arith.constant 0 : index
    %33 = vector.load %arg6[%c0_13, %c0_14] : memref<1x32xf32, #tpu.memory_space<vmem>>, vector<1x32xf32>
    %34 = vector.shape_cast %33 : vector<1x32xf32> to vector<32xf32>
    %35 = vector.shape_cast %34 : vector<32xf32> to vector<1x32xf32>
    %36 = vector.broadcast %35 : vector<1x32xf32> to vector<128x32xf32>
    %37 = arith.addf %32, %36 : vector<128x32xf32>
    %38 = vector.shape_cast %37 : vector<128x32xf32> to vector<128x4x8xf32>
    %39 = tpu.transpose %38, [1, 0, 2] : vector<128x4x8xf32> -> vector<4x128x8xf32>
    %40 = arith.truncf %39 : vector<4x128x8xf32> to vector<4x128x8xbf16>
    %c0_15 = arith.constant 0 : index
    %c0_16 = arith.constant 0 : index
    %c0_17 = arith.constant 0 : index
    %c0_18 = arith.constant 0 : index
    %41 = vector.load %arg11[%c0_15, %c0_16, %c0_17, %c0_18] : memref<1x4x128x8xbf16, #tpu.memory_space<vmem>>, vector<1x4x128x8xbf16>
    %42 = vector.shape_cast %41 : vector<1x4x128x8xbf16> to vector<4x128x8xbf16>
    %43 = vector.shape_cast %40 : vector<4x128x8xbf16> to vector<1x4x128x8xbf16>
    tpu.vector_store %arg11[%c0_15, %c0_16, %c0_17, %c0_18], %43 {strides = array<i32>} : memref<1x4x128x8xbf16, #tpu.memory_space<vmem>>, vector<1x4x128x8xbf16>,
    %c0_19 = arith.constant 0 : index
    %c0_20 = arith.constant 0 : index
    %44 = vector.load %arg7[%c0_19, %c0_20] : memref<32x32xbf16, #tpu.memory_space<vmem>>, vector<32x32xbf16>
    %cst_21 = arith.constant dense<0.000000e+00> : vector<128x32xf32>
    %45 = tpu.matmul %30, %44, %cst_21 {dimension_numbers = #tpu.dot_dimension_numbers<[1], [0], [0], [1], [0, 0, 1, 1], [], []>} : vector<128x32xbf16>, vector<32x32xbf16>, vector<128x32xf32> -> vector<128x32xf32>
    %c0_22 = arith.constant 0 : index
    %c0_23 = arith.constant 0 : index
    %46 = vector.load %arg8[%c0_22, %c0_23] : memref<1x32xf32, #tpu.memory_space<vmem>>, vector<1x32xf32>
    %47 = vector.shape_cast %46 : vector<1x32xf32> to vector<32xf32>
    %48 = vector.shape_cast %47 : vector<32xf32> to vector<1x32xf32>
    %49 = vector.broadcast %48 : vector<1x32xf32> to vector<128x32xf32>
    %50 = arith.addf %45, %49 : vector<128x32xf32>
    %51 = vector.shape_cast %50 : vector<128x32xf32> to vector<128x4x8xf32>
    %52 = tpu.transpose %51, [1, 0, 2] : vector<128x4x8xf32> -> vector<4x128x8xf32>
    %53 = arith.truncf %52 : vector<4x128x8xf32> to vector<4x128x8xbf16>
    %c0_24 = arith.constant 0 : index
    %c0_25 = arith.constant 0 : index
    %c0_26 = arith.constant 0 : index
    %c0_27 = arith.constant 0 : index
    %54 = vector.load %arg12[%c0_24, %c0_25, %c0_26, %c0_27] : memref<1x4x128x8xbf16, #tpu.memory_space<vmem>>, vector<1x4x128x8xbf16>
    %55 = vector.shape_cast %54 : vector<1x4x128x8xbf16> to vector<4x128x8xbf16>
    %56 = vector.shape_cast %53 : vector<4x128x8xbf16> to vector<1x4x128x8xbf16>
    tpu.vector_store %arg12[%c0_24, %c0_25, %c0_26, %c0_27], %56 {strides = array<i32>} : memref<1x4x128x8xbf16, #tpu.memory_space<vmem>>, vector<1x4x128x8xbf16>,
    %c0_28 = arith.constant 0 : index
    %c0_29 = arith.constant 0 : index
    %57 = vector.load %arg9[%c0_28, %c0_29] : memref<32x32xbf16, #tpu.memory_space<vmem>>, vector<32x32xbf16>
    %cst_30 = arith.constant dense<0.000000e+00> : vector<128x32xf32>
    %58 = tpu.matmul %30, %57, %cst_30 {dimension_numbers = #tpu.dot_dimension_numbers<[1], [0], [0], [1], [0, 0, 1, 1], [], []>} : vector<128x32xbf16>, vector<32x32xbf16>, vector<128x32xf32> -> vector<128x32xf32>
    %c0_31 = arith.constant 0 : index
    %c0_32 = arith.constant 0 : index
    %59 = vector.load %arg10[%c0_31, %c0_32] : memref<1x32xf32, #tpu.memory_space<vmem>>, vector<1x32xf32>
    %60 = vector.shape_cast %59 : vector<1x32xf32> to vector<32xf32>
    %61 = vector.shape_cast %60 : vector<32xf32> to vector<1x32xf32>
    %62 = vector.broadcast %61 : vector<1x32xf32> to vector<128x32xf32>
    %63 = arith.addf %58, %62 : vector<128x32xf32>
    %64 = vector.shape_cast %63 : vector<128x32xf32> to vector<128x4x8xf32>
    %65 = tpu.transpose %64, [1, 0, 2] : vector<128x4x8xf32> -> vector<4x128x8xf32>
    %66 = arith.truncf %65 : vector<4x128x8xf32> to vector<4x128x8xbf16>
    %c0_33 = arith.constant 0 : index
    %c0_34 = arith.constant 0 : index
    %c0_35 = arith.constant 0 : index
    %c0_36 = arith.constant 0 : index
    %67 = vector.load %arg13[%c0_33, %c0_34, %c0_35, %c0_36] : memref<1x4x128x8xbf16, #tpu.memory_space<vmem>>, vector<1x4x128x8xbf16>
    %68 = vector.shape_cast %67 : vector<1x4x128x8xbf16> to vector<4x128x8xbf16>
    %69 = vector.shape_cast %66 : vector<4x128x8xbf16> to vector<1x4x128x8xbf16>
    tpu.vector_store %arg13[%c0_33, %c0_34, %c0_35, %c0_36], %69 {strides = array<i32>} : memref<1x4x128x8xbf16, #tpu.memory_space<vmem>>, vector<1x4x128x8xbf16>,
    return
  }
  func.func @transform_0(%arg0: i32, %arg1: i32) -> (i32, i32, i32) {
    %c0_i32 = arith.constant 0 : i32
    %c0_i32_0 = arith.constant 0 : i32
    return %arg0, %arg1, %c0_i32 : i32, i32, i32
  }
  func.func @transform_1(%arg0: i32, %arg1: i32) -> (i32, i32) {
    %c0_i32 = arith.constant 0 : i32
    %c0_i32_0 = arith.constant 0 : i32
    %c0_i32_1 = arith.constant 0 : i32
    return %c0_i32, %c0_i32_0 : i32, i32
  }
  func.func @transform_2(%arg0: i32, %arg1: i32) -> (i32, i32) {
    %c0_i32 = arith.constant 0 : i32
    %c0_i32_0 = arith.constant 0 : i32
    %c0_i32_1 = arith.constant 0 : i32
    return %c0_i32, %c0_i32_0 : i32, i32
  }
  func.func @transform_3(%arg0: i32, %arg1: i32) -> (i32, i32) {
    %c0_i32 = arith.constant 0 : i32
    %c0_i32_0 = arith.constant 0 : i32
    %c0_i32_1 = arith.constant 0 : i32
    return %c0_i32, %c0_i32_0 : i32, i32
  }
  func.func @transform_4(%arg0: i32, %arg1: i32) -> (i32, i32) {
    %c0_i32 = arith.constant 0 : i32
    %c0_i32_0 = arith.constant 0 : i32
    %c0_i32_1 = arith.constant 0 : i32
    return %c0_i32, %c0_i32_0 : i32, i32
  }
  func.func @transform_5(%arg0: i32, %arg1: i32) -> (i32, i32) {
    %c0_i32 = arith.constant 0 : i32
    %c0_i32_0 = arith.constant 0 : i32
    %c0_i32_1 = arith.constant 0 : i32
    return %c0_i32, %c0_i32_0 : i32, i32
  }
  func.func @transform_6(%arg0: i32, %arg1: i32) -> (i32, i32) {
    %c0_i32 = arith.constant 0 : i32
    %c0_i32_0 = arith.constant 0 : i32
    %c0_i32_1 = arith.constant 0 : i32
    return %c0_i32, %c0_i32_0 : i32, i32
  }
  func.func @transform_7(%arg0: i32, %arg1: i32) -> (i32, i32) {
    %c0_i32 = arith.constant 0 : i32
    %c0_i32_0 = arith.constant 0 : i32
    %c0_i32_1 = arith.constant 0 : i32
    return %c0_i32, %c0_i32_0 : i32, i32
  }
  func.func @transform_8(%arg0: i32, %arg1: i32) -> (i32, i32) {
    %c0_i32 = arith.constant 0 : i32
    %c0_i32_0 = arith.constant 0 : i32
    %c0_i32_1 = arith.constant 0 : i32
    return %c0_i32, %c0_i32_0 : i32, i32
  }
  func.func @transform_9(%arg0: i32, %arg1: i32) -> (i32, i32, i32, i32) {
    %c0_i32 = arith.constant 0 : i32
    %c0_i32_0 = arith.constant 0 : i32
    %c0_i32_1 = arith.constant 0 : i32
    return %arg0, %c0_i32, %arg1, %c0_i32_0 : i32, i32, i32, i32
  }
  func.func @transform_10(%arg0: i32, %arg1: i32) -> (i32, i32, i32, i32) {
    %c0_i32 = arith.constant 0 : i32
    %c0_i32_0 = arith.constant 0 : i32
    %c0_i32_1 = arith.constant 0 : i32
    return %arg0, %c0_i32, %arg1, %c0_i32_0 : i32, i32, i32, i32
  }
  func.func @transform_11(%arg0: i32, %arg1: i32) -> (i32, i32, i32, i32) {
    %c0_i32 = arith.constant 0 : i32
    %c0_i32_0 = arith.constant 0 : i32
    %c0_i32_1 = arith.constant 0 : i32
    return %arg0, %c0_i32, %arg1, %c0_i32_0 : i32, i32, i32, i32
  }
}

</mosaic_0001>

<bundles_post_ra>
// kernel: tpu_custom_call.1
= control target key start
LH: loop header
LB: loop body
LE: loop exit
PB: predicated region body
PF: predicated region fallthrough
CT: control target
= control target key end

     0   :  { %s10078_s17 = smov 0   ;;  %s10080_s18 = smov 0   ;;  %s12593_s0 = inlined_call_operand.vmem [shape: f32[2,128,32], index: 0, kind: input, shape index: {}]   ;;  %s12594_s1 = inlined_call_operand.vmem [shape: f32[1,32], index: 1, kind: input, shape index: {}]   ;;  %s12595_s2 = inlined_call_operand.vmem [shape: f32[1,32], index: 2, kind: input, shape index: {}]   ;;  %s12596_s3 = inlined_call_operand.vmem [shape: bf16[32,32], index: 3, kind: input, shape index: {}]   ;;  %s12597_s4 = inlined_call_operand.vmem [shape: f32[1,32], index: 4, kind: input, shape index: {}]   ;;  %s12598_s5 = inlined_call_operand.vmem [shape: bf16[32,32], index: 5, kind: input, shape index: {}]   ;;  %s12599_s6 = inlined_call_operand.vmem [shape: f32[1,32], index: 6, kind: input, shape index: {}]   ;;  %s12600_s7 = inlined_call_operand.vmem [shape: bf16[32,32], index: 7, kind: input, shape index: {}]   ;;  %s12601_s8 = inlined_call_operand.vmem [shape: f32[1,32], index: 8, kind: input, shape index: {}]   ;;  %s12602_s9 = inlined_call_operand.vmem [shape: bf16[2,4,128,8], index: 9, kind: output, shape index: {0}]   ;;  %s12603_s10 = inlined_call_operand.vmem [shape: bf16[2,4,128,8], index: 10, kind: output, shape index: {1}]   ;;  %s12604_s11 = inlined_call_operand.vmem [shape: bf16[2,4,128,8], index: 11, kind: output, shape index: {2}]  }
   0x1   :  { %s10082_s19 = smov 0  }
   0x2 LB: > { %s34_s20 = sadd.s32 1, %s10007_s18  ;;  %p9298_p0 = scmp.ge.s32.totalorder %s10011_s19, 1  ;;  %s10011_s19 = sphi %s10082_s19, %s22_s19   ;;  %s10007_s18 = sphi %s10080_s18, %s12648_s18   ;;  %s10003_s17 = sphi %s10078_s17, %s12647_s17  }
   0x3   : > { %p36_p1 = scmp.ge.s32.totalorder %s34_s20, 2  ;;  %p367_p2 = scmp.lt.s32.totalorder %s10011_s19, 3 }
   0x5   : > { %s12650_s20 = smov (%p36_p1, %s34_s20), 0  ;;  %p368_p3 = pnand %p9298_p0, %p367_p2 }
   0x7   : > { %371 = sbr.rel (%p368_p3) target bundleno = 1205 (0x4b5), region = 56 }
   0xe   : > { %p434_p4 = scmp.lt.s32.totalorder %s10003_s17, 1  ;;  %vm492_vm0 = vcmask 261120   ;;  %s10013_s28 = smov 120   ;;  %vm3490_vm1 = vcmask 60416  }
   0xf   : > { %s10014_s29 = smov 112   ;;  %s10015_s30 = smov 104  }
  0x10   : > { %s12652_s17 = smov (!%p434_p4, %s10003_s17), 1 }
  0x11   : > { %s9632_s21 = sshll.u32 %s12652_s17, 7  ;;  %s10788_s16 = sshll.u32 %s12652_s17, 8 }
  0x12   : > { %s10102_s24 = scalar_lea.vmem %s12593_s0, %s9632_s21  ;;  %s10804_s22 = scalar_lea.vmem %s12602_s9, %s10788_s16 }
  0x13   : > { %v474_v0 = vld [vmem:[%s10102_s24] sm:$0xff]  ;;  %v475_v2 = vld [vmem:[%s10102_s24 + $0x8] sm:$0xff]  ;;  %v476_v8 = vld [vmem:[%s10102_s24 + $0x10] sm:$0xff]  ;;  %s11560_s25 = scalar_lea.vmem %s12603_s10, %s10788_s16 }
  0x14   : > { %v482_v1 = vld [vmem:[%s10102_s24 + $0x40] sm:$0xff]  ;;  %v493_v3 = vsel %vm492_vm0, %v474_v0, 0.0  ;;  %v483_v5 = vld [vmem:[%s10102_s24 + $0x48] sm:$0xff]  ;;  %v496_v6 = vsel %vm492_vm0, %v475_v2, 0.0  ;;  %v477_v9 = vld [vmem:[%s10102_s24 + $0x18] sm:$0xff]  ;;  %v499_v10 = vsel %vm492_vm0, %v476_v8, 0.0 }
  0x15   : > { %v517_v4 = vsel %vm492_vm0, %v482_v1, 0.0  ;;  %494 = vadd.xlane.f32.xlu0 %v493_v3  ;;  %v520_v7 = vsel %vm492_vm0, %v483_v5, 0.0  ;;  %v502_v11 = vsel %vm492_vm0, %v477_v9, 0.0  ;;  %v10117_v12 = vld [vmem:[%s10102_s24 + $0x50] sm:$0xff]  ;;  %v10120_v13 = vld [vmem:[%s10102_s24 + $0x58] sm:$0xff]  ;;  %v10127_v16 = vld [vmem:[%s10102_s24 + $0x20] sm:$0xff] }
  0x16   : > { %518 = vadd.xlane.f32.xlu1 %v517_v4  ;;  %v523_v14 = vsel %vm492_vm0, %v10117_v12, 0.0  ;;  %v526_v15 = vsel %vm492_vm0, %v10120_v13, 0.0  ;;  %v10130_v17 = vld [vmem:[%s10102_s24 + $0x28] sm:$0xff]  ;;  %v505_v18 = vsel %vm492_vm0, %v10127_v16, 0.0  ;;  %v10137_v20 = vld [vmem:[%s10102_s24 + $0x60] sm:$0xff]  ;;  %v10147_v24 = vld [vmem:[%s10102_s24 + $0x30] sm:$0xff] }
  0x17   : > { %v508_v19 = vsel %vm492_vm0, %v10130_v17, 0.0  ;;  %v10140_v21 = vld [vmem:[%s10102_s24 + $0x68] sm:$0xff]  ;;  %v529_v22 = vsel %vm492_vm0, %v10137_v20, 0.0  ;;  %v10150_v25 = vld [vmem:[%s10102_s24 + $0x38] sm:$0xff]  ;;  %v511_v26 = vsel %vm492_vm0, %v10147_v24, 0.0  ;;  %v10157_v28 = vld [vmem:[%s10102_s24 + $0x70] sm:$0xff] }
  0x18   : > { %v532_v23 = vsel %vm492_vm0, %v10140_v21, 0.0  ;;  %v514_v27 = vsel %vm492_vm0, %v10150_v25, 0.0  ;;  %v10160_v29 = vld [vmem:[%s10102_s24 + $0x78] sm:$0xff]  ;;  %v535_v30 = vsel %vm492_vm0, %v10157_v28, 0.0 }
  0x19   : > { %497 = vadd.xlane.f32.xlu0 %v496_v6  ;;  %v538_v31 = vsel %vm492_vm0, %v10160_v29, 0.0 }
  0x1a   : > { %521 = vadd.xlane.f32.xlu1 %v520_v7 }
  0x1d   : > { %500 = vadd.xlane.f32.xlu0 %v499_v10 }
  0x1e   : > { %503 = vadd.xlane.f32.xlu1 %v502_v11 }
  0x21   : > { %524 = vadd.xlane.f32.xlu0 %v523_v14 }
  0x22   : > { %527 = vadd.xlane.f32.xlu1 %v526_v15 }
  0x25   : > { %506 = vadd.xlane.f32.xlu0 %v505_v18 }
  0x26   : > { %509 = vadd.xlane.f32.xlu1 %v508_v19 }
  0x29   : > { %530 = vadd.xlane.f32.xlu0 %v529_v22 }
  0x2a   : > { %533 = vadd.xlane.f32.xlu1 %v532_v23 }
  0x2d   : > { %512 = vadd.xlane.f32.xlu0 %v511_v26 }
  0x2e   : > { %515 = vadd.xlane.f32.xlu1 %v514_v27 }
  0x31   : > { %536 = vadd.xlane.f32.xlu0 %v535_v30 }
  0x32   : > { %539 = vadd.xlane.f32.xlu1 %v538_v31 }
  0xa2   : > { %v495_v32 = vpop.xlane.xlu0 %494 }
  0xa3   : > { %v519_v33 = vpop.xlane.xlu1 %518  ;;  %v542_v34 = vmul.f32 0.03125, %v495_v32 }
  0xa4   : > { %v550_v35 = vmul.f32 0.03125, %v519_v33 }
  0xa5   : > { %v10166_v36 = vsub.f32 %v474_v0, %v542_v34 }
  0xa6   : > { %v10168_v37 = vsub.f32 %v482_v1, %v550_v35  ;;  %v498_v38 = vpop.xlane.xlu0 %497 }
  0xa7   : > { %v522_v39 = vpop.xlane.xlu1 %521  ;;  %v543_v40 = vmul.f32 0.03125, %v498_v38  ;;  %v574_v42 = vmul.f32 %v10166_v36, %v10166_v36 }
  0xa8   : > { %v551_v41 = vmul.f32 0.03125, %v522_v39  ;;  %v582_v43 = vmul.f32 %v10168_v37, %v10168_v37 }
  0xa9   : > { %v10174_v44 = vsub.f32 %v475_v2, %v543_v40  ;;  %v590_v46 = vsel %vm492_vm0, %v574_v42, 0.0 }
  0xaa   : > { %v10176_v45 = vsub.f32 %v483_v5, %v551_v41  ;;  %591 = vadd.xlane.f32.xlu0 %v590_v46  ;;  %v501_v47 = vpop.xlane.xlu0 %500  ;;  %v614_v49 = vsel %vm492_vm0, %v582_v43, 0.0 }
  0xab   : > { %v504_v48 = vpop.xlane.xlu1 %503  ;;  %v544_v50 = vmul.f32 0.03125, %v501_v47  ;;  %v575_v52 = vmul.f32 %v10174_v44, %v10174_v44 }
  0xac   : > { %v545_v51 = vmul.f32 0.03125, %v504_v48  ;;  %v583_v53 = vmul.f32 %v10176_v45, %v10176_v45 }
  0xad   : > { %v10184_v54 = vsub.f32 %v476_v8, %v544_v50  ;;  %v593_v56 = vsel %vm492_vm0, %v575_v52, 0.0 }
  0xae   : > { %v10186_v55 = vsub.f32 %v477_v9, %v545_v51  ;;  %615 = vadd.xlane.f32.xlu0 %v614_v49  ;;  %594 = vadd.xlane.f32.xlu1 %v593_v56  ;;  %v525_v57 = vpop.xlane.xlu0 %524  ;;  %v617_v59 = vsel %vm492_vm0, %v583_v53, 0.0  ;;  %v9952_v53 = vld [vmem:[%s12596_s3 + $0x8] sm:$0xff]   ;;  %v10265_v56 = vld [vmem:[%s12600_s7] sm:$0xff]  }
  0xaf   : > { %v528_v58 = vpop.xlane.xlu1 %527  ;;  %v552_v60 = vmul.f32 0.03125, %v525_v57  ;;  %v576_v62 = vmul.f32 %v10184_v54, %v10184_v54  ;;  %v10271_v57 = vld [vmem:[%s12598_s5] sm:$0xff]  }
  0xb0   : > { %v553_v61 = vmul.f32 0.03125, %v528_v58  ;;  %v577_v63 = vmul.f32 %v10186_v55, %v10186_v55 }
  0xb1   : > { %v10195_v0 = vsub.f32 %v10117_v12, %v552_v60  ;;  %v596_v2 = vsel %vm492_vm0, %v576_v62, 0.0 }
  0xb2   : > { %v10198_v1 = vsub.f32 %v10120_v13, %v553_v61  ;;  %618 = vadd.xlane.f32.xlu1 %v617_v59  ;;  %597 = vadd.xlane.f32.xlu0 %v596_v2  ;;  %v507_v3 = vpop.xlane.xlu0 %506  ;;  %v599_v5 = vsel %vm492_vm0, %v577_v63, 0.0 }
  0xb3   : > { %v510_v4 = vpop.xlane.xlu1 %509  ;;  %v546_v6 = vmul.f32 0.03125, %v507_v3  ;;  %v584_v8 = vmul.f32 %v10195_v0, %v10195_v0 }
  0xb4   : > { %v547_v7 = vmul.f32 0.03125, %v510_v4  ;;  %v585_v9 = vmul.f32 %v10198_v1, %v10198_v1 }
  0xb5   : > { %v10207_v10 = vsub.f32 %v10127_v16, %v546_v6  ;;  %v620_v12 = vsel %vm492_vm0, %v584_v8, 0.0 }
  0xb6   : > { %v10210_v11 = vsub.f32 %v10130_v17, %v547_v7  ;;  %600 = vadd.xlane.f32.xlu1 %v599_v5  ;;  %621 = vadd.xlane.f32.xlu0 %v620_v12  ;;  %v531_v13 = vpop.xlane.xlu0 %530  ;;  %v623_v15 = vsel %vm492_vm0, %v585_v9, 0.0 }
  0xb7   : > { %v534_v14 = vpop.xlane.xlu1 %533  ;;  %v554_v18 = vmul.f32 0.03125, %v531_v13  ;;  %v578_v22 = vmul.f32 %v10207_v10, %v10207_v10 }
  0xb8   : > { %v555_v19 = vmul.f32 0.03125, %v534_v14  ;;  %v579_v16 = vmul.f32 %v10210_v11, %v10210_v11 }
  0xb9   : > { %v10219_v23 = vsub.f32 %v10137_v20, %v554_v18  ;;  %v602_v26 = vsel %vm492_vm0, %v578_v22, 0.0 }
  0xba   : > { %v10222_v17 = vsub.f32 %v10140_v21, %v555_v19  ;;  %624 = vadd.xlane.f32.xlu1 %v623_v15  ;;  %603 = vadd.xlane.f32.xlu0 %v602_v26  ;;  %v513_v27 = vpop.xlane.xlu0 %512  ;;  %v605_v31 = vsel %vm492_vm0, %v579_v16, 0.0 }
  0xbb   : > { %v516_v30 = vpop.xlane.xlu1 %515  ;;  %v548_v32 = vmul.f32 0.03125, %v513_v27  ;;  %v586_v34 = vmul.f32 %v10219_v23, %v10219_v23 }
  0xbc   : > { %v549_v33 = vmul.f32 0.03125, %v516_v30  ;;  %v587_v20 = vmul.f32 %v10222_v17, %v10222_v17 }
  0xbd   : > { %v10231_v35 = vsub.f32 %v10147_v24, %v548_v32  ;;  %v626_v38 = vsel %vm492_vm0, %v586_v34, 0.0 }
  0xbe   : > { %v10234_v21 = vsub.f32 %v10150_v25, %v549_v33  ;;  %606 = vadd.xlane.f32.xlu1 %v605_v31  ;;  %627 = vadd.xlane.f32.xlu0 %v626_v38  ;;  %v537_v39 = vpop.xlane.xlu0 %536  ;;  %v629_v41 = vsel %vm492_vm0, %v587_v20, 0.0  ;;  %v10278_v33 = vld [vmem:[%s12594_s1] ss:$0 sm:$0xff] }
  0xbf   : > { %v540_v40 = vpop.xlane.xlu1 %539  ;;  %v556_v42 = vmul.f32 0.03125, %v537_v39  ;;  %v580_v46 = vmul.f32 %v10231_v35, %v10231_v35 }
  0xc0   : > { %v557_v43 = vmul.f32 0.03125, %v540_v40  ;;  %v581_v24 = vmul.f32 %v10234_v21, %v10234_v21 }
  0xc1   : > { %v10243_v47 = vsub.f32 %v10157_v28, %v556_v42  ;;  %v608_v48 = vsel %vm492_vm0, %v580_v46, 0.0 }
  0xc2   : > { %v10246_v25 = vsub.f32 %v10160_v29, %v557_v43  ;;  %630 = vadd.xlane.f32.xlu1 %v629_v41  ;;  %609 = vadd.xlane.f32.xlu0 %v608_v48  ;;  %v611_v49 = vsel %vm492_vm0, %v581_v24, 0.0  ;;  %v9951_v29 = vld [vmem:[%s12596_s3] sm:$0xff]  }
  0xc3   : > { %v588_v50 = vmul.f32 %v10243_v47, %v10243_v47  ;;  %9858 = vmatprep.subr.bf16.mxu0 %v9951_v29  ;;  %9918 = vmatprep.subr.bf16.mxu1 %v9951_v29  ;;  %v10285_v24 = vld [vmem:[%s12595_s2] ss:$0 sm:$0xff] }
  0xc4   : > { %v589_v51 = vmul.f32 %v10246_v25, %v10246_v25  ;;  %9859 = vmatpush3.bf16.msra.mxu0 %v9951_v29  ;;  %9920 = vmatpush3.bf16.msra.mxu1 %v9951_v29 }
  0xc5   : > { %v632_v52 = vsel %vm492_vm0, %v588_v50, 0.0  ;;  %9860 = vmatprep.subr.bf16.mxu0 %v9952_v53  ;;  %9919 = vmatprep.subr.bf16.mxu1 %v9952_v53 }
  0xc6   : > { %612 = vadd.xlane.f32.xlu1 %v611_v49  ;;  %633 = vadd.xlane.f32.xlu0 %v632_v52  ;;  %v635_v28 = vsel %vm492_vm0, %v589_v51, 0.0 }
  0xc8   : > { %9861 = vmatpush3.bf16.msra.mxu0 %v9952_v53  ;;  %9921 = vmatpush3.bf16.msra.mxu1 %v9952_v53 }
  0xc9   : > { %9898 = vmatprep.subr.bf16.mxu0 %v10265_v56  ;;  %9878 = vmatprep.subr.bf16.mxu1 %v10271_v57 }
  0xca   : > { %636 = vadd.xlane.f32.xlu1 %v635_v28 }
 0x137   : > { %v592_v58 = vpop.xlane.xlu0 %591 }
 0x138   : > { %v638_v59 = vmul.f32 0.03125, %v592_v58 }
 0x13a   : > { %v654_v60 = vadd.f32 1e-06, %v638_v59 }
 0x13b   : > { %v595_v61 = vpop.xlane.xlu1 %594  ;;  %v616_v62 = vpop.xlane.xlu0 %615 }
 0x13c   : > { %9957 = vrsqrt.f32 %v654_v60  ;;  %v639_v63 = vmul.f32 0.03125, %v595_v61  ;;  %v646_v2 = vmul.f32 0.03125, %v616_v62 }
 0x13e   : > { %v655_v3 = vadd.f32 1e-06, %v639_v63  ;;  %v662_v4 = vadd.f32 1e-06, %v646_v2 }
 0x13f   : > { %v619_v5 = vpop.xlane.xlu1 %618  ;;  %v598_v6 = vpop.xlane.xlu0 %597 }
 0x140   : > { %9959 = vrsqrt.f32 %v655_v3  ;;  %v647_v7 = vmul.f32 0.03125, %v619_v5  ;;  %v640_v8 = vmul.f32 0.03125, %v598_v6 }
 0x141   : > { %9961 = vrsqrt.f32 %v662_v4 }
 0x142   : > { %v663_v9 = vadd.f32 1e-06, %v647_v7  ;;  %v656_v12 = vadd.f32 1e-06, %v640_v8 }
 0x143   : > { %v601_v13 = vpop.xlane.xlu1 %600  ;;  %v622_v14 = vpop.xlane.xlu0 %621 }
 0x144   : > { %9963 = vrsqrt.f32 %v663_v9  ;;  %v641_v15 = vmul.f32 0.03125, %v601_v13  ;;  %v648_v18 = vmul.f32 0.03125, %v622_v14 }
 0x145   : > { %9965 = vrsqrt.f32 %v656_v12 }
 0x146   : > { %v9958_v19 = vpop.eup %9957  ;;  %v657_v22 = vadd.f32 1e-06, %v641_v15  ;;  %v664_v16 = vadd.f32 1e-06, %v648_v18 }
 0x147   : > { %v625_v26 = vpop.xlane.xlu1 %624  ;;  %v604_v27 = vpop.xlane.xlu0 %603  ;;  %v686_v30 = vmul.f32 %v9958_v19, %v10166_v36 }
 0x148   : > { %9967 = vrsqrt.f32 %v657_v22  ;;  %v649_v31 = vmul.f32 0.03125, %v625_v26  ;;  %v642_v32 = vmul.f32 0.03125, %v604_v27 }
 0x149   : > { %9969 = vrsqrt.f32 %v664_v16  ;;  %v708_v43 = vmul.f32 %v10278_v33, %v686_v30 }
 0x14a   : > { %v9960_v34 = vpop.eup %9959  ;;  %v665_v20 = vadd.f32 1e-06, %v649_v31  ;;  %v658_v38 = vadd.f32 1e-06, %v642_v32 }
 0x14b   : > { %v9962_v39 = vpop.eup %9961  ;;  %v607_v40 = vpop.xlane.xlu1 %606  ;;  %v687_v42 = vmul.f32 %v9960_v34, %v10174_v44  ;;  %v730_v53 = vadd.f32 %v10285_v24, %v708_v43 }
 0x14c   : > { %v628_v41 = vpop.xlane.xlu0 %627  ;;  %9971 = vrsqrt.f32 %v665_v20  ;;  %v643_v36 = vmul.f32 0.03125, %v607_v40  ;;  %v694_v48 = vmul.f32 %v9962_v39, %v10168_v37  ;;  %v9955_v40 = vld [vmem:[%s12600_s7 + $0x8] sm:$0xff]  }
 0x14d   : > { %v650_v46 = vmul.f32 0.03125, %v628_v41  ;;  %9973 = vrsqrt.f32 %v658_v38  ;;  %v709_v49 = vmul.f32 %v10278_v33, %v687_v42 }
 0x14e   : > { %v9964_v50 = vpop.eup %9963  ;;  %v659_v51 = vadd.f32 1e-06, %v643_v36  ;;  %v716_v60 = vmul.f32 %v10278_v33, %v694_v48 }
 0x14f   : > { %v666_v52 = vadd.f32 1e-06, %v650_v46  ;;  %v9966_v28 = vpop.eup %9965  ;;  %v631_v44 = vpop.xlane.xlu1 %630  ;;  %v731_v58 = vadd.f32 %v10285_v24, %v709_v49  ;;  %v695_v59 = vmul.f32 %v9964_v50, %v10176_v45 }
 0x150   : > { %v610_v29 = vpop.xlane.xlu0 %609  ;;  %9975 = vrsqrt.f32 %v659_v51  ;;  %v651_v61 = vmul.f32 0.03125, %v631_v44  ;;  %v688_v2 = vmul.f32 %v9966_v28, %v10184_v54  ;;  %v738_v8 = vadd.f32 %v10285_v24, %v716_v60  ;;  %v9956_v51 = vld [vmem:[%s12598_s5 + $0x8] sm:$0xff]  }
 0x151   : > { %v644_v37 = vmul.f32 0.03125, %v610_v29  ;;  %9977 = vrsqrt.f32 %v666_v52  ;;  %v10293_v62 = vpack.c.bf16 %v731_v58, %v730_v53  ;;  %v717_v63 = vmul.f32 %v10278_v33, %v695_v59 }
 0x152   : > { %v9968_v3 = vpop.eup %9967  ;;  %v667_v4 = vadd.f32 1e-06, %v651_v61  ;;  %v710_v13 = vmul.f32 %v10278_v33, %v688_v2 }
 0x153   : > { %v660_v5 = vadd.f32 1e-06, %v644_v37  ;;  %v9970_v6 = vpop.eup %9969  ;;  %v613_v7 = vpop.xlane.xlu1 %612  ;;  %9862 = vmatprep.mubr.msk.bf16.mxu0 %vm492_vm0, %v10293_v62  ;;  %v739_v9 = vadd.f32 %v10285_v24, %v717_v63  ;;  %v689_v12 = vmul.f32 %v9968_v3, %v10186_v55 }
 0x154   : > { %v634_v45 = vpop.xlane.xlu0 %633  ;;  %9979 = vrsqrt.f32 %v667_v4  ;;  %v645_v14 = vmul.f32 0.03125, %v613_v7  ;;  %v696_v15 = vmul.f32 %v9970_v6, %v10195_v0  ;;  %v732_v55 = vadd.f32 %v10285_v24, %v710_v13 }
 0x155   : > { %v652_v54 = vmul.f32 0.03125, %v634_v45  ;;  %9981 = vrsqrt.f32 %v660_v5  ;;  %v10304_v18 = vpack.c.bf16 %v739_v9, %v738_v8  ;;  %v711_v19 = vmul.f32 %v10278_v33, %v689_v12 }
 0x156   : > { %v9972_v22 = vpop.eup %9971  ;;  %v661_v16 = vadd.f32 1e-06, %v645_v14  ;;  %v718_v0 = vmul.f32 %v10278_v33, %v696_v15 }
 0x157   : > { %v668_v26 = vadd.f32 1e-06, %v652_v54  ;;  %v9974_v27 = vpop.eup %9973  ;;  %v637_v30 = vpop.xlane.xlu1 %636  ;;  %9870 = vmatprep.mubr.msk.bf16.mxu1 %vm492_vm0, %v10304_v18  ;;  %v733_v31 = vadd.f32 %v10285_v24, %v711_v19  ;;  %v697_v32 = vmul.f32 %v9972_v22, %v10198_v1 }
 0x158   : > { %9983 = vrsqrt.f32 %v661_v16  ;;  %v653_v34 = vmul.f32 0.03125, %v637_v30  ;;  %v690_v20 = vmul.f32 %v9974_v27, %v10207_v10  ;;  %v740_v1 = vadd.f32 %v10285_v24, %v718_v0 }
 0x159   : > { %9985 = vrsqrt.f32 %v668_v26  ;;  %v747_v38 = vpack.c.bf16 %v733_v31, %v732_v55  ;;  %v719_v39 = vmul.f32 %v10278_v33, %v697_v32 }
 0x15a   : > { %v9976_v41 = vpop.eup %9975  ;;  %v669_v42 = vadd.f32 1e-06, %v653_v34  ;;  %v712_v10 = vmul.f32 %v10278_v33, %v690_v20 }
 0x15b   : > { %v9978_v43 = vpop.eup %9977  ;;  %9863 = vmatmul.mubr.msk.bf16.vlgmr.msra.gmra.mrb[0].mxu0 %vm492_vm0, %v747_v38  ;;  %v741_v36 = vadd.f32 %v10285_v24, %v719_v39  ;;  %v691_v46 = vmul.f32 %v9976_v41, %v10210_v11 }
 0x15c   : > { %9987 = vrsqrt.f32 %v669_v42  ;;  %v698_v48 = vmul.f32 %v9978_v43, %v10219_v23  ;;  %9899 = vmatpush3.bf16.msra.mxu0 %v10265_v56  ;;  %v734_v11 = vadd.f32 %v10285_v24, %v712_v10 }
 0x15d   : > { %v751_v49 = vpack.c.bf16 %v741_v36, %v740_v1  ;;  %v713_v50 = vmul.f32 %v10278_v33, %v691_v46  ;;  %9900 = vmatprep.subr.bf16.mxu0 %v9955_v40 }
 0x15e   : > { %v9980_v52 = vpop.eup %9979  ;;  %v720_v56 = vmul.f32 %v10278_v33, %v698_v48 }
 0x15f   : > { %v9982_v28 = vpop.eup %9981  ;;  %9871 = vmatmul.mubr.msk.bf16.vlgmr.msra.gmra.mrb[0].mxu1 %vm492_vm0, %v751_v49  ;;  %v735_v44 = vadd.f32 %v10285_v24, %v713_v50  ;;  %v699_v23 = vmul.f32 %v9980_v52, %v10222_v17 }
 0x160   : > { %v692_v29 = vmul.f32 %v9982_v28, %v10231_v35  ;;  %9879 = vmatpush3.bf16.msra.mxu1 %v10271_v57  ;;  %9901 = vmatpush3.bf16.msra.mxu0 %v9955_v40  ;;  %v742_v61 = vadd.f32 %v10285_v24, %v720_v56 }
 0x161   : > { %v748_v53 = vpack.c.bf16 %v735_v44, %v734_v11  ;;  %v721_v58 = vmul.f32 %v10278_v33, %v699_v23  ;;  %9880 = vmatprep.subr.bf16.mxu1 %v9956_v51  ;;  %v10474_v11 = vld [vmem:[%s12601_s8] ss:$0 sm:$0xff] }
 0x162   : > { %v9984_v59 = vpop.eup %9983  ;;  %v714_v63 = vmul.f32 %v10278_v33, %v692_v29 }
 0x163   : > { %v9986_v60 = vpop.eup %9985  ;;  %9866 = vmatprep.mubr.msk.bf16.mxu0 %vm492_vm0, %v748_v53  ;;  %v743_v37 = vadd.f32 %v10285_v24, %v721_v58  ;;  %v693_v17 = vmul.f32 %v9984_v59, %v10234_v21  ;;  %v10493_v59 = vld [vmem:[%s12599_s6] ss:$0 sm:$0xff] }
 0x164   : > { %v700_v35 = vmul.f32 %v9986_v60, %v10243_v47  ;;  %9881 = vmatpush3.bf16.msra.mxu1 %v9956_v51  ;;  %v736_v4 = vadd.f32 %v10285_v24, %v714_v63 }
 0x165   : > { %v752_v57 = vpack.c.bf16 %v743_v37, %v742_v61  ;;  %v715_v2 = vmul.f32 %v10278_v33, %v693_v17 }
 0x166   : > { %v9988_v3 = vpop.eup %9987  ;;  %v722_v7 = vmul.f32 %v10278_v33, %v700_v35 }
 0x167   : > { %9874 = vmatprep.mubr.msk.bf16.mxu1 %vm492_vm0, %v752_v57  ;;  %v737_v5 = vadd.f32 %v10285_v24, %v715_v2  ;;  %v701_v6 = vmul.f32 %v9988_v3, %v10246_v25  ;;  %v10377_v25 = vld [vmem:[%s12597_s4] ss:$0 sm:$0xff] }
 0x168   : > { %v744_v47 = vadd.f32 %v10285_v24, %v722_v7 }
 0x169   : > { %v749_v21 = vpack.c.bf16 %v737_v5, %v736_v4  ;;  %v723_v45 = vmul.f32 %v10278_v33, %v701_v6 }
 0x16b   : > { %9867 = vmatmul.mubr.msk.bf16.gmra.mrb[4].mxu0 %vm492_vm0, %v749_v21  ;;  %v745_v8 = vadd.f32 %v10285_v24, %v723_v45 }
 0x16c   : > { %9902 = vmatprep.mubr.msk.bf16.mxu0 %vm492_vm0, %v10293_v62 }
 0x16d   : > { %v753_v9 = vpack.c.bf16 %v745_v8, %v744_v47 }
 0x16f   : > { %9875 = vmatmul.mubr.msk.bf16.gmra.mrb[4].mxu1 %vm492_vm0, %v753_v9 }
 0x170   : > { %9882 = vmatprep.mubr.msk.bf16.mxu1 %vm492_vm0, %v10293_v62 }
 0x173   : > { %9903 = vmatmul.mubr.msk.bf16.vlgmr.msra.gmra.mrb[8].mxu0 %vm492_vm0, %v747_v38 }
 0x174   : > { %9906 = vmatprep.mubr.msk.bf16.mxu0 %vm492_vm0, %v748_v53 }
 0x177   : > { %9883 = vmatmul.mubr.msk.bf16.vlgmr.msra.gmra.mrb[8].mxu1 %vm492_vm0, %v747_v38 }
 0x178   : > { %9886 = vmatprep.mubr.msk.bf16.mxu1 %vm492_vm0, %v748_v53 }
 0x17b   : > { %9907 = vmatmul.mubr.msk.bf16.gmra.mrb[12].mxu0 %vm492_vm0, %v749_v21 }
 0x17c   : > { %9910 = vmatprep.mubr.msk.bf16.mxu0 %vm492_vm0, %v10304_v18 }
 0x17f   : > { %9887 = vmatmul.mubr.msk.bf16.gmra.mrb[12].mxu1 %vm492_vm0, %v749_v21 }
 0x180   : > { %9890 = vmatprep.mubr.msk.bf16.mxu1 %vm492_vm0, %v10304_v18 }
 0x183   : > { %9911 = vmatmul.mubr.msk.bf16.gmra.mrb[16].mxu0 %vm492_vm0, %v751_v49 }
 0x184   : > { %9914 = vmatprep.mubr.msk.bf16.mxu0 %vm492_vm0, %v752_v57 }
 0x187   : > { %9891 = vmatmul.mubr.msk.bf16.gmra.mrb[16].mxu1 %vm492_vm0, %v751_v49 }
 0x188   : > { %9894 = vmatprep.mubr.msk.bf16.mxu1 %vm492_vm0, %v752_v57 }
 0x18b   : > { %9915 = vmatmul.mubr.msk.bf16.gmra.mrb[20].mxu0 %vm492_vm0, %v753_v9 }
 0x18f   : > { %9895 = vmatmul.mubr.msk.bf16.gmra.mrb[20].mxu1 %vm492_vm0, %v753_v9 }
 0x22e   : > { %v9864_v33 = vpop.f32.mrb[0].mxu0 }
 0x22f   : > { %v10380_v24 = vadd.f32 %v9864_v33, %v10377_v25  ;;  %v835_v62 = vpop.f32.mrb[1].mxu0 }
 0x230   : > { %v9865_v12 = vpop.f32.mrb[2].mxu0  ;;  %v10436_v42 = vadd.f32 %v10377_v25, %v835_v62 }
 0x231   : > { %918 = vrot.lane.b32.xlu1 %v10380_v24, %s10013_s28  ;;  %v838_v13 = vpop.f32.mrb[3].mxu0  ;;  %v10385_v54 = vadd.f32 %v9865_v12, %v10377_v25 }
 0x232   : > { %v9872_v14 = vpop.f32.mrb[0].mxu1  ;;  %v10451_v10 = vadd.f32 %v10377_v25, %v838_v13 }
 0x233   : > { %v10388_v15 = vadd.f32 %v9872_v14, %v10377_v25  ;;  %v867_v18 = vpop.f32.mrb[1].mxu1 }
 0x234   : > { %v9873_v19 = vpop.f32.mrb[2].mxu1  ;;  %v10454_v48 = vadd.f32 %v10377_v25, %v867_v18 }
 0x235   : > { %920 = vrot.lane.b32.xlu1 %v10385_v54, %s10013_s28  ;;  %934 = vrot.lane.b32.xlu0 %v10388_v15, %s10013_s28  ;;  %v870_v22 = vpop.f32.mrb[3].mxu1  ;;  %v10395_v16 = vadd.f32 %v9873_v19, %v10377_v25 }
 0x236   : > { %v10469_v28 = vadd.f32 %v10377_v25, %v870_v22 }
 0x239   : > { %966 = vrot.lane.b32.xlu0 %v10380_v24, %s10014_s29  ;;  %936 = vrot.lane.b32.xlu1 %v10395_v16, %s10013_s28 }
 0x23d   : > { %982 = vrot.lane.b32.xlu0 %v10388_v15, %s10014_s29  ;;  %968 = vrot.lane.b32.xlu1 %v10385_v54, %s10014_s29 }
 0x23e   : > { %v10405_v26 = vpop.f32.mrb[4].mxu0 }
 0x23f   : > { %v851_v27 = vpop.f32.mrb[5].mxu0  ;;  %v10541_v14 = vadd.f32 %v10405_v26, %v10377_v25 }
 0x240   : > { %v10408_v30 = vadd.f32 %v10377_v25, %v851_v27  ;;  %v10410_v55 = vpop.f32.mrb[6].mxu0 }
 0x241   : > { %1014 = vrot.lane.b32.xlu0 %v10380_v24, %s10015_s30  ;;  %984 = vrot.lane.b32.xlu1 %v10395_v16, %s10014_s29  ;;  %v854_v31 = vpop.f32.mrb[7].mxu0 }
 0x242   : > { %v10417_v32 = vadd.f32 %v10377_v25, %v854_v31  ;;  %v10419_v0 = vpop.f32.mrb[4].mxu1 }
 0x243   : > { %v883_v34 = vpop.f32.mrb[5].mxu1 }
 0x244   : > { %v10422_v20 = vadd.f32 %v10377_v25, %v883_v34  ;;  %v10424_v38 = vpop.f32.mrb[6].mxu1 }
 0x245   : > { %1030 = vrot.lane.b32.xlu0 %v10388_v15, %s10015_s30  ;;  %1016 = vrot.lane.b32.xlu1 %v10385_v54, %s10015_s30  ;;  %v886_v39 = vpop.f32.mrb[7].mxu1 }
 0x246   : > { %v10431_v40 = vadd.f32 %v10377_v25, %v886_v39  ;;  %v10433_v41 = vpop.f32.mrb[8].mxu0 }
 0x247   : > { %v10438_v43 = vpop.f32.mrb[9].mxu0 }
 0x248   : > { %v10440_v1 = vpop.f32.mrb[10].mxu0 }
 0x249   : > { %914 = vrot.lane.b32.xlu0 %v10436_v42, %s10013_s28  ;;  %1032 = vrot.lane.b32.xlu1 %v10395_v16, %s10015_s30  ;;  %v10446_v36 = vpop.f32.mrb[11].mxu0 }
 0x24a   : > { %v10448_v46 = vpop.f32.mrb[8].mxu1 }
 0x24b   : > { %v10456_v49 = vpop.f32.mrb[9].mxu1 }
 0x24c   : > { %v10458_v50 = vpop.f32.mrb[10].mxu1 }
 0x24d   : > { %916 = vrot.lane.b32.xlu1 %v10451_v10, %s10013_s28  ;;  %930 = vrot.lane.b32.xlu0 %v10454_v48, %s10013_s28  ;;  %v10464_v51 = vpop.f32.mrb[11].mxu1 }
 0x24e   : > { %v10466_v52 = vpop.f32.mrb[12].mxu0 }
 0x24f   : > { %v6404_v44 = vpop.f32.mrb[13].mxu0 }
 0x250   : > { %v10477_v23 = vadd.f32 %v10474_v11, %v6404_v44  ;;  %v10479_v56 = vpop.f32.mrb[14].mxu0  ;;  %v10561_v44 = vadd.f32 %v10410_v55, %v10377_v25 }
 0x251   : > { %932 = vrot.lane.b32.xlu1 %v10469_v28, %s10013_s28  ;;  %962 = vrot.lane.b32.xlu0 %v10436_v42, %s10014_s29  ;;  %v6407_v29 = vpop.f32.mrb[15].mxu0 }
 0x252   : > { %v10486_v53 = vadd.f32 %v10474_v11, %v6407_v29  ;;  %v10488_v58 = vpop.f32.mrb[12].mxu1  ;;  %v10565_v29 = vadd.f32 %v10419_v0, %v10377_v25 }
 0x253   : > { %v3628_v60 = vpop.f32.mrb[13].mxu1 }
 0x254   : > { %v10496_v61 = vadd.f32 %v10493_v59, %v3628_v60  ;;  %v10498_v37 = vpop.f32.mrb[14].mxu1 }
 0x255   : > { %964 = vrot.lane.b32.xlu1 %v10451_v10, %s10014_s29  ;;  %978 = vrot.lane.b32.xlu0 %v10454_v48, %s10014_s29  ;;  %v3631_v17 = vpop.f32.mrb[15].mxu1 }
 0x256   : > { %v10505_v63 = vadd.f32 %v10493_v59, %v3631_v17  ;;  %v9912_v35 = vpop.f32.mrb[16].mxu0 }
 0x257   : > { %v10508_v57 = vadd.f32 %v9912_v35, %v10474_v11  ;;  %v6420_v2 = vpop.f32.mrb[17].mxu0 }
 0x258   : > { %v10511_v3 = vadd.f32 %v10474_v11, %v6420_v2  ;;  %v9913_v4 = vpop.f32.mrb[18].mxu0 }
 0x259   : > { %v10514_v5 = vadd.f32 %v9913_v4, %v10474_v11  ;;  %980 = vrot.lane.b32.xlu1 %v10469_v28, %s10014_s29  ;;  %1010 = vrot.lane.b32.xlu0 %v10436_v42, %s10015_s30  ;;  %v6423_v6 = vpop.f32.mrb[19].mxu0 }
 0x25a   : > { %v10521_v7 = vadd.f32 %v10474_v11, %v6423_v6  ;;  %v9892_v21 = vpop.f32.mrb[16].mxu1  ;;  %v10585_v6 = vadd.f32 %v10424_v38, %v10377_v25  ;;  %v10629_v25 = vadd.f32 %v10448_v46, %v10493_v59  ;;  %v10637_v38 = vadd.f32 %v10458_v50, %v10493_v59 }
 0x25b   : > { %v10524_v45 = vadd.f32 %v9892_v21, %v10493_v59  ;;  %v3644_v47 = vpop.f32.mrb[17].mxu1  ;;  %v10649_v46 = vadd.f32 %v10433_v41, %v10474_v11  ;;  %v10657_v50 = vadd.f32 %v10440_v1, %v10474_v11  ;;  %v10669_v41 = vadd.f32 %v10493_v59, %v10456_v49 }
 0x25c   : > { %v10527_v8 = vadd.f32 %v10493_v59, %v3644_v47  ;;  %v9893_v9 = vpop.f32.mrb[18].mxu1  ;;  %12627 = vst [vmem:[#allocation6_spill] sm:$0xff] %v10629_v25  ;;  %12628 = vst [vmem:[#allocation7_spill] sm:$0xff] %v10637_v38 }
 0x25d   : > { %v10530_v33 = vadd.f32 %v9893_v9, %v10493_v59  ;;  %1012 = vrot.lane.b32.xlu1 %v10451_v10, %s10015_s30  ;;  %1026 = vrot.lane.b32.xlu0 %v10454_v48, %s10015_s30  ;;  %v3647_v62 = vpop.f32.mrb[19].mxu1  ;;  %12629 = vst [vmem:[#allocation8_spill] sm:$0xff] %v10649_v46  ;;  %12630 = vst [vmem:[#allocation9_spill] sm:$0xff] %v10657_v50  ;;  %v10016_v9 = vmov 1983009808  }
 0x25e   : > { %v10537_v12 = vadd.f32 %v10493_v59, %v3647_v62  ;;  %v9916_v13 = vpop.f32.mrb[20].mxu0  ;;  %12631 = vst [vmem:[#allocation10_spill] sm:$0xff] %v10669_v41  ;;  %v1061_v62 = vunpack.c.l.s4 %v10016_v9 }
 0x25f   : > { %v10544_v18 = vadd.f32 %v9916_v13, %v10474_v11  ;;  %v6436_v19 = vpop.f32.mrb[21].mxu0  ;;  %v1063_v13 = vlaneseq }
 0x260   : > { %v10547_v22 = vadd.f32 %v10474_v11, %v6436_v19  ;;  %v9917_v27 = vpop.f32.mrb[22].mxu0  ;;  %v10017_v19 = vmov 1934713408  }
 0x261   : > { %v10550_v31 = vadd.f32 %v9917_v27, %v10474_v11  ;;  %1028 = vrot.lane.b32.xlu1 %v10469_v28, %s10015_s30  ;;  %926 = vrot.lane.b32.xlu0 %v10541_v14, %s10013_s28  ;;  %v6439_v34 = vpop.f32.mrb[23].mxu0  ;;  %v1093_v27 = vunpack.c.l.s4 %v10017_v19 }
 0x262   : > { %12623 = vst [vmem:[#allocation2_spill] sm:$0xff] %v10547_v22  ;;  %v10557_v26 = vadd.f32 %v10474_v11, %v6439_v34  ;;  %v9896_v39 = vpop.f32.mrb[20].mxu1  ;;  %v10681_v34 = vadd.f32 %v10493_v59, %v10464_v51 }
 0x263   : > { %v10568_v60 = vadd.f32 %v9896_v39, %v10493_v59  ;;  %v3660_v17 = vpop.f32.mrb[21].mxu1 }
 0x264   : > { %12624 = vst [vmem:[#allocation3_spill] sm:$0xff] %v10557_v26  ;;  %v10571_v35 = vadd.f32 %v10493_v59, %v3660_v17  ;;  %v9897_v2 = vpop.f32.mrb[22].mxu1  ;;  %12632 = vst [vmem:[#allocation11_spill] sm:$0xff] %v10681_v34  ;;  %v1062_v17 = vunpack.c.0.s8 %v1061_v62  ;;  %v10699_v62 = vadd.f32 %v10474_v11, %v10438_v43 }
 0x265   : > { %v10574_v4 = vadd.f32 %v9897_v2, %v10493_v59  ;;  %928 = vrot.lane.b32.xlu1 %v10561_v44, %s10013_s28  ;;  %942 = vrot.lane.b32.xlu0 %v10565_v29, %s10013_s28  ;;  %v3663_v55 = vpop.f32.mrb[23].mxu1  ;;  %v1064_v2 = vshrl.u32 %v1063_v13, 7 }
 0x266   : > { %12625 = vst [vmem:[#allocation4_spill] sm:$0xff] %v10571_v35  ;;  %v10581_v0 = vadd.f32 %v10493_v59, %v3663_v55  ;;  %v1094_v55 = vunpack.c.0.s8 %v1093_v27  ;;  %12633 = vst [vmem:[#allocation12_spill] sm:$0xff] %v10699_v62 }
 0x268   : > { %12626 = vst [vmem:[#allocation5_spill] sm:$0xff] %v10581_v0 }
 0x269   : > { %974 = vrot.lane.b32.xlu0 %v10541_v14, %s10014_s29  ;;  %944 = vrot.lane.b32.xlu1 %v10585_v6, %s10013_s28 }
 0x26d   : > { %990 = vrot.lane.b32.xlu0 %v10565_v29, %s10014_s29  ;;  %976 = vrot.lane.b32.xlu1 %v10561_v44, %s10014_s29 }
 0x271   : > { %1022 = vrot.lane.b32.xlu0 %v10541_v14, %s10015_s30  ;;  %992 = vrot.lane.b32.xlu1 %v10585_v6, %s10014_s29 }
 0x275   : > { %1038 = vrot.lane.b32.xlu0 %v10565_v29, %s10015_s30  ;;  %1024 = vrot.lane.b32.xlu1 %v10561_v44, %s10015_s30 }
 0x279   : > { %922 = vrot.lane.b32.xlu0 %v10408_v30, %s10013_s28  ;;  %1040 = vrot.lane.b32.xlu1 %v10585_v6, %s10015_s30 }
 0x27d   : > { %924 = vrot.lane.b32.xlu1 %v10417_v32, %s10013_s28  ;;  %938 = vrot.lane.b32.xlu0 %v10422_v20, %s10013_s28 }
 0x281   : > { %940 = vrot.lane.b32.xlu1 %v10431_v40, %s10013_s28  ;;  %970 = vrot.lane.b32.xlu0 %v10408_v30, %s10014_s29 }
 0x285   : > { %972 = vrot.lane.b32.xlu1 %v10417_v32, %s10014_s29  ;;  %986 = vrot.lane.b32.xlu0 %v10422_v20, %s10014_s29 }
 0x289   : > { %988 = vrot.lane.b32.xlu1 %v10431_v40, %s10014_s29  ;;  %1018 = vrot.lane.b32.xlu0 %v10408_v30, %s10015_s30 }
 0x28d   : > { %1020 = vrot.lane.b32.xlu1 %v10417_v32, %s10015_s30  ;;  %1034 = vrot.lane.b32.xlu0 %v10422_v20, %s10015_s30 }
 0x291   : > { %1036 = vrot.lane.b32.xlu1 %v10431_v40, %s10015_s30  ;;  %3695 = vrot.lane.b32.xlu0 %v10629_v25, %s10013_s28 }
 0x295   : > { %3697 = vrot.lane.b32.xlu1 %v10637_v38, %s10013_s28  ;;  %3743 = vrot.lane.b32.xlu0 %v10629_v25, %s10014_s29 }
 0x299   : > { %3745 = vrot.lane.b32.xlu1 %v10637_v38, %s10014_s29  ;;  %3791 = vrot.lane.b32.xlu0 %v10629_v25, %s10015_s30 }
 0x29d   : > { %3793 = vrot.lane.b32.xlu1 %v10637_v38, %s10015_s30  ;;  %6471 = vrot.lane.b32.xlu0 %v10649_v46, %s10013_s28  ;;  %v10707_v38 = vadd.f32 %v10474_v11, %v10446_v36 }
 0x2a1   : > { %6473 = vrot.lane.b32.xlu1 %v10657_v50, %s10013_s28  ;;  %6519 = vrot.lane.b32.xlu0 %v10649_v46, %s10014_s29 }
 0x2a3   : > { %v919_v21 = vpop.permute.xlu1 %918 }
 0x2a5   : > { %6521 = vrot.lane.b32.xlu1 %v10657_v50, %s10014_s29  ;;  %6567 = vrot.lane.b32.xlu0 %v10649_v46, %s10015_s30  ;;  %v10689_v46 = vsub.s32 %v1062_v17, %v1064_v2  ;;  %v10703_v17 = vsub.s32 %v1094_v55, %v1064_v2  ;;  %v10723_v2 = vadd.f32 %v10488_v58, %v10493_v59 }
 0x2a7   : > { %v10671_v47 = vpop.permute.xlu1 %920  ;;  %v10673_v1 = vpop.permute.xlu0 %934 }
 0x2a9   : > { %6569 = vrot.lane.b32.xlu1 %v10657_v50, %s10015_s30  ;;  %3691 = vrot.lane.b32.xlu0 %v10669_v41, %s10013_s28 }
 0x2ab   : > { %v10683_v49 = vpop.permute.xlu1 %936  ;;  %v967_v39 = vpop.permute.xlu0 %966 }
 0x2ac   : > { %v1194_v19 = vcombine.low %v10380_v24, %v967_v39  ;;  %v1195_v51 = vcombine.high %v10380_v24, %v967_v39  ;;  %v10711_v24 = vadd.f32 %v10466_v52, %v10474_v11  ;;  %v10727_v52 = vadd.f32 %v10498_v37, %v10493_v59 }
 0x2ad   : > { %3693 = vrot.lane.b32.xlu1 %v10681_v34, %s10013_s28  ;;  %3739 = vrot.lane.b32.xlu0 %v10669_v41, %s10014_s29 }
 0x2af   : > { %v969_v9 = vpop.permute.xlu1 %968  ;;  %v983_v50 = vpop.permute.xlu0 %982 }
 0x2b0   : > { %v1262_v13 = vcombine.low %v10385_v54, %v969_v9  ;;  %v1263_v27 = vcombine.high %v10385_v54, %v969_v9  ;;  %v1738_v39 = vcombine.low %v10388_v15, %v983_v50  ;;  %v10719_v54 = vadd.f32 %v10479_v56, %v10474_v11 }
 0x2b1   : > { %3741 = vrot.lane.b32.xlu1 %v10681_v34, %s10014_s29  ;;  %3787 = vrot.lane.b32.xlu0 %v10669_v41, %s10015_s30  ;;  %v1739_v41 = vcombine.high %v10388_v15, %v983_v50  ;;  %v1202_v9 = vrot.slane %v1194_v19, %v10689_v46  ;;  %v1209_v15 = vrot.slane %v1195_v51, %v10689_v46 }
 0x2b2   : > { %v1270_v11 = vrot.slane %v1262_v13, %v10689_v46  ;;  %v1277_v56 = vrot.slane %v1263_v27, %v10689_v46  ;;  %v10740_v59 = vrot.slane %v1738_v39, %v10689_v46 }
 0x2b3   : > { %v10715_v43 = vpop.permute.xlu1 %984  ;;  %v1015_v25 = vpop.permute.xlu0 %1014  ;;  %v10743_v37 = vrot.slane %v1739_v41, %v10689_v46 }
 0x2b4   : > { %v1210_v36 = vcombine.low %v919_v21, %v1015_v25  ;;  %v1211_v55 = vcombine.high %v919_v21, %v1015_v25 }
 0x2b5   : > { %3789 = vrot.lane.b32.xlu1 %v10681_v34, %s10015_s30  ;;  %6467 = vrot.lane.b32.xlu0 %v10699_v62, %s10013_s28 }
 0x2b6   : > { %v1218_v58 = vrot.slane %v1210_v36, %v10689_v46  ;;  %v1225_v25 = vrot.slane %v1211_v55, %v10689_v46 }
 0x2b7   : > { %v1017_v19 = vpop.permute.xlu1 %1016  ;;  %v1031_v51 = vpop.permute.xlu0 %1030 }
 0x2b8   : > { %v1226_v13 = vcombine.low %v1202_v9, %v1218_v58  ;;  %v1227_v27 = vcombine.high %v1202_v9, %v1218_v58  ;;  %v1242_v34 = vcombine.low %v1209_v15, %v1225_v25  ;;  %v1243_v36 = vcombine.high %v1209_v15, %v1225_v25 }
 0x2b9   : > { %v1278_v55 = vcombine.low %v10671_v47, %v1017_v19  ;;  %v1279_v39 = vcombine.high %v10671_v47, %v1017_v19  ;;  %v1754_v26 = vcombine.low %v10673_v1, %v1031_v51  ;;  %v1755_v41 = vcombine.high %v10673_v1, %v1031_v51  ;;  %6469 = vrot.lane.b32.xlu1 %v10707_v38, %s10013_s28 }
 0x2ba   : > { %v1234_v50 = vrot.slane %v1226_v13, %v10703_v17  ;;  %v1241_v21 = vrot.slane %v1227_v27, %v10703_v17  ;;  %v1250_v22 = vrot.slane %v1242_v34, %v10703_v17  ;;  %v1257_v9 = vrot.slane %v1243_v36, %v10703_v17  ;;  %6515 = vrot.lane.b32.xlu0 %v10699_v62, %s10014_s29 }
 0x2bb   : > { %v1286_v47 = vrot.slane %v1278_v55, %v10689_v46  ;;  %v1293_v15 = vrot.slane %v1279_v39, %v10689_v46  ;;  %v10764_v1 = vrot.slane %v1754_v26, %v10689_v46  ;;  %v10767_v58 = vrot.slane %v1755_v41, %v10689_v46 }
 0x2bc   : > { %v2282_v25 = vcombine.low %v1234_v50, %v1241_v21  ;;  %v9324_v19 = vcombine.high %v1234_v50, %v1241_v21  ;;  %v2298_v51 = vcombine.low %v1250_v22, %v1257_v9  ;;  %v9325_v13 = vcombine.high %v1250_v22, %v1257_v9 }
 0x2bd   : > { %v1294_v34 = vcombine.low %v1270_v11, %v1286_v47  ;;  %v1295_v27 = vcombine.high %v1270_v11, %v1286_v47  ;;  %v1310_v36 = vcombine.low %v1277_v56, %v1293_v15  ;;  %v1311_v0 = vcombine.high %v1277_v56, %v1293_v15  ;;  %6517 = vrot.lane.b32.xlu1 %v10707_v38, %s10014_s29 }
 0x2be   : > { %v2289_v55 = vrot.slane %v2282_v25, %v10689_v46  ;;  %v2297_v26 = vrot.slane %v9324_v19, %v10689_v46  ;;  %v2305_v39 = vrot.slane %v2298_v51, %v10689_v46  ;;  %v2313_v41 = vrot.slane %v9325_v13, %v10689_v46  ;;  %6563 = vrot.lane.b32.xlu0 %v10699_v62, %s10015_s30  ;;  %v10781_v25 = vpop.permute.xlu1 %1032  ;;  %v10783_v19 = vpop.permute.xlu0 %914 }
 0x2bf   : > { %v1302_v22 = vrot.slane %v1294_v34, %v10703_v17  ;;  %v1309_v11 = vrot.slane %v1295_v27, %v10703_v17  ;;  %v1318_v56 = vrot.slane %v1310_v36, %v10703_v17  ;;  %v1325_v50 = vrot.slane %v1311_v0, %v10703_v17 }
 0x2c0   : > { %v2314_v21 = vcombine.low %v2289_v55, %v2297_v26  ;;  %v2315_v9 = vcombine.high %v2289_v55, %v2297_v26  ;;  %v2330_v47 = vcombine.low %v2305_v39, %v2313_v41  ;;  %v2331_v15 = vcombine.high %v2305_v39, %v2313_v41 }
 0x2c1   : > { %v2350_v51 = vcombine.low %v1302_v22, %v1309_v11  ;;  %v9326_v13 = vcombine.high %v1302_v22, %v1309_v11  ;;  %v2366_v62 = vcombine.low %v1318_v56, %v1325_v50  ;;  %v9327_v35 = vcombine.high %v1318_v56, %v1325_v50  ;;  %6565 = vrot.lane.b32.xlu1 %v10707_v38, %s10015_s30 }
 0x2c2   : > { %v2322_v0 = vrot.slane %v2314_v21, %v10703_v17  ;;  %v2329_v34 = vrot.slane %v2315_v9, %v10703_v17  ;;  %v2338_v27 = vrot.slane %v2330_v47, %v10703_v17  ;;  %v2345_v36 = vrot.slane %v2331_v15, %v10703_v17  ;;  %3703 = vrot.lane.b32.xlu0 %v10723_v2, %s10013_s28 }
 0x2c3   : > { %v2357_v55 = vrot.slane %v2350_v51, %v10689_v46  ;;  %v2365_v26 = vrot.slane %v9326_v13, %v10689_v46  ;;  %v2373_v39 = vrot.slane %v2366_v62, %v10689_v46  ;;  %v2381_v41 = vrot.slane %v9327_v35, %v10689_v46 }
 0x2c4   : > { %v2346_v22 = vcombine.low %v2322_v0, %v2338_v27  ;;  %v2347_v11 = vcombine.high %v2322_v0, %v2338_v27  ;;  %v2348_v56 = vcombine.low %v2329_v34, %v2345_v36  ;;  %v2349_v50 = vcombine.high %v2329_v34, %v2345_v36  ;;  %v10808_v0 = vpop.permute.xlu1 %916  ;;  %v10810_v34 = vpop.permute.xlu0 %930 }
 0x2c5   : > { %v2382_v21 = vcombine.low %v2357_v55, %v2365_v26  ;;  %v2383_v9 = vcombine.high %v2357_v55, %v2365_v26  ;;  %v2398_v47 = vcombine.low %v2373_v39, %v2381_v41  ;;  %v2399_v15 = vcombine.high %v2373_v39, %v2381_v41  ;;  %3705 = vrot.lane.b32.xlu1 %v10727_v52, %s10013_s28 }
 0x2c6   : > { %v9638_v35 = vpack.c.bf16 %v2346_v22, %v2346_v22  ;;  %v9654_v62 = vpack.c.bf16 %v2347_v11, %v2347_v11  ;;  %v9670_v51 = vpack.c.bf16 %v2348_v56, %v2348_v56  ;;  %v9686_v13 = vpack.c.bf16 %v2349_v50, %v2349_v50  ;;  %3751 = vrot.lane.b32.xlu0 %v10723_v2, %s10014_s29 }
 0x2c7   : > { %v2390_v27 = vrot.slane %v2382_v21, %v10703_v17  ;;  %v2397_v36 = vrot.slane %v2383_v9, %v10703_v17  ;;  %v2406_v55 = vrot.slane %v2398_v47, %v10703_v17  ;;  %v2413_v26 = vrot.slane %v2399_v15, %v10703_v17 }
 0x2c8   : > { %3493 = vst.msk [vmem:[%s10804_s22 + $0x8] sm:$0xf] %vm3490_vm1, %v9638_v35  ;;  %3509 = vst.msk [vmem:[%s10804_s22 + $0x48] sm:$0xf] %vm3490_vm1, %v9654_v62  ;;  %v1770_v39 = vcombine.low %v10740_v59, %v10764_v1  ;;  %v1771_v41 = vcombine.high %v10740_v59, %v10764_v1  ;;  %v1786_v22 = vcombine.low %v10743_v37, %v10767_v58 }
 0x2c9   : > { %3525 = vst.msk [vmem:[%s10804_s22 + $0x88] sm:$0xf] %vm3490_vm1, %v9670_v51  ;;  %3541 = vst.msk [vmem:[%s10804_s22 + $0xc8] sm:$0xf] %vm3490_vm1, %v9686_v13  ;;  %v1787_v11 = vcombine.high %v10743_v37, %v10767_v58  ;;  %v2414_v56 = vcombine.low %v2390_v27, %v2406_v55  ;;  %v2415_v50 = vcombine.high %v2390_v27, %v2406_v55  ;;  %3753 = vrot.lane.b32.xlu1 %v10727_v52, %s10014_s29  ;;  %v10842_v55 = vpop.permute.xlu1 %932 }
 0x2ca   : > { %v2416_v21 = vcombine.low %v2397_v36, %v2413_v26  ;;  %v2417_v9 = vcombine.high %v2397_v36, %v2413_v26  ;;  %v1778_v47 = vrot.slane %v1770_v39, %v10703_v17  ;;  %v1785_v15 = vrot.slane %v1771_v41, %v10703_v17  ;;  %3799 = vrot.lane.b32.xlu0 %v10723_v2, %s10015_s30  ;;  %v10844_v26 = vpop.permute.xlu0 %962 }
 0x2cb   : > { %v1794_v59 = vrot.slane %v1786_v22, %v10703_v17  ;;  %v1801_v1 = vrot.slane %v1787_v11, %v10703_v17  ;;  %v9639_v37 = vpack.c.bf16 %v2414_v56, %v2414_v56  ;;  %v9655_v58 = vpack.c.bf16 %v2415_v50, %v2415_v50 }
 0x2cc   : > { %v9671_v35 = vpack.c.bf16 %v2416_v21, %v2416_v21  ;;  %v9687_v62 = vpack.c.bf16 %v2417_v9, %v2417_v9  ;;  %v2826_v51 = vcombine.low %v1778_v47, %v1785_v15  ;;  %v9340_v13 = vcombine.high %v1778_v47, %v1785_v15 }
 0x2cd   : > { %v2842_v27 = vcombine.low %v1794_v59, %v1801_v1  ;;  %v9341_v36 = vcombine.high %v1794_v59, %v1801_v1  ;;  %v12634_v39 = vcombine.low %v10395_v16, %v10715_v43  ;;  %v12635_v22 = vcombine.high %v10395_v16, %v10715_v43  ;;  %3494 = vst.msk [vmem:[%s10804_s22 + $0xc] sm:$0xf] %vm3490_vm1, %v9639_v37 }
 0x2ce   : > { %3510 = vst.msk [vmem:[%s10804_s22 + $0x4c] sm:$0xf] %vm3490_vm1, %v9655_v58  ;;  %3526 = vst.msk [vmem:[%s10804_s22 + $0x8c] sm:$0xf] %vm3490_vm1, %v9671_v35  ;;  %v1822_v56 = vcombine.low %v10683_v49, %v10781_v25  ;;  %v1823_v50 = vcombine.high %v10683_v49, %v10781_v25  ;;  %3801 = vrot.lane.b32.xlu1 %v10727_v52, %s10015_s30  ;;  %v2833_v16 = vrot.slane %v2826_v51, %v10689_v46 }
 0x2cf   : > { %v1814_v41 = vrot.slane %v12634_v39, %v10689_v46  ;;  %v1821_v11 = vrot.slane %v12635_v22, %v10689_v46  ;;  %3542 = vst.msk [vmem:[%s10804_s22 + $0xcc] sm:$0xf] %vm3490_vm1, %v9687_v62  ;;  %v2841_v43 = vrot.slane %v9340_v13, %v10689_v46  ;;  %v2849_v21 = vrot.slane %v2842_v27, %v10689_v46 }
 0x2d0   : > { %v2857_v9 = vrot.slane %v9341_v36, %v10689_v46  ;;  %6479 = vrot.lane.b32.xlu0 %v10711_v24, %s10013_s28  ;;  %v1830_v47 = vrot.slane %v1822_v56, %v10689_v46  ;;  %v1837_v15 = vrot.slane %v1823_v50, %v10689_v46  ;;  %v1058_v49 = vcombine.low %v10436_v42, %v10844_v26 }
 0x2d1   : > { %v1059_v25 = vcombine.high %v10436_v42, %v10844_v26  ;;  %v2858_v59 = vcombine.low %v2833_v16, %v2841_v43  ;;  %v2859_v1 = vcombine.high %v2833_v16, %v2841_v43  ;;  %v965_v42 = vpop.permute.xlu1 %964  ;;  %v979_v26 = vpop.permute.xlu0 %978 }
 0x2d2   : > { %v2874_v37 = vcombine.low %v2849_v21, %v2857_v9  ;;  %v2875_v58 = vcombine.high %v2849_v21, %v2857_v9  ;;  %v1838_v35 = vcombine.low %v1814_v41, %v1830_v47  ;;  %v1839_v62 = vcombine.high %v1814_v41, %v1830_v47  ;;  %6481 = vrot.lane.b32.xlu1 %v10719_v54, %s10013_s28 }
 0x2d3   : > { %v1854_v51 = vcombine.low %v1821_v11, %v1837_v15  ;;  %v1855_v13 = vcombine.high %v1821_v11, %v1837_v15  ;;  %v2866_v27 = vrot.slane %v2858_v59, %v10703_v17  ;;  %v2873_v36 = vrot.slane %v2859_v1, %v10703_v17 }
 0x2d4   : > { %v2882_v39 = vrot.slane %v2874_v37, %v10703_v17  ;;  %v2889_v22 = vrot.slane %v2875_v58, %v10703_v17  ;;  %6527 = vrot.lane.b32.xlu0 %v10711_v24, %s10014_s29  ;;  %v1846_v41 = vrot.slane %v1838_v35, %v10703_v17  ;;  %v1853_v11 = vrot.slane %v1839_v62, %v10703_v17 }
 0x2d5   : > { %v1862_v56 = vrot.slane %v1854_v51, %v10703_v17  ;;  %v1869_v50 = vrot.slane %v1855_v13, %v10703_v17 }
 0x2d6   : > { %v2890_v16 = vcombine.low %v2866_v27, %v2882_v39  ;;  %v2891_v43 = vcombine.high %v2866_v27, %v2882_v39  ;;  %v2892_v21 = vcombine.low %v2873_v36, %v2889_v22  ;;  %v2893_v9 = vcombine.high %v2873_v36, %v2889_v22  ;;  %6529 = vrot.lane.b32.xlu1 %v10719_v54, %s10014_s29 }
 0x2d7   : > { %v2894_v47 = vcombine.low %v1846_v41, %v1853_v11  ;;  %v9342_v15 = vcombine.high %v1846_v41, %v1853_v11  ;;  %v2910_v59 = vcombine.low %v1862_v56, %v1869_v50  ;;  %v9343_v1 = vcombine.high %v1862_v56, %v1869_v50  ;;  %v10912_v56 = vpop.permute.xlu1 %980  ;;  %v1011_v50 = vpop.permute.xlu0 %1010 }
 0x2d8   : > { %v9646_v37 = vpack.c.bf16 %v2890_v16, %v2890_v16  ;;  %v9662_v58 = vpack.c.bf16 %v2891_v43, %v2891_v43  ;;  %v9678_v35 = vpack.c.bf16 %v2892_v21, %v2892_v21  ;;  %v9694_v62 = vpack.c.bf16 %v2893_v9, %v2893_v9  ;;  %6575 = vrot.lane.b32.xlu0 %v10711_v24, %s10015_s30 }
 0x2d9   : > { %v2901_v51 = vrot.slane %v2894_v47, %v10689_v46  ;;  %v2909_v13 = vrot.slane %v9342_v15, %v10689_v46  ;;  %v2917_v27 = vrot.slane %v2910_v59, %v10689_v46  ;;  %v2925_v36 = vrot.slane %v9343_v1, %v10689_v46 }
 0x2da   : > { %3501 = vst.msk [vmem:[%s10804_s22 + $0x28] sm:$0xf] %vm3490_vm1, %v9646_v37  ;;  %3517 = vst.msk [vmem:[%s10804_s22 + $0x68] sm:$0xf] %vm3490_vm1, %v9662_v58  ;;  %v1126_v39 = vcombine.low %v10451_v10, %v965_v42  ;;  %v1127_v22 = vcombine.high %v10451_v10, %v965_v42  ;;  %v1602_v41 = vcombine.low %v10454_v48, %v979_v26  ;;  %6577 = vrot.lane.b32.xlu1 %v10719_v54, %s10015_s30 }
 0x2db   : > { %3533 = vst.msk [vmem:[%s10804_s22 + $0xa8] sm:$0xf] %vm3490_vm1, %v9678_v35  ;;  %3549 = vst.msk [vmem:[%s10804_s22 + $0xe8] sm:$0xf] %vm3490_vm1, %v9694_v62  ;;  %v1603_v11 = vcombine.high %v10454_v48, %v979_v26  ;;  %v2926_v16 = vcombine.low %v2901_v51, %v2909_v13  ;;  %v2927_v43 = vcombine.high %v2901_v51, %v2909_v13 }
 0x2dc   : > { %v2942_v21 = vcombine.low %v2917_v27, %v2925_v36  ;;  %v2943_v9 = vcombine.high %v2917_v27, %v2925_v36  ;;  %v1066_v47 = vrot.slane %v1058_v49, %v10689_v46  ;;  %v1073_v15 = vrot.slane %v1059_v25, %v10689_v46  ;;  %3699 = vrot.lane.b32.xlu0 %v10496_v61, %s10013_s28 }
 0x2dd   : > { %v10919_v10 = vrot.slane %v1126_v39, %v10689_v46  ;;  %v10922_v42 = vrot.slane %v1127_v22, %v10689_v46  ;;  %v2934_v48 = vrot.slane %v2926_v16, %v10703_v17  ;;  %v2941_v26 = vrot.slane %v2927_v43, %v10703_v17  ;;  %v1013_v22 = vpop.permute.xlu1 %1012 }
 0x2de   : > { %v2950_v59 = vrot.slane %v2942_v21, %v10703_v17  ;;  %v2957_v1 = vrot.slane %v2943_v9, %v10703_v17  ;;  %v10931_v49 = vrot.slane %v1602_v41, %v10689_v46  ;;  %v10934_v25 = vrot.slane %v1603_v11, %v10689_v46  ;;  %3701 = vrot.lane.b32.xlu1 %v10505_v63, %s10013_s28  ;;  %v1027_v41 = vpop.permute.xlu0 %1026 }
 0x2df   : > { %v1074_v37 = vcombine.low %v10783_v19, %v1011_v50  ;;  %v1075_v58 = vcombine.high %v10783_v19, %v1011_v50  ;;  %v1670_v27 = vcombine.low %v10469_v28, %v10912_v56  ;;  %v1671_v36 = vcombine.high %v10469_v28, %v10912_v56 }
 0x2e0   : > { %v2958_v35 = vcombine.low %v2934_v48, %v2950_v59  ;;  %v2959_v62 = vcombine.high %v2934_v48, %v2950_v59  ;;  %v2960_v51 = vcombine.low %v2941_v26, %v2957_v1  ;;  %v2961_v13 = vcombine.high %v2941_v26, %v2957_v1  ;;  %3747 = vrot.lane.b32.xlu0 %v10496_v61, %s10014_s29 }
 0x2e1   : > { %v1082_v39 = vrot.slane %v1074_v37, %v10689_v46  ;;  %v1089_v19 = vrot.slane %v1075_v58, %v10689_v46  ;;  %v1142_v59 = vcombine.low %v10808_v0, %v1013_v22  ;;  %v1143_v1 = vcombine.high %v10808_v0, %v1013_v22 }
 0x2e2   : > { %v9647_v11 = vpack.c.bf16 %v2958_v35, %v2958_v35  ;;  %v9663_v50 = vpack.c.bf16 %v2959_v62, %v2959_v62  ;;  %v9679_v16 = vpack.c.bf16 %v2960_v51, %v2960_v51  ;;  %v9695_v43 = vpack.c.bf16 %v2961_v13, %v2961_v13  ;;  %3749 = vrot.lane.b32.xlu1 %v10505_v63, %s10014_s29 }
 0x2e3   : > { %v1090_v21 = vcombine.low %v1066_v47, %v1082_v39  ;;  %v1091_v9 = vcombine.high %v1066_v47, %v1082_v39  ;;  %v1106_v48 = vcombine.low %v1073_v15, %v1089_v19  ;;  %v1107_v26 = vcombine.high %v1073_v15, %v1089_v19 }
 0x2e4   : > { %3502 = vst.msk [vmem:[%s10804_s22 + $0x2c] sm:$0xf] %vm3490_vm1, %v9647_v11  ;;  %3518 = vst.msk [vmem:[%s10804_s22 + $0x6c] sm:$0xf] %vm3490_vm1, %v9663_v50  ;;  %v1618_v37 = vcombine.low %v10810_v34, %v1027_v41  ;;  %v1619_v58 = vcombine.high %v10810_v34, %v1027_v41  ;;  %3795 = vrot.lane.b32.xlu0 %v10496_v61, %s10015_s30  ;;  %v1150_v0 = vrot.slane %v1142_v59, %v10689_v46 }
 0x2e5   : > { %3534 = vst.msk [vmem:[%s10804_s22 + $0xac] sm:$0xf] %vm3490_vm1, %v9679_v16  ;;  %3550 = vst.msk [vmem:[%s10804_s22 + $0xec] sm:$0xf] %vm3490_vm1, %v9695_v43  ;;  %v1098_v47 = vrot.slane %v1090_v21, %v10703_v17  ;;  %v1105_v15 = vrot.slane %v1091_v9, %v10703_v17  ;;  %v1114_v35 = vrot.slane %v1106_v48, %v10703_v17 }
 0x2e6   : > { %v1121_v62 = vrot.slane %v1107_v26, %v10703_v17  ;;  %v1157_v51 = vrot.slane %v1143_v1, %v10689_v46  ;;  %v10971_v34 = vrot.slane %v1618_v37, %v10689_v46  ;;  %v10974_v13 = vrot.slane %v1619_v58, %v10689_v46  ;;  %3797 = vrot.lane.b32.xlu1 %v10505_v63, %s10015_s30 }
 0x2e7   : > { %v2146_v39 = vcombine.low %v1098_v47, %v1105_v15  ;;  %v9320_v19 = vcombine.high %v1098_v47, %v1105_v15  ;;  %v1158_v11 = vcombine.low %v10919_v10, %v1150_v0  ;;  %v1159_v50 = vcombine.high %v10919_v10, %v1150_v0 }
 0x2e8   : > { %v2162_v22 = vcombine.low %v1114_v35, %v1121_v62  ;;  %v9321_v41 = vcombine.high %v1114_v35, %v1121_v62  ;;  %v1174_v16 = vcombine.low %v10922_v42, %v1157_v51  ;;  %v1175_v43 = vcombine.high %v10922_v42, %v1157_v51  ;;  %6475 = vrot.lane.b32.xlu0 %v10477_v23, %s10013_s28  ;;  %v10992_v35 = vpop.permute.xlu1 %1028  ;;  %v10994_v62 = vpop.permute.xlu0 %926 }
 0x2e9   : > { %v2153_v21 = vrot.slane %v2146_v39, %v10689_v46  ;;  %v2161_v9 = vrot.slane %v9320_v19, %v10689_v46  ;;  %v1166_v10 = vrot.slane %v1158_v11, %v10703_v17  ;;  %v1173_v59 = vrot.slane %v1159_v50, %v10703_v17 }
 0x2ea   : > { %v2169_v48 = vrot.slane %v2162_v22, %v10689_v46  ;;  %v2177_v26 = vrot.slane %v9321_v41, %v10689_v46  ;;  %v1182_v42 = vrot.slane %v1174_v16, %v10703_v17  ;;  %v1189_v1 = vrot.slane %v1175_v43, %v10703_v17  ;;  %6477 = vrot.lane.b32.xlu1 %v10486_v53, %s10013_s28 }
 0x2eb   : > { %v2178_v37 = vcombine.low %v2153_v21, %v2161_v9  ;;  %v2179_v58 = vcombine.high %v2153_v21, %v2161_v9  ;;  %v2214_v0 = vcombine.low %v1166_v10, %v1173_v59  ;;  %v9322_v51 = vcombine.high %v1166_v10, %v1173_v59 }
 0x2ec   : > { %v2194_v47 = vcombine.low %v2169_v48, %v2177_v26  ;;  %v2195_v15 = vcombine.high %v2169_v48, %v2177_v26  ;;  %v2230_v39 = vcombine.low %v1182_v42, %v1189_v1  ;;  %v9323_v19 = vcombine.high %v1182_v42, %v1189_v1  ;;  %6523 = vrot.lane.b32.xlu0 %v10477_v23, %s10014_s29 }
 0x2ed   : > { %v2186_v22 = vrot.slane %v2178_v37, %v10703_v17  ;;  %v2193_v41 = vrot.slane %v2179_v58, %v10703_v17  ;;  %v2221_v16 = vrot.slane %v2214_v0, %v10689_v46  ;;  %v2229_v43 = vrot.slane %v9322_v51, %v10689_v46 }
 0x2ee   : > { %v2202_v11 = vrot.slane %v2194_v47, %v10703_v17  ;;  %v2209_v50 = vrot.slane %v2195_v15, %v10703_v17  ;;  %v2237_v21 = vrot.slane %v2230_v39, %v10689_v46  ;;  %v2245_v9 = vrot.slane %v9323_v19, %v10689_v46  ;;  %6525 = vrot.lane.b32.xlu1 %v10486_v53, %s10014_s29  ;;  %v11010_v39 = vpop.permute.xlu1 %928  ;;  %v11012_v19 = vpop.permute.xlu0 %942 }
 0x2ef   : > { %v2246_v42 = vcombine.low %v2221_v16, %v2229_v43  ;;  %v2247_v1 = vcombine.high %v2221_v16, %v2229_v43  ;;  %v1634_v16 = vcombine.low %v10931_v49, %v10971_v34  ;;  %v1635_v43 = vcombine.high %v10931_v49, %v10971_v34 }
 0x2f0   : > { %v2210_v48 = vcombine.low %v2186_v22, %v2202_v11  ;;  %v2211_v26 = vcombine.high %v2186_v22, %v2202_v11  ;;  %v2212_v10 = vcombine.low %v2193_v41, %v2209_v50  ;;  %v2213_v59 = vcombine.high %v2193_v41, %v2209_v50  ;;  %6571 = vrot.lane.b32.xlu0 %v10477_v23, %s10015_s30 }
 0x2f1   : > { %v2262_v37 = vcombine.low %v2237_v21, %v2245_v9  ;;  %v2263_v58 = vcombine.high %v2237_v21, %v2245_v9  ;;  %v2254_v22 = vrot.slane %v2246_v42, %v10703_v17  ;;  %v2261_v41 = vrot.slane %v2247_v1, %v10703_v17 }
 0x2f2   : > { %v9636_v47 = vpack.c.bf16 %v2210_v48, %v2210_v48  ;;  %v9652_v15 = vpack.c.bf16 %v2211_v26, %v2211_v26  ;;  %v9668_v0 = vpack.c.bf16 %v2212_v10, %v2212_v10  ;;  %v9684_v51 = vpack.c.bf16 %v2213_v59, %v2213_v59  ;;  %6573 = vrot.lane.b32.xlu1 %v10486_v53, %s10015_s30 }
 0x2f3   : > { %v2270_v11 = vrot.slane %v2262_v37, %v10703_v17  ;;  %v2277_v50 = vrot.slane %v2263_v58, %v10703_v17  ;;  %v1650_v21 = vcombine.low %v10934_v25, %v10974_v13  ;;  %v1651_v9 = vcombine.high %v10934_v25, %v10974_v13 }
 0x2f4   : > { %3491 = vst.msk [vmem:[%s10804_s22] sm:$0xf] %vm3490_vm1, %v9636_v47  ;;  %3507 = vst.msk [vmem:[%s10804_s22 + $0x40] sm:$0xf] %vm3490_vm1, %v9652_v15  ;;  %v1642_v42 = vrot.slane %v1634_v16, %v10703_v17  ;;  %v1649_v1 = vrot.slane %v1635_v43, %v10703_v17  ;;  %3711 = vrot.lane.b32.xlu0 %v10524_v45, %s10013_s28  ;;  %v1686_v16 = vcombine.low %v10842_v55, %v10992_v35 }
 0x2f5   : > { %3523 = vst.msk [vmem:[%s10804_s22 + $0x80] sm:$0xf] %vm3490_vm1, %v9668_v0  ;;  %3539 = vst.msk [vmem:[%s10804_s22 + $0xc0] sm:$0xf] %vm3490_vm1, %v9684_v51  ;;  %v2278_v48 = vcombine.low %v2254_v22, %v2270_v11  ;;  %v2279_v26 = vcombine.high %v2254_v22, %v2270_v11  ;;  %v2280_v10 = vcombine.low %v2261_v41, %v2277_v50  ;;  %v11044_v22 = vpop.permute.xlu1 %944 }
 0x2f6   : > { %v2281_v59 = vcombine.high %v2261_v41, %v2277_v50  ;;  %v1658_v49 = vrot.slane %v1650_v21, %v10703_v17  ;;  %v1665_v34 = vrot.slane %v1651_v9, %v10703_v17  ;;  %v2690_v47 = vcombine.low %v1642_v42, %v1649_v1  ;;  %v11046_v41 = vpop.permute.xlu0 %974  ;;  %3713 = vrot.lane.b32.xlu1 %v10530_v33, %s10013_s28 }
 0x2f7   : > { %v9637_v25 = vpack.c.bf16 %v2278_v48, %v2278_v48  ;;  %v9653_v13 = vpack.c.bf16 %v2279_v26, %v2279_v26  ;;  %v9669_v37 = vpack.c.bf16 %v2280_v10, %v2280_v10  ;;  %v9336_v15 = vcombine.high %v1642_v42, %v1649_v1 }
 0x2f8   : > { %v9685_v58 = vpack.c.bf16 %v2281_v59, %v2281_v59  ;;  %v2706_v0 = vcombine.low %v1658_v49, %v1665_v34  ;;  %v9337_v51 = vcombine.high %v1658_v49, %v1665_v34  ;;  %v1678_v11 = vrot.slane %v1670_v27, %v10689_v46  ;;  %3759 = vrot.lane.b32.xlu0 %v10524_v45, %s10014_s29 }
 0x2f9   : > { %v1685_v50 = vrot.slane %v1671_v36, %v10689_v46  ;;  %3492 = vst.msk [vmem:[%s10804_s22 + $0x4] sm:$0xf] %vm3490_vm1, %v9637_v25  ;;  %3508 = vst.msk [vmem:[%s10804_s22 + $0x44] sm:$0xf] %vm3490_vm1, %v9653_v13  ;;  %v1687_v43 = vcombine.high %v10842_v55, %v10992_v35  ;;  %v2697_v28 = vrot.slane %v2690_v47, %v10689_v46 }
 0x2fa   : > { %3524 = vst.msk [vmem:[%s10804_s22 + $0x84] sm:$0xf] %vm3490_vm1, %v9669_v37  ;;  %3540 = vst.msk [vmem:[%s10804_s22 + $0xc4] sm:$0xf] %vm3490_vm1, %v9685_v58  ;;  %v2705_v56 = vrot.slane %v9336_v15, %v10689_v46  ;;  %v2713_v27 = vrot.slane %v2706_v0, %v10689_v46  ;;  %v2721_v36 = vrot.slane %v9337_v51, %v10689_v46  ;;  %3761 = vrot.lane.b32.xlu1 %v10530_v33, %s10014_s29  ;;  %v991_v47 = vpop.permute.xlu0 %990 }
 0x2fb   : > { %v1694_v21 = vrot.slane %v1686_v16, %v10689_v46  ;;  %v1701_v9 = vrot.slane %v1687_v43, %v10689_v46  ;;  %v1466_v55 = vcombine.low %v10541_v14, %v11046_v41  ;;  %v1467_v35 = vcombine.high %v10541_v14, %v11046_v41  ;;  %v977_v14 = vpop.permute.xlu1 %976 }
 0x2fc   : > { %v2722_v48 = vcombine.low %v2697_v28, %v2705_v56  ;;  %v2723_v26 = vcombine.high %v2697_v28, %v2705_v56  ;;  %v2738_v10 = vcombine.low %v2713_v27, %v2721_v36  ;;  %v2739_v59 = vcombine.high %v2713_v27, %v2721_v36  ;;  %3807 = vrot.lane.b32.xlu0 %v10524_v45, %s10015_s30 }
 0x2fd   : > { %v1702_v42 = vcombine.low %v1678_v11, %v1694_v21  ;;  %v1703_v1 = vcombine.high %v1678_v11, %v1694_v21  ;;  %v1718_v49 = vcombine.low %v1685_v50, %v1701_v9  ;;  %v1719_v34 = vcombine.high %v1685_v50, %v1701_v9 }
 0x2fe   : > { %v2730_v25 = vrot.slane %v2722_v48, %v10703_v17  ;;  %v2737_v13 = vrot.slane %v2723_v26, %v10703_v17  ;;  %v2746_v37 = vrot.slane %v2738_v10, %v10703_v17  ;;  %v2753_v58 = vrot.slane %v2739_v59, %v10703_v17  ;;  %3809 = vrot.lane.b32.xlu1 %v10530_v33, %s10015_s30 }
 0x2ff   : > { %v1710_v15 = vrot.slane %v1702_v42, %v10703_v17  ;;  %v1717_v0 = vrot.slane %v1703_v1, %v10703_v17  ;;  %v1726_v51 = vrot.slane %v1718_v49, %v10703_v17  ;;  %v1733_v41 = vrot.slane %v1719_v34, %v10703_v17 }
 0x300   : > { %v2754_v11 = vcombine.low %v2730_v25, %v2746_v37  ;;  %v2755_v50 = vcombine.high %v2730_v25, %v2746_v37  ;;  %v2756_v16 = vcombine.low %v2737_v13, %v2753_v58  ;;  %v2757_v43 = vcombine.high %v2737_v13, %v2753_v58  ;;  %6487 = vrot.lane.b32.xlu0 %v10508_v57, %s10013_s28  ;;  %v11114_v37 = vpop.permute.xlu1 %992  ;;  %v1023_v58 = vpop.permute.xlu0 %1022 }
 0x301   : > { %v2758_v28 = vcombine.low %v1710_v15, %v1717_v0  ;;  %v9338_v56 = vcombine.high %v1710_v15, %v1717_v0  ;;  %v2774_v27 = vcombine.low %v1726_v51, %v1733_v41  ;;  %v9339_v36 = vcombine.high %v1726_v51, %v1733_v41 }
 0x302   : > { %v9644_v21 = vpack.c.bf16 %v2754_v11, %v2754_v11  ;;  %v9660_v9 = vpack.c.bf16 %v2755_v50, %v2755_v50  ;;  %v9676_v48 = vpack.c.bf16 %v2756_v16, %v2756_v16  ;;  %v9692_v26 = vpack.c.bf16 %v2757_v43, %v2757_v43  ;;  %6489 = vrot.lane.b32.xlu1 %v10514_v5, %s10013_s28 }
 0x303   : > { %v2765_v10 = vrot.slane %v2758_v28, %v10689_v46  ;;  %v2773_v59 = vrot.slane %v9338_v56, %v10689_v46  ;;  %v2781_v42 = vrot.slane %v2774_v27, %v10689_v46  ;;  %v2789_v1 = vrot.slane %v9339_v36, %v10689_v46 }
 0x304   : > { %3499 = vst.msk [vmem:[%s10804_s22 + $0x20] sm:$0xf] %vm3490_vm1, %v9644_v21  ;;  %3515 = vst.msk [vmem:[%s10804_s22 + $0x60] sm:$0xf] %vm3490_vm1, %v9660_v9  ;;  %v1534_v49 = vcombine.low %v10561_v44, %v977_v14  ;;  %v1535_v34 = vcombine.high %v10561_v44, %v977_v14  ;;  %v2010_v25 = vcombine.low %v10565_v29, %v991_v47  ;;  %6535 = vrot.lane.b32.xlu0 %v10508_v57, %s10014_s29 }
 0x305   : > { %3531 = vst.msk [vmem:[%s10804_s22 + $0xa0] sm:$0xf] %vm3490_vm1, %v9676_v48  ;;  %3547 = vst.msk [vmem:[%s10804_s22 + $0xe0] sm:$0xf] %vm3490_vm1, %v9692_v26  ;;  %v2011_v13 = vcombine.high %v10565_v29, %v991_v47  ;;  %v2790_v15 = vcombine.low %v2765_v10, %v2773_v59  ;;  %v2791_v0 = vcombine.high %v2765_v10, %v2773_v59  ;;  %v1025_v59 = vpop.permute.xlu1 %1024 }
 0x306   : > { %v2806_v51 = vcombine.low %v2781_v42, %v2789_v1  ;;  %v2807_v41 = vcombine.high %v2781_v42, %v2789_v1  ;;  %v1474_v11 = vrot.slane %v1466_v55, %v10689_v46  ;;  %v1481_v50 = vrot.slane %v1467_v35, %v10689_v46  ;;  %6537 = vrot.lane.b32.xlu1 %v10514_v5, %s10014_s29  ;;  %v1039_v42 = vpop.permute.xlu0 %1038 }
 0x307   : > { %v11121_v44 = vrot.slane %v1534_v49, %v10689_v46  ;;  %v11124_v14 = vrot.slane %v1535_v34, %v10689_v46  ;;  %v2798_v29 = vrot.slane %v2790_v15, %v10703_v17  ;;  %v2805_v47 = vrot.slane %v2791_v0, %v10703_v17 }
 0x308   : > { %v2814_v16 = vrot.slane %v2806_v51, %v10703_v17  ;;  %v2821_v43 = vrot.slane %v2807_v41, %v10703_v17  ;;  %v11133_v55 = vrot.slane %v2010_v25, %v10689_v46  ;;  %v11136_v35 = vrot.slane %v2011_v13, %v10689_v46  ;;  %6583 = vrot.lane.b32.xlu0 %v10508_v57, %s10015_s30 }
 0x309   : > { %v1482_v28 = vcombine.low %v10994_v62, %v1023_v58  ;;  %v1483_v56 = vcombine.high %v10994_v62, %v1023_v58  ;;  %v2078_v48 = vcombine.low %v10585_v6, %v11114_v37  ;;  %v2079_v26 = vcombine.high %v10585_v6, %v11114_v37 }
 0x30a   : > { %v2822_v27 = vcombine.low %v2798_v29, %v2814_v16  ;;  %v2823_v36 = vcombine.high %v2798_v29, %v2814_v16  ;;  %v2824_v21 = vcombine.low %v2805_v47, %v2821_v43  ;;  %v2825_v9 = vcombine.high %v2805_v47, %v2821_v43  ;;  %6585 = vrot.lane.b32.xlu1 %v10514_v5, %s10015_s30 }
 0x30b   : > { %v1490_v10 = vrot.slane %v1482_v28, %v10689_v46  ;;  %v1497_v62 = vrot.slane %v1483_v56, %v10689_v46  ;;  %v1550_v51 = vcombine.low %v11010_v39, %v1025_v59  ;;  %v1551_v41 = vcombine.high %v11010_v39, %v1025_v59 }
 0x30c   : > { %v9645_v1 = vpack.c.bf16 %v2822_v27, %v2822_v27  ;;  %v9661_v49 = vpack.c.bf16 %v2823_v36, %v2823_v36  ;;  %v9677_v34 = vpack.c.bf16 %v2824_v21, %v2824_v21  ;;  %v9693_v25 = vpack.c.bf16 %v2825_v9, %v2825_v9  ;;  %3707 = vrot.lane.b32.xlu0 %v10527_v8, %s10013_s28 }
 0x30d   : > { %v1498_v13 = vcombine.low %v1474_v11, %v1490_v10  ;;  %v1499_v58 = vcombine.high %v1474_v11, %v1490_v10  ;;  %v1514_v15 = vcombine.low %v1481_v50, %v1497_v62  ;;  %v1515_v0 = vcombine.high %v1481_v50, %v1497_v62 }
 0x30e   : > { %3500 = vst.msk [vmem:[%s10804_s22 + $0x24] sm:$0xf] %vm3490_vm1, %v9645_v1  ;;  %3516 = vst.msk [vmem:[%s10804_s22 + $0x64] sm:$0xf] %vm3490_vm1, %v9661_v49  ;;  %v2026_v29 = vcombine.low %v11012_v19, %v1039_v42  ;;  %v2027_v47 = vcombine.high %v11012_v19, %v1039_v42  ;;  %v1558_v39 = vrot.slane %v1550_v51, %v10689_v46  ;;  %3709 = vrot.lane.b32.xlu1 %v10537_v12, %s10013_s28 }
 0x30f   : > { %3532 = vst.msk [vmem:[%s10804_s22 + $0xa4] sm:$0xf] %vm3490_vm1, %v9677_v34  ;;  %3548 = vst.msk [vmem:[%s10804_s22 + $0xe4] sm:$0xf] %vm3490_vm1, %v9693_v25  ;;  %v1506_v11 = vrot.slane %v1498_v13, %v10703_v17  ;;  %v1513_v50 = vrot.slane %v1499_v58, %v10703_v17  ;;  %v1522_v16 = vrot.slane %v1514_v15, %v10703_v17 }
 0x310   : > { %v1529_v43 = vrot.slane %v1515_v0, %v10703_v17  ;;  %v1565_v28 = vrot.slane %v1551_v41, %v10689_v46  ;;  %v11173_v19 = vrot.slane %v2026_v29, %v10689_v46  ;;  %v11176_v56 = vrot.slane %v2027_v47, %v10689_v46  ;;  %3755 = vrot.lane.b32.xlu0 %v10527_v8, %s10014_s29  ;;  %v11194_v29 = vpop.permute.xlu1 %1040  ;;  %v11196_v47 = vpop.permute.xlu0 %922 }
 0x311   : > { %v2554_v27 = vcombine.low %v1506_v11, %v1513_v50  ;;  %v9332_v36 = vcombine.high %v1506_v11, %v1513_v50  ;;  %v1566_v10 = vcombine.low %v11121_v44, %v1558_v39  ;;  %v1567_v62 = vcombine.high %v11121_v44, %v1558_v39 }
 0x312   : > { %v2570_v21 = vcombine.low %v1522_v16, %v1529_v43  ;;  %v9333_v9 = vcombine.high %v1522_v16, %v1529_v43  ;;  %v1582_v59 = vcombine.low %v11124_v14, %v1565_v28  ;;  %v1583_v42 = vcombine.high %v11124_v14, %v1565_v28  ;;  %3757 = vrot.lane.b32.xlu1 %v10537_v12, %s10014_s29 }
 0x313   : > { %v2561_v1 = vrot.slane %v2554_v27, %v10689_v46  ;;  %v2569_v49 = vrot.slane %v9332_v36, %v10689_v46  ;;  %v1574_v44 = vrot.slane %v1566_v10, %v10703_v17  ;;  %v1581_v13 = vrot.slane %v1567_v62, %v10703_v17 }
 0x314   : > { %v2577_v34 = vrot.slane %v2570_v21, %v10689_v46  ;;  %v2585_v25 = vrot.slane %v9333_v9, %v10689_v46  ;;  %v1590_v14 = vrot.slane %v1582_v59, %v10703_v17  ;;  %v1597_v58 = vrot.slane %v1583_v42, %v10703_v17  ;;  %3803 = vrot.lane.b32.xlu0 %v10527_v8, %s10015_s30 }
 0x315   : > { %v2586_v15 = vcombine.low %v2561_v1, %v2569_v49  ;;  %v2587_v0 = vcombine.high %v2561_v1, %v2569_v49  ;;  %v2622_v11 = vcombine.low %v1574_v44, %v1581_v13  ;;  %v9334_v50 = vcombine.high %v1574_v44, %v1581_v13 }
 0x316   : > { %v2602_v51 = vcombine.low %v2577_v34, %v2585_v25  ;;  %v2603_v41 = vcombine.high %v2577_v34, %v2585_v25  ;;  %v2638_v16 = vcombine.low %v1590_v14, %v1597_v58  ;;  %v9335_v43 = vcombine.high %v1590_v14, %v1597_v58  ;;  %3805 = vrot.lane.b32.xlu1 %v10537_v12, %s10015_s30 }
 0x317   : > { %v2594_v39 = vrot.slane %v2586_v15, %v10703_v17  ;;  %v2601_v28 = vrot.slane %v2587_v0, %v10703_v17  ;;  %v2629_v21 = vrot.slane %v2622_v11, %v10689_v46  ;;  %v2637_v9 = vrot.slane %v9334_v50, %v10689_v46 }
 0x318   : > { %v2610_v27 = vrot.slane %v2602_v51, %v10703_v17  ;;  %v2617_v36 = vrot.slane %v2603_v41, %v10703_v17  ;;  %v2645_v10 = vrot.slane %v2638_v16, %v10689_v46  ;;  %v2653_v62 = vrot.slane %v9335_v43, %v10689_v46  ;;  %v11212_v51 = vpop.permute.xlu1 %924  ;;  %v11214_v41 = vpop.permute.xlu0 %938  ;;  %6483 = vrot.lane.b32.xlu0 %v10511_v3, %s10013_s28 }
 0x319   : > { %v2654_v34 = vcombine.low %v2629_v21, %v2637_v9  ;;  %v2655_v25 = vcombine.high %v2629_v21, %v2637_v9 }
 0x31a   : > { %v2618_v59 = vcombine.low %v2594_v39, %v2610_v27  ;;  %v2619_v42 = vcombine.high %v2594_v39, %v2610_v27  ;;  %v2620_v1 = vcombine.low %v2601_v28, %v2617_v36  ;;  %v2621_v49 = vcombine.high %v2601_v28, %v2617_v36  ;;  %6485 = vrot.lane.b32.xlu1 %v10521_v7, %s10013_s28 }
 0x31b   : > { %v2670_v44 = vcombine.low %v2645_v10, %v2653_v62  ;;  %v2671_v13 = vcombine.high %v2645_v10, %v2653_v62  ;;  %v2662_v11 = vrot.slane %v2654_v34, %v10703_v17  ;;  %v2669_v50 = vrot.slane %v2655_v25, %v10703_v17 }
 0x31c   : > { %v9642_v14 = vpack.c.bf16 %v2618_v59, %v2618_v59  ;;  %v9658_v58 = vpack.c.bf16 %v2619_v42, %v2619_v42  ;;  %v9674_v15 = vpack.c.bf16 %v2620_v1, %v2620_v1  ;;  %v9690_v0 = vpack.c.bf16 %v2621_v49, %v2621_v49  ;;  %6531 = vrot.lane.b32.xlu0 %v10511_v3, %s10014_s29 }
 0x31d   : > { %v2678_v16 = vrot.slane %v2670_v44, %v10703_v17  ;;  %v2685_v43 = vrot.slane %v2671_v13, %v10703_v17  ;;  %v2042_v39 = vcombine.low %v11133_v55, %v11173_v19  ;;  %v2043_v28 = vcombine.high %v11133_v55, %v11173_v19 }
 0x31e   : > { %3497 = vst.msk [vmem:[%s10804_s22 + $0x18] sm:$0xf] %vm3490_vm1, %v9642_v14  ;;  %3513 = vst.msk [vmem:[%s10804_s22 + $0x58] sm:$0xf] %vm3490_vm1, %v9658_v58  ;;  %v2058_v27 = vcombine.low %v11136_v35, %v11176_v56  ;;  %v2059_v36 = vcombine.high %v11136_v35, %v11176_v56  ;;  %v11246_v14 = vpop.permute.xlu1 %940  ;;  %v11248_v58 = vpop.permute.xlu0 %970  ;;  %6533 = vrot.lane.b32.xlu1 %v10521_v7, %s10014_s29 }
 0x31f   : > { %3529 = vst.msk [vmem:[%s10804_s22 + $0x98] sm:$0xf] %vm3490_vm1, %v9674_v15  ;;  %3545 = vst.msk [vmem:[%s10804_s22 + $0xd8] sm:$0xf] %vm3490_vm1, %v9690_v0  ;;  %v2686_v21 = vcombine.low %v2662_v11, %v2678_v16  ;;  %v2687_v9 = vcombine.high %v2662_v11, %v2678_v16  ;;  %v2688_v10 = vcombine.low %v2669_v50, %v2685_v43 }
 0x320   : > { %v2689_v62 = vcombine.high %v2669_v50, %v2685_v43  ;;  %v2050_v59 = vrot.slane %v2042_v39, %v10703_v17  ;;  %v2057_v42 = vrot.slane %v2043_v28, %v10703_v17  ;;  %v2066_v55 = vrot.slane %v2058_v27, %v10703_v17  ;;  %6579 = vrot.lane.b32.xlu0 %v10511_v3, %s10015_s30 }
 0x321   : > { %v2073_v19 = vrot.slane %v2059_v36, %v10703_v17  ;;  %v9643_v35 = vpack.c.bf16 %v2686_v21, %v2686_v21  ;;  %v9659_v56 = vpack.c.bf16 %v2687_v9, %v2687_v9  ;;  %v9675_v1 = vpack.c.bf16 %v2688_v10, %v2688_v10 }
 0x322   : > { %v9691_v49 = vpack.c.bf16 %v2689_v62, %v2689_v62  ;;  %v3098_v34 = vcombine.low %v2050_v59, %v2057_v42  ;;  %v9348_v25 = vcombine.high %v2050_v59, %v2057_v42  ;;  %v2086_v15 = vrot.slane %v2078_v48, %v10689_v46  ;;  %6581 = vrot.lane.b32.xlu1 %v10521_v7, %s10015_s30 }
 0x323   : > { %v3114_v44 = vcombine.low %v2066_v55, %v2073_v19  ;;  %v9349_v13 = vcombine.high %v2066_v55, %v2073_v19  ;;  %v2093_v0 = vrot.slane %v2079_v26, %v10689_v46  ;;  %3498 = vst.msk [vmem:[%s10804_s22 + $0x1c] sm:$0xf] %vm3490_vm1, %v9643_v35  ;;  %3514 = vst.msk [vmem:[%s10804_s22 + $0x5c] sm:$0xf] %vm3490_vm1, %v9659_v56  ;;  %v987_v35 = vpop.permute.xlu0 %986 }
 0x324   : > { %3530 = vst.msk [vmem:[%s10804_s22 + $0x9c] sm:$0xf] %vm3490_vm1, %v9675_v1  ;;  %3546 = vst.msk [vmem:[%s10804_s22 + $0xdc] sm:$0xf] %vm3490_vm1, %v9691_v49  ;;  %v2094_v11 = vcombine.low %v11044_v22, %v11194_v29  ;;  %v2095_v50 = vcombine.high %v11044_v22, %v11194_v29  ;;  %v3105_v6 = vrot.slane %v3098_v34, %v10689_v46  ;;  %3719 = vrot.lane.b32.xlu0 %v10568_v60, %s10013_s28 }
 0x325   : > { %v3113_v37 = vrot.slane %v9348_v25, %v10689_v46  ;;  %v3121_v48 = vrot.slane %v3114_v44, %v10689_v46  ;;  %v3129_v26 = vrot.slane %v9349_v13, %v10689_v46  ;;  %v1330_v22 = vcombine.low %v10408_v30, %v11248_v58 }
 0x326   : > { %v2102_v16 = vrot.slane %v2094_v11, %v10689_v46  ;;  %v2109_v43 = vrot.slane %v2095_v50, %v10689_v46  ;;  %v1331_v29 = vcombine.high %v10408_v30, %v11248_v58  ;;  %v973_v30 = vpop.permute.xlu1 %972  ;;  %3721 = vrot.lane.b32.xlu1 %v10574_v4, %s10013_s28 }
 0x327   : > { %v3130_v39 = vcombine.low %v3105_v6, %v3113_v37  ;;  %v3131_v28 = vcombine.high %v3105_v6, %v3113_v37  ;;  %v3146_v27 = vcombine.low %v3121_v48, %v3129_v26  ;;  %v3147_v36 = vcombine.high %v3121_v48, %v3129_v26 }
 0x328   : > { %v2110_v21 = vcombine.low %v2086_v15, %v2102_v16  ;;  %v2111_v9 = vcombine.high %v2086_v15, %v2102_v16  ;;  %v2126_v10 = vcombine.low %v2093_v0, %v2109_v43  ;;  %v2127_v62 = vcombine.high %v2093_v0, %v2109_v43  ;;  %3767 = vrot.lane.b32.xlu0 %v10568_v60, %s10014_s29 }
 0x329   : > { %v3138_v59 = vrot.slane %v3130_v39, %v10703_v17  ;;  %v3145_v42 = vrot.slane %v3131_v28, %v10703_v17  ;;  %v3154_v55 = vrot.slane %v3146_v27, %v10703_v17  ;;  %v3161_v19 = vrot.slane %v3147_v36, %v10703_v17 }
 0x32a   : > { %v2118_v56 = vrot.slane %v2110_v21, %v10703_v17  ;;  %v2125_v1 = vrot.slane %v2111_v9, %v10703_v17  ;;  %v2134_v49 = vrot.slane %v2126_v10, %v10703_v17  ;;  %v2141_v34 = vrot.slane %v2127_v62, %v10703_v17  ;;  %v11316_v10 = vpop.permute.xlu1 %988  ;;  %v1019_v62 = vpop.permute.xlu0 %1018  ;;  %3769 = vrot.lane.b32.xlu1 %v10574_v4, %s10014_s29 }
 0x32b   : > { %v3162_v25 = vcombine.low %v3138_v59, %v3154_v55  ;;  %v3163_v44 = vcombine.high %v3138_v59, %v3154_v55  ;;  %v3164_v13 = vcombine.low %v3145_v42, %v3161_v19  ;;  %v3165_v58 = vcombine.high %v3145_v42, %v3161_v19 }
 0x32c   : > { %v3166_v15 = vcombine.low %v2118_v56, %v2125_v1  ;;  %v9350_v0 = vcombine.high %v2118_v56, %v2125_v1  ;;  %v3182_v11 = vcombine.low %v2134_v49, %v2141_v34  ;;  %v9351_v50 = vcombine.high %v2134_v49, %v2141_v34  ;;  %3815 = vrot.lane.b32.xlu0 %v10568_v60, %s10015_s30 }
 0x32d   : > { %v9650_v6 = vpack.c.bf16 %v3162_v25, %v3162_v25  ;;  %v9666_v37 = vpack.c.bf16 %v3163_v44, %v3163_v44  ;;  %v9682_v48 = vpack.c.bf16 %v3164_v13, %v3164_v13  ;;  %v9698_v26 = vpack.c.bf16 %v3165_v58, %v3165_v58 }
 0x32e   : > { %v3173_v16 = vrot.slane %v3166_v15, %v10689_v46  ;;  %v3181_v43 = vrot.slane %v9350_v0, %v10689_v46  ;;  %v3189_v39 = vrot.slane %v3182_v11, %v10689_v46  ;;  %v3197_v28 = vrot.slane %v9351_v50, %v10689_v46  ;;  %3817 = vrot.lane.b32.xlu1 %v10574_v4, %s10015_s30 }
 0x32f   : > { %3505 = vst.msk [vmem:[%s10804_s22 + $0x38] sm:$0xf] %vm3490_vm1, %v9650_v6  ;;  %3521 = vst.msk [vmem:[%s10804_s22 + $0x78] sm:$0xf] %vm3490_vm1, %v9666_v37  ;;  %v1398_v27 = vcombine.low %v10417_v32, %v973_v30  ;;  %v1399_v36 = vcombine.high %v10417_v32, %v973_v30  ;;  %v1874_v21 = vcombine.low %v10422_v20, %v987_v35  ;;  %v1021_v37 = vpop.permute.xlu1 %1020 }
 0x330   : > { %3537 = vst.msk [vmem:[%s10804_s22 + $0xb8] sm:$0xf] %vm3490_vm1, %v9682_v48  ;;  %3553 = vst.msk [vmem:[%s10804_s22 + $0xf8] sm:$0xf] %vm3490_vm1, %v9698_v26  ;;  %v1875_v9 = vcombine.high %v10422_v20, %v987_v35  ;;  %v3198_v59 = vcombine.low %v3173_v16, %v3181_v43  ;;  %v3199_v42 = vcombine.high %v3173_v16, %v3181_v43  ;;  %v1035_v48 = vpop.permute.xlu0 %1034  ;;  %6495 = vrot.lane.b32.xlu0 %v10544_v18, %s10013_s28 }
 0x331   : > { %v3214_v55 = vcombine.low %v3189_v39, %v3197_v28  ;;  %v3215_v19 = vcombine.high %v3189_v39, %v3197_v28  ;;  %v1338_v56 = vrot.slane %v1330_v22, %v10689_v46  ;;  %v1345_v1 = vrot.slane %v1331_v29, %v10689_v46 }
 0x332   : > { %v11323_v32 = vrot.slane %v1398_v27, %v10689_v46  ;;  %v11326_v30 = vrot.slane %v1399_v36, %v10689_v46  ;;  %v3206_v20 = vrot.slane %v3198_v59, %v10703_v17  ;;  %v3213_v35 = vrot.slane %v3199_v42, %v10703_v17  ;;  %6497 = vrot.lane.b32.xlu1 %v10550_v31, %s10013_s28 }
 0x333   : > { %v3222_v49 = vrot.slane %v3214_v55, %v10703_v17  ;;  %v3229_v34 = vrot.slane %v3215_v19, %v10703_v17  ;;  %v11335_v22 = vrot.slane %v1874_v21, %v10689_v46  ;;  %v11338_v29 = vrot.slane %v1875_v9, %v10689_v46 }
 0x334   : > { %v1346_v25 = vcombine.low %v11196_v47, %v1019_v62  ;;  %v1347_v44 = vcombine.high %v11196_v47, %v1019_v62  ;;  %v1942_v11 = vcombine.low %v10431_v40, %v11316_v10  ;;  %v1943_v50 = vcombine.high %v10431_v40, %v11316_v10  ;;  %6543 = vrot.lane.b32.xlu0 %v10544_v18, %s10014_s29 }
 0x335   : > { %v3230_v13 = vcombine.low %v3206_v20, %v3222_v49  ;;  %v3231_v58 = vcombine.high %v3206_v20, %v3222_v49  ;;  %v3232_v15 = vcombine.low %v3213_v35, %v3229_v34  ;;  %v3233_v0 = vcombine.high %v3213_v35, %v3229_v34 }
 0x336   : > { %v1354_v6 = vrot.slane %v1346_v25, %v10689_v46  ;;  %v1361_v47 = vrot.slane %v1347_v44, %v10689_v46  ;;  %v1414_v9 = vcombine.low %v11212_v51, %v1021_v37  ;;  %v1415_v62 = vcombine.high %v11212_v51, %v1021_v37  ;;  %6545 = vrot.lane.b32.xlu1 %v10550_v31, %s10014_s29 }
 0x337   : > { %v9651_v26 = vpack.c.bf16 %v3230_v13, %v3230_v13  ;;  %v9667_v16 = vpack.c.bf16 %v3231_v58, %v3231_v58  ;;  %v9683_v43 = vpack.c.bf16 %v3232_v15, %v3232_v15  ;;  %v9699_v39 = vpack.c.bf16 %v3233_v0, %v3233_v0 }
 0x338   : > { %v1362_v28 = vcombine.low %v1338_v56, %v1354_v6  ;;  %v1363_v27 = vcombine.high %v1338_v56, %v1354_v6  ;;  %v1378_v36 = vcombine.low %v1345_v1, %v1361_v47  ;;  %v1379_v21 = vcombine.high %v1345_v1, %v1361_v47 }
 0x339   : > { %3506 = vst.msk [vmem:[%s10804_s22 + $0x3c] sm:$0xf] %vm3490_vm1, %v9651_v26  ;;  %3522 = vst.msk [vmem:[%s10804_s22 + $0x7c] sm:$0xf] %vm3490_vm1, %v9667_v16  ;;  %v1890_v59 = vcombine.low %v11214_v41, %v1035_v48  ;;  %v1891_v42 = vcombine.high %v11214_v41, %v1035_v48  ;;  %v1422_v51 = vrot.slane %v1414_v9, %v10689_v46  ;;  %v12636_v26 = vld [vmem:[#allocation4_spill] sm:$0xff] }
 0x33a   : > { %3538 = vst.msk [vmem:[%s10804_s22 + $0xbc] sm:$0xf] %vm3490_vm1, %v9683_v43  ;;  %3554 = vst.msk [vmem:[%s10804_s22 + $0xfc] sm:$0xf] %vm3490_vm1, %v9699_v39  ;;  %v1370_v55 = vrot.slane %v1362_v28, %v10703_v17  ;;  %v1377_v19 = vrot.slane %v1363_v27, %v10703_v17  ;;  %v1386_v56 = vrot.slane %v1378_v36, %v10703_v17  ;;  %3715 = vrot.lane.b32.xlu0 %v12636_v26, %s10013_s28 }
 0x33b   : > { %v1393_v1 = vrot.slane %v1379_v21, %v10703_v17  ;;  %v1429_v20 = vrot.slane %v1415_v62, %v10689_v46  ;;  %v11375_v41 = vrot.slane %v1890_v59, %v10689_v46  ;;  %v11378_v35 = vrot.slane %v1891_v42, %v10689_v46  ;;  %v12637_v42 = vld [vmem:[#allocation5_spill] sm:$0xff] }
 0x33c   : > { %v2418_v49 = vcombine.low %v1370_v55, %v1377_v19  ;;  %v9328_v34 = vcombine.high %v1370_v55, %v1377_v19  ;;  %v1430_v13 = vcombine.low %v11323_v32, %v1422_v51  ;;  %v1431_v58 = vcombine.high %v11323_v32, %v1422_v51  ;;  %3717 = vrot.lane.b32.xlu1 %v12637_v42, %s10013_s28 }
 0x33d   : > { %v2434_v25 = vcombine.low %v1386_v56, %v1393_v1  ;;  %v9329_v44 = vcombine.high %v1386_v56, %v1393_v1  ;;  %v1446_v15 = vcombine.low %v11326_v30, %v1429_v20  ;;  %v1447_v0 = vcombine.high %v11326_v30, %v1429_v20 }
 0x33e   : > { %v2425_v6 = vrot.slane %v2418_v49, %v10689_v46  ;;  %v2433_v47 = vrot.slane %v9328_v34, %v10689_v46  ;;  %v1438_v32 = vrot.slane %v1430_v13, %v10703_v17  ;;  %v1445_v16 = vrot.slane %v1431_v58, %v10703_v17  ;;  %3763 = vrot.lane.b32.xlu0 %v12636_v26, %s10014_s29 }
 0x33f   : > { %v2441_v37 = vrot.slane %v2434_v25, %v10689_v46  ;;  %v2449_v48 = vrot.slane %v9329_v44, %v10689_v46  ;;  %v1454_v30 = vrot.slane %v1446_v15, %v10703_v17  ;;  %v1461_v43 = vrot.slane %v1447_v0, %v10703_v17 }
 0x340   : > { %v2450_v39 = vcombine.low %v2425_v6, %v2433_v47  ;;  %v2451_v28 = vcombine.high %v2425_v6, %v2433_v47  ;;  %v2486_v21 = vcombine.low %v1438_v32, %v1445_v16  ;;  %v9330_v9 = vcombine.high %v1438_v32, %v1445_v16  ;;  %3765 = vrot.lane.b32.xlu1 %v12637_v42, %s10014_s29 }
 0x341   : > { %v2466_v27 = vcombine.low %v2441_v37, %v2449_v48  ;;  %v2467_v36 = vcombine.high %v2441_v37, %v2449_v48  ;;  %v2502_v62 = vcombine.low %v1454_v30, %v1461_v43  ;;  %v9331_v59 = vcombine.high %v1454_v30, %v1461_v43  ;;  %v11410_v30 = vpop.permute.xlu0 %3695 }
 0x342   : > { %v2458_v55 = vrot.slane %v2450_v39, %v10703_v17  ;;  %v2465_v19 = vrot.slane %v2451_v28, %v10703_v17  ;;  %v2493_v51 = vrot.slane %v2486_v21, %v10689_v46  ;;  %v2501_v20 = vrot.slane %v9330_v9, %v10689_v46  ;;  %3811 = vrot.lane.b32.xlu0 %v12636_v26, %s10015_s30 }
 0x343   : > { %v2474_v56 = vrot.slane %v2466_v27, %v10703_v17  ;;  %v2481_v1 = vrot.slane %v2467_v36, %v10703_v17  ;;  %v2509_v49 = vrot.slane %v2502_v62, %v10689_v46  ;;  %v2517_v34 = vrot.slane %v9331_v59, %v10689_v46 }
 0x344   : > { %v2518_v15 = vcombine.low %v2493_v51, %v2501_v20  ;;  %v2519_v0 = vcombine.high %v2493_v51, %v2501_v20  ;;  %v1906_v36 = vcombine.low %v11335_v22, %v11375_v41  ;;  %v1907_v21 = vcombine.high %v11335_v22, %v11375_v41  ;;  %3813 = vrot.lane.b32.xlu1 %v12637_v42, %s10015_s30  ;;  %v1037_v20 = vpop.permute.xlu1 %1036 }
 0x345   : > { %v2482_v25 = vcombine.low %v2458_v55, %v2474_v56  ;;  %v2483_v44 = vcombine.high %v2458_v55, %v2474_v56  ;;  %v2484_v13 = vcombine.low %v2465_v19, %v2481_v1  ;;  %v2485_v58 = vcombine.high %v2465_v19, %v2481_v1 }
 0x346   : > { %v2534_v6 = vcombine.low %v2509_v49, %v2517_v34  ;;  %v2535_v47 = vcombine.high %v2509_v49, %v2517_v34  ;;  %v2526_v43 = vrot.slane %v2518_v15, %v10703_v17  ;;  %v2533_v39 = vrot.slane %v2519_v0, %v10703_v17  ;;  %v11442_v0 = vpop.permute.xlu0 %3743 }
 0x347   : > { %v9640_v37 = vpack.c.bf16 %v2482_v25, %v2482_v25  ;;  %v9656_v48 = vpack.c.bf16 %v2483_v44, %v2483_v44  ;;  %v9672_v32 = vpack.c.bf16 %v2484_v13, %v2484_v13  ;;  %v9688_v16 = vpack.c.bf16 %v2485_v58, %v2485_v58 }
 0x348   : > { %v2542_v28 = vrot.slane %v2534_v6, %v10703_v17  ;;  %v2549_v27 = vrot.slane %v2535_v47, %v10703_v17  ;;  %v1922_v9 = vcombine.low %v11338_v29, %v11378_v35  ;;  %v1923_v62 = vcombine.high %v11338_v29, %v11378_v35  ;;  %v12638_v29 = vld [vmem:[#allocation2_spill] sm:$0xff] }
 0x349   : > { %3495 = vst.msk [vmem:[%s10804_s22 + $0x10] sm:$0xf] %vm3490_vm1, %v9640_v37  ;;  %3511 = vst.msk [vmem:[%s10804_s22 + $0x50] sm:$0xf] %vm3490_vm1, %v9656_v48  ;;  %v1914_v1 = vrot.slane %v1906_v36, %v10703_v17  ;;  %v1921_v51 = vrot.slane %v1907_v21, %v10703_v17  ;;  %6491 = vrot.lane.b32.xlu0 %v12638_v29, %s10013_s28  ;;  %v1950_v6 = vrot.slane %v1942_v11, %v10689_v46 }
 0x34a   : > { %3527 = vst.msk [vmem:[%s10804_s22 + $0x90] sm:$0xf] %vm3490_vm1, %v9672_v32  ;;  %3543 = vst.msk [vmem:[%s10804_s22 + $0xd0] sm:$0xf] %vm3490_vm1, %v9688_v16  ;;  %v2550_v59 = vcombine.low %v2526_v43, %v2542_v28  ;;  %v2551_v55 = vcombine.high %v2526_v43, %v2542_v28  ;;  %v2552_v19 = vcombine.low %v2533_v39, %v2549_v27  ;;  %v12639_v32 = vld [vmem:[#allocation3_spill] sm:$0xff] }
 0x34b   : > { %v2553_v56 = vcombine.high %v2533_v39, %v2549_v27  ;;  %v1930_v22 = vrot.slane %v1922_v9, %v10703_v17  ;;  %v1937_v41 = vrot.slane %v1923_v62, %v10703_v17  ;;  %v2962_v44 = vcombine.low %v1914_v1, %v1921_v51  ;;  %6493 = vrot.lane.b32.xlu1 %v12639_v32, %s10013_s28  ;;  %s11626_s28 = scalar_lea.vmem %s12604_s11, %s10788_s16 }
 0x34c   : > { %v9641_v35 = vpack.c.bf16 %v2550_v59, %v2550_v59  ;;  %v9657_v49 = vpack.c.bf16 %v2551_v55, %v2551_v55  ;;  %v9673_v34 = vpack.c.bf16 %v2552_v19, %v2552_v19  ;;  %v9344_v13 = vcombine.high %v1914_v1, %v1921_v51 }
 0x34d   : > { %v9689_v25 = vpack.c.bf16 %v2553_v56, %v2553_v56  ;;  %v2978_v58 = vcombine.low %v1930_v22, %v1937_v41  ;;  %v9345_v15 = vcombine.high %v1930_v22, %v1937_v41  ;;  %v1957_v47 = vrot.slane %v1943_v50, %v10689_v46  ;;  %6539 = vrot.lane.b32.xlu0 %v12638_v29, %s10014_s29  ;;  %v11476_v56 = vpop.permute.xlu1 %3697 }
 0x34e   : > { %3496 = vst.msk [vmem:[%s10804_s22 + $0x14] sm:$0xf] %vm3490_vm1, %v9641_v35  ;;  %3512 = vst.msk [vmem:[%s10804_s22 + $0x54] sm:$0xf] %vm3490_vm1, %v9657_v49  ;;  %v1958_v37 = vcombine.low %v11246_v14, %v1037_v20  ;;  %v1959_v48 = vcombine.high %v11246_v14, %v1037_v20  ;;  %v2969_v11 = vrot.slane %v2962_v44, %v10689_v46  ;;  %v12640_v14 = vld [vmem:[#allocation6_spill] sm:$0xff] }
 0x34f   : > { %3528 = vst.msk [vmem:[%s10804_s22 + $0x94] sm:$0xf] %vm3490_vm1, %v9673_v34  ;;  %3544 = vst.msk [vmem:[%s10804_s22 + $0xd4] sm:$0xf] %vm3490_vm1, %v9689_v25  ;;  %v2977_v40 = vrot.slane %v9344_v13, %v10689_v46  ;;  %v2985_v10 = vrot.slane %v2978_v58, %v10689_v46  ;;  %v2993_v50 = vrot.slane %v9345_v15, %v10689_v46  ;;  %6541 = vrot.lane.b32.xlu1 %v12639_v32, %s10014_s29  ;;  %v3792_v15 = vpop.permute.xlu0 %3791 }
 0x350   : > { %v1966_v16 = vrot.slane %v1958_v37, %v10689_v46  ;;  %v1973_v43 = vrot.slane %v1959_v48, %v10689_v46  ;;  %v3971_v39 = vcombine.low %v12640_v14, %v11442_v0  ;;  %v3972_v28 = vcombine.high %v12640_v14, %v11442_v0 }
 0x351   : > { %v2994_v27 = vcombine.low %v2969_v11, %v2977_v40  ;;  %v2995_v36 = vcombine.high %v2969_v11, %v2977_v40  ;;  %v3010_v21 = vcombine.low %v2985_v10, %v2993_v50  ;;  %v3011_v9 = vcombine.high %v2985_v10, %v2993_v50  ;;  %6587 = vrot.lane.b32.xlu0 %v12638_v29, %s10015_s30 }
 0x352   : > { %v1974_v62 = vcombine.low %v1950_v6, %v1966_v16  ;;  %v1975_v59 = vcombine.high %v1950_v6, %v1966_v16  ;;  %v1990_v55 = vcombine.low %v1957_v47, %v1973_v43  ;;  %v1991_v19 = vcombine.high %v1957_v47, %v1973_v43 }
 0x353   : > { %v3002_v1 = vrot.slane %v2994_v27, %v10703_v17  ;;  %v3009_v51 = vrot.slane %v2995_v36, %v10703_v17  ;;  %v3018_v22 = vrot.slane %v3010_v21, %v10703_v17  ;;  %v3025_v41 = vrot.slane %v3011_v9, %v10703_v17  ;;  %6589 = vrot.lane.b32.xlu1 %v12639_v32, %s10015_s30  ;;  %v3746_v27 = vpop.permute.xlu1 %3745 }
 0x354   : > { %v1982_v20 = vrot.slane %v1974_v62, %v10703_v17  ;;  %v1989_v35 = vrot.slane %v1975_v59, %v10703_v17  ;;  %v1998_v49 = vrot.slane %v1990_v55, %v10703_v17  ;;  %v2005_v34 = vrot.slane %v1991_v19, %v10703_v17 }
 0x355   : > { %v3026_v25 = vcombine.low %v3002_v1, %v3018_v22  ;;  %v3027_v44 = vcombine.high %v3002_v1, %v3018_v22  ;;  %v3028_v13 = vcombine.low %v3009_v51, %v3025_v41  ;;  %v3029_v58 = vcombine.high %v3009_v51, %v3025_v41  ;;  %6591 = vrot.lane.b32.xlu0 %v10544_v18, %s10015_s30  ;;  %v12641_v51 = vld [vmem:[#allocation7_spill] sm:$0xff] }
 0x356   : > { %v3030_v0 = vcombine.low %v1982_v20, %v1989_v35  ;;  %v9346_v6 = vcombine.high %v1982_v20, %v1989_v35  ;;  %v3046_v47 = vcombine.low %v1998_v49, %v2005_v34  ;;  %v9347_v37 = vcombine.high %v1998_v49, %v2005_v34 }
 0x357   : > { %v9648_v48 = vpack.c.bf16 %v3026_v25, %v3026_v25  ;;  %v9664_v11 = vpack.c.bf16 %v3027_v44, %v3027_v44  ;;  %v9680_v40 = vpack.c.bf16 %v3028_v13, %v3028_v13  ;;  %v9696_v10 = vpack.c.bf16 %v3029_v58, %v3029_v58  ;;  %6593 = vrot.lane.b32.xlu1 %v10550_v31, %s10015_s30 }
 0x358   : > { %v3037_v50 = vrot.slane %v3030_v0, %v10689_v46  ;;  %v3045_v16 = vrot.slane %v9346_v6, %v10689_v46  ;;  %v3053_v43 = vrot.slane %v3046_v47, %v10689_v46  ;;  %v3061_v14 = vrot.slane %v9347_v37, %v10689_v46 }
 0x359   : > { %3503 = vst.msk [vmem:[%s10804_s22 + $0x30] sm:$0xf] %vm3490_vm1, %v9648_v48  ;;  %3519 = vst.msk [vmem:[%s10804_s22 + $0x70] sm:$0xf] %vm3490_vm1, %v9664_v11  ;;  %v3979_v36 = vrot.slane %v3971_v39, %v10689_v46  ;;  %v3986_v21 = vrot.slane %v3972_v28, %v10689_v46  ;;  %v3987_v9 = vcombine.low %v11410_v30, %v3792_v15  ;;  %v11516_v28 = vpop.permute.xlu0 %6471 }
 0x35a   : > { %3535 = vst.msk [vmem:[%s10804_s22 + $0xb0] sm:$0xf] %vm3490_vm1, %v9680_v40  ;;  %3551 = vst.msk [vmem:[%s10804_s22 + $0xf0] sm:$0xf] %vm3490_vm1, %v9696_v10  ;;  %v3988_v62 = vcombine.high %v11410_v30, %v3792_v15  ;;  %v3062_v59 = vcombine.low %v3037_v50, %v3045_v16  ;;  %v3063_v55 = vcombine.high %v3037_v50, %v3045_v16  ;;  %v3794_v10 = vpop.permute.xlu1 %3793 }
 0x35b   : > { %v3078_v19 = vcombine.low %v3053_v43, %v3061_v14  ;;  %v3079_v1 = vcombine.high %v3053_v43, %v3061_v14  ;;  %v4039_v22 = vcombine.low %v12641_v51, %v3746_v27  ;;  %v4040_v41 = vcombine.high %v12641_v51, %v3746_v27 }
 0x35c   : > { %v3995_v20 = vrot.slane %v3987_v9, %v10689_v46  ;;  %v4002_v39 = vrot.slane %v3988_v62, %v10689_v46  ;;  %v3070_v35 = vrot.slane %v3062_v59, %v10703_v17  ;;  %v3077_v30 = vrot.slane %v3063_v55, %v10703_v17 }
 0x35d   : > { %v3086_v49 = vrot.slane %v3078_v19, %v10703_v17  ;;  %v3093_v34 = vrot.slane %v3079_v1, %v10703_v17  ;;  %v6520_v62 = vpop.permute.xlu0 %6519  ;;  %v4047_v59 = vrot.slane %v4039_v22, %v10689_v46  ;;  %v4054_v55 = vrot.slane %v4040_v41, %v10689_v46 }
 0x35e   : > { %v4003_v25 = vcombine.low %v3979_v36, %v3995_v20  ;;  %v4004_v44 = vcombine.high %v3979_v36, %v3995_v20  ;;  %v4019_v13 = vcombine.low %v3986_v21, %v4002_v39  ;;  %v4020_v58 = vcombine.high %v3986_v21, %v4002_v39 }
 0x35f   : > { %v3094_v15 = vcombine.low %v3070_v35, %v3086_v49  ;;  %v3095_v0 = vcombine.high %v3070_v35, %v3086_v49  ;;  %v3096_v6 = vcombine.low %v3077_v30, %v3093_v34  ;;  %v3097_v47 = vcombine.high %v3077_v30, %v3093_v34  ;;  %v12642_v34 = vld [vmem:[#allocation8_spill] sm:$0xff] }
 0x360   : > { %v4011_v37 = vrot.slane %v4003_v25, %v10703_v17  ;;  %v4018_v48 = vrot.slane %v4004_v44, %v10703_v17  ;;  %v4027_v11 = vrot.slane %v4019_v13, %v10703_v17  ;;  %v4034_v40 = vrot.slane %v4020_v58, %v10703_v17 }
 0x361   : > { %v9649_v50 = vpack.c.bf16 %v3094_v15, %v3094_v15  ;;  %v9665_v16 = vpack.c.bf16 %v3095_v0, %v3095_v0  ;;  %v9681_v43 = vpack.c.bf16 %v3096_v6, %v3096_v6  ;;  %v9697_v14 = vpack.c.bf16 %v3097_v47, %v3097_v47  ;;  %v11546_v47 = vpop.permute.xlu1 %6473 }
 0x362   : > { %v5059_v27 = vcombine.low %v4011_v37, %v4018_v48  ;;  %v9431_v36 = vcombine.high %v4011_v37, %v4018_v48  ;;  %v5075_v21 = vcombine.low %v4027_v11, %v4034_v40  ;;  %v9432_v9 = vcombine.high %v4027_v11, %v4034_v40 }
 0x363   : > { %3504 = vst.msk [vmem:[%s10804_s22 + $0x34] sm:$0xf] %vm3490_vm1, %v9649_v50  ;;  %3520 = vst.msk [vmem:[%s10804_s22 + $0x74] sm:$0xf] %vm3490_vm1, %v9665_v16  ;;  %v4055_v19 = vcombine.low %v11476_v56, %v3794_v10  ;;  %v4056_v1 = vcombine.high %v11476_v56, %v3794_v10  ;;  %v6747_v22 = vcombine.low %v12642_v34, %v6520_v62 }
 0x364   : > { %3536 = vst.msk [vmem:[%s10804_s22 + $0xb4] sm:$0xf] %vm3490_vm1, %v9681_v43  ;;  %3552 = vst.msk [vmem:[%s10804_s22 + $0xf4] sm:$0xf] %vm3490_vm1, %v9697_v14  ;;  %v5066_v51 = vrot.slane %v5059_v27, %v10689_v46  ;;  %v5074_v20 = vrot.slane %v9431_v36, %v10689_v46  ;;  %v5082_v39 = vrot.slane %v5075_v21, %v10689_v46 }
 0x365   : > { %v5090_v35 = vrot.slane %v9432_v9, %v10689_v46  ;;  %v4063_v30 = vrot.slane %v4055_v19, %v10689_v46  ;;  %v4070_v49 = vrot.slane %v4056_v1, %v10689_v46  ;;  %v6748_v41 = vcombine.high %v12642_v34, %v6520_v62  ;;  %v6568_v9 = vpop.permute.xlu0 %6567 }
 0x366   : > { %v5091_v25 = vcombine.low %v5066_v51, %v5074_v20  ;;  %v5092_v44 = vcombine.high %v5066_v51, %v5074_v20 }
 0x367   : > { %v5107_v13 = vcombine.low %v5082_v39, %v5090_v35  ;;  %v5108_v56 = vcombine.high %v5082_v39, %v5090_v35  ;;  %v4071_v58 = vcombine.low %v4047_v59, %v4063_v30  ;;  %v4072_v15 = vcombine.high %v4047_v59, %v4063_v30 }
 0x368   : > { %v4087_v0 = vcombine.low %v4054_v55, %v4070_v49  ;;  %v4088_v6 = vcombine.high %v4054_v55, %v4070_v49  ;;  %v5099_v37 = vrot.slane %v5091_v25, %v10703_v17  ;;  %v5106_v48 = vrot.slane %v5092_v44, %v10703_v17  ;;  %v6522_v25 = vpop.permute.xlu1 %6521 }
 0x369   : > { %v5115_v11 = vrot.slane %v5107_v13, %v10703_v17  ;;  %v5122_v40 = vrot.slane %v5108_v56, %v10703_v17  ;;  %v4079_v10 = vrot.slane %v4071_v58, %v10703_v17  ;;  %v4086_v50 = vrot.slane %v4072_v15, %v10703_v17 }
 0x36a   : > { %v4095_v16 = vrot.slane %v4087_v0, %v10703_v17  ;;  %v4102_v43 = vrot.slane %v4088_v6, %v10703_v17  ;;  %v6755_v44 = vrot.slane %v6747_v22, %v10689_v46  ;;  %v6762_v13 = vrot.slane %v6748_v41, %v10689_v46 }
 0x36b   : > { %v5123_v14 = vcombine.low %v5099_v37, %v5115_v11  ;;  %v5124_v27 = vcombine.high %v5099_v37, %v5115_v11  ;;  %v5125_v36 = vcombine.low %v5106_v48, %v5122_v40  ;;  %v5126_v21 = vcombine.high %v5106_v48, %v5122_v40  ;;  %v12643_v48 = vld [vmem:[#allocation9_spill] sm:$0xff] }
 0x36c   : > { %v5127_v62 = vcombine.low %v4079_v10, %v4086_v50  ;;  %v9433_v59 = vcombine.high %v4079_v10, %v4086_v50  ;;  %v5143_v55 = vcombine.low %v4095_v16, %v4102_v43  ;;  %v9434_v19 = vcombine.high %v4095_v16, %v4102_v43  ;;  %v11582_v16 = vpop.permute.xlu0 %3691 }
 0x36d   : > { %v9702_v1 = vpack.c.bf16 %v5123_v14, %v5123_v14  ;;  %v9718_v51 = vpack.c.bf16 %v5124_v27, %v5124_v27  ;;  %v9734_v20 = vpack.c.bf16 %v5125_v36, %v5125_v36  ;;  %v9750_v39 = vpack.c.bf16 %v5126_v21, %v5126_v21 }
 0x36e   : > { %v5134_v35 = vrot.slane %v5127_v62, %v10689_v46  ;;  %v5142_v30 = vrot.slane %v9433_v59, %v10689_v46  ;;  %v5150_v49 = vrot.slane %v5143_v55, %v10689_v46  ;;  %v5158_v34 = vrot.slane %v9434_v19, %v10689_v46 }
 0x36f   : > { %6269 = vst.msk [vmem:[%s11560_s25 + $0x8] sm:$0xf] %vm3490_vm1, %v9702_v1  ;;  %6285 = vst.msk [vmem:[%s11560_s25 + $0x48] sm:$0xf] %vm3490_vm1, %v9718_v51  ;;  %v6763_v56 = vcombine.low %v11516_v28, %v6568_v9  ;;  %v6764_v58 = vcombine.high %v11516_v28, %v6568_v9  ;;  %v6815_v11 = vcombine.low %v12643_v48, %v6522_v25 }
 0x370   : > { %6301 = vst.msk [vmem:[%s11560_s25 + $0x88] sm:$0xf] %vm3490_vm1, %v9734_v20  ;;  %6317 = vst.msk [vmem:[%s11560_s25 + $0xc8] sm:$0xf] %vm3490_vm1, %v9750_v39  ;;  %v5159_v15 = vcombine.low %v5134_v35, %v5142_v30  ;;  %v5160_v0 = vcombine.high %v5134_v35, %v5142_v30  ;;  %v5175_v6 = vcombine.low %v5150_v49, %v5158_v34  ;;  %v6570_v39 = vpop.permute.xlu1 %6569 }
 0x371   : > { %v5176_v37 = vcombine.high %v5150_v49, %v5158_v34  ;;  %v6816_v40 = vcombine.high %v12643_v48, %v6522_v25  ;;  %v6771_v10 = vrot.slane %v6763_v56, %v10689_v46  ;;  %v6778_v50 = vrot.slane %v6764_v58, %v10689_v46  ;;  %v3740_v58 = vpop.permute.xlu0 %3739 }
 0x372   : > { %v5167_v22 = vrot.slane %v5159_v15, %v10703_v17  ;;  %v5174_v41 = vrot.slane %v5160_v0, %v10703_v17  ;;  %v5183_v28 = vrot.slane %v5175_v6, %v10703_v17  ;;  %v6823_v15 = vrot.slane %v6815_v11, %v10689_v46 }
 0x373   : > { %v5190_v43 = vrot.slane %v5176_v37, %v10703_v17  ;;  %v6779_v14 = vcombine.low %v6755_v44, %v6771_v10  ;;  %v6780_v27 = vcombine.high %v6755_v44, %v6771_v10  ;;  %v6795_v36 = vcombine.low %v6762_v13, %v6778_v50 }
 0x374   : > { %v6796_v21 = vcombine.high %v6762_v13, %v6778_v50  ;;  %v5191_v9 = vcombine.low %v5167_v22, %v5183_v28  ;;  %v5192_v62 = vcombine.high %v5167_v22, %v5183_v28  ;;  %v6830_v0 = vrot.slane %v6816_v40, %v10689_v46 }
 0x375   : > { %v5193_v59 = vcombine.low %v5174_v41, %v5190_v43  ;;  %v5194_v55 = vcombine.high %v5174_v41, %v5190_v43  ;;  %v6787_v19 = vrot.slane %v6779_v14, %v10703_v17  ;;  %v6794_v1 = vrot.slane %v6780_v27, %v10703_v17  ;;  %v12644_v43 = vld [vmem:[#allocation10_spill] sm:$0xff] }
 0x376   : > { %v6803_v51 = vrot.slane %v6795_v36, %v10703_v17  ;;  %v6810_v20 = vrot.slane %v6796_v21, %v10703_v17  ;;  %v9703_v35 = vpack.c.bf16 %v5191_v9, %v5191_v9  ;;  %v9719_v30 = vpack.c.bf16 %v5192_v62, %v5192_v62 }
 0x377   : > { %v9735_v49 = vpack.c.bf16 %v5193_v59, %v5193_v59  ;;  %v9751_v34 = vpack.c.bf16 %v5194_v55, %v5194_v55  ;;  %v7835_v25 = vcombine.low %v6787_v19, %v6794_v1  ;;  %v9538_v44 = vcombine.high %v6787_v19, %v6794_v1  ;;  %v11612_v55 = vpop.permute.xlu1 %3693 }
 0x378   : > { %v7851_v13 = vcombine.low %v6803_v51, %v6810_v20  ;;  %v9539_v56 = vcombine.high %v6803_v51, %v6810_v20  ;;  %6270 = vst.msk [vmem:[%s11560_s25 + $0xc] sm:$0xf] %vm3490_vm1, %v9703_v35  ;;  %6286 = vst.msk [vmem:[%s11560_s25 + $0x4c] sm:$0xf] %vm3490_vm1, %v9719_v30  ;;  %v6831_v6 = vcombine.low %v11546_v47, %v6570_v39 }
 0x379   : > { %6302 = vst.msk [vmem:[%s11560_s25 + $0x8c] sm:$0xf] %vm3490_vm1, %v9735_v49  ;;  %6318 = vst.msk [vmem:[%s11560_s25 + $0xcc] sm:$0xf] %vm3490_vm1, %v9751_v34  ;;  %v6832_v37 = vcombine.high %v11546_v47, %v6570_v39  ;;  %v7842_v48 = vrot.slane %v7835_v25, %v10689_v46  ;;  %v7850_v10 = vrot.slane %v9538_v44, %v10689_v46 }
 0x37a   : > { %v7858_v50 = vrot.slane %v7851_v13, %v10689_v46  ;;  %v7866_v22 = vrot.slane %v9539_v56, %v10689_v46  ;;  %v6839_v41 = vrot.slane %v6831_v6, %v10689_v46  ;;  %v3835_v11 = vcombine.low %v12644_v43, %v3740_v58  ;;  %v3788_v56 = vpop.permute.xlu0 %3787 }
 0x37b   : > { %v6846_v28 = vrot.slane %v6832_v37, %v10689_v46  ;;  %v3836_v40 = vcombine.high %v12644_v43, %v3740_v58  ;;  %v7867_v14 = vcombine.low %v7842_v48, %v7850_v10  ;;  %v7868_v27 = vcombine.high %v7842_v48, %v7850_v10 }
 0x37c   : > { %v7883_v36 = vcombine.low %v7858_v50, %v7866_v22  ;;  %v7884_v47 = vcombine.high %v7858_v50, %v7866_v22  ;;  %v6847_v21 = vcombine.low %v6823_v15, %v6839_v41  ;;  %v6848_v9 = vcombine.high %v6823_v15, %v6839_v41 }
 0x37d   : > { %v6863_v62 = vcombine.low %v6830_v0, %v6846_v28  ;;  %v6864_v59 = vcombine.high %v6830_v0, %v6846_v28  ;;  %v7875_v19 = vrot.slane %v7867_v14, %v10703_v17  ;;  %v7882_v1 = vrot.slane %v7868_v27, %v10703_v17  ;;  %v3742_v14 = vpop.permute.xlu1 %3741 }
 0x37e   : > { %v7891_v51 = vrot.slane %v7883_v36, %v10703_v17  ;;  %v7898_v20 = vrot.slane %v7884_v47, %v10703_v17  ;;  %v6855_v39 = vrot.slane %v6847_v21, %v10703_v17  ;;  %v6862_v35 = vrot.slane %v6848_v9, %v10703_v17 }
 0x37f   : > { %v6871_v30 = vrot.slane %v6863_v62, %v10703_v17  ;;  %v6878_v49 = vrot.slane %v6864_v59, %v10703_v17  ;;  %v3843_v27 = vrot.slane %v3835_v11, %v10689_v46  ;;  %v3850_v36 = vrot.slane %v3836_v40, %v10689_v46 }
 0x380   : > { %v7899_v34 = vcombine.low %v7875_v19, %v7891_v51  ;;  %v7900_v25 = vcombine.high %v7875_v19, %v7891_v51  ;;  %v7901_v44 = vcombine.low %v7882_v1, %v7898_v20  ;;  %v7902_v13 = vcombine.high %v7882_v1, %v7898_v20  ;;  %v12645_v1 = vld [vmem:[#allocation11_spill] sm:$0xff] }
 0x381   : > { %v7903_v58 = vcombine.low %v6855_v39, %v6862_v35  ;;  %v9540_v15 = vcombine.high %v6855_v39, %v6862_v35  ;;  %v7919_v0 = vcombine.low %v6871_v30, %v6878_v49  ;;  %v9541_v6 = vcombine.high %v6871_v30, %v6878_v49  ;;  %v11648_v30 = vpop.permute.xlu0 %6467 }
 0x382   : > { %v9766_v37 = vpack.c.bf16 %v7899_v34, %v7899_v34  ;;  %v9782_v48 = vpack.c.bf16 %v7900_v25, %v7900_v25  ;;  %v9798_v10 = vpack.c.bf16 %v7901_v44, %v7901_v44  ;;  %v9814_v50 = vpack.c.bf16 %v7902_v13, %v7902_v13 }
 0x383   : > { %v7910_v22 = vrot.slane %v7903_v58, %v10689_v46  ;;  %v7918_v41 = vrot.slane %v9540_v15, %v10689_v46  ;;  %v7926_v28 = vrot.slane %v7919_v0, %v10689_v46  ;;  %v7934_v43 = vrot.slane %v9541_v6, %v10689_v46 }
 0x384   : > { %9045 = vst.msk [vmem:[%s11626_s28 + $0x8] sm:$0xf] %vm3490_vm1, %v9766_v37  ;;  %9061 = vst.msk [vmem:[%s11626_s28 + $0x48] sm:$0xf] %vm3490_vm1, %v9782_v48  ;;  %v3851_v47 = vcombine.low %v11582_v16, %v3788_v56  ;;  %v3852_v21 = vcombine.high %v11582_v16, %v3788_v56  ;;  %v3903_v51 = vcombine.low %v12645_v1, %v3742_v14 }
 0x385   : > { %9077 = vst.msk [vmem:[%s11626_s28 + $0x88] sm:$0xf] %vm3490_vm1, %v9798_v10  ;;  %9093 = vst.msk [vmem:[%s11626_s28 + $0xc8] sm:$0xf] %vm3490_vm1, %v9814_v50  ;;  %v7935_v9 = vcombine.low %v7910_v22, %v7918_v41  ;;  %v7936_v62 = vcombine.high %v7910_v22, %v7918_v41  ;;  %v7951_v59 = vcombine.low %v7926_v28, %v7934_v43  ;;  %v3790_v50 = vpop.permute.xlu1 %3789 }
 0x386   : > { %v7952_v19 = vcombine.high %v7926_v28, %v7934_v43  ;;  %v3904_v20 = vcombine.high %v12645_v1, %v3742_v14  ;;  %v3859_v39 = vrot.slane %v3851_v47, %v10689_v46  ;;  %v3866_v35 = vrot.slane %v3852_v21, %v10689_v46  ;;  %v6516_v21 = vpop.permute.xlu0 %6515 }
 0x387   : > { %v7943_v11 = vrot.slane %v7935_v9, %v10703_v17  ;;  %v7950_v40 = vrot.slane %v7936_v62, %v10703_v17  ;;  %v7959_v16 = vrot.slane %v7951_v59, %v10703_v17  ;;  %v3911_v9 = vrot.slane %v3903_v51, %v10689_v46 }
 0x388   : > { %v7966_v49 = vrot.slane %v7952_v19, %v10703_v17  ;;  %v3867_v34 = vcombine.low %v3843_v27, %v3859_v39  ;;  %v3868_v25 = vcombine.high %v3843_v27, %v3859_v39  ;;  %v3883_v44 = vcombine.low %v3850_v36, %v3866_v35 }
 0x389   : > { %v3884_v13 = vcombine.high %v3850_v36, %v3866_v35  ;;  %v7967_v56 = vcombine.low %v7943_v11, %v7959_v16  ;;  %v7968_v58 = vcombine.high %v7943_v11, %v7959_v16  ;;  %v3918_v62 = vrot.slane %v3904_v20, %v10689_v46 }
 0x38a   : > { %v7969_v15 = vcombine.low %v7950_v40, %v7966_v49  ;;  %v7970_v0 = vcombine.high %v7950_v40, %v7966_v49  ;;  %v3875_v6 = vrot.slane %v3867_v34, %v10703_v17  ;;  %v3882_v37 = vrot.slane %v3868_v25, %v10703_v17  ;;  %v12646_v49 = vld [vmem:[#allocation12_spill] sm:$0xff] }
 0x38b   : > { %v3891_v48 = vrot.slane %v3883_v44, %v10703_v17  ;;  %v3898_v10 = vrot.slane %v3884_v13, %v10703_v17  ;;  %v9767_v22 = vpack.c.bf16 %v7967_v56, %v7967_v56  ;;  %v9783_v41 = vpack.c.bf16 %v7968_v58, %v7968_v58 }
 0x38c   : > { %v9799_v28 = vpack.c.bf16 %v7969_v15, %v7969_v15  ;;  %v9815_v43 = vpack.c.bf16 %v7970_v0, %v7970_v0  ;;  %v4923_v14 = vcombine.low %v3875_v6, %v3882_v37  ;;  %v9427_v27 = vcombine.high %v3875_v6, %v3882_v37  ;;  %v11678_v0 = vpop.permute.xlu1 %6469 }
 0x38d   : > { %v4939_v36 = vcombine.low %v3891_v48, %v3898_v10  ;;  %v9428_v47 = vcombine.high %v3891_v48, %v3898_v10  ;;  %9046 = vst.msk [vmem:[%s11626_s28 + $0xc] sm:$0xf] %vm3490_vm1, %v9767_v22  ;;  %9062 = vst.msk [vmem:[%s11626_s28 + $0x4c] sm:$0xf] %vm3490_vm1, %v9783_v41  ;;  %v3919_v59 = vcombine.low %v11612_v55, %v3790_v50 }
 0x38e   : > { %9078 = vst.msk [vmem:[%s11626_s28 + $0x8c] sm:$0xf] %vm3490_vm1, %v9799_v28  ;;  %9094 = vst.msk [vmem:[%s11626_s28 + $0xcc] sm:$0xf] %vm3490_vm1, %v9815_v43  ;;  %v3920_v19 = vcombine.high %v11612_v55, %v3790_v50  ;;  %v4930_v1 = vrot.slane %v4923_v14, %v10689_v46  ;;  %v4938_v39 = vrot.slane %v9427_v27, %v10689_v46 }
 0x38f   : > { %v4946_v35 = vrot.slane %v4939_v36, %v10689_v46  ;;  %v4954_v11 = vrot.slane %v9428_v47, %v10689_v46  ;;  %v3927_v40 = vrot.slane %v3919_v59, %v10689_v46  ;;  %v6611_v51 = vcombine.low %v12646_v49, %v6516_v21  ;;  %v6564_v47 = vpop.permute.xlu0 %6563 }
 0x390   : > { %v3934_v16 = vrot.slane %v3920_v19, %v10689_v46  ;;  %v6612_v20 = vcombine.high %v12646_v49, %v6516_v21  ;;  %v4955_v34 = vcombine.low %v4930_v1, %v4938_v39  ;;  %v4956_v25 = vcombine.high %v4930_v1, %v4938_v39 }
 0x391   : > { %v4971_v44 = vcombine.low %v4946_v35, %v4954_v11  ;;  %v4972_v55 = vcombine.high %v4946_v35, %v4954_v11  ;;  %v3935_v13 = vcombine.low %v3911_v9, %v3927_v40  ;;  %v3936_v56 = vcombine.high %v3911_v9, %v3927_v40 }
 0x392   : > { %v3951_v58 = vcombine.low %v3918_v62, %v3934_v16  ;;  %v3952_v15 = vcombine.high %v3918_v62, %v3934_v16  ;;  %v4963_v6 = vrot.slane %v4955_v34, %v10703_v17  ;;  %v4970_v37 = vrot.slane %v4956_v25, %v10703_v17  ;;  %v6518_v34 = vpop.permute.xlu1 %6517 }
 0x393   : > { %v4979_v48 = vrot.slane %v4971_v44, %v10703_v17  ;;  %v4986_v10 = vrot.slane %v4972_v55, %v10703_v17  ;;  %v3943_v50 = vrot.slane %v3935_v13, %v10703_v17  ;;  %v3950_v22 = vrot.slane %v3936_v56, %v10703_v17 }
 0x394   : > { %v3959_v41 = vrot.slane %v3951_v58, %v10703_v17  ;;  %v3966_v28 = vrot.slane %v3952_v15, %v10703_v17  ;;  %v6619_v25 = vrot.slane %v6611_v51, %v10689_v46  ;;  %v6626_v44 = vrot.slane %v6612_v20, %v10689_v46 }
 0x395   : > { %v4987_v43 = vcombine.low %v4963_v6, %v4979_v48  ;;  %v4988_v14 = vcombine.high %v4963_v6, %v4979_v48  ;;  %v4989_v27 = vcombine.low %v4970_v37, %v4986_v10  ;;  %v4990_v36 = vcombine.high %v4970_v37, %v4986_v10 }
 0x396   : > { %v4991_v21 = vcombine.low %v3943_v50, %v3950_v22  ;;  %v9429_v9 = vcombine.high %v3943_v50, %v3950_v22  ;;  %v5007_v62 = vcombine.low %v3959_v41, %v3966_v28  ;;  %v9430_v59 = vcombine.high %v3959_v41, %v3966_v28  ;;  %v11708_v22 = vpop.permute.xlu0 %3703 }
 0x397   : > { %v9700_v19 = vpack.c.bf16 %v4987_v43, %v4987_v43  ;;  %v9716_v1 = vpack.c.bf16 %v4988_v14, %v4988_v14  ;;  %v9732_v39 = vpack.c.bf16 %v4989_v27, %v4989_v27  ;;  %v9748_v35 = vpack.c.bf16 %v4990_v36, %v4990_v36 }
 0x398   : > { %v4998_v11 = vrot.slane %v4991_v21, %v10689_v46  ;;  %v5006_v40 = vrot.slane %v9429_v9, %v10689_v46  ;;  %v5014_v16 = vrot.slane %v5007_v62, %v10689_v46  ;;  %v5022_v49 = vrot.slane %v9430_v59, %v10689_v46 }
 0x399   : > { %6267 = vst.msk [vmem:[%s11560_s25] sm:$0xf] %vm3490_vm1, %v9700_v19  ;;  %6283 = vst.msk [vmem:[%s11560_s25 + $0x40] sm:$0xf] %vm3490_vm1, %v9716_v1  ;;  %v6627_v55 = vcombine.low %v11648_v30, %v6564_v47  ;;  %v6628_v13 = vcombine.high %v11648_v30, %v6564_v47  ;;  %v6679_v37 = vcombine.low %v10707_v38, %v6518_v34  ;;  %v6566_v1 = vpop.permute.xlu1 %6565 }
 0x39a   : > { %6299 = vst.msk [vmem:[%s11560_s25 + $0x80] sm:$0xf] %vm3490_vm1, %v9732_v39  ;;  %6315 = vst.msk [vmem:[%s11560_s25 + $0xc0] sm:$0xf] %vm3490_vm1, %v9748_v35  ;;  %v5023_v56 = vcombine.low %v4998_v11, %v5006_v40  ;;  %v5024_v58 = vcombine.high %v4998_v11, %v5006_v40  ;;  %v5039_v15 = vcombine.low %v5014_v16, %v5022_v49 }
 0x39b   : > { %v5040_v6 = vcombine.high %v5014_v16, %v5022_v49  ;;  %v6680_v48 = vcombine.high %v10707_v38, %v6518_v34  ;;  %v6635_v10 = vrot.slane %v6627_v55, %v10689_v46  ;;  %v6642_v50 = vrot.slane %v6628_v13, %v10689_v46 }
 0x39c   : > { %v5031_v51 = vrot.slane %v5023_v56, %v10703_v17  ;;  %v5038_v20 = vrot.slane %v5024_v58, %v10703_v17  ;;  %v5047_v30 = vrot.slane %v5039_v15, %v10703_v17  ;;  %v6687_v55 = vrot.slane %v6679_v37, %v10689_v46 }
 0x39d   : > { %v5054_v41 = vrot.slane %v5040_v6, %v10703_v17  ;;  %v6643_v28 = vcombine.low %v6619_v25, %v6635_v10  ;;  %v6644_v43 = vcombine.high %v6619_v25, %v6635_v10  ;;  %v6659_v14 = vcombine.low %v6626_v44, %v6642_v50 }
 0x39e   : > { %v6660_v27 = vcombine.high %v6626_v44, %v6642_v50  ;;  %v5055_v36 = vcombine.low %v5031_v51, %v5047_v30  ;;  %v5056_v38 = vcombine.high %v5031_v51, %v5047_v30  ;;  %v3752_v44 = vpop.permute.xlu0 %3751  ;;  %v6694_v13 = vrot.slane %v6680_v48, %v10689_v46 }
 0x39f   : > { %v5057_v47 = vcombine.low %v5038_v20, %v5054_v41  ;;  %v5058_v21 = vcombine.high %v5038_v20, %v5054_v41  ;;  %v6651_v9 = vrot.slane %v6643_v28, %v10703_v17  ;;  %v6658_v62 = vrot.slane %v6644_v43, %v10703_v17 }
 0x3a0   : > { %v6667_v59 = vrot.slane %v6659_v14, %v10703_v17  ;;  %v6674_v19 = vrot.slane %v6660_v27, %v10703_v17  ;;  %v9701_v39 = vpack.c.bf16 %v5055_v36, %v5055_v36  ;;  %v9717_v35 = vpack.c.bf16 %v5056_v38, %v5056_v38  ;;  %v11738_v38 = vpop.permute.xlu1 %3705 }
 0x3a1   : > { %v9733_v11 = vpack.c.bf16 %v5057_v47, %v5057_v47  ;;  %v9749_v40 = vpack.c.bf16 %v5058_v21, %v5058_v21  ;;  %v7699_v16 = vcombine.low %v6651_v9, %v6658_v62  ;;  %v9534_v49 = vcombine.high %v6651_v9, %v6658_v62 }
 0x3a2   : > { %v7715_v34 = vcombine.low %v6667_v59, %v6674_v19  ;;  %v9535_v25 = vcombine.high %v6667_v59, %v6674_v19  ;;  %6268 = vst.msk [vmem:[%s11560_s25 + $0x4] sm:$0xf] %vm3490_vm1, %v9701_v39  ;;  %6284 = vst.msk [vmem:[%s11560_s25 + $0x44] sm:$0xf] %vm3490_vm1, %v9717_v35  ;;  %v6695_v56 = vcombine.low %v11678_v0, %v6566_v1 }
 0x3a3   : > { %6300 = vst.msk [vmem:[%s11560_s25 + $0x84] sm:$0xf] %vm3490_vm1, %v9733_v11  ;;  %6316 = vst.msk [vmem:[%s11560_s25 + $0xc4] sm:$0xf] %vm3490_vm1, %v9749_v40  ;;  %v6696_v58 = vcombine.high %v11678_v0, %v6566_v1  ;;  %v7706_v15 = vrot.slane %v7699_v16, %v10689_v46  ;;  %v7714_v6 = vrot.slane %v9534_v49, %v10689_v46  ;;  %v3800_v16 = vpop.permute.xlu0 %3799 }
 0x3a4   : > { %v7722_v10 = vrot.slane %v7715_v34, %v10689_v46  ;;  %v7730_v50 = vrot.slane %v9535_v25, %v10689_v46  ;;  %v6703_v51 = vrot.slane %v6695_v56, %v10689_v46  ;;  %v4243_v37 = vcombine.low %v10723_v2, %v3752_v44 }
 0x3a5   : > { %v6710_v20 = vrot.slane %v6696_v58, %v10689_v46  ;;  %v4244_v48 = vcombine.high %v10723_v2, %v3752_v44  ;;  %v7731_v30 = vcombine.low %v7706_v15, %v7714_v6  ;;  %v7732_v41 = vcombine.high %v7706_v15, %v7714_v6 }
 0x3a6   : > { %v7747_v28 = vcombine.low %v7722_v10, %v7730_v50  ;;  %v7748_v0 = vcombine.high %v7722_v10, %v7730_v50  ;;  %v6711_v43 = vcombine.low %v6687_v55, %v6703_v51  ;;  %v6712_v14 = vcombine.high %v6687_v55, %v6703_v51  ;;  %v3754_v51 = vpop.permute.xlu1 %3753 }
 0x3a7   : > { %v6727_v27 = vcombine.low %v6694_v13, %v6710_v20  ;;  %v6728_v36 = vcombine.high %v6694_v13, %v6710_v20  ;;  %v7739_v47 = vrot.slane %v7731_v30, %v10703_v17  ;;  %v7746_v21 = vrot.slane %v7732_v41, %v10703_v17 }
 0x3a8   : > { %v7755_v9 = vrot.slane %v7747_v28, %v10703_v17  ;;  %v7762_v62 = vrot.slane %v7748_v0, %v10703_v17  ;;  %v6719_v2 = vrot.slane %v6711_v43, %v10703_v17  ;;  %v6726_v59 = vrot.slane %v6712_v14, %v10703_v17 }
 0x3a9   : > { %v6735_v19 = vrot.slane %v6727_v27, %v10703_v17  ;;  %v6742_v1 = vrot.slane %v6728_v36, %v10703_v17  ;;  %v4251_v20 = vrot.slane %v4243_v37, %v10689_v46  ;;  %v4258_v30 = vrot.slane %v4244_v48, %v10689_v46 }
 0x3aa   : > { %v7763_v39 = vcombine.low %v7739_v47, %v7755_v9  ;;  %v7764_v35 = vcombine.high %v7739_v47, %v7755_v9  ;;  %v7765_v11 = vcombine.low %v7746_v21, %v7762_v62  ;;  %v7766_v40 = vcombine.high %v7746_v21, %v7762_v62  ;;  %v11768_v62 = vpop.permute.xlu0 %6479 }
 0x3ab   : > { %v7767_v49 = vcombine.low %v6719_v2, %v6726_v59  ;;  %v9536_v34 = vcombine.high %v6719_v2, %v6726_v59  ;;  %v7783_v25 = vcombine.low %v6735_v19, %v6742_v1  ;;  %v9537_v44 = vcombine.high %v6735_v19, %v6742_v1 }
 0x3ac   : > { %v9764_v55 = vpack.c.bf16 %v7763_v39, %v7763_v39  ;;  %v9780_v13 = vpack.c.bf16 %v7764_v35, %v7764_v35  ;;  %v9796_v56 = vpack.c.bf16 %v7765_v11, %v7765_v11  ;;  %v9812_v58 = vpack.c.bf16 %v7766_v40, %v7766_v40 }
 0x3ad   : > { %v7774_v15 = vrot.slane %v7767_v49, %v10689_v46  ;;  %v7782_v6 = vrot.slane %v9536_v34, %v10689_v46  ;;  %v7790_v10 = vrot.slane %v7783_v25, %v10689_v46  ;;  %v7798_v50 = vrot.slane %v9537_v44, %v10689_v46  ;;  %v3802_v44 = vpop.permute.xlu1 %3801 }
 0x3ae   : > { %9043 = vst.msk [vmem:[%s11626_s28] sm:$0xf] %vm3490_vm1, %v9764_v55  ;;  %9059 = vst.msk [vmem:[%s11626_s28 + $0x40] sm:$0xf] %vm3490_vm1, %v9780_v13  ;;  %v4259_v41 = vcombine.low %v11708_v22, %v3800_v16  ;;  %v4260_v28 = vcombine.high %v11708_v22, %v3800_v16  ;;  %v4311_v36 = vcombine.low %v10727_v52, %v3754_v51 }
 0x3af   : > { %9075 = vst.msk [vmem:[%s11626_s28 + $0x80] sm:$0xf] %vm3490_vm1, %v9796_v56  ;;  %9091 = vst.msk [vmem:[%s11626_s28 + $0xc0] sm:$0xf] %vm3490_vm1, %v9812_v58  ;;  %v7799_v0 = vcombine.low %v7774_v15, %v7782_v6  ;;  %v7800_v43 = vcombine.high %v7774_v15, %v7782_v6  ;;  %v7815_v14 = vcombine.low %v7790_v10, %v7798_v50 }
 0x3b0   : > { %v7816_v27 = vcombine.high %v7790_v10, %v7798_v50  ;;  %v4312_v47 = vcombine.high %v10727_v52, %v3754_v51  ;;  %v4267_v21 = vrot.slane %v4259_v41, %v10689_v46  ;;  %v4274_v9 = vrot.slane %v4260_v28, %v10689_v46  ;;  %v6528_v51 = vpop.permute.xlu0 %6527 }
 0x3b1   : > { %v7807_v37 = vrot.slane %v7799_v0, %v10703_v17  ;;  %v7814_v48 = vrot.slane %v7800_v43, %v10703_v17  ;;  %v7823_v22 = vrot.slane %v7815_v14, %v10703_v17  ;;  %v4327_v41 = vcombine.low %v11738_v38, %v3802_v44 }
 0x3b2   : > { %v7830_v2 = vrot.slane %v7816_v27, %v10703_v17  ;;  %v4275_v59 = vcombine.low %v4251_v20, %v4267_v21  ;;  %v4276_v19 = vcombine.high %v4251_v20, %v4267_v21  ;;  %v4291_v1 = vcombine.low %v4258_v30, %v4274_v9 }
 0x3b3   : > { %v4292_v39 = vcombine.high %v4258_v30, %v4274_v9  ;;  %v7831_v35 = vcombine.low %v7807_v37, %v7823_v22  ;;  %v7832_v52 = vcombine.high %v7807_v37, %v7823_v22  ;;  %v4319_v20 = vrot.slane %v4311_v36, %v10689_v46 }
 0x3b4   : > { %v7833_v11 = vcombine.low %v7814_v48, %v7830_v2  ;;  %v7834_v40 = vcombine.high %v7814_v48, %v7830_v2  ;;  %v4283_v16 = vrot.slane %v4275_v59, %v10703_v17  ;;  %v4290_v49 = vrot.slane %v4276_v19, %v10703_v17 }
 0x3b5   : > { %v4299_v34 = vrot.slane %v4291_v1, %v10703_v17  ;;  %v4306_v25 = vrot.slane %v4292_v39, %v10703_v17  ;;  %v9765_v55 = vpack.c.bf16 %v7831_v35, %v7831_v35  ;;  %v9781_v13 = vpack.c.bf16 %v7832_v52, %v7832_v52  ;;  %v11798_v39 = vpop.permute.xlu1 %6481 }
 0x3b6   : > { %v9797_v56 = vpack.c.bf16 %v7833_v11, %v7833_v11  ;;  %v9813_v58 = vpack.c.bf16 %v7834_v40, %v7834_v40  ;;  %v5331_v15 = vcombine.low %v4283_v16, %v4290_v49  ;;  %v9439_v6 = vcombine.high %v4283_v16, %v4290_v49 }
 0x3b7   : > { %v5347_v10 = vcombine.low %v4299_v34, %v4306_v25  ;;  %v9440_v50 = vcombine.high %v4299_v34, %v4306_v25  ;;  %9044 = vst.msk [vmem:[%s11626_s28 + $0x4] sm:$0xf] %vm3490_vm1, %v9765_v55  ;;  %9060 = vst.msk [vmem:[%s11626_s28 + $0x44] sm:$0xf] %vm3490_vm1, %v9781_v13  ;;  %v4326_v30 = vrot.slane %v4312_v47, %v10689_v46 }
 0x3b8   : > { %9076 = vst.msk [vmem:[%s11626_s28 + $0x84] sm:$0xf] %vm3490_vm1, %v9797_v56  ;;  %9092 = vst.msk [vmem:[%s11626_s28 + $0xc4] sm:$0xf] %vm3490_vm1, %v9813_v58  ;;  %v4328_v28 = vcombine.high %v11738_v38, %v3802_v44  ;;  %v5338_v0 = vrot.slane %v5331_v15, %v10689_v46  ;;  %v5346_v43 = vrot.slane %v9439_v6, %v10689_v46  ;;  %v6576_v56 = vpop.permute.xlu0 %6575 }
 0x3b9   : > { %v5354_v14 = vrot.slane %v5347_v10, %v10689_v46  ;;  %v5362_v27 = vrot.slane %v9440_v50, %v10689_v46  ;;  %v4335_v21 = vrot.slane %v4327_v41, %v10689_v46  ;;  %v7019_v36 = vcombine.low %v10711_v24, %v6528_v51 }
 0x3ba   : > { %v4342_v9 = vrot.slane %v4328_v28, %v10689_v46  ;;  %v7020_v47 = vcombine.high %v10711_v24, %v6528_v51  ;;  %v5363_v37 = vcombine.low %v5338_v0, %v5346_v43  ;;  %v5364_v48 = vcombine.high %v5338_v0, %v5346_v43 }
 0x3bb   : > { %v5379_v22 = vcombine.low %v5354_v14, %v5362_v27  ;;  %v5380_v38 = vcombine.high %v5354_v14, %v5362_v27  ;;  %v4343_v2 = vcombine.low %v4319_v20, %v4335_v21  ;;  %v4344_v59 = vcombine.high %v4319_v20, %v4335_v21  ;;  %v6530_v14 = vpop.permute.xlu1 %6529 }
 0x3bc   : > { %v4359_v19 = vcombine.low %v4326_v30, %v4342_v9  ;;  %v4360_v1 = vcombine.high %v4326_v30, %v4342_v9  ;;  %v5371_v35 = vrot.slane %v5363_v37, %v10703_v17  ;;  %v5378_v52 = vrot.slane %v5364_v48, %v10703_v17 }
 0x3bd   : > { %v5387_v11 = vrot.slane %v5379_v22, %v10703_v17  ;;  %v5394_v40 = vrot.slane %v5380_v38, %v10703_v17  ;;  %v4351_v24 = vrot.slane %v4343_v2, %v10703_v17  ;;  %v4358_v16 = vrot.slane %v4344_v59, %v10703_v17 }
 0x3be   : > { %v4367_v49 = vrot.slane %v4359_v19, %v10703_v17  ;;  %v4374_v34 = vrot.slane %v4360_v1, %v10703_v17  ;;  %v7027_v27 = vrot.slane %v7019_v36, %v10689_v46  ;;  %v7034_v21 = vrot.slane %v7020_v47, %v10689_v46 }
 0x3bf   : > { %v5395_v25 = vcombine.low %v5371_v35, %v5387_v11  ;;  %v5396_v44 = vcombine.high %v5371_v35, %v5387_v11  ;;  %v5397_v55 = vcombine.low %v5378_v52, %v5394_v40  ;;  %v5398_v13 = vcombine.high %v5378_v52, %v5394_v40  ;;  %v11828_v52 = vpop.permute.xlu0 %3699 }
 0x3c0   : > { %v5399_v58 = vcombine.low %v4351_v24, %v4358_v16  ;;  %v9441_v15 = vcombine.high %v4351_v24, %v4358_v16  ;;  %v5415_v6 = vcombine.low %v4367_v49, %v4374_v34  ;;  %v9442_v10 = vcombine.high %v4367_v49, %v4374_v34 }
 0x3c1   : > { %v9706_v50 = vpack.c.bf16 %v5395_v25, %v5395_v25  ;;  %v9722_v51 = vpack.c.bf16 %v5396_v44, %v5396_v44  ;;  %v9738_v20 = vpack.c.bf16 %v5397_v55, %v5397_v55  ;;  %v9754_v30 = vpack.c.bf16 %v5398_v13, %v5398_v13 }
 0x3c2   : > { %v5406_v41 = vrot.slane %v5399_v58, %v10689_v46  ;;  %v5414_v28 = vrot.slane %v9441_v15, %v10689_v46  ;;  %v5422_v0 = vrot.slane %v5415_v6, %v10689_v46  ;;  %v5430_v43 = vrot.slane %v9442_v10, %v10689_v46  ;;  %v6578_v15 = vpop.permute.xlu1 %6577 }
 0x3c3   : > { %6273 = vst.msk [vmem:[%s11560_s25 + $0x18] sm:$0xf] %vm3490_vm1, %v9706_v50  ;;  %6289 = vst.msk [vmem:[%s11560_s25 + $0x58] sm:$0xf] %vm3490_vm1, %v9722_v51  ;;  %v7035_v9 = vcombine.low %v11768_v62, %v6576_v56  ;;  %v7036_v37 = vcombine.high %v11768_v62, %v6576_v56  ;;  %v7087_v59 = vcombine.low %v10719_v54, %v6530_v14 }
 0x3c4   : > { %6305 = vst.msk [vmem:[%s11560_s25 + $0x98] sm:$0xf] %vm3490_vm1, %v9738_v20  ;;  %6321 = vst.msk [vmem:[%s11560_s25 + $0xd8] sm:$0xf] %vm3490_vm1, %v9754_v30  ;;  %v5431_v48 = vcombine.low %v5406_v41, %v5414_v28  ;;  %v5432_v22 = vcombine.high %v5406_v41, %v5414_v28  ;;  %v5447_v38 = vcombine.low %v5422_v0, %v5430_v43 }
 0x3c5   : > { %v5448_v2 = vcombine.high %v5422_v0, %v5430_v43  ;;  %v7088_v19 = vcombine.high %v10719_v54, %v6530_v14  ;;  %v7043_v1 = vrot.slane %v7035_v9, %v10689_v46  ;;  %v7050_v35 = vrot.slane %v7036_v37, %v10689_v46  ;;  %v3748_v0 = vpop.permute.xlu0 %3747 }
 0x3c6   : > { %v5439_v36 = vrot.slane %v5431_v48, %v10703_v17  ;;  %v5446_v47 = vrot.slane %v5432_v22, %v10703_v17  ;;  %v5455_v62 = vrot.slane %v5447_v38, %v10703_v17  ;;  %v7095_v43 = vrot.slane %v7087_v59, %v10689_v46 }
 0x3c7   : > { %v5462_v11 = vrot.slane %v5448_v2, %v10703_v17  ;;  %v7051_v40 = vcombine.low %v7027_v27, %v7043_v1  ;;  %v7052_v24 = vcombine.high %v7027_v27, %v7043_v1  ;;  %v7067_v16 = vcombine.low %v7034_v21, %v7050_v35 }
 0x3c8   : > { %v7068_v49 = vcombine.high %v7034_v21, %v7050_v35  ;;  %v5463_v34 = vcombine.low %v5439_v36, %v5455_v62  ;;  %v5464_v54 = vcombine.high %v5439_v36, %v5455_v62  ;;  %v7102_v14 = vrot.slane %v7088_v19, %v10689_v46 }
 0x3c9   : > { %v5465_v25 = vcombine.low %v5446_v47, %v5462_v11  ;;  %v5466_v44 = vcombine.high %v5446_v47, %v5462_v11  ;;  %v7059_v55 = vrot.slane %v7051_v40, %v10703_v17  ;;  %v7066_v13 = vrot.slane %v7052_v24, %v10703_v17  ;;  %v11858_v24 = vpop.permute.xlu1 %3701 }
 0x3ca   : > { %v7075_v56 = vrot.slane %v7067_v16, %v10703_v17  ;;  %v7082_v58 = vrot.slane %v7068_v49, %v10703_v17  ;;  %v9707_v6 = vpack.c.bf16 %v5463_v34, %v5463_v34  ;;  %v9723_v10 = vpack.c.bf16 %v5464_v54, %v5464_v54 }
 0x3cb   : > { %v9739_v50 = vpack.c.bf16 %v5465_v25, %v5465_v25  ;;  %v9755_v51 = vpack.c.bf16 %v5466_v44, %v5466_v44  ;;  %v8107_v20 = vcombine.low %v7059_v55, %v7066_v13  ;;  %v9546_v30 = vcombine.high %v7059_v55, %v7066_v13 }
 0x3cc   : > { %v8123_v41 = vcombine.low %v7075_v56, %v7082_v58  ;;  %v9547_v28 = vcombine.high %v7075_v56, %v7082_v58  ;;  %6274 = vst.msk [vmem:[%s11560_s25 + $0x1c] sm:$0xf] %vm3490_vm1, %v9707_v6  ;;  %6290 = vst.msk [vmem:[%s11560_s25 + $0x5c] sm:$0xf] %vm3490_vm1, %v9723_v10  ;;  %v7103_v27 = vcombine.low %v11798_v39, %v6578_v15  ;;  %v3796_v6 = vpop.permute.xlu0 %3795 }
 0x3cd   : > { %6306 = vst.msk [vmem:[%s11560_s25 + $0x9c] sm:$0xf] %vm3490_vm1, %v9739_v50  ;;  %6322 = vst.msk [vmem:[%s11560_s25 + $0xdc] sm:$0xf] %vm3490_vm1, %v9755_v51  ;;  %v7104_v21 = vcombine.high %v11798_v39, %v6578_v15  ;;  %v8114_v9 = vrot.slane %v8107_v20, %v10689_v46  ;;  %v8122_v37 = vrot.slane %v9546_v30, %v10689_v46 }
 0x3ce   : > { %v8130_v48 = vrot.slane %v8123_v41, %v10689_v46  ;;  %v8138_v22 = vrot.slane %v9547_v28, %v10689_v46  ;;  %v7111_v38 = vrot.slane %v7103_v27, %v10689_v46  ;;  %v4107_v59 = vcombine.low %v10496_v61, %v3748_v0 }
 0x3cf   : > { %v7118_v2 = vrot.slane %v7104_v21, %v10689_v46  ;;  %v4108_v19 = vcombine.high %v10496_v61, %v3748_v0  ;;  %v8139_v1 = vcombine.low %v8114_v9, %v8122_v37  ;;  %v8140_v35 = vcombine.high %v8114_v9, %v8122_v37  ;;  %v3750_v9 = vpop.permute.xlu1 %3749 }
 0x3d0   : > { %v8155_v36 = vcombine.low %v8130_v48, %v8138_v22  ;;  %v8156_v39 = vcombine.high %v8130_v48, %v8138_v22  ;;  %v7119_v47 = vcombine.low %v7095_v43, %v7111_v38  ;;  %v7120_v62 = vcombine.high %v7095_v43, %v7111_v38 }
 0x3d1   : > { %v7135_v11 = vcombine.low %v7102_v14, %v7118_v2  ;;  %v7136_v40 = vcombine.high %v7102_v14, %v7118_v2  ;;  %v8147_v16 = vrot.slane %v8139_v1, %v10703_v17  ;;  %v8154_v49 = vrot.slane %v8140_v35, %v10703_v17 }
 0x3d2   : > { %v8163_v34 = vrot.slane %v8155_v36, %v10703_v17  ;;  %v8170_v54 = vrot.slane %v8156_v39, %v10703_v17  ;;  %v7127_v61 = vrot.slane %v7119_v47, %v10703_v17  ;;  %v7134_v25 = vrot.slane %v7120_v62, %v10703_v17 }
 0x3d3   : > { %v7143_v44 = vrot.slane %v7135_v11, %v10703_v17  ;;  %v7150_v55 = vrot.slane %v7136_v40, %v10703_v17  ;;  %v4115_v37 = vrot.slane %v4107_v59, %v10689_v46  ;;  %v4122_v48 = vrot.slane %v4108_v19, %v10689_v46  ;;  %v11888_v40 = vpop.permute.xlu0 %6475 }
 0x3d4   : > { %v8171_v13 = vcombine.low %v8147_v16, %v8163_v34  ;;  %v8172_v56 = vcombine.high %v8147_v16, %v8163_v34  ;;  %v8173_v58 = vcombine.low %v8154_v49, %v8170_v54  ;;  %v8174_v15 = vcombine.high %v8154_v49, %v8170_v54 }
 0x3d5   : > { %v8175_v10 = vcombine.low %v7127_v61, %v7134_v25  ;;  %v9548_v50 = vcombine.high %v7127_v61, %v7134_v25  ;;  %v8191_v51 = vcombine.low %v7143_v44, %v7150_v55  ;;  %v9549_v20 = vcombine.high %v7143_v44, %v7150_v55 }
 0x3d6   : > { %v9770_v30 = vpack.c.bf16 %v8171_v13, %v8171_v13  ;;  %v9786_v41 = vpack.c.bf16 %v8172_v56, %v8172_v56  ;;  %v9802_v28 = vpack.c.bf16 %v8173_v58, %v8173_v58  ;;  %v9818_v0 = vpack.c.bf16 %v8174_v15, %v8174_v15 }
 0x3d7   : > { %v8182_v43 = vrot.slane %v8175_v10, %v10689_v46  ;;  %v8190_v14 = vrot.slane %v9548_v50, %v10689_v46  ;;  %v8198_v27 = vrot.slane %v8191_v51, %v10689_v46  ;;  %v8206_v21 = vrot.slane %v9549_v20, %v10689_v46 }
 0x3d8   : > { %9049 = vst.msk [vmem:[%s11626_s28 + $0x18] sm:$0xf] %vm3490_vm1, %v9770_v30  ;;  %9065 = vst.msk [vmem:[%s11626_s28 + $0x58] sm:$0xf] %vm3490_vm1, %v9786_v41  ;;  %v4123_v22 = vcombine.low %v11828_v52, %v3796_v6  ;;  %v4124_v38 = vcombine.high %v11828_v52, %v3796_v6  ;;  %v4175_v39 = vcombine.low %v10505_v63, %v3750_v9  ;;  %v3798_v6 = vpop.permute.xlu1 %3797 }
 0x3d9   : > { %9081 = vst.msk [vmem:[%s11626_s28 + $0x98] sm:$0xf] %vm3490_vm1, %v9802_v28  ;;  %9097 = vst.msk [vmem:[%s11626_s28 + $0xd8] sm:$0xf] %vm3490_vm1, %v9818_v0  ;;  %v8207_v2 = vcombine.low %v8182_v43, %v8190_v14  ;;  %v8208_v1 = vcombine.high %v8182_v43, %v8190_v14  ;;  %v8223_v35 = vcombine.low %v8198_v27, %v8206_v21  ;;  %v6524_v43 = vpop.permute.xlu0 %6523 }
 0x3da   : > { %v8224_v36 = vcombine.high %v8198_v27, %v8206_v21  ;;  %v4176_v47 = vcombine.high %v10505_v63, %v3750_v9  ;;  %v4131_v62 = vrot.slane %v4123_v22, %v10689_v46  ;;  %v4138_v11 = vrot.slane %v4124_v38, %v10689_v46 }
 0x3db   : > { %v8215_v59 = vrot.slane %v8207_v2, %v10703_v17  ;;  %v8222_v19 = vrot.slane %v8208_v1, %v10703_v17  ;;  %v8231_v52 = vrot.slane %v8223_v35, %v10703_v17  ;;  %v4183_v14 = vrot.slane %v4175_v39, %v10689_v46 }
 0x3dc   : > { %v8238_v16 = vrot.slane %v8224_v36, %v10703_v17  ;;  %v4139_v49 = vcombine.low %v4115_v37, %v4131_v62  ;;  %v4140_v34 = vcombine.high %v4115_v37, %v4131_v62  ;;  %v4155_v54 = vcombine.low %v4122_v48, %v4138_v11 }
 0x3dd   : > { %v4156_v61 = vcombine.high %v4122_v48, %v4138_v11  ;;  %v8239_v25 = vcombine.low %v8215_v59, %v8231_v52  ;;  %v8240_v63 = vcombine.high %v8215_v59, %v8231_v52  ;;  %v4190_v27 = vrot.slane %v4176_v47, %v10689_v46 }
 0x3de   : > { %v8241_v44 = vcombine.low %v8222_v19, %v8238_v16  ;;  %v8242_v55 = vcombine.high %v8222_v19, %v8238_v16  ;;  %v4147_v13 = vrot.slane %v4139_v49, %v10703_v17  ;;  %v4154_v56 = vrot.slane %v4140_v34, %v10703_v17  ;;  %v11918_v16 = vpop.permute.xlu1 %6477 }
 0x3df   : > { %v4163_v58 = vrot.slane %v4155_v54, %v10703_v17  ;;  %v4170_v15 = vrot.slane %v4156_v61, %v10703_v17  ;;  %v9771_v10 = vpack.c.bf16 %v8239_v25, %v8239_v25  ;;  %v9787_v50 = vpack.c.bf16 %v8240_v63, %v8240_v63  ;;  %v6572_v25 = vpop.permute.xlu0 %6571 }
 0x3e0   : > { %v9803_v51 = vpack.c.bf16 %v8241_v44, %v8241_v44  ;;  %v9819_v20 = vpack.c.bf16 %v8242_v55, %v8242_v55  ;;  %v5195_v30 = vcombine.low %v4147_v13, %v4154_v56  ;;  %v9435_v41 = vcombine.high %v4147_v13, %v4154_v56 }
 0x3e1   : > { %v5211_v28 = vcombine.low %v4163_v58, %v4170_v15  ;;  %v9436_v0 = vcombine.high %v4163_v58, %v4170_v15  ;;  %9050 = vst.msk [vmem:[%s11626_s28 + $0x1c] sm:$0xf] %vm3490_vm1, %v9771_v10  ;;  %9066 = vst.msk [vmem:[%s11626_s28 + $0x5c] sm:$0xf] %vm3490_vm1, %v9787_v50  ;;  %v4191_v21 = vcombine.low %v11858_v24, %v3798_v6 }
 0x3e2   : > { %9082 = vst.msk [vmem:[%s11626_s28 + $0x9c] sm:$0xf] %vm3490_vm1, %v9803_v51  ;;  %9098 = vst.msk [vmem:[%s11626_s28 + $0xdc] sm:$0xf] %vm3490_vm1, %v9819_v20  ;;  %v4192_v9 = vcombine.high %v11858_v24, %v3798_v6  ;;  %v5202_v37 = vrot.slane %v5195_v30, %v10689_v46  ;;  %v5210_v48 = vrot.slane %v9435_v41, %v10689_v46 }
 0x3e3   : > { %v5218_v22 = vrot.slane %v5211_v28, %v10689_v46  ;;  %v5226_v38 = vrot.slane %v9436_v0, %v10689_v46  ;;  %v4199_v2 = vrot.slane %v4191_v21, %v10689_v46  ;;  %v6883_v35 = vcombine.low %v10477_v23, %v6524_v43  ;;  %v6526_v21 = vpop.permute.xlu1 %6525 }
 0x3e4   : > { %v4206_v1 = vrot.slane %v4192_v9, %v10689_v46  ;;  %v6884_v36 = vcombine.high %v10477_v23, %v6524_v43  ;;  %v5227_v39 = vcombine.low %v5202_v37, %v5210_v48  ;;  %v5228_v47 = vcombine.high %v5202_v37, %v5210_v48 }
 0x3e5   : > { %v5243_v62 = vcombine.low %v5218_v22, %v5226_v38  ;;  %v5244_v24 = vcombine.high %v5218_v22, %v5226_v38  ;;  %v4207_v11 = vcombine.low %v4183_v14, %v4199_v2  ;;  %v4208_v59 = vcombine.high %v4183_v14, %v4199_v2  ;;  %v11944_v38 = vpop.permute.xlu0 %3711 }
 0x3e6   : > { %v4223_v19 = vcombine.low %v4190_v27, %v4206_v1  ;;  %v4224_v52 = vcombine.high %v4190_v27, %v4206_v1  ;;  %v5235_v49 = vrot.slane %v5227_v39, %v10703_v17  ;;  %v5242_v34 = vrot.slane %v5228_v47, %v10703_v17 }
 0x3e7   : > { %v5251_v54 = vrot.slane %v5243_v62, %v10703_v17  ;;  %v5258_v61 = vrot.slane %v5244_v24, %v10703_v17  ;;  %v4215_v23 = vrot.slane %v4207_v11, %v10703_v17  ;;  %v4222_v63 = vrot.slane %v4208_v59, %v10703_v17 }
 0x3e8   : > { %v4231_v44 = vrot.slane %v4223_v19, %v10703_v17  ;;  %v4238_v55 = vrot.slane %v4224_v52, %v10703_v17  ;;  %v6891_v9 = vrot.slane %v6883_v35, %v10689_v46  ;;  %v6898_v37 = vrot.slane %v6884_v36, %v10689_v46 }
 0x3e9   : > { %v5259_v13 = vcombine.low %v5235_v49, %v5251_v54  ;;  %v5260_v56 = vcombine.high %v5235_v49, %v5251_v54  ;;  %v5261_v58 = vcombine.low %v5242_v34, %v5258_v61  ;;  %v5262_v15 = vcombine.high %v5242_v34, %v5258_v61 }
 0x3ea   : > { %v5263_v6 = vcombine.low %v4215_v23, %v4222_v63  ;;  %v9437_v10 = vcombine.high %v4215_v23, %v4222_v63  ;;  %v5279_v50 = vcombine.low %v4231_v44, %v4238_v55  ;;  %v9438_v51 = vcombine.high %v4231_v44, %v4238_v55 }
 0x3eb   : > { %v9704_v20 = vpack.c.bf16 %v5259_v13, %v5259_v13  ;;  %v9720_v30 = vpack.c.bf16 %v5260_v56, %v5260_v56  ;;  %v9736_v41 = vpack.c.bf16 %v5261_v58, %v5261_v58  ;;  %v9752_v28 = vpack.c.bf16 %v5262_v15, %v5262_v15  ;;  %v6574_v56 = vpop.permute.xlu1 %6573  ;;  %v11958_v58 = vpop.permute.xlu0 %3759 }
 0x3ec   : > { %v5270_v0 = vrot.slane %v5263_v6, %v10689_v46  ;;  %v5278_v43 = vrot.slane %v9437_v10, %v10689_v46  ;;  %v5286_v14 = vrot.slane %v5279_v50, %v10689_v46  ;;  %v5294_v27 = vrot.slane %v9438_v51, %v10689_v46 }
 0x3ed   : > { %6271 = vst.msk [vmem:[%s11560_s25 + $0x10] sm:$0xf] %vm3490_vm1, %v9704_v20  ;;  %6287 = vst.msk [vmem:[%s11560_s25 + $0x50] sm:$0xf] %vm3490_vm1, %v9720_v30  ;;  %v6899_v48 = vcombine.low %v11888_v40, %v6572_v25  ;;  %v6900_v22 = vcombine.high %v11888_v40, %v6572_v25  ;;  %v6951_v62 = vcombine.low %v10486_v53, %v6526_v21 }
 0x3ee   : > { %6303 = vst.msk [vmem:[%s11560_s25 + $0x90] sm:$0xf] %vm3490_vm1, %v9736_v41  ;;  %6319 = vst.msk [vmem:[%s11560_s25 + $0xd0] sm:$0xf] %vm3490_vm1, %v9752_v28  ;;  %v5295_v2 = vcombine.low %v5270_v0, %v5278_v43  ;;  %v5296_v1 = vcombine.high %v5270_v0, %v5278_v43  ;;  %v5311_v39 = vcombine.low %v5286_v14, %v5294_v27 }
 0x3ef   : > { %v5312_v47 = vcombine.high %v5286_v14, %v5294_v27  ;;  %v6952_v24 = vcombine.high %v10486_v53, %v6526_v21  ;;  %v6907_v11 = vrot.slane %v6899_v48, %v10689_v46  ;;  %v6914_v35 = vrot.slane %v6900_v22, %v10689_v46 }
 0x3f0   : > { %v5303_v36 = vrot.slane %v5295_v2, %v10703_v17  ;;  %v5310_v59 = vrot.slane %v5296_v1, %v10703_v17  ;;  %v5319_v40 = vrot.slane %v5311_v39, %v10703_v17  ;;  %v6959_v28 = vrot.slane %v6951_v62, %v10689_v46 }
 0x3f1   : > { %v5326_v19 = vrot.slane %v5312_v47, %v10703_v17  ;;  %v6915_v52 = vcombine.low %v6891_v9, %v6907_v11  ;;  %v6916_v49 = vcombine.high %v6891_v9, %v6907_v11  ;;  %v6931_v34 = vcombine.low %v6898_v37, %v6914_v35  ;;  %v3808_v11 = vpop.permute.xlu0 %3807 }
 0x3f2   : > { %v6932_v54 = vcombine.high %v6898_v37, %v6914_v35  ;;  %v5327_v61 = vcombine.low %v5303_v36, %v5319_v40  ;;  %v5328_v25 = vcombine.high %v5303_v36, %v5319_v40  ;;  %v6966_v0 = vrot.slane %v6952_v24, %v10689_v46  ;;  %v11982_v24 = vpop.permute.xlu1 %3713 }
 0x3f3   : > { %v5329_v23 = vcombine.low %v5310_v59, %v5326_v19  ;;  %v5330_v53 = vcombine.high %v5310_v59, %v5326_v19  ;;  %v6923_v63 = vrot.slane %v6915_v52, %v10703_v17  ;;  %v6930_v44 = vrot.slane %v6916_v49, %v10703_v17 }
 0x3f4   : > { %v6939_v55 = vrot.slane %v6931_v34, %v10703_v17  ;;  %v6946_v13 = vrot.slane %v6932_v54, %v10703_v17  ;;  %v9705_v15 = vpack.c.bf16 %v5327_v61, %v5327_v61  ;;  %v9721_v6 = vpack.c.bf16 %v5328_v25, %v5328_v25 }
 0x3f5   : > { %v9737_v10 = vpack.c.bf16 %v5329_v23, %v5329_v23  ;;  %v9753_v50 = vpack.c.bf16 %v5330_v53, %v5330_v53  ;;  %v7971_v51 = vcombine.low %v6923_v63, %v6930_v44  ;;  %v9542_v20 = vcombine.high %v6923_v63, %v6930_v44 }
 0x3f6   : > { %v7987_v30 = vcombine.low %v6939_v55, %v6946_v13  ;;  %v9543_v41 = vcombine.high %v6939_v55, %v6946_v13  ;;  %6272 = vst.msk [vmem:[%s11560_s25 + $0x14] sm:$0xf] %vm3490_vm1, %v9705_v15  ;;  %6288 = vst.msk [vmem:[%s11560_s25 + $0x54] sm:$0xf] %vm3490_vm1, %v9721_v6  ;;  %v6967_v43 = vcombine.low %v11918_v16, %v6574_v56 }
 0x3f7   : > { %6304 = vst.msk [vmem:[%s11560_s25 + $0x94] sm:$0xf] %vm3490_vm1, %v9737_v10  ;;  %6320 = vst.msk [vmem:[%s11560_s25 + $0xd4] sm:$0xf] %vm3490_vm1, %v9753_v50  ;;  %v6968_v14 = vcombine.high %v11918_v16, %v6574_v56  ;;  %v7978_v27 = vrot.slane %v7971_v51, %v10689_v46  ;;  %v7986_v21 = vrot.slane %v9542_v20, %v10689_v46  ;;  %v3762_v51 = vpop.permute.xlu1 %3761  ;;  %v11992_v20 = vpop.permute.xlu0 %6487 }
 0x3f8   : > { %v7994_v9 = vrot.slane %v7987_v30, %v10689_v46  ;;  %v8002_v37 = vrot.slane %v9543_v41, %v10689_v46  ;;  %v6975_v48 = vrot.slane %v6967_v43, %v10689_v46  ;;  %v4515_v2 = vcombine.low %v10524_v45, %v11958_v58 }
 0x3f9   : > { %v6982_v22 = vrot.slane %v6968_v14, %v10689_v46  ;;  %v4516_v1 = vcombine.high %v10524_v45, %v11958_v58  ;;  %v8003_v39 = vcombine.low %v7978_v27, %v7986_v21  ;;  %v8004_v16 = vcombine.high %v7978_v27, %v7986_v21 }
 0x3fa   : > { %v8019_v47 = vcombine.low %v7994_v9, %v8002_v37  ;;  %v8020_v62 = vcombine.high %v7994_v9, %v8002_v37  ;;  %v6983_v35 = vcombine.low %v6959_v28, %v6975_v48  ;;  %v6984_v36 = vcombine.high %v6959_v28, %v6975_v48 }
 0x3fb   : > { %v6999_v59 = vcombine.low %v6966_v0, %v6982_v22  ;;  %v7000_v40 = vcombine.high %v6966_v0, %v6982_v22  ;;  %v8011_v19 = vrot.slane %v8003_v39, %v10703_v17  ;;  %v8018_v52 = vrot.slane %v8004_v16, %v10703_v17 }
 0x3fc   : > { %v8027_v49 = vrot.slane %v8019_v47, %v10703_v17  ;;  %v8034_v34 = vrot.slane %v8020_v62, %v10703_v17  ;;  %v6991_v45 = vrot.slane %v6983_v35, %v10703_v17  ;;  %v6998_v54 = vrot.slane %v6984_v36, %v10703_v17 }
 0x3fd   : > { %v7007_v61 = vrot.slane %v6999_v59, %v10703_v17  ;;  %v7014_v25 = vrot.slane %v7000_v40, %v10703_v17  ;;  %v4523_v43 = vrot.slane %v4515_v2, %v10689_v46  ;;  %v4530_v14 = vrot.slane %v4516_v1, %v10689_v46 }
 0x3fe   : > { %v8035_v23 = vcombine.low %v8011_v19, %v8027_v49  ;;  %v8036_v53 = vcombine.high %v8011_v19, %v8027_v49  ;;  %v8037_v63 = vcombine.low %v8018_v52, %v8034_v34  ;;  %v8038_v44 = vcombine.high %v8018_v52, %v8034_v34  ;;  %v3810_v19 = vpop.permute.xlu1 %3809  ;;  %v12018_v52 = vpop.permute.xlu0 %6535 }
 0x3ff   : > { %v8039_v55 = vcombine.low %v6991_v45, %v6998_v54  ;;  %v9544_v13 = vcombine.high %v6991_v45, %v6998_v54  ;;  %v8055_v56 = vcombine.low %v7007_v61, %v7014_v25  ;;  %v9545_v58 = vcombine.high %v7007_v61, %v7014_v25 }
 0x400   : > { %v9768_v15 = vpack.c.bf16 %v8035_v23, %v8035_v23  ;;  %v9784_v6 = vpack.c.bf16 %v8036_v53, %v8036_v53  ;;  %v9800_v10 = vpack.c.bf16 %v8037_v63, %v8037_v63  ;;  %v9816_v50 = vpack.c.bf16 %v8038_v44, %v8038_v44 }
 0x401   : > { %v8046_v30 = vrot.slane %v8039_v55, %v10689_v46  ;;  %v8054_v41 = vrot.slane %v9544_v13, %v10689_v46  ;;  %v8062_v28 = vrot.slane %v8055_v56, %v10689_v46  ;;  %v8070_v0 = vrot.slane %v9545_v58, %v10689_v46 }
 0x402   : > { %9047 = vst.msk [vmem:[%s11626_s28 + $0x10] sm:$0xf] %vm3490_vm1, %v9768_v15  ;;  %9063 = vst.msk [vmem:[%s11626_s28 + $0x50] sm:$0xf] %vm3490_vm1, %v9784_v6  ;;  %v4531_v27 = vcombine.low %v11944_v38, %v3808_v11  ;;  %v4532_v21 = vcombine.high %v11944_v38, %v3808_v11  ;;  %v4583_v39 = vcombine.low %v10530_v33, %v3762_v51 }
 0x403   : > { %9079 = vst.msk [vmem:[%s11626_s28 + $0x90] sm:$0xf] %vm3490_vm1, %v9800_v10  ;;  %9095 = vst.msk [vmem:[%s11626_s28 + $0xd0] sm:$0xf] %vm3490_vm1, %v9816_v50  ;;  %v8071_v9 = vcombine.low %v8046_v30, %v8054_v41  ;;  %v8072_v37 = vcombine.high %v8046_v30, %v8054_v41  ;;  %v8087_v48 = vcombine.low %v8062_v28, %v8070_v0 }
 0x404   : > { %v8088_v22 = vcombine.high %v8062_v28, %v8070_v0  ;;  %v4584_v16 = vcombine.high %v10530_v33, %v3762_v51  ;;  %v4539_v47 = vrot.slane %v4531_v27, %v10689_v46  ;;  %v4546_v62 = vrot.slane %v4532_v21, %v10689_v46 }
 0x405   : > { %v8079_v2 = vrot.slane %v8071_v9, %v10703_v17  ;;  %v8086_v1 = vrot.slane %v8072_v37, %v10703_v17  ;;  %v8095_v35 = vrot.slane %v8087_v48, %v10703_v17  ;;  %v4591_v6 = vrot.slane %v4583_v39, %v10689_v46 }
 0x406   : > { %v8102_v38 = vrot.slane %v8088_v22, %v10703_v17  ;;  %v4547_v11 = vcombine.low %v4523_v43, %v4539_v47  ;;  %v4548_v36 = vcombine.high %v4523_v43, %v4539_v47  ;;  %v4563_v59 = vcombine.low %v4530_v14, %v4546_v62  ;;  %v12040_v43 = vpop.permute.xlu1 %6489 }
 0x407   : > { %v4564_v40 = vcombine.high %v4530_v14, %v4546_v62  ;;  %v8103_v33 = vcombine.low %v8079_v2, %v8095_v35  ;;  %v8104_v49 = vcombine.high %v8079_v2, %v8095_v35  ;;  %v4598_v10 = vrot.slane %v4584_v16, %v10689_v46  ;;  %v6584_v14 = vpop.permute.xlu0 %6583 }
 0x408   : > { %v8105_v34 = vcombine.low %v8086_v1, %v8102_v38  ;;  %v8106_v45 = vcombine.high %v8086_v1, %v8102_v38  ;;  %v4555_v54 = vrot.slane %v4547_v11, %v10703_v17  ;;  %v4562_v61 = vrot.slane %v4548_v36, %v10703_v17 }
 0x409   : > { %v4571_v25 = vrot.slane %v4563_v59, %v10703_v17  ;;  %v4578_v23 = vrot.slane %v4564_v40, %v10703_v17  ;;  %v9769_v53 = vpack.c.bf16 %v8103_v33, %v8103_v33  ;;  %v9785_v63 = vpack.c.bf16 %v8104_v49, %v8104_v49 }
 0x40a   : > { %v9801_v44 = vpack.c.bf16 %v8105_v34, %v8105_v34  ;;  %v9817_v55 = vpack.c.bf16 %v8106_v45, %v8106_v45  ;;  %v5603_v13 = vcombine.low %v4555_v54, %v4562_v61  ;;  %v9447_v56 = vcombine.high %v4555_v54, %v4562_v61  ;;  %v12056_v34 = vpop.permute.xlu1 %6537 }
 0x40b   : > { %v5619_v58 = vcombine.low %v4571_v25, %v4578_v23  ;;  %v9448_v15 = vcombine.high %v4571_v25, %v4578_v23  ;;  %9048 = vst.msk [vmem:[%s11626_s28 + $0x14] sm:$0xf] %vm3490_vm1, %v9769_v53  ;;  %9064 = vst.msk [vmem:[%s11626_s28 + $0x54] sm:$0xf] %vm3490_vm1, %v9785_v63  ;;  %v4599_v50 = vcombine.low %v11982_v24, %v3810_v19  ;;  %v12058_v45 = vpop.permute.xlu0 %3707 }
 0x40c   : > { %9080 = vst.msk [vmem:[%s11626_s28 + $0x94] sm:$0xf] %vm3490_vm1, %v9801_v44  ;;  %9096 = vst.msk [vmem:[%s11626_s28 + $0xd4] sm:$0xf] %vm3490_vm1, %v9817_v55  ;;  %v4600_v51 = vcombine.high %v11982_v24, %v3810_v19  ;;  %v5610_v30 = vrot.slane %v5603_v13, %v10689_v46  ;;  %v5618_v41 = vrot.slane %v9447_v56, %v10689_v46 }
 0x40d   : > { %v5626_v28 = vrot.slane %v5619_v58, %v10689_v46  ;;  %v5634_v0 = vrot.slane %v9448_v15, %v10689_v46  ;;  %v4607_v27 = vrot.slane %v4599_v50, %v10689_v46  ;;  %v7291_v9 = vcombine.low %v10508_v57, %v12018_v52 }
 0x40e   : > { %v4614_v21 = vrot.slane %v4600_v51, %v10689_v46  ;;  %v7292_v24 = vcombine.high %v10508_v57, %v12018_v52  ;;  %v5635_v37 = vcombine.low %v5610_v30, %v5618_v41  ;;  %v5636_v48 = vcombine.high %v5610_v30, %v5618_v41 }
 0x40f   : > { %v5651_v22 = vcombine.low %v5626_v28, %v5634_v0  ;;  %v5652_v39 = vcombine.high %v5626_v28, %v5634_v0  ;;  %v4615_v16 = vcombine.low %v4591_v6, %v4607_v27  ;;  %v4616_v47 = vcombine.high %v4591_v6, %v4607_v27 }
 0x410   : > { %v4631_v62 = vcombine.low %v4598_v10, %v4614_v21  ;;  %v4632_v2 = vcombine.high %v4598_v10, %v4614_v21  ;;  %v5643_v1 = vrot.slane %v5635_v37, %v10703_v17  ;;  %v5650_v35 = vrot.slane %v5636_v48, %v10703_v17  ;;  %v6586_v48 = vpop.permute.xlu1 %6585 }
 0x411   : > { %v5659_v38 = vrot.slane %v5651_v22, %v10703_v17  ;;  %v5666_v11 = vrot.slane %v5652_v39, %v10703_v17  ;;  %v4623_v36 = vrot.slane %v4615_v16, %v10703_v17  ;;  %v4630_v57 = vrot.slane %v4616_v47, %v10703_v17 }
 0x412   : > { %v4639_v59 = vrot.slane %v4631_v62, %v10703_v17  ;;  %v4646_v40 = vrot.slane %v4632_v2, %v10703_v17  ;;  %v7299_v6 = vrot.slane %v7291_v9, %v10689_v46  ;;  %v7306_v10 = vrot.slane %v7292_v24, %v10689_v46  ;;  %v12082_v24 = vpop.permute.xlu0 %3755 }
 0x413   : > { %v5667_v19 = vcombine.low %v5643_v1, %v5659_v38  ;;  %v5668_v52 = vcombine.high %v5643_v1, %v5659_v38  ;;  %v5669_v33 = vcombine.low %v5650_v35, %v5666_v11  ;;  %v5670_v49 = vcombine.high %v5650_v35, %v5666_v11 }
 0x414   : > { %v5671_v54 = vcombine.low %v4623_v36, %v4630_v57  ;;  %v9449_v61 = vcombine.high %v4623_v36, %v4630_v57  ;;  %v5687_v25 = vcombine.low %v4639_v59, %v4646_v40  ;;  %v9450_v23 = vcombine.high %v4639_v59, %v4646_v40 }
 0x415   : > { %v9710_v53 = vpack.c.bf16 %v5667_v19, %v5667_v19  ;;  %v9726_v63 = vpack.c.bf16 %v5668_v52, %v5668_v52  ;;  %v9742_v44 = vpack.c.bf16 %v5669_v33, %v5669_v33  ;;  %v9758_v55 = vpack.c.bf16 %v5670_v49, %v5670_v49 }
 0x416   : > { %v5678_v13 = vrot.slane %v5671_v54, %v10689_v46  ;;  %v5686_v56 = vrot.slane %v9449_v61, %v10689_v46  ;;  %v5694_v58 = vrot.slane %v5687_v25, %v10689_v46  ;;  %v5702_v15 = vrot.slane %v9450_v23, %v10689_v46  ;;  %v12092_v25 = vpop.permute.xlu1 %3709  ;;  %v12094_v23 = vpop.permute.xlu0 %3803 }
 0x417   : > { %6277 = vst.msk [vmem:[%s11560_s25 + $0x28] sm:$0xf] %vm3490_vm1, %v9710_v53  ;;  %6293 = vst.msk [vmem:[%s11560_s25 + $0x68] sm:$0xf] %vm3490_vm1, %v9726_v63  ;;  %v7307_v50 = vcombine.low %v11992_v20, %v6584_v14  ;;  %v7308_v51 = vcombine.high %v11992_v20, %v6584_v14  ;;  %v7359_v27 = vcombine.low %v10514_v5, %v12056_v34 }
 0x418   : > { %6309 = vst.msk [vmem:[%s11560_s25 + $0xa8] sm:$0xf] %vm3490_vm1, %v9742_v44  ;;  %6325 = vst.msk [vmem:[%s11560_s25 + $0xe8] sm:$0xf] %vm3490_vm1, %v9758_v55  ;;  %v5703_v30 = vcombine.low %v5678_v13, %v5686_v56  ;;  %v5704_v41 = vcombine.high %v5678_v13, %v5686_v56  ;;  %v5719_v28 = vcombine.low %v5694_v58, %v5702_v15 }
 0x419   : > { %v5720_v0 = vcombine.high %v5694_v58, %v5702_v15  ;;  %v7360_v21 = vcombine.high %v10514_v5, %v12056_v34  ;;  %v7315_v37 = vrot.slane %v7307_v50, %v10689_v46  ;;  %v7322_v9 = vrot.slane %v7308_v51, %v10689_v46 }
 0x41a   : > { %v5711_v22 = vrot.slane %v5703_v30, %v10703_v17  ;;  %v5718_v20 = vrot.slane %v5704_v41, %v10703_v17  ;;  %v5727_v14 = vrot.slane %v5719_v28, %v10703_v17  ;;  %v7367_v53 = vrot.slane %v7359_v27, %v10689_v46 }
 0x41b   : > { %v5734_v39 = vrot.slane %v5720_v0, %v10703_v17  ;;  %v7323_v16 = vcombine.low %v7299_v6, %v7315_v37  ;;  %v7324_v47 = vcombine.high %v7299_v6, %v7315_v37  ;;  %v7339_v62 = vcombine.low %v7306_v10, %v7322_v9 }
 0x41c   : > { %v7340_v2 = vcombine.high %v7306_v10, %v7322_v9  ;;  %v5735_v5 = vcombine.low %v5711_v22, %v5727_v14  ;;  %v5736_v1 = vcombine.high %v5711_v22, %v5727_v14  ;;  %v7374_v63 = vrot.slane %v7360_v21, %v10689_v46  ;;  %v12122_v14 = vpop.permute.xlu1 %3757 }
 0x41d   : > { %v5737_v35 = vcombine.low %v5718_v20, %v5734_v39  ;;  %v5738_v38 = vcombine.high %v5718_v20, %v5734_v39  ;;  %v7331_v11 = vrot.slane %v7323_v16, %v10703_v17  ;;  %v7338_v36 = vrot.slane %v7324_v47, %v10703_v17  ;;  %v12124_v39 = vpop.permute.xlu0 %6483 }
 0x41e   : > { %v7347_v57 = vrot.slane %v7339_v62, %v10703_v17  ;;  %v7354_v59 = vrot.slane %v7340_v2, %v10703_v17  ;;  %v9711_v40 = vpack.c.bf16 %v5735_v5, %v5735_v5  ;;  %v9727_v19 = vpack.c.bf16 %v5736_v1, %v5736_v1 }
 0x41f   : > { %v9743_v52 = vpack.c.bf16 %v5737_v35, %v5737_v35  ;;  %v9759_v33 = vpack.c.bf16 %v5738_v38, %v5738_v38  ;;  %v8379_v49 = vcombine.low %v7331_v11, %v7338_v36  ;;  %v9554_v34 = vcombine.high %v7331_v11, %v7338_v36 }
 0x420   : > { %v8395_v54 = vcombine.low %v7347_v57, %v7354_v59  ;;  %v9555_v61 = vcombine.high %v7347_v57, %v7354_v59  ;;  %6278 = vst.msk [vmem:[%s11560_s25 + $0x2c] sm:$0xf] %vm3490_vm1, %v9711_v40  ;;  %6294 = vst.msk [vmem:[%s11560_s25 + $0x6c] sm:$0xf] %vm3490_vm1, %v9727_v19  ;;  %v7375_v44 = vcombine.low %v12040_v43, %v6586_v48 }
 0x421   : > { %6310 = vst.msk [vmem:[%s11560_s25 + $0xac] sm:$0xf] %vm3490_vm1, %v9743_v52  ;;  %6326 = vst.msk [vmem:[%s11560_s25 + $0xec] sm:$0xf] %vm3490_vm1, %v9759_v33  ;;  %v7376_v55 = vcombine.high %v12040_v43, %v6586_v48  ;;  %v8386_v13 = vrot.slane %v8379_v49, %v10689_v46  ;;  %v8394_v56 = vrot.slane %v9554_v34, %v10689_v46 }
 0x422   : > { %v8402_v58 = vrot.slane %v8395_v54, %v10689_v46  ;;  %v8410_v15 = vrot.slane %v9555_v61, %v10689_v46  ;;  %v7383_v6 = vrot.slane %v7375_v44, %v10689_v46  ;;  %v4379_v50 = vcombine.low %v10527_v8, %v12082_v24  ;;  %v3806_v44 = vpop.permute.xlu1 %3805 }
 0x423   : > { %v7390_v10 = vrot.slane %v7376_v55, %v10689_v46  ;;  %v4380_v51 = vcombine.high %v10527_v8, %v12082_v24  ;;  %v8411_v30 = vcombine.low %v8386_v13, %v8394_v56  ;;  %v8412_v43 = vcombine.high %v8386_v13, %v8394_v56  ;;  %v12148_v55 = vpop.permute.xlu0 %6531 }
 0x424   : > { %v8427_v41 = vcombine.low %v8402_v58, %v8410_v15  ;;  %v8428_v28 = vcombine.high %v8402_v58, %v8410_v15  ;;  %v7391_v0 = vcombine.low %v7367_v53, %v7383_v6  ;;  %v7392_v27 = vcombine.high %v7367_v53, %v7383_v6 }
 0x425   : > { %v7407_v21 = vcombine.low %v7374_v63, %v7390_v10  ;;  %v7408_v37 = vcombine.high %v7374_v63, %v7390_v10  ;;  %v8419_v9 = vrot.slane %v8411_v30, %v10703_v17  ;;  %v8426_v48 = vrot.slane %v8412_v43, %v10703_v17 }
 0x426   : > { %v8435_v22 = vrot.slane %v8427_v41, %v10703_v17  ;;  %v8442_v20 = vrot.slane %v8428_v28, %v10703_v17  ;;  %v7399_v8 = vrot.slane %v7391_v0, %v10703_v17  ;;  %v7406_v24 = vrot.slane %v7392_v27, %v10703_v17 }
 0x427   : > { %v7415_v16 = vrot.slane %v7407_v21, %v10703_v17  ;;  %v7422_v47 = vrot.slane %v7408_v37, %v10703_v17  ;;  %v4387_v54 = vrot.slane %v4379_v50, %v10689_v46  ;;  %v4394_v61 = vrot.slane %v4380_v51, %v10689_v46 }
 0x428   : > { %v8443_v62 = vcombine.low %v8419_v9, %v8435_v22  ;;  %v8444_v2 = vcombine.high %v8419_v9, %v8435_v22  ;;  %v8445_v5 = vcombine.low %v8426_v48, %v8442_v20  ;;  %v8446_v1 = vcombine.high %v8426_v48, %v8442_v20 }
 0x429   : > { %v8447_v35 = vcombine.low %v7399_v8, %v7406_v24  ;;  %v9556_v38 = vcombine.high %v7399_v8, %v7406_v24  ;;  %v8463_v11 = vcombine.low %v7415_v16, %v7422_v47  ;;  %v9557_v36 = vcombine.high %v7415_v16, %v7422_v47  ;;  %v12164_v8 = vpop.permute.xlu1 %6485  ;;  %v12166_v24 = vpop.permute.xlu0 %6579 }
 0x42a   : > { %v9774_v57 = vpack.c.bf16 %v8443_v62, %v8443_v62  ;;  %v9790_v59 = vpack.c.bf16 %v8444_v2, %v8444_v2  ;;  %v9806_v40 = vpack.c.bf16 %v8445_v5, %v8445_v5  ;;  %v9822_v19 = vpack.c.bf16 %v8446_v1, %v8446_v1 }
 0x42b   : > { %v8454_v52 = vrot.slane %v8447_v35, %v10689_v46  ;;  %v8462_v33 = vrot.slane %v9556_v38, %v10689_v46  ;;  %v8470_v49 = vrot.slane %v8463_v11, %v10689_v46  ;;  %v8478_v34 = vrot.slane %v9557_v36, %v10689_v46 }
 0x42c   : > { %9053 = vst.msk [vmem:[%s11626_s28 + $0x28] sm:$0xf] %vm3490_vm1, %v9774_v57  ;;  %9069 = vst.msk [vmem:[%s11626_s28 + $0x68] sm:$0xf] %vm3490_vm1, %v9790_v59  ;;  %v4395_v53 = vcombine.low %v12058_v45, %v12094_v23  ;;  %v4396_v63 = vcombine.high %v12058_v45, %v12094_v23  ;;  %v4447_v6 = vcombine.low %v10537_v12, %v12122_v14 }
 0x42d   : > { %9085 = vst.msk [vmem:[%s11626_s28 + $0xa8] sm:$0xf] %vm3490_vm1, %v9806_v40  ;;  %9101 = vst.msk [vmem:[%s11626_s28 + $0xe8] sm:$0xf] %vm3490_vm1, %v9822_v19  ;;  %v8479_v13 = vcombine.low %v8454_v52, %v8462_v33  ;;  %v8480_v56 = vcombine.high %v8454_v52, %v8462_v33  ;;  %v8495_v58 = vcombine.low %v8470_v49, %v8478_v34 }
 0x42e   : > { %v8496_v15 = vcombine.high %v8470_v49, %v8478_v34  ;;  %v4448_v10 = vcombine.high %v10537_v12, %v12122_v14  ;;  %v4403_v50 = vrot.slane %v4395_v53, %v10689_v46  ;;  %v4410_v51 = vrot.slane %v4396_v63, %v10689_v46 }
 0x42f   : > { %v8487_v30 = vrot.slane %v8479_v13, %v10703_v17  ;;  %v8494_v45 = vrot.slane %v8480_v56, %v10703_v17  ;;  %v8503_v23 = vrot.slane %v8495_v58, %v10703_v17  ;;  %v4455_v11 = vrot.slane %v4447_v6, %v10689_v46  ;;  %v12190_v13 = vpop.permute.xlu1 %6533  ;;  %v12192_v56 = vpop.permute.xlu0 %3719 }
 0x430   : > { %v8510_v43 = vrot.slane %v8496_v15, %v10703_v17  ;;  %v4411_v41 = vcombine.low %v4387_v54, %v4403_v50  ;;  %v4412_v28 = vcombine.high %v4387_v54, %v4403_v50  ;;  %v4427_v0 = vcombine.low %v4394_v61, %v4410_v51 }
 0x431   : > { %v4428_v27 = vcombine.high %v4394_v61, %v4410_v51  ;;  %v8511_v21 = vcombine.low %v8487_v30, %v8503_v23  ;;  %v8512_v37 = vcombine.high %v8487_v30, %v8503_v23  ;;  %v4462_v36 = vrot.slane %v4448_v10, %v10689_v46 }
 0x432   : > { %v8513_v9 = vcombine.low %v8494_v45, %v8510_v43  ;;  %v8514_v12 = vcombine.high %v8494_v45, %v8510_v43  ;;  %v4419_v48 = vrot.slane %v4411_v41, %v10703_v17  ;;  %v4426_v22 = vrot.slane %v4412_v28, %v10703_v17 }
 0x433   : > { %v4435_v20 = vrot.slane %v4427_v0, %v10703_v17  ;;  %v4442_v14 = vrot.slane %v4428_v27, %v10703_v17  ;;  %v9775_v16 = vpack.c.bf16 %v8511_v21, %v8511_v21  ;;  %v9791_v47 = vpack.c.bf16 %v8512_v37, %v8512_v37 }
 0x434   : > { %v9807_v62 = vpack.c.bf16 %v8513_v9, %v8513_v9  ;;  %v9823_v2 = vpack.c.bf16 %v8514_v12, %v8514_v12  ;;  %v5467_v5 = vcombine.low %v4419_v48, %v4426_v22  ;;  %v9443_v1 = vcombine.high %v4419_v48, %v4426_v22 }
 0x435   : > { %v5483_v35 = vcombine.low %v4435_v20, %v4442_v14  ;;  %v9444_v38 = vcombine.high %v4435_v20, %v4442_v14  ;;  %9054 = vst.msk [vmem:[%s11626_s28 + $0x2c] sm:$0xf] %vm3490_vm1, %v9775_v16  ;;  %9070 = vst.msk [vmem:[%s11626_s28 + $0x6c] sm:$0xf] %vm3490_vm1, %v9791_v47  ;;  %v4463_v57 = vcombine.low %v12092_v25, %v3806_v44  ;;  %v12202_v16 = vpop.permute.xlu1 %6581  ;;  %v12204_v47 = vpop.permute.xlu0 %3767 }
 0x436   : > { %9086 = vst.msk [vmem:[%s11626_s28 + $0xac] sm:$0xf] %vm3490_vm1, %v9807_v62  ;;  %9102 = vst.msk [vmem:[%s11626_s28 + $0xec] sm:$0xf] %vm3490_vm1, %v9823_v2  ;;  %v4464_v59 = vcombine.high %v12092_v25, %v3806_v44  ;;  %v5474_v40 = vrot.slane %v5467_v5, %v10689_v46  ;;  %v5482_v19 = vrot.slane %v9443_v1, %v10689_v46 }
 0x437   : > { %v5490_v52 = vrot.slane %v5483_v35, %v10689_v46  ;;  %v5498_v33 = vrot.slane %v9444_v38, %v10689_v46  ;;  %v4471_v49 = vrot.slane %v4463_v57, %v10689_v46  ;;  %v7155_v54 = vcombine.low %v10511_v3, %v12148_v55 }
 0x438   : > { %v4478_v34 = vrot.slane %v4464_v59, %v10689_v46  ;;  %v7156_v61 = vcombine.high %v10511_v3, %v12148_v55  ;;  %v5499_v53 = vcombine.low %v5474_v40, %v5482_v19  ;;  %v5500_v25 = vcombine.high %v5474_v40, %v5482_v19 }
 0x439   : > { %v5515_v63 = vcombine.low %v5490_v52, %v5498_v33  ;;  %v5516_v44 = vcombine.high %v5490_v52, %v5498_v33  ;;  %v4479_v58 = vcombine.low %v4455_v11, %v4471_v49  ;;  %v4480_v15 = vcombine.high %v4455_v11, %v4471_v49 }
 0x43a   : > { %v4495_v6 = vcombine.low %v4462_v36, %v4478_v34  ;;  %v4496_v10 = vcombine.high %v4462_v36, %v4478_v34  ;;  %v5507_v50 = vrot.slane %v5499_v53, %v10703_v17  ;;  %v5514_v51 = vrot.slane %v5500_v25, %v10703_v17 }
 0x43b   : > { %v5523_v30 = vrot.slane %v5515_v63, %v10703_v17  ;;  %v5530_v3 = vrot.slane %v5516_v44, %v10703_v17  ;;  %v4487_v55 = vrot.slane %v4479_v58, %v10703_v17  ;;  %v4494_v45 = vrot.slane %v4480_v15, %v10703_v17  ;;  %v12234_v58 = vpop.permute.xlu1 %3721  ;;  %v12236_v15 = vpop.permute.xlu0 %3815 }
 0x43c   : > { %v4503_v23 = vrot.slane %v4495_v6, %v10703_v17  ;;  %v4510_v43 = vrot.slane %v4496_v10, %v10703_v17  ;;  %v7163_v35 = vrot.slane %v7155_v54, %v10689_v46  ;;  %v7170_v38 = vrot.slane %v7156_v61, %v10689_v46 }
 0x43d   : > { %v5531_v41 = vcombine.low %v5507_v50, %v5523_v30  ;;  %v5532_v28 = vcombine.high %v5507_v50, %v5523_v30  ;;  %v5533_v0 = vcombine.low %v5514_v51, %v5530_v3  ;;  %v5534_v27 = vcombine.high %v5514_v51, %v5530_v3 }
 0x43e   : > { %v5535_v21 = vcombine.low %v4487_v55, %v4494_v45  ;;  %v9445_v37 = vcombine.high %v4487_v55, %v4494_v45  ;;  %v5551_v9 = vcombine.low %v4503_v23, %v4510_v43  ;;  %v9446_v12 = vcombine.high %v4503_v23, %v4510_v43 }
 0x43f   : > { %v9708_v48 = vpack.c.bf16 %v5531_v41, %v5531_v41  ;;  %v9724_v22 = vpack.c.bf16 %v5532_v28, %v5532_v28  ;;  %v9740_v20 = vpack.c.bf16 %v5533_v0, %v5533_v0  ;;  %v9756_v14 = vpack.c.bf16 %v5534_v27, %v5534_v27 }
 0x440   : > { %v5542_v62 = vrot.slane %v5535_v21, %v10689_v46  ;;  %v5550_v2 = vrot.slane %v9445_v37, %v10689_v46  ;;  %v5558_v5 = vrot.slane %v5551_v9, %v10689_v46  ;;  %v5566_v1 = vrot.slane %v9446_v12, %v10689_v46 }
 0x441   : > { %6275 = vst.msk [vmem:[%s11560_s25 + $0x20] sm:$0xf] %vm3490_vm1, %v9708_v48  ;;  %6291 = vst.msk [vmem:[%s11560_s25 + $0x60] sm:$0xf] %vm3490_vm1, %v9724_v22  ;;  %v7171_v11 = vcombine.low %v12124_v39, %v12166_v24  ;;  %v7172_v36 = vcombine.high %v12124_v39, %v12166_v24  ;;  %v7223_v52 = vcombine.low %v10521_v7, %v12190_v13 }
 0x442   : > { %6307 = vst.msk [vmem:[%s11560_s25 + $0xa0] sm:$0xf] %vm3490_vm1, %v9740_v20  ;;  %6323 = vst.msk [vmem:[%s11560_s25 + $0xe0] sm:$0xf] %vm3490_vm1, %v9756_v14  ;;  %v5567_v57 = vcombine.low %v5542_v62, %v5550_v2  ;;  %v5568_v59 = vcombine.high %v5542_v62, %v5550_v2  ;;  %v5583_v40 = vcombine.low %v5558_v5, %v5566_v1  ;;  %v12260_v62 = vpop.permute.xlu1 %3769  ;;  %v12262_v2 = vpop.permute.xlu0 %6495 }
 0x443   : > { %v5584_v19 = vcombine.high %v5558_v5, %v5566_v1  ;;  %v7224_v33 = vcombine.high %v10521_v7, %v12190_v13  ;;  %v7179_v49 = vrot.slane %v7171_v11, %v10689_v46  ;;  %v7186_v34 = vrot.slane %v7172_v36, %v10689_v46 }
 0x444   : > { %v5575_v54 = vrot.slane %v5567_v57, %v10703_v17  ;;  %v5582_v61 = vrot.slane %v5568_v59, %v10703_v17  ;;  %v5591_v39 = vrot.slane %v5583_v40, %v10703_v17  ;;  %v7231_v21 = vrot.slane %v7223_v52, %v10689_v46 }
 0x445   : > { %v5598_v24 = vrot.slane %v5584_v19, %v10703_v17  ;;  %v7187_v53 = vcombine.low %v7163_v35, %v7179_v49  ;;  %v7188_v25 = vcombine.high %v7163_v35, %v7179_v49  ;;  %v7203_v63 = vcombine.low %v7170_v38, %v7186_v34 }
 0x446   : > { %v7204_v44 = vcombine.high %v7170_v38, %v7186_v34  ;;  %v5599_v7 = vcombine.low %v5575_v54, %v5591_v39  ;;  %v5600_v13 = vcombine.high %v5575_v54, %v5591_v39  ;;  %v7238_v37 = vrot.slane %v7224_v33, %v10689_v46 }
 0x447   : > { %v5601_v6 = vcombine.low %v5582_v61, %v5598_v24  ;;  %v5602_v10 = vcombine.high %v5582_v61, %v5598_v24  ;;  %v7195_v50 = vrot.slane %v7187_v53, %v10703_v17  ;;  %v7202_v51 = vrot.slane %v7188_v25, %v10703_v17 }
 0x448   : > { %v7211_v30 = vrot.slane %v7203_v63, %v10703_v17  ;;  %v7218_v3 = vrot.slane %v7204_v44, %v10703_v17  ;;  %v9709_v55 = vpack.c.bf16 %v5599_v7, %v5599_v7  ;;  %v9725_v45 = vpack.c.bf16 %v5600_v13, %v5600_v13  ;;  %v12278_v63 = vpop.permute.xlu1 %3817  ;;  %v12280_v44 = vpop.permute.xlu0 %6543 }
 0x449   : > { %v9741_v23 = vpack.c.bf16 %v5601_v6, %v5601_v6  ;;  %v9757_v43 = vpack.c.bf16 %v5602_v10, %v5602_v10  ;;  %v8243_v41 = vcombine.low %v7195_v50, %v7202_v51  ;;  %v9550_v28 = vcombine.high %v7195_v50, %v7202_v51 }
 0x44a   : > { %v8259_v0 = vcombine.low %v7211_v30, %v7218_v3  ;;  %v9551_v27 = vcombine.high %v7211_v30, %v7218_v3  ;;  %6276 = vst.msk [vmem:[%s11560_s25 + $0x24] sm:$0xf] %vm3490_vm1, %v9709_v55  ;;  %6292 = vst.msk [vmem:[%s11560_s25 + $0x64] sm:$0xf] %vm3490_vm1, %v9725_v45  ;;  %v7239_v9 = vcombine.low %v12164_v8, %v12202_v16 }
 0x44b   : > { %6308 = vst.msk [vmem:[%s11560_s25 + $0xa4] sm:$0xf] %vm3490_vm1, %v9741_v23  ;;  %6324 = vst.msk [vmem:[%s11560_s25 + $0xe4] sm:$0xf] %vm3490_vm1, %v9757_v43  ;;  %v7240_v12 = vcombine.high %v12164_v8, %v12202_v16  ;;  %v8250_v48 = vrot.slane %v8243_v41, %v10689_v46  ;;  %v8258_v22 = vrot.slane %v9550_v28, %v10689_v46 }
 0x44c   : > { %v8266_v20 = vrot.slane %v8259_v0, %v10689_v46  ;;  %v8274_v14 = vrot.slane %v9551_v27, %v10689_v46  ;;  %v7247_v5 = vrot.slane %v7239_v9, %v10689_v46  ;;  %v4787_v35 = vcombine.low %v10568_v60, %v12204_v47 }
 0x44d   : > { %v7254_v1 = vrot.slane %v7240_v12, %v10689_v46  ;;  %v4788_v8 = vcombine.high %v10568_v60, %v12204_v47  ;;  %v8275_v16 = vcombine.low %v8250_v48, %v8258_v22  ;;  %v8276_v38 = vcombine.high %v8250_v48, %v8258_v22 }
 0x44e   : > { %v8291_v11 = vcombine.low %v8266_v20, %v8274_v14  ;;  %v8292_v36 = vcombine.high %v8266_v20, %v8274_v14  ;;  %v7255_v57 = vcombine.low %v7231_v21, %v7247_v5  ;;  %v7256_v59 = vcombine.high %v7231_v21, %v7247_v5  ;;  %v12306_v5 = vpop.permute.xlu1 %6497 }
 0x44f   : > { %v7271_v40 = vcombine.low %v7238_v37, %v7254_v1  ;;  %v7272_v19 = vcombine.high %v7238_v37, %v7254_v1  ;;  %v8283_v52 = vrot.slane %v8275_v16, %v10703_v17  ;;  %v8290_v33 = vrot.slane %v8276_v38, %v10703_v17  ;;  %v12308_v1 = vpop.permute.xlu0 %3715 }
 0x450   : > { %v8299_v49 = vrot.slane %v8291_v11, %v10703_v17  ;;  %v8306_v34 = vrot.slane %v8292_v36, %v10703_v17  ;;  %v7263_v54 = vrot.slane %v7255_v57, %v10703_v17  ;;  %v7270_v60 = vrot.slane %v7256_v59, %v10703_v17 }
 0x451   : > { %v7279_v47 = vrot.slane %v7271_v40, %v10703_v17  ;;  %v7286_v61 = vrot.slane %v7272_v19, %v10703_v17  ;;  %v4795_v41 = vrot.slane %v4787_v35, %v10689_v46  ;;  %v4802_v28 = vrot.slane %v4788_v8, %v10689_v46 }
 0x452   : > { %v8307_v39 = vcombine.low %v8283_v52, %v8299_v49  ;;  %v8308_v24 = vcombine.high %v8283_v52, %v8299_v49  ;;  %v8309_v53 = vcombine.low %v8290_v33, %v8306_v34  ;;  %v8310_v25 = vcombine.high %v8290_v33, %v8306_v34 }
 0x453   : > { %v8311_v7 = vcombine.low %v7263_v54, %v7270_v60  ;;  %v9552_v13 = vcombine.high %v7263_v54, %v7270_v60  ;;  %v8327_v6 = vcombine.low %v7279_v47, %v7286_v61  ;;  %v9553_v10 = vcombine.high %v7279_v47, %v7286_v61 }
 0x454   : > { %v9772_v50 = vpack.c.bf16 %v8307_v39, %v8307_v39  ;;  %v9788_v51 = vpack.c.bf16 %v8308_v24, %v8308_v24  ;;  %v9804_v30 = vpack.c.bf16 %v8309_v53, %v8309_v53  ;;  %v9820_v3 = vpack.c.bf16 %v8310_v25, %v8310_v25  ;;  %v12318_v53 = vpop.permute.xlu1 %6545  ;;  %v12320_v25 = vpop.permute.xlu0 %3763 }
 0x455   : > { %v8318_v55 = vrot.slane %v8311_v7, %v10689_v46  ;;  %v8326_v45 = vrot.slane %v9552_v13, %v10689_v46  ;;  %v8334_v23 = vrot.slane %v8327_v6, %v10689_v46  ;;  %v8342_v43 = vrot.slane %v9553_v10, %v10689_v46 }
 0x456   : > { %9051 = vst.msk [vmem:[%s11626_s28 + $0x20] sm:$0xf] %vm3490_vm1, %v9772_v50  ;;  %9067 = vst.msk [vmem:[%s11626_s28 + $0x60] sm:$0xf] %vm3490_vm1, %v9788_v51  ;;  %v4803_v0 = vcombine.low %v12192_v56, %v12236_v15  ;;  %v4804_v27 = vcombine.high %v12192_v56, %v12236_v15  ;;  %v4855_v48 = vcombine.low %v10574_v4, %v12260_v62 }
 0x457   : > { %9083 = vst.msk [vmem:[%s11626_s28 + $0xa0] sm:$0xf] %vm3490_vm1, %v9804_v30  ;;  %9099 = vst.msk [vmem:[%s11626_s28 + $0xe0] sm:$0xf] %vm3490_vm1, %v9820_v3  ;;  %v8343_v21 = vcombine.low %v8318_v55, %v8326_v45  ;;  %v8344_v37 = vcombine.high %v8318_v55, %v8326_v45  ;;  %v8359_v9 = vcombine.low %v8334_v23, %v8342_v43 }
 0x458   : > { %v8360_v12 = vcombine.high %v8334_v23, %v8342_v43  ;;  %v4856_v22 = vcombine.high %v10574_v4, %v12260_v62  ;;  %v4811_v20 = vrot.slane %v4803_v0, %v10689_v46  ;;  %v4818_v14 = vrot.slane %v4804_v27, %v10689_v46 }
 0x459   : > { %v8351_v56 = vrot.slane %v8343_v21, %v10703_v17  ;;  %v8358_v15 = vrot.slane %v8344_v37, %v10703_v17  ;;  %v8367_v35 = vrot.slane %v8359_v9, %v10703_v17  ;;  %v4863_v7 = vrot.slane %v4855_v48, %v10689_v46 }
 0x45a   : > { %v8374_v8 = vrot.slane %v8360_v12, %v10703_v17  ;;  %v4819_v16 = vcombine.low %v4795_v41, %v4811_v20  ;;  %v4820_v38 = vcombine.high %v4795_v41, %v4811_v20  ;;  %v4835_v11 = vcombine.low %v4802_v28, %v4818_v14  ;;  %v12350_v20 = vpop.permute.xlu1 %3717 }
 0x45b   : > { %v4836_v4 = vcombine.high %v4802_v28, %v4818_v14  ;;  %v8375_v62 = vcombine.low %v8351_v56, %v8367_v35  ;;  %v8376_v36 = vcombine.high %v8351_v56, %v8367_v35  ;;  %v4870_v13 = vrot.slane %v4856_v22, %v10689_v46  ;;  %v3812_v14 = vpop.permute.xlu0 %3811 }
 0x45c   : > { %v8377_v57 = vcombine.low %v8358_v15, %v8374_v8  ;;  %v8378_v59 = vcombine.high %v8358_v15, %v8374_v8  ;;  %v4827_v40 = vrot.slane %v4819_v16, %v10703_v17  ;;  %v4834_v19 = vrot.slane %v4820_v38, %v10703_v17 }
 0x45d   : > { %v4843_v52 = vrot.slane %v4835_v11, %v10703_v17  ;;  %v4850_v33 = vrot.slane %v4836_v4, %v10703_v17  ;;  %v9773_v49 = vpack.c.bf16 %v8375_v62, %v8375_v62  ;;  %v9789_v34 = vpack.c.bf16 %v8376_v36, %v8376_v36 }
 0x45e   : > { %v9805_v54 = vpack.c.bf16 %v8377_v57, %v8377_v57  ;;  %v9821_v60 = vpack.c.bf16 %v8378_v59, %v8378_v59  ;;  %v5875_v47 = vcombine.low %v4827_v40, %v4834_v19  ;;  %v9455_v61 = vcombine.high %v4827_v40, %v4834_v19 }
 0x45f   : > { %v5891_v39 = vcombine.low %v4843_v52, %v4850_v33  ;;  %v9456_v24 = vcombine.high %v4843_v52, %v4850_v33  ;;  %9052 = vst.msk [vmem:[%s11626_s28 + $0x24] sm:$0xf] %vm3490_vm1, %v9773_v49  ;;  %9068 = vst.msk [vmem:[%s11626_s28 + $0x64] sm:$0xf] %vm3490_vm1, %v9789_v34  ;;  %v4871_v6 = vcombine.low %v12234_v58, %v12278_v63 }
 0x460   : > { %9084 = vst.msk [vmem:[%s11626_s28 + $0xa4] sm:$0xf] %vm3490_vm1, %v9805_v54  ;;  %9100 = vst.msk [vmem:[%s11626_s28 + $0xe4] sm:$0xf] %vm3490_vm1, %v9821_v60  ;;  %v4872_v10 = vcombine.high %v12234_v58, %v12278_v63  ;;  %v5882_v50 = vrot.slane %v5875_v47, %v10689_v46  ;;  %v5890_v51 = vrot.slane %v9455_v61, %v10689_v46 }
 0x461   : > { %v5898_v30 = vrot.slane %v5891_v39, %v10689_v46  ;;  %v5906_v3 = vrot.slane %v9456_v24, %v10689_v46  ;;  %v4879_v55 = vrot.slane %v4871_v6, %v10689_v46  ;;  %v7563_v23 = vcombine.low %v10544_v18, %v12280_v44  ;;  %v3766_v39 = vpop.permute.xlu1 %3765  ;;  %v12378_v24 = vpop.permute.xlu0 %6491 }
 0x462   : > { %v4886_v45 = vrot.slane %v4872_v10, %v10689_v46  ;;  %v7564_v43 = vcombine.high %v10544_v18, %v12280_v44  ;;  %v5907_v41 = vcombine.low %v5882_v50, %v5890_v51  ;;  %v5908_v58 = vcombine.high %v5882_v50, %v5890_v51 }
 0x463   : > { %v5923_v63 = vcombine.low %v5898_v30, %v5906_v3  ;;  %v5924_v28 = vcombine.high %v5898_v30, %v5906_v3  ;;  %v4887_v0 = vcombine.low %v4863_v7, %v4879_v55  ;;  %v4888_v27 = vcombine.high %v4863_v7, %v4879_v55 }
 0x464   : > { %v4903_v21 = vcombine.low %v4870_v13, %v4886_v45  ;;  %v4904_v37 = vcombine.high %v4870_v13, %v4886_v45  ;;  %v5915_v9 = vrot.slane %v5907_v41, %v10703_v17  ;;  %v5922_v12 = vrot.slane %v5908_v58, %v10703_v17 }
 0x465   : > { %v5931_v48 = vrot.slane %v5923_v63, %v10703_v17  ;;  %v5938_v22 = vrot.slane %v5924_v28, %v10703_v17  ;;  %v4895_v18 = vrot.slane %v4887_v0, %v10703_v17  ;;  %v4902_v44 = vrot.slane %v4888_v27, %v10703_v17 }
 0x466   : > { %v4911_v56 = vrot.slane %v4903_v21, %v10703_v17  ;;  %v4918_v15 = vrot.slane %v4904_v37, %v10703_v17  ;;  %v12369_v54 = vrot.slane %v7563_v23, %v10689_v46  ;;  %v12372_v60 = vrot.slane %v7564_v43, %v10689_v46 }
 0x467   : > { %v5939_v35 = vcombine.low %v5915_v9, %v5931_v48  ;;  %v5940_v8 = vcombine.high %v5915_v9, %v5931_v48  ;;  %v5941_v16 = vcombine.low %v5922_v12, %v5938_v22  ;;  %v5942_v38 = vcombine.high %v5922_v12, %v5938_v22  ;;  %v3814_v12 = vpop.permute.xlu1 %3813  ;;  %v6540_v48 = vpop.permute.xlu0 %6539 }
 0x468   : > { %v5943_v11 = vcombine.low %v4895_v18, %v4902_v44  ;;  %v9457_v4 = vcombine.high %v4895_v18, %v4902_v44  ;;  %v5959_v62 = vcombine.low %v4911_v56, %v4918_v15  ;;  %v9458_v36 = vcombine.high %v4911_v56, %v4918_v15 }
 0x469   : > { %v9714_v57 = vpack.c.bf16 %v5939_v35, %v5939_v35  ;;  %v9730_v59 = vpack.c.bf16 %v5940_v8, %v5940_v8  ;;  %v9746_v40 = vpack.c.bf16 %v5941_v16, %v5941_v16  ;;  %v9762_v19 = vpack.c.bf16 %v5942_v38, %v5942_v38 }
 0x46a   : > { %v5950_v52 = vrot.slane %v5943_v11, %v10689_v46  ;;  %v5958_v33 = vrot.slane %v9457_v4, %v10689_v46  ;;  %v5966_v49 = vrot.slane %v5959_v62, %v10689_v46  ;;  %v5974_v34 = vrot.slane %v9458_v36, %v10689_v46 }
 0x46b   : > { %6281 = vst.msk [vmem:[%s11560_s25 + $0x38] sm:$0xf] %vm3490_vm1, %v9714_v57  ;;  %6297 = vst.msk [vmem:[%s11560_s25 + $0x78] sm:$0xf] %vm3490_vm1, %v9730_v59  ;;  %v4651_v47 = vcombine.low %v12636_v26, %v12320_v25  ;;  %v4652_v61 = vcombine.high %v12636_v26, %v12320_v25  ;;  %v7631_v50 = vcombine.low %v10550_v31, %v12318_v53 }
 0x46c   : > { %6313 = vst.msk [vmem:[%s11560_s25 + $0xb8] sm:$0xf] %vm3490_vm1, %v9746_v40  ;;  %6329 = vst.msk [vmem:[%s11560_s25 + $0xf8] sm:$0xf] %vm3490_vm1, %v9762_v19  ;;  %v5975_v7 = vcombine.low %v5950_v52, %v5958_v33  ;;  %v5976_v13 = vcombine.high %v5950_v52, %v5958_v33  ;;  %v5991_v6 = vcombine.low %v5966_v49, %v5974_v34 }
 0x46d   : > { %v5992_v10 = vcombine.high %v5966_v49, %v5974_v34  ;;  %v7632_v51 = vcombine.high %v10550_v31, %v12318_v53  ;;  %v4659_v30 = vrot.slane %v4651_v47, %v10689_v46  ;;  %v4666_v3 = vrot.slane %v4652_v61, %v10689_v46 }
 0x46e   : > { %v5983_v55 = vrot.slane %v5975_v7, %v10703_v17  ;;  %v5990_v26 = vrot.slane %v5976_v13, %v10703_v17  ;;  %v5999_v25 = vrot.slane %v5991_v6, %v10703_v17  ;;  %v4719_v23 = vcombine.low %v12637_v42, %v3766_v39 }
 0x46f   : > { %v6006_v45 = vrot.slane %v5992_v10, %v10703_v17  ;;  %v4720_v43 = vcombine.high %v12637_v42, %v3766_v39  ;;  %v4667_v41 = vcombine.low %v12308_v1, %v3812_v14  ;;  %v4668_v58 = vcombine.high %v12308_v1, %v3812_v14 }
 0x470   : > { %v6007_v63 = vcombine.low %v5983_v55, %v5999_v25  ;;  %v6008_v28 = vcombine.high %v5983_v55, %v5999_v25  ;;  %v4727_v21 = vrot.slane %v4719_v23, %v10689_v46  ;;  %v4735_v8 = vcombine.low %v12350_v20, %v3814_v12 }
 0x471   : > { %v6009_v0 = vcombine.low %v5990_v26, %v6006_v45  ;;  %v6010_v27 = vcombine.high %v5990_v26, %v6006_v45  ;;  %v4734_v37 = vrot.slane %v4720_v43, %v10689_v46  ;;  %v4675_v9 = vrot.slane %v4667_v41, %v10689_v46 }
 0x472   : > { %v4682_v42 = vrot.slane %v4668_v58, %v10689_v46  ;;  %v9715_v22 = vpack.c.bf16 %v6007_v63, %v6007_v63  ;;  %v9731_v1 = vpack.c.bf16 %v6008_v28, %v6008_v28  ;;  %v4736_v16 = vcombine.high %v12350_v20, %v3814_v12 }
 0x473   : > { %v9747_v14 = vpack.c.bf16 %v6009_v0, %v6009_v0  ;;  %v9763_v18 = vpack.c.bf16 %v6010_v27, %v6010_v27  ;;  %v4683_v44 = vcombine.low %v4659_v30, %v4675_v9  ;;  %v4684_v56 = vcombine.high %v4659_v30, %v4675_v9  ;;  %v12426_v30 = vpop.permute.xlu1 %6493 }
 0x474   : > { %v4699_v15 = vcombine.low %v4666_v3, %v4682_v42  ;;  %v4700_v35 = vcombine.high %v4666_v3, %v4682_v42  ;;  %6282 = vst.msk [vmem:[%s11560_s25 + $0x3c] sm:$0xf] %vm3490_vm1, %v9715_v22  ;;  %6298 = vst.msk [vmem:[%s11560_s25 + $0x7c] sm:$0xf] %vm3490_vm1, %v9731_v1  ;;  %v7427_v38 = vcombine.low %v12638_v29, %v6540_v48 }
 0x475   : > { %6314 = vst.msk [vmem:[%s11560_s25 + $0xbc] sm:$0xf] %vm3490_vm1, %v9747_v14  ;;  %6330 = vst.msk [vmem:[%s11560_s25 + $0xfc] sm:$0xf] %vm3490_vm1, %v9763_v18  ;;  %v7428_v11 = vcombine.high %v12638_v29, %v6540_v48  ;;  %v4691_v4 = vrot.slane %v4683_v44, %v10703_v17  ;;  %v4698_v62 = vrot.slane %v4684_v56, %v10703_v17 }
 0x476   : > { %v4707_v36 = vrot.slane %v4699_v15, %v10703_v17  ;;  %v4714_v57 = vrot.slane %v4700_v35, %v10703_v17  ;;  %v4743_v59 = vrot.slane %v4735_v8, %v10689_v46  ;;  %v4750_v40 = vrot.slane %v4736_v16, %v10689_v46  ;;  %v6588_v15 = vpop.permute.xlu0 %6587 }
 0x477   : > { %v12417_v19 = vrot.slane %v7427_v38, %v10689_v46  ;;  %v12420_v20 = vrot.slane %v7428_v11, %v10689_v46  ;;  %v5739_v52 = vcombine.low %v4691_v4, %v4698_v62  ;;  %v9451_v29 = vcombine.high %v4691_v4, %v4698_v62  ;;  %v6542_v56 = vpop.permute.xlu1 %6541 }
 0x478   : > { %v5755_v33 = vcombine.low %v4707_v36, %v4714_v57  ;;  %v9452_v49 = vcombine.high %v4707_v36, %v4714_v57  ;;  %v4751_v34 = vcombine.low %v4727_v21, %v4743_v59  ;;  %v4752_v47 = vcombine.high %v4727_v21, %v4743_v59 }
 0x479   : > { %v4767_v61 = vcombine.low %v4734_v37, %v4750_v40  ;;  %v4768_v39 = vcombine.high %v4734_v37, %v4750_v40  ;;  %v5746_v7 = vrot.slane %v5739_v52, %v10689_v46  ;;  %v5754_v13 = vrot.slane %v9451_v29, %v10689_v46 }
 0x47a   : > { %v5762_v6 = vrot.slane %v5755_v33, %v10689_v46  ;;  %v5770_v10 = vrot.slane %v9452_v49, %v10689_v46  ;;  %v4759_v3 = vrot.slane %v4751_v34, %v10703_v17  ;;  %v4766_v55 = vrot.slane %v4752_v47, %v10703_v17 }
 0x47b   : > { %v4775_v26 = vrot.slane %v4767_v61, %v10703_v17  ;;  %v4782_v25 = vrot.slane %v4768_v39, %v10703_v17  ;;  %v5771_v45 = vcombine.low %v5746_v7, %v5754_v13  ;;  %v5772_v23 = vcombine.high %v5746_v7, %v5754_v13 }
 0x47c   : > { %v5787_v43 = vcombine.low %v5762_v6, %v5770_v10  ;;  %v5788_v41 = vcombine.high %v5762_v6, %v5770_v10  ;;  %v5807_v58 = vcombine.low %v4759_v3, %v4766_v55  ;;  %v9453_v63 = vcombine.high %v4759_v3, %v4766_v55  ;;  %v6590_v3 = vpop.permute.xlu1 %6589  ;;  %v6592_v55 = vpop.permute.xlu0 %6591 }
 0x47d   : > { %v5823_v28 = vcombine.low %v4775_v26, %v4782_v25  ;;  %v9454_v0 = vcombine.high %v4775_v26, %v4782_v25  ;;  %v5779_v27 = vrot.slane %v5771_v45, %v10703_v17  ;;  %v5786_v21 = vrot.slane %v5772_v23, %v10703_v17 }
 0x47e   : > { %v5795_v37 = vrot.slane %v5787_v43, %v10703_v17  ;;  %v5802_v9 = vrot.slane %v5788_v41, %v10703_v17  ;;  %v5814_v42 = vrot.slane %v5807_v58, %v10689_v46  ;;  %v5822_v12 = vrot.slane %v9453_v63, %v10689_v46 }
 0x47f   : > { %v5830_v48 = vrot.slane %v5823_v28, %v10689_v46  ;;  %v5838_v22 = vrot.slane %v9454_v0, %v10689_v46  ;;  %v7495_v29 = vcombine.low %v12639_v32, %v6542_v56  ;;  %v7496_v33 = vcombine.high %v12639_v32, %v6542_v56 }
 0x480   : > { %v5803_v1 = vcombine.low %v5779_v27, %v5795_v37  ;;  %v5804_v14 = vcombine.high %v5779_v27, %v5795_v37  ;;  %v5805_v18 = vcombine.low %v5786_v21, %v5802_v9  ;;  %v5806_v44 = vcombine.high %v5786_v21, %v5802_v9 }
 0x481   : > { %v5839_v35 = vcombine.low %v5814_v42, %v5822_v12  ;;  %v5840_v8 = vcombine.high %v5814_v42, %v5822_v12  ;;  %v5855_v16 = vcombine.low %v5830_v48, %v5838_v22  ;;  %v5856_v38 = vcombine.high %v5830_v48, %v5838_v22 }
 0x482   : > { %v9712_v11 = vpack.c.bf16 %v5803_v1, %v5803_v1  ;;  %v9728_v4 = vpack.c.bf16 %v5804_v14, %v5804_v14  ;;  %v9744_v62 = vpack.c.bf16 %v5805_v18, %v5805_v18  ;;  %v9760_v36 = vpack.c.bf16 %v5806_v44, %v5806_v44 }
 0x483   : > { %v5847_v57 = vrot.slane %v5839_v35, %v10703_v17  ;;  %v5854_v59 = vrot.slane %v5840_v8, %v10703_v17  ;;  %v5863_v40 = vrot.slane %v5855_v16, %v10703_v17  ;;  %v5870_v52 = vrot.slane %v5856_v38, %v10703_v17 }
 0x484   : > { %6279 = vst.msk [vmem:[%s11560_s25 + $0x30] sm:$0xf] %vm3490_vm1, %v9712_v11  ;;  %6295 = vst.msk [vmem:[%s11560_s25 + $0x70] sm:$0xf] %vm3490_vm1, %v9728_v4  ;;  %v7443_v49 = vcombine.low %v12378_v24, %v6588_v15  ;;  %v7444_v34 = vcombine.high %v12378_v24, %v6588_v15  ;;  %v7503_v13 = vrot.slane %v7495_v29, %v10689_v46 }
 0x485   : > { %6311 = vst.msk [vmem:[%s11560_s25 + $0xb0] sm:$0xf] %vm3490_vm1, %v9744_v62  ;;  %6327 = vst.msk [vmem:[%s11560_s25 + $0xf0] sm:$0xf] %vm3490_vm1, %v9760_v36  ;;  %v5871_v47 = vcombine.low %v5847_v57, %v5863_v40  ;;  %v5872_v61 = vcombine.high %v5847_v57, %v5863_v40  ;;  %v5873_v39 = vcombine.low %v5854_v59, %v5870_v52 }
 0x486   : > { %v5874_v7 = vcombine.high %v5854_v59, %v5870_v52  ;;  %v7510_v6 = vrot.slane %v7496_v33, %v10689_v46  ;;  %v7451_v10 = vrot.slane %v7443_v49, %v10689_v46  ;;  %v7458_v32 = vrot.slane %v7444_v34, %v10689_v46 }
 0x487   : > { %v9713_v26 = vpack.c.bf16 %v5871_v47, %v5871_v47  ;;  %v9729_v24 = vpack.c.bf16 %v5872_v61, %v5872_v61  ;;  %v9745_v25 = vpack.c.bf16 %v5873_v39, %v5873_v39  ;;  %v7511_v63 = vcombine.low %v12426_v30, %v6590_v3 }
 0x488   : > { %v9761_v45 = vpack.c.bf16 %v5874_v7, %v5874_v7  ;;  %v7459_v23 = vcombine.low %v12417_v19, %v7451_v10  ;;  %v7460_v43 = vcombine.high %v12417_v19, %v7451_v10  ;;  %v7475_v41 = vcombine.low %v12420_v20, %v7458_v32 }
 0x489   : > { %v7476_v58 = vcombine.high %v12420_v20, %v7458_v32  ;;  %6280 = vst.msk [vmem:[%s11560_s25 + $0x34] sm:$0xf] %vm3490_vm1, %v9713_v26  ;;  %6296 = vst.msk [vmem:[%s11560_s25 + $0x74] sm:$0xf] %vm3490_vm1, %v9729_v24  ;;  %v7512_v28 = vcombine.high %v12426_v30, %v6590_v3  ;;  %v7579_v0 = vcombine.low %v12262_v2, %v6592_v55 }
 0x48a   : > { %6312 = vst.msk [vmem:[%s11560_s25 + $0xb4] sm:$0xf] %vm3490_vm1, %v9745_v25  ;;  %6328 = vst.msk [vmem:[%s11560_s25 + $0xf4] sm:$0xf] %vm3490_vm1, %v9761_v45  ;;  %v7580_v19 = vcombine.high %v12262_v2, %v6592_v55  ;;  %v7467_v27 = vrot.slane %v7459_v23, %v10703_v17  ;;  %v7474_v20 = vrot.slane %v7460_v43, %v10703_v17 }
 0x48b   : > { %v7483_v21 = vrot.slane %v7475_v41, %v10703_v17  ;;  %v7490_v37 = vrot.slane %v7476_v58, %v10703_v17  ;;  %v7519_v9 = vrot.slane %v7511_v63, %v10689_v46  ;;  %v7526_v42 = vrot.slane %v7512_v28, %v10689_v46 }
 0x48c   : > { %v12483_v12 = vrot.slane %v7579_v0, %v10689_v46  ;;  %v12486_v30 = vrot.slane %v7580_v19, %v10689_v46  ;;  %v8515_v48 = vcombine.low %v7467_v27, %v7474_v20  ;;  %v9558_v2 = vcombine.high %v7467_v27, %v7474_v20 }
 0x48d   : > { %v8531_v22 = vcombine.low %v7483_v21, %v7490_v37  ;;  %v9559_v1 = vcombine.high %v7483_v21, %v7490_v37  ;;  %v7527_v14 = vcombine.low %v7503_v13, %v7519_v9  ;;  %v7528_v18 = vcombine.high %v7503_v13, %v7519_v9 }
 0x48e   : > { %v7543_v44 = vcombine.low %v7510_v6, %v7526_v42  ;;  %v7544_v56 = vcombine.high %v7510_v6, %v7526_v42  ;;  %v8522_v15 = vrot.slane %v8515_v48, %v10689_v46  ;;  %v8530_v35 = vrot.slane %v9558_v2, %v10689_v46 }
 0x48f   : > { %v8538_v8 = vrot.slane %v8531_v22, %v10689_v46  ;;  %v8546_v16 = vrot.slane %v9559_v1, %v10689_v46  ;;  %v7535_v38 = vrot.slane %v7527_v14, %v10703_v17  ;;  %v7542_v11 = vrot.slane %v7528_v18, %v10703_v17  ;;  %v6594_v18 = vpop.permute.xlu1 %6593 }
 0x490   : > { %v7551_v4 = vrot.slane %v7543_v44, %v10703_v17  ;;  %v7558_v62 = vrot.slane %v7544_v56, %v10703_v17  ;;  %v8547_v36 = vcombine.low %v8522_v15, %v8530_v35  ;;  %v8548_v57 = vcombine.high %v8522_v15, %v8530_v35 }
 0x491   : > { %v8563_v59 = vcombine.low %v8538_v8, %v8546_v16  ;;  %v8564_v40 = vcombine.high %v8538_v8, %v8546_v16  ;;  %v8583_v52 = vcombine.low %v7535_v38, %v7542_v11  ;;  %v9560_v29 = vcombine.high %v7535_v38, %v7542_v11 }
 0x492   : > { %v8599_v33 = vcombine.low %v7551_v4, %v7558_v62  ;;  %v9561_v49 = vcombine.high %v7551_v4, %v7558_v62  ;;  %v8555_v34 = vrot.slane %v8547_v36, %v10703_v17  ;;  %v8562_v47 = vrot.slane %v8548_v57, %v10703_v17 }
 0x493   : > { %v8571_v61 = vrot.slane %v8563_v59, %v10703_v17  ;;  %v8578_v39 = vrot.slane %v8564_v40, %v10703_v17  ;;  %v8590_v7 = vrot.slane %v8583_v52, %v10689_v46  ;;  %v8598_v13 = vrot.slane %v9560_v29, %v10689_v46 }
 0x494   : > { %v8606_v6 = vrot.slane %v8599_v33, %v10689_v46  ;;  %v8614_v10 = vrot.slane %v9561_v49, %v10689_v46  ;;  %v7595_v20 = vcombine.low %v12369_v54, %v12483_v12  ;;  %v7596_v21 = vcombine.high %v12369_v54, %v12483_v12 }
 0x495   : > { %v8579_v32 = vcombine.low %v8555_v34, %v8571_v61  ;;  %v8580_v3 = vcombine.high %v8555_v34, %v8571_v61  ;;  %v8581_v55 = vcombine.low %v8562_v47, %v8578_v39  ;;  %v8582_v26 = vcombine.high %v8562_v47, %v8578_v39 }
 0x496   : > { %v8615_v24 = vcombine.low %v8590_v7, %v8598_v13  ;;  %v8616_v25 = vcombine.high %v8590_v7, %v8598_v13  ;;  %v8631_v45 = vcombine.low %v8606_v6, %v8614_v10  ;;  %v8632_v23 = vcombine.high %v8606_v6, %v8614_v10 }
 0x497   : > { %v9776_v43 = vpack.c.bf16 %v8579_v32, %v8579_v32  ;;  %v9792_v41 = vpack.c.bf16 %v8580_v3, %v8580_v3  ;;  %v9808_v58 = vpack.c.bf16 %v8581_v55, %v8581_v55  ;;  %v9824_v63 = vpack.c.bf16 %v8582_v26, %v8582_v26 }
 0x498   : > { %v8623_v28 = vrot.slane %v8615_v24, %v10703_v17  ;;  %v8630_v0 = vrot.slane %v8616_v25, %v10703_v17  ;;  %v8639_v19 = vrot.slane %v8631_v45, %v10703_v17  ;;  %v8646_v27 = vrot.slane %v8632_v23, %v10703_v17 }
 0x499   : > { %9055 = vst.msk [vmem:[%s11626_s28 + $0x30] sm:$0xf] %vm3490_vm1, %v9776_v43  ;;  %9071 = vst.msk [vmem:[%s11626_s28 + $0x70] sm:$0xf] %vm3490_vm1, %v9792_v41  ;;  %v7611_v37 = vcombine.low %v12372_v60, %v12486_v30  ;;  %v7612_v9 = vcombine.high %v12372_v60, %v12486_v30  ;;  %v7603_v1 = vrot.slane %v7595_v20, %v10703_v17 }
 0x49a   : > { %9087 = vst.msk [vmem:[%s11626_s28 + $0xb0] sm:$0xf] %vm3490_vm1, %v9808_v58  ;;  %9103 = vst.msk [vmem:[%s11626_s28 + $0xf0] sm:$0xf] %vm3490_vm1, %v9824_v63  ;;  %v8647_v42 = vcombine.low %v8623_v28, %v8639_v19  ;;  %v8648_v48 = vcombine.high %v8623_v28, %v8639_v19  ;;  %v8649_v2 = vcombine.low %v8630_v0, %v8646_v27 }
 0x49b   : > { %v8650_v22 = vcombine.high %v8630_v0, %v8646_v27  ;;  %v7610_v14 = vrot.slane %v7596_v21, %v10703_v17  ;;  %v7619_v54 = vrot.slane %v7611_v37, %v10703_v17  ;;  %v7626_v12 = vrot.slane %v7612_v9, %v10703_v17 }
 0x49c   : > { %v9777_v44 = vpack.c.bf16 %v8647_v42, %v8647_v42  ;;  %v9793_v56 = vpack.c.bf16 %v8648_v48, %v8648_v48  ;;  %v9809_v60 = vpack.c.bf16 %v8649_v2, %v8649_v2  ;;  %v7647_v38 = vcombine.low %v12306_v5, %v6594_v18 }
 0x49d   : > { %v9825_v30 = vpack.c.bf16 %v8650_v22, %v8650_v22  ;;  %v8651_v15 = vcombine.low %v7603_v1, %v7610_v14  ;;  %v9562_v35 = vcombine.high %v7603_v1, %v7610_v14  ;;  %v8667_v8 = vcombine.low %v7619_v54, %v7626_v12 }
 0x49e   : > { %v9563_v16 = vcombine.high %v7619_v54, %v7626_v12  ;;  %9056 = vst.msk [vmem:[%s11626_s28 + $0x34] sm:$0xf] %vm3490_vm1, %v9777_v44  ;;  %9072 = vst.msk [vmem:[%s11626_s28 + $0x74] sm:$0xf] %vm3490_vm1, %v9793_v56  ;;  %v7648_v11 = vcombine.high %v12306_v5, %v6594_v18  ;;  %v7639_v59 = vrot.slane %v7631_v50, %v10689_v46 }
 0x49f   : > { %9088 = vst.msk [vmem:[%s11626_s28 + $0xb4] sm:$0xf] %vm3490_vm1, %v9809_v60  ;;  %9104 = vst.msk [vmem:[%s11626_s28 + $0xf4] sm:$0xf] %vm3490_vm1, %v9825_v30  ;;  %v8658_v4 = vrot.slane %v8651_v15, %v10689_v46  ;;  %v8666_v62 = vrot.slane %v9562_v35, %v10689_v46  ;;  %v8674_v36 = vrot.slane %v8667_v8, %v10689_v46 }
 0x4a0   : > { %v8682_v57 = vrot.slane %v9563_v16, %v10689_v46  ;;  %v7646_v40 = vrot.slane %v7632_v51, %v10689_v46  ;;  %v7655_v5 = vrot.slane %v7647_v38, %v10689_v46  ;;  %v7662_v52 = vrot.slane %v7648_v11, %v10689_v46 }
 0x4a1   : > { %v8683_v29 = vcombine.low %v8658_v4, %v8666_v62  ;;  %v8684_v33 = vcombine.high %v8658_v4, %v8666_v62 }
 0x4a2   : > { %v8699_v49 = vcombine.low %v8674_v36, %v8682_v57  ;;  %v8700_v34 = vcombine.high %v8674_v36, %v8682_v57  ;;  %v7663_v47 = vcombine.low %v7639_v59, %v7655_v5  ;;  %v7664_v61 = vcombine.high %v7639_v59, %v7655_v5 }
 0x4a3   : > { %v7679_v39 = vcombine.low %v7646_v40, %v7662_v52  ;;  %v7680_v7 = vcombine.high %v7646_v40, %v7662_v52  ;;  %v8691_v13 = vrot.slane %v8683_v29, %v10703_v17  ;;  %v8698_v50 = vrot.slane %v8684_v33, %v10703_v17 }
 0x4a4   : > { %v8707_v6 = vrot.slane %v8699_v49, %v10703_v17  ;;  %v8714_v31 = vrot.slane %v8700_v34, %v10703_v17  ;;  %v7671_v53 = vrot.slane %v7663_v47, %v10703_v17  ;;  %v7678_v51 = vrot.slane %v7664_v61, %v10703_v17 }
 0x4a5   : > { %v7687_v10 = vrot.slane %v7679_v39, %v10703_v17  ;;  %v7694_v32 = vrot.slane %v7680_v7, %v10703_v17 }
 0x4a6   : > { %v8715_v3 = vcombine.low %v8691_v13, %v8707_v6  ;;  %v8716_v55 = vcombine.high %v8691_v13, %v8707_v6  ;;  %v8717_v26 = vcombine.low %v8698_v50, %v8714_v31  ;;  %v8718_v24 = vcombine.high %v8698_v50, %v8714_v31 }
 0x4a7   : > { %v8719_v25 = vcombine.low %v7671_v53, %v7678_v51  ;;  %v9564_v45 = vcombine.high %v7671_v53, %v7678_v51  ;;  %v8735_v23 = vcombine.low %v7687_v10, %v7694_v32  ;;  %v9565_v43 = vcombine.high %v7687_v10, %v7694_v32 }
 0x4a8   : > { %v9778_v41 = vpack.c.bf16 %v8715_v3, %v8715_v3  ;;  %v9794_v58 = vpack.c.bf16 %v8716_v55, %v8716_v55  ;;  %v9810_v63 = vpack.c.bf16 %v8717_v26, %v8717_v26  ;;  %v9826_v28 = vpack.c.bf16 %v8718_v24, %v8718_v24 }
 0x4a9   : > { %v8726_v0 = vrot.slane %v8719_v25, %v10689_v46  ;;  %v8734_v19 = vrot.slane %v9564_v45, %v10689_v46  ;;  %v8742_v27 = vrot.slane %v8735_v23, %v10689_v46  ;;  %v8750_v20 = vrot.slane %v9565_v43, %v10689_v46 }
 0x4aa   : > { %9057 = vst.msk [vmem:[%s11626_s28 + $0x38] sm:$0xf] %vm3490_vm1, %v9778_v41  ;;  %9073 = vst.msk [vmem:[%s11626_s28 + $0x78] sm:$0xf] %vm3490_vm1, %v9794_v58 }
 0x4ab   : > { %9089 = vst.msk [vmem:[%s11626_s28 + $0xb8] sm:$0xf] %vm3490_vm1, %v9810_v63  ;;  %9105 = vst.msk [vmem:[%s11626_s28 + $0xf8] sm:$0xf] %vm3490_vm1, %v9826_v28  ;;  %v8751_v21 = vcombine.low %v8726_v0, %v8734_v19  ;;  %v8752_v37 = vcombine.high %v8726_v0, %v8734_v19  ;;  %v8767_v9 = vcombine.low %v8742_v27, %v8750_v20 }
 0x4ac   : > { %v8768_v42 = vcombine.high %v8742_v27, %v8750_v20 }
 0x4ad   : > { %v8759_v48 = vrot.slane %v8751_v21, %v10703_v17  ;;  %v8766_v46 = vrot.slane %v8752_v37, %v10703_v17  ;;  %v8775_v2 = vrot.slane %v8767_v9, %v10703_v17 }
 0x4ae   : > { %v8782_v22 = vrot.slane %v8768_v42, %v10703_v17 }
 0x4af   : > { %v8783_v1 = vcombine.low %v8759_v48, %v8775_v2  ;;  %v8784_v14 = vcombine.high %v8759_v48, %v8775_v2 }
 0x4b0   : > { %v8785_v54 = vcombine.low %v8766_v46, %v8782_v22  ;;  %v8786_v12 = vcombine.high %v8766_v46, %v8782_v22 }
 0x4b1   : > { %v9779_v18 = vpack.c.bf16 %v8783_v1, %v8783_v1  ;;  %v9795_v44 = vpack.c.bf16 %v8784_v14, %v8784_v14 }
 0x4b2   : > { %v9811_v56 = vpack.c.bf16 %v8785_v54, %v8785_v54  ;;  %v9827_v60 = vpack.c.bf16 %v8786_v12, %v8786_v12 }
 0x4b3   : > { %9058 = vst.msk [vmem:[%s11626_s28 + $0x3c] sm:$0xf] %vm3490_vm1, %v9779_v18  ;;  %9074 = vst.msk [vmem:[%s11626_s28 + $0x7c] sm:$0xf] %vm3490_vm1, %v9795_v44 }
 0x4b4   : > { %9090 = vst.msk [vmem:[%s11626_s28 + $0xbc] sm:$0xf] %vm3490_vm1, %v9811_v56  ;;  %9106 = vst.msk [vmem:[%s11626_s28 + $0xfc] sm:$0xf] %vm3490_vm1, %v9827_v60 }
 0x4b5 PF: > { %s22_s19 = sadd.s32 1, %s10011_s19   ;;  %s12647_s17 = smov %s10007_s18 }
 0x4b6   : > { %p19_p5 = scmp.ge.s32.totalorder %s22_s19, 4   ;;  %s12648_s18 = smov %s12650_s20 }
 0x4b8   :  { %21 = sbr.rel (!%p19_p5) target bundleno = 2 (0x2), region = 110 }

// kernel: tpu_custom_call.1
= control target key start
LH: loop header
LB: loop body
LE: loop exit
PB: predicated region body
PF: predicated region fallthrough
CT: control target
= control target key end

     0   :  { %s10078_s17 = smov 0   ;;  %s10080_s18 = smov 0   ;;  %s12593_s0 = inlined_call_operand.vmem [shape: f32[2,128,32], index: 0, kind: input, shape index: {}]   ;;  %s12594_s1 = inlined_call_operand.vmem [shape: f32[1,32], index: 1, kind: input, shape index: {}]   ;;  %s12595_s2 = inlined_call_operand.vmem [shape: f32[1,32], index: 2, kind: input, shape index: {}]   ;;  %s12596_s3 = inlined_call_operand.vmem [shape: bf16[32,32], index: 3, kind: input, shape index: {}]   ;;  %s12597_s4 = inlined_call_operand.vmem [shape: f32[1,32], index: 4, kind: input, shape index: {}]   ;;  %s12598_s5 = inlined_call_operand.vmem [shape: bf16[32,32], index: 5, kind: input, shape index: {}]   ;;  %s12599_s6 = inlined_call_operand.vmem [shape: f32[1,32], index: 6, kind: input, shape index: {}]   ;;  %s12600_s7 = inlined_call_operand.vmem [shape: bf16[32,32], index: 7, kind: input, shape index: {}]   ;;  %s12601_s8 = inlined_call_operand.vmem [shape: f32[1,32], index: 8, kind: input, shape index: {}]   ;;  %s12602_s9 = inlined_call_operand.vmem [shape: bf16[2,4,128,8], index: 9, kind: output, shape index: {0}]   ;;  %s12603_s10 = inlined_call_operand.vmem [shape: bf16[2,4,128,8], index: 10, kind: output, shape index: {1}]   ;;  %s12604_s11 = inlined_call_operand.vmem [shape: bf16[2,4,128,8], index: 11, kind: output, shape index: {2}]  }
   0x1   :  { %s10082_s19 = smov 0  }
   0x2 LB: > { %s34_s20 = sadd.s32 1, %s10007_s18  ;;  %p9298_p0 = scmp.ge.s32.totalorder %s10011_s19, 1  ;;  %s10011_s19 = sphi %s10082_s19, %s22_s19   ;;  %s10007_s18 = sphi %s10080_s18, %s12648_s18   ;;  %s10003_s17 = sphi %s10078_s17, %s12647_s17  }
   0x3   : > { %p36_p1 = scmp.ge.s32.totalorder %s34_s20, 2  ;;  %p367_p2 = scmp.lt.s32.totalorder %s10011_s19, 3 }
   0x5   : > { %s12650_s20 = smov (%p36_p1, %s34_s20), 0  ;;  %p368_p3 = pnand %p9298_p0, %p367_p2 }
   0x7   : > { %371 = sbr.rel (%p368_p3) target bundleno = 1205 (0x4b5), region = 56 }
   0xe   : > { %p434_p4 = scmp.lt.s32.totalorder %s10003_s17, 1  ;;  %vm492_vm0 = vcmask 261120   ;;  %s10013_s28 = smov 120   ;;  %vm3490_vm1 = vcmask 60416  }
   0xf   : > { %s10014_s29 = smov 112   ;;  %s10015_s30 = smov 104  }
  0x10   : > { %s12652_s17 = smov (!%p434_p4, %s10003_s17), 1 }
  0x11   : > { %s9632_s21 = sshll.u32 %s12652_s17, 7  ;;  %s10788_s16 = sshll.u32 %s12652_s17, 8 }
  0x12   : > { %s10102_s24 = scalar_lea.vmem %s12593_s0, %s9632_s21  ;;  %s10804_s22 = scalar_lea.vmem %s12602_s9, %s10788_s16 }
  0x13   : > { %v474_v0 = vld [vmem:[%s10102_s24] sm:$0xff]  ;;  %v475_v2 = vld [vmem:[%s10102_s24 + $0x8] sm:$0xff]  ;;  %v476_v8 = vld [vmem:[%s10102_s24 + $0x10] sm:$0xff]  ;;  %s11560_s25 = scalar_lea.vmem %s12603_s10, %s10788_s16 }
  0x14   : > { %v482_v1 = vld [vmem:[%s10102_s24 + $0x40] sm:$0xff]  ;;  %v493_v3 = vsel %vm492_vm0, %v474_v0, 0.0  ;;  %v483_v5 = vld [vmem:[%s10102_s24 + $0x48] sm:$0xff]  ;;  %v496_v6 = vsel %vm492_vm0, %v475_v2, 0.0  ;;  %v477_v9 = vld [vmem:[%s10102_s24 + $0x18] sm:$0xff]  ;;  %v499_v10 = vsel %vm492_vm0, %v476_v8, 0.0 }
  0x15   : > { %v517_v4 = vsel %vm492_vm0, %v482_v1, 0.0  ;;  %494 = vadd.xlane.f32.xlu0 %v493_v3  ;;  %v520_v7 = vsel %vm492_vm0, %v483_v5, 0.0  ;;  %v502_v11 = vsel %vm492_vm0, %v477_v9, 0.0  ;;  %v10117_v12 = vld [vmem:[%s10102_s24 + $0x50] sm:$0xff]  ;;  %v10120_v13 = vld [vmem:[%s10102_s24 + $0x58] sm:$0xff]  ;;  %v10127_v16 = vld [vmem:[%s10102_s24 + $0x20] sm:$0xff] }
  0x16   : > { %518 = vadd.xlane.f32.xlu1 %v517_v4  ;;  %v523_v14 = vsel %vm492_vm0, %v10117_v12, 0.0  ;;  %v526_v15 = vsel %vm492_vm0, %v10120_v13, 0.0  ;;  %v10130_v17 = vld [vmem:[%s10102_s24 + $0x28] sm:$0xff]  ;;  %v505_v18 = vsel %vm492_vm0, %v10127_v16, 0.0  ;;  %v10137_v20 = vld [vmem:[%s10102_s24 + $0x60] sm:$0xff]  ;;  %v10147_v24 = vld [vmem:[%s10102_s24 + $0x30] sm:$0xff] }
  0x17   : > { %v508_v19 = vsel %vm492_vm0, %v10130_v17, 0.0  ;;  %v10140_v21 = vld [vmem:[%s10102_s24 + $0x68] sm:$0xff]  ;;  %v529_v22 = vsel %vm492_vm0, %v10137_v20, 0.0  ;;  %v10150_v25 = vld [vmem:[%s10102_s24 + $0x38] sm:$0xff]  ;;  %v511_v26 = vsel %vm492_vm0, %v10147_v24, 0.0  ;;  %v10157_v28 = vld [vmem:[%s10102_s24 + $0x70] sm:$0xff] }
  0x18   : > { %v532_v23 = vsel %vm492_vm0, %v10140_v21, 0.0  ;;  %v514_v27 = vsel %vm492_vm0, %v10150_v25, 0.0  ;;  %v10160_v29 = vld [vmem:[%s10102_s24 + $0x78] sm:$0xff]  ;;  %v535_v30 = vsel %vm492_vm0, %v10157_v28, 0.0 }
  0x19   : > { %497 = vadd.xlane.f32.xlu0 %v496_v6  ;;  %v538_v31 = vsel %vm492_vm0, %v10160_v29, 0.0 }
  0x1a   : > { %521 = vadd.xlane.f32.xlu1 %v520_v7 }
  0x1d   : > { %500 = vadd.xlane.f32.xlu0 %v499_v10 }
  0x1e   : > { %503 = vadd.xlane.f32.xlu1 %v502_v11 }
  0x21   : > { %524 = vadd.xlane.f32.xlu0 %v523_v14 }
  0x22   : > { %527 = vadd.xlane.f32.xlu1 %v526_v15 }
  0x25   : > { %506 = vadd.xlane.f32.xlu0 %v505_v18 }
  0x26   : > { %509 = vadd.xlane.f32.xlu1 %v508_v19 }
  0x29   : > { %530 = vadd.xlane.f32.xlu0 %v529_v22 }
  0x2a   : > { %533 = vadd.xlane.f32.xlu1 %v532_v23 }
  0x2d   : > { %512 = vadd.xlane.f32.xlu0 %v511_v26 }
  0x2e   : > { %515 = vadd.xlane.f32.xlu1 %v514_v27 }
  0x31   : > { %536 = vadd.xlane.f32.xlu0 %v535_v30 }
  0x32   : > { %539 = vadd.xlane.f32.xlu1 %v538_v31 }
  0xa2   : > { %v495_v32 = vpop.xlane.xlu0 %494 }
  0xa3   : > { %v519_v33 = vpop.xlane.xlu1 %518  ;;  %v542_v34 = vmul.f32 0.03125, %v495_v32 }
  0xa4   : > { %v550_v35 = vmul.f32 0.03125, %v519_v33 }
  0xa5   : > { %v10166_v36 = vsub.f32 %v474_v0, %v542_v34 }
  0xa6   : > { %v10168_v37 = vsub.f32 %v482_v1, %v550_v35  ;;  %v498_v38 = vpop.xlane.xlu0 %497 }
  0xa7   : > { %v522_v39 = vpop.xlane.xlu1 %521  ;;  %v543_v40 = vmul.f32 0.03125, %v498_v38  ;;  %v574_v42 = vmul.f32 %v10166_v36, %v10166_v36 }
  0xa8   : > { %v551_v41 = vmul.f32 0.03125, %v522_v39  ;;  %v582_v43 = vmul.f32 %v10168_v37, %v10168_v37 }
  0xa9   : > { %v10174_v44 = vsub.f32 %v475_v2, %v543_v40  ;;  %v590_v46 = vsel %vm492_vm0, %v574_v42, 0.0 }
  0xaa   : > { %v10176_v45 = vsub.f32 %v483_v5, %v551_v41  ;;  %591 = vadd.xlane.f32.xlu0 %v590_v46  ;;  %v501_v47 = vpop.xlane.xlu0 %500  ;;  %v614_v49 = vsel %vm492_vm0, %v582_v43, 0.0 }
  0xab   : > { %v504_v48 = vpop.xlane.xlu1 %503  ;;  %v544_v50 = vmul.f32 0.03125, %v501_v47  ;;  %v575_v52 = vmul.f32 %v10174_v44, %v10174_v44 }
  0xac   : > { %v545_v51 = vmul.f32 0.03125, %v504_v48  ;;  %v583_v53 = vmul.f32 %v10176_v45, %v10176_v45 }
  0xad   : > { %v10184_v54 = vsub.f32 %v476_v8, %v544_v50  ;;  %v593_v56 = vsel %vm492_vm0, %v575_v52, 0.0 }
  0xae   : > { %v10186_v55 = vsub.f32 %v477_v9, %v545_v51  ;;  %615 = vadd.xlane.f32.xlu0 %v614_v49  ;;  %594 = vadd.xlane.f32.xlu1 %v593_v56  ;;  %v525_v57 = vpop.xlane.xlu0 %524  ;;  %v617_v59 = vsel %vm492_vm0, %v583_v53, 0.0  ;;  %v9952_v53 = vld [vmem:[%s12596_s3 + $0x8] sm:$0xff]   ;;  %v10265_v56 = vld [vmem:[%s12600_s7] sm:$0xff]  }
  0xaf   : > { %v528_v58 = vpop.xlane.xlu1 %527  ;;  %v552_v60 = vmul.f32 0.03125, %v525_v57  ;;  %v576_v62 = vmul.f32 %v10184_v54, %v10184_v54  ;;  %v10271_v57 = vld [vmem:[%s12598_s5] sm:$0xff]  }
  0xb0   : > { %v553_v61 = vmul.f32 0.03125, %v528_v58  ;;  %v577_v63 = vmul.f32 %v10186_v55, %v10186_v55 }
  0xb1   : > { %v10195_v0 = vsub.f32 %v10117_v12, %v552_v60  ;;  %v596_v2 = vsel %vm492_vm0, %v576_v62, 0.0 }
  0xb2   : > { %v10198_v1 = vsub.f32 %v10120_v13, %v553_v61  ;;  %618 = vadd.xlane.f32.xlu1 %v617_v59  ;;  %597 = vadd.xlane.f32.xlu0 %v596_v2  ;;  %v507_v3 = vpop.xlane.xlu0 %506  ;;  %v599_v5 = vsel %vm492_vm0, %v577_v63, 0.0 }
  0xb3   : > { %v510_v4 = vpop.xlane.xlu1 %509  ;;  %v546_v6 = vmul.f32 0.03125, %v507_v3  ;;  %v584_v8 = vmul.f32 %v10195_v0, %v10195_v0 }
  0xb4   : > { %v547_v7 = vmul.f32 0.03125, %v510_v4  ;;  %v585_v9 = vmul.f32 %v10198_v1, %v10198_v1 }
  0xb5   : > { %v10207_v10 = vsub.f32 %v10127_v16, %v546_v6  ;;  %v620_v12 = vsel %vm492_vm0, %v584_v8, 0.0 }
  0xb6   : > { %v10210_v11 = vsub.f32 %v10130_v17, %v547_v7  ;;  %600 = vadd.xlane.f32.xlu1 %v599_v5  ;;  %621 = vadd.xlane.f32.xlu0 %v620_v12  ;;  %v531_v13 = vpop.xlane.xlu0 %530  ;;  %v623_v15 = vsel %vm492_vm0, %v585_v9, 0.0 }
  0xb7   : > { %v534_v14 = vpop.xlane.xlu1 %533  ;;  %v554_v18 = vmul.f32 0.03125, %v531_v13  ;;  %v578_v22 = vmul.f32 %v10207_v10, %v10207_v10 }
  0xb8   : > { %v555_v19 = vmul.f32 0.03125, %v534_v14  ;;  %v579_v16 = vmul.f32 %v10210_v11, %v10210_v11 }
  0xb9   : > { %v10219_v23 = vsub.f32 %v10137_v20, %v554_v18  ;;  %v602_v26 = vsel %vm492_vm0, %v578_v22, 0.0 }
  0xba   : > { %v10222_v17 = vsub.f32 %v10140_v21, %v555_v19  ;;  %624 = vadd.xlane.f32.xlu1 %v623_v15  ;;  %603 = vadd.xlane.f32.xlu0 %v602_v26  ;;  %v513_v27 = vpop.xlane.xlu0 %512  ;;  %v605_v31 = vsel %vm492_vm0, %v579_v16, 0.0 }
  0xbb   : > { %v516_v30 = vpop.xlane.xlu1 %515  ;;  %v548_v32 = vmul.f32 0.03125, %v513_v27  ;;  %v586_v34 = vmul.f32 %v10219_v23, %v10219_v23 }
  0xbc   : > { %v549_v33 = vmul.f32 0.03125, %v516_v30  ;;  %v587_v20 = vmul.f32 %v10222_v17, %v10222_v17 }
  0xbd   : > { %v10231_v35 = vsub.f32 %v10147_v24, %v548_v32  ;;  %v626_v38 = vsel %vm492_vm0, %v586_v34, 0.0 }
  0xbe   : > { %v10234_v21 = vsub.f32 %v10150_v25, %v549_v33  ;;  %606 = vadd.xlane.f32.xlu1 %v605_v31  ;;  %627 = vadd.xlane.f32.xlu0 %v626_v38  ;;  %v537_v39 = vpop.xlane.xlu0 %536  ;;  %v629_v41 = vsel %vm492_vm0, %v587_v20, 0.0  ;;  %v10278_v33 = vld [vmem:[%s12594_s1] ss:$0 sm:$0xff] }
  0xbf   : > { %v540_v40 = vpop.xlane.xlu1 %539  ;;  %v556_v42 = vmul.f32 0.03125, %v537_v39  ;;  %v580_v46 = vmul.f32 %v10231_v35, %v10231_v35 }
  0xc0   : > { %v557_v43 = vmul.f32 0.03125, %v540_v40  ;;  %v581_v24 = vmul.f32 %v10234_v21, %v10234_v21 }
  0xc1   : > { %v10243_v47 = vsub.f32 %v10157_v28, %v556_v42  ;;  %v608_v48 = vsel %vm492_vm0, %v580_v46, 0.0 }
  0xc2   : > { %v10246_v25 = vsub.f32 %v10160_v29, %v557_v43  ;;  %630 = vadd.xlane.f32.xlu1 %v629_v41  ;;  %609 = vadd.xlane.f32.xlu0 %v608_v48  ;;  %v611_v49 = vsel %vm492_vm0, %v581_v24, 0.0  ;;  %v9951_v29 = vld [vmem:[%s12596_s3] sm:$0xff]  }
  0xc3   : > { %v588_v50 = vmul.f32 %v10243_v47, %v10243_v47  ;;  %9858 = vmatprep.subr.bf16.mxu0 %v9951_v29  ;;  %9918 = vmatprep.subr.bf16.mxu1 %v9951_v29  ;;  %v10285_v24 = vld [vmem:[%s12595_s2] ss:$0 sm:$0xff] }
  0xc4   : > { %v589_v51 = vmul.f32 %v10246_v25, %v10246_v25  ;;  %9859 = vmatpush3.bf16.msra.mxu0 %v9951_v29  ;;  %9920 = vmatpush3.bf16.msra.mxu1 %v9951_v29 }
  0xc5   : > { %v632_v52 = vsel %vm492_vm0, %v588_v50, 0.0  ;;  %9860 = vmatprep.subr.bf16.mxu0 %v9952_v53  ;;  %9919 = vmatprep.subr.bf16.mxu1 %v9952_v53 }
  0xc6   : > { %612 = vadd.xlane.f32.xlu1 %v611_v49  ;;  %633 = vadd.xlane.f32.xlu0 %v632_v52  ;;  %v635_v28 = vsel %vm492_vm0, %v589_v51, 0.0 }
  0xc8   : > { %9861 = vmatpush3.bf16.msra.mxu0 %v9952_v53  ;;  %9921 = vmatpush3.bf16.msra.mxu1 %v9952_v53 }
  0xc9   : > { %9898 = vmatprep.subr.bf16.mxu0 %v10265_v56  ;;  %9878 = vmatprep.subr.bf16.mxu1 %v10271_v57 }
  0xca   : > { %636 = vadd.xlane.f32.xlu1 %v635_v28 }
 0x137   : > { %v592_v58 = vpop.xlane.xlu0 %591 }
 0x138   : > { %v638_v59 = vmul.f32 0.03125, %v592_v58 }
 0x13a   : > { %v654_v60 = vadd.f32 1e-06, %v638_v59 }
 0x13b   : > { %v595_v61 = vpop.xlane.xlu1 %594  ;;  %v616_v62 = vpop.xlane.xlu0 %615 }
 0x13c   : > { %9957 = vrsqrt.f32 %v654_v60  ;;  %v639_v63 = vmul.f32 0.03125, %v595_v61  ;;  %v646_v2 = vmul.f32 0.03125, %v616_v62 }
 0x13e   : > { %v655_v3 = vadd.f32 1e-06, %v639_v63  ;;  %v662_v4 = vadd.f32 1e-06, %v646_v2 }
 0x13f   : > { %v619_v5 = vpop.xlane.xlu1 %618  ;;  %v598_v6 = vpop.xlane.xlu0 %597 }
 0x140   : > { %9959 = vrsqrt.f32 %v655_v3  ;;  %v647_v7 = vmul.f32 0.03125, %v619_v5  ;;  %v640_v8 = vmul.f32 0.03125, %v598_v6 }
 0x141   : > { %9961 = vrsqrt.f32 %v662_v4 }
 0x142   : > { %v663_v9 = vadd.f32 1e-06, %v647_v7  ;;  %v656_v12 = vadd.f32 1e-06, %v640_v8 }
 0x143   : > { %v601_v13 = vpop.xlane.xlu1 %600  ;;  %v622_v14 = vpop.xlane.xlu0 %621 }
 0x144   : > { %9963 = vrsqrt.f32 %v663_v9  ;;  %v641_v15 = vmul.f32 0.03125, %v601_v13  ;;  %v648_v18 = vmul.f32 0.03125, %v622_v14 }
 0x145   : > { %9965 = vrsqrt.f32 %v656_v12 }
 0x146   : > { %v9958_v19 = vpop.eup %9957  ;;  %v657_v22 = vadd.f32 1e-06, %v641_v15  ;;  %v664_v16 = vadd.f32 1e-06, %v648_v18 }
 0x147   : > { %v625_v26 = vpop.xlane.xlu1 %624  ;;  %v604_v27 = vpop.xlane.xlu0 %603  ;;  %v686_v30 = vmul.f32 %v9958_v19, %v10166_v36 }
 0x148   : > { %9967 = vrsqrt.f32 %v657_v22  ;;  %v649_v31 = vmul.f32 0.03125, %v625_v26  ;;  %v642_v32 = vmul.f32 0.03125, %v604_v27 }
 0x149   : > { %9969 = vrsqrt.f32 %v664_v16  ;;  %v708_v43 = vmul.f32 %v10278_v33, %v686_v30 }
 0x14a   : > { %v9960_v34 = vpop.eup %9959  ;;  %v665_v20 = vadd.f32 1e-06, %v649_v31  ;;  %v658_v38 = vadd.f32 1e-06, %v642_v32 }
 0x14b   : > { %v9962_v39 = vpop.eup %9961  ;;  %v607_v40 = vpop.xlane.xlu1 %606  ;;  %v687_v42 = vmul.f32 %v9960_v34, %v10174_v44  ;;  %v730_v53 = vadd.f32 %v10285_v24, %v708_v43 }
 0x14c   : > { %v628_v41 = vpop.xlane.xlu0 %627  ;;  %9971 = vrsqrt.f32 %v665_v20  ;;  %v643_v36 = vmul.f32 0.03125, %v607_v40  ;;  %v694_v48 = vmul.f32 %v9962_v39, %v10168_v37  ;;  %v9955_v40 = vld [vmem:[%s12600_s7 + $0x8] sm:$0xff]  }
 0x14d   : > { %v650_v46 = vmul.f32 0.03125, %v628_v41  ;;  %9973 = vrsqrt.f32 %v658_v38  ;;  %v709_v49 = vmul.f32 %v10278_v33, %v687_v42 }
 0x14e   : > { %v9964_v50 = vpop.eup %9963  ;;  %v659_v51 = vadd.f32 1e-06, %v643_v36  ;;  %v716_v60 = vmul.f32 %v10278_v33, %v694_v48 }
 0x14f   : > { %v666_v52 = vadd.f32 1e-06, %v650_v46  ;;  %v9966_v28 = vpop.eup %9965  ;;  %v631_v44 = vpop.xlane.xlu1 %630  ;;  %v731_v58 = vadd.f32 %v10285_v24, %v709_v49  ;;  %v695_v59 = vmul.f32 %v9964_v50, %v10176_v45 }
 0x150   : > { %v610_v29 = vpop.xlane.xlu0 %609  ;;  %9975 = vrsqrt.f32 %v659_v51  ;;  %v651_v61 = vmul.f32 0.03125, %v631_v44  ;;  %v688_v2 = vmul.f32 %v9966_v28, %v10184_v54  ;;  %v738_v8 = vadd.f32 %v10285_v24, %v716_v60  ;;  %v9956_v51 = vld [vmem:[%s12598_s5 + $0x8] sm:$0xff]  }
 0x151   : > { %v644_v37 = vmul.f32 0.03125, %v610_v29  ;;  %9977 = vrsqrt.f32 %v666_v52  ;;  %v10293_v62 = vpack.c.bf16 %v731_v58, %v730_v53  ;;  %v717_v63 = vmul.f32 %v10278_v33, %v695_v59 }
 0x152   : > { %v9968_v3 = vpop.eup %9967  ;;  %v667_v4 = vadd.f32 1e-06, %v651_v61  ;;  %v710_v13 = vmul.f32 %v10278_v33, %v688_v2 }
 0x153   : > { %v660_v5 = vadd.f32 1e-06, %v644_v37  ;;  %v9970_v6 = vpop.eup %9969  ;;  %v613_v7 = vpop.xlane.xlu1 %612  ;;  %9862 = vmatprep.mubr.msk.bf16.mxu0 %vm492_vm0, %v10293_v62  ;;  %v739_v9 = vadd.f32 %v10285_v24, %v717_v63  ;;  %v689_v12 = vmul.f32 %v9968_v3, %v10186_v55 }
 0x154   : > { %v634_v45 = vpop.xlane.xlu0 %633  ;;  %9979 = vrsqrt.f32 %v667_v4  ;;  %v645_v14 = vmul.f32 0.03125, %v613_v7  ;;  %v696_v15 = vmul.f32 %v9970_v6, %v10195_v0  ;;  %v732_v55 = vadd.f32 %v10285_v24, %v710_v13 }
 0x155   : > { %v652_v54 = vmul.f32 0.03125, %v634_v45  ;;  %9981 = vrsqrt.f32 %v660_v5  ;;  %v10304_v18 = vpack.c.bf16 %v739_v9, %v738_v8  ;;  %v711_v19 = vmul.f32 %v10278_v33, %v689_v12 }
 0x156   : > { %v9972_v22 = vpop.eup %9971  ;;  %v661_v16 = vadd.f32 1e-06, %v645_v14  ;;  %v718_v0 = vmul.f32 %v10278_v33, %v696_v15 }
 0x157   : > { %v668_v26 = vadd.f32 1e-06, %v652_v54  ;;  %v9974_v27 = vpop.eup %9973  ;;  %v637_v30 = vpop.xlane.xlu1 %636  ;;  %9870 = vmatprep.mubr.msk.bf16.mxu1 %vm492_vm0, %v10304_v18  ;;  %v733_v31 = vadd.f32 %v10285_v24, %v711_v19  ;;  %v697_v32 = vmul.f32 %v9972_v22, %v10198_v1 }
 0x158   : > { %9983 = vrsqrt.f32 %v661_v16  ;;  %v653_v34 = vmul.f32 0.03125, %v637_v30  ;;  %v690_v20 = vmul.f32 %v9974_v27, %v10207_v10  ;;  %v740_v1 = vadd.f32 %v10285_v24, %v718_v0 }
 0x159   : > { %9985 = vrsqrt.f32 %v668_v26  ;;  %v747_v38 = vpack.c.bf16 %v733_v31, %v732_v55  ;;  %v719_v39 = vmul.f32 %v10278_v33, %v697_v32 }
 0x15a   : > { %v9976_v41 = vpop.eup %9975  ;;  %v669_v42 = vadd.f32 1e-06, %v653_v34  ;;  %v712_v10 = vmul.f32 %v10278_v33, %v690_v20 }
 0x15b   : > { %v9978_v43 = vpop.eup %9977  ;;  %9863 = vmatmul.mubr.msk.bf16.vlgmr.msra.gmra.mrb[0].mxu0 %vm492_vm0, %v747_v38  ;;  %v741_v36 = vadd.f32 %v10285_v24, %v719_v39  ;;  %v691_v46 = vmul.f32 %v9976_v41, %v10210_v11 }
 0x15c   : > { %9987 = vrsqrt.f32 %v669_v42  ;;  %v698_v48 = vmul.f32 %v9978_v43, %v10219_v23  ;;  %9899 = vmatpush3.bf16.msra.mxu0 %v10265_v56  ;;  %v734_v11 = vadd.f32 %v10285_v24, %v712_v10 }
 0x15d   : > { %v751_v49 = vpack.c.bf16 %v741_v36, %v740_v1  ;;  %v713_v50 = vmul.f32 %v10278_v33, %v691_v46  ;;  %9900 = vmatprep.subr.bf16.mxu0 %v9955_v40 }
 0x15e   : > { %v9980_v52 = vpop.eup %9979  ;;  %v720_v56 = vmul.f32 %v10278_v33, %v698_v48 }
 0x15f   : > { %v9982_v28 = vpop.eup %9981  ;;  %9871 = vmatmul.mubr.msk.bf16.vlgmr.msra.gmra.mrb[0].mxu1 %vm492_vm0, %v751_v49  ;;  %v735_v44 = vadd.f32 %v10285_v24, %v713_v50  ;;  %v699_v23 = vmul.f32 %v9980_v52, %v10222_v17 }
 0x160   : > { %v692_v29 = vmul.f32 %v9982_v28, %v10231_v35  ;;  %9879 = vmatpush3.bf16.msra.mxu1 %v10271_v57  ;;  %9901 = vmatpush3.bf16.msra.mxu0 %v9955_v40  ;;  %v742_v61 = vadd.f32 %v10285_v24, %v720_v56 }
 0x161   : > { %v748_v53 = vpack.c.bf16 %v735_v44, %v734_v11  ;;  %v721_v58 = vmul.f32 %v10278_v33, %v699_v23  ;;  %9880 = vmatprep.subr.bf16.mxu1 %v9956_v51  ;;  %v10474_v11 = vld [vmem:[%s12601_s8] ss:$0 sm:$0xff] }
 0x162   : > { %v9984_v59 = vpop.eup %9983  ;;  %v714_v63 = vmul.f32 %v10278_v33, %v692_v29 }
 0x163   : > { %v9986_v60 = vpop.eup %9985  ;;  %9866 = vmatprep.mubr.msk.bf16.mxu0 %vm492_vm0, %v748_v53  ;;  %v743_v37 = vadd.f32 %v10285_v24, %v721_v58  ;;  %v693_v17 = vmul.f32 %v9984_v59, %v10234_v21  ;;  %v10493_v59 = vld [vmem:[%s12599_s6] ss:$0 sm:$0xff] }
 0x164   : > { %v700_v35 = vmul.f32 %v9986_v60, %v10243_v47  ;;  %9881 = vmatpush3.bf16.msra.mxu1 %v9956_v51  ;;  %v736_v4 = vadd.f32 %v10285_v24, %v714_v63 }
 0x165   : > { %v752_v57 = vpack.c.bf16 %v743_v37, %v742_v61  ;;  %v715_v2 = vmul.f32 %v10278_v33, %v693_v17 }
 0x166   : > { %v9988_v3 = vpop.eup %9987  ;;  %v722_v7 = vmul.f32 %v10278_v33, %v700_v35 }
 0x167   : > { %9874 = vmatprep.mubr.msk.bf16.mxu1 %vm492_vm0, %v752_v57  ;;  %v737_v5 = vadd.f32 %v10285_v24, %v715_v2  ;;  %v701_v6 = vmul.f32 %v9988_v3, %v10246_v25  ;;  %v10377_v25 = vld [vmem:[%s12597_s4] ss:$0 sm:$0xff] }
 0x168   : > { %v744_v47 = vadd.f32 %v10285_v24, %v722_v7 }
 0x169   : > { %v749_v21 = vpack.c.bf16 %v737_v5, %v736_v4  ;;  %v723_v45 = vmul.f32 %v10278_v33, %v701_v6 }
 0x16b   : > { %9867 = vmatmul.mubr.msk.bf16.gmra.mrb[4].mxu0 %vm492_vm0, %v749_v21  ;;  %v745_v8 = vadd.f32 %v10285_v24, %v723_v45 }
 0x16c   : > { %9902 = vmatprep.mubr.msk.bf16.mxu0 %vm492_vm0, %v10293_v62 }
 0x16d   : > { %v753_v9 = vpack.c.bf16 %v745_v8, %v744_v47 }
 0x16f   : > { %9875 = vmatmul.mubr.msk.bf16.gmra.mrb[4].mxu1 %vm492_vm0, %v753_v9 }
 0x170   : > { %9882 = vmatprep.mubr.msk.bf16.mxu1 %vm492_vm0, %v10293_v62 }
 0x173   : > { %9903 = vmatmul.mubr.msk.bf16.vlgmr.msra.gmra.mrb[8].mxu0 %vm492_vm0, %v747_v38 }
 0x174   : > { %9906 = vmatprep.mubr.msk.bf16.mxu0 %vm492_vm0, %v748_v53 }
 0x177   : > { %9883 = vmatmul.mubr.msk.bf16.vlgmr.msra.gmra.mrb[8].mxu1 %vm492_vm0, %v747_v38 }
 0x178   : > { %9886 = vmatprep.mubr.msk.bf16.mxu1 %vm492_vm0, %v748_v53 }
 0x17b   : > { %9907 = vmatmul.mubr.msk.bf16.gmra.mrb[12].mxu0 %vm492_vm0, %v749_v21 }
 0x17c   : > { %9910 = vmatprep.mubr.msk.bf16.mxu0 %vm492_vm0, %v10304_v18 }
 0x17f   : > { %9887 = vmatmul.mubr.msk.bf16.gmra.mrb[12].mxu1 %vm492_vm0, %v749_v21 }
 0x180   : > { %9890 = vmatprep.mubr.msk.bf16.mxu1 %vm492_vm0, %v10304_v18 }
 0x183   : > { %9911 = vmatmul.mubr.msk.bf16.gmra.mrb[16].mxu0 %vm492_vm0, %v751_v49 }
 0x184   : > { %9914 = vmatprep.mubr.msk.bf16.mxu0 %vm492_vm0, %v752_v57 }
 0x187   : > { %9891 = vmatmul.mubr.msk.bf16.gmra.mrb[16].mxu1 %vm492_vm0, %v751_v49 }
 0x188   : > { %9894 = vmatprep.mubr.msk.bf16.mxu1 %vm492_vm0, %v752_v57 }
 0x18b   : > { %9915 = vmatmul.mubr.msk.bf16.gmra.mrb[20].mxu0 %vm492_vm0, %v753_v9 }
 0x18f   : > { %9895 = vmatmul.mubr.msk.bf16.gmra.mrb[20].mxu1 %vm492_vm0, %v753_v9 }
 0x22e   : > { %v9864_v33 = vpop.f32.mrb[0].mxu0 }
 0x22f   : > { %v10380_v24 = vadd.f32 %v9864_v33, %v10377_v25  ;;  %v835_v62 = vpop.f32.mrb[1].mxu0 }
 0x230   : > { %v9865_v12 = vpop.f32.mrb[2].mxu0  ;;  %v10436_v42 = vadd.f32 %v10377_v25, %v835_v62 }
 0x231   : > { %918 = vrot.lane.b32.xlu1 %v10380_v24, %s10013_s28  ;;  %v838_v13 = vpop.f32.mrb[3].mxu0  ;;  %v10385_v54 = vadd.f32 %v9865_v12, %v10377_v25 }
 0x232   : > { %v9872_v14 = vpop.f32.mrb[0].mxu1  ;;  %v10451_v10 = vadd.f32 %v10377_v25, %v838_v13 }
 0x233   : > { %v10388_v15 = vadd.f32 %v9872_v14, %v10377_v25  ;;  %v867_v18 = vpop.f32.mrb[1].mxu1 }
 0x234   : > { %v9873_v19 = vpop.f32.mrb[2].mxu1  ;;  %v10454_v48 = vadd.f32 %v10377_v25, %v867_v18 }
 0x235   : > { %920 = vrot.lane.b32.xlu1 %v10385_v54, %s10013_s28  ;;  %934 = vrot.lane.b32.xlu0 %v10388_v15, %s10013_s28  ;;  %v870_v22 = vpop.f32.mrb[3].mxu1  ;;  %v10395_v16 = vadd.f32 %v9873_v19, %v10377_v25 }
 0x236   : > { %v10469_v28 = vadd.f32 %v10377_v25, %v870_v22 }
 0x239   : > { %966 = vrot.lane.b32.xlu0 %v10380_v24, %s10014_s29  ;;  %936 = vrot.lane.b32.xlu1 %v10395_v16, %s10013_s28 }
 0x23d   : > { %982 = vrot.lane.b32.xlu0 %v10388_v15, %s10014_s29  ;;  %968 = vrot.lane.b32.xlu1 %v10385_v54, %s10014_s29 }
 0x23e   : > { %v10405_v26 = vpop.f32.mrb[4].mxu0 }
 0x23f   : > { %v851_v27 = vpop.f32.mrb[5].mxu0  ;;  %v10541_v14 = vadd.f32 %v10405_v26, %v10377_v25 }
 0x240   : > { %v10408_v30 = vadd.f32 %v10377_v25, %v851_v27  ;;  %v10410_v55 = vpop.f32.mrb[6].mxu0 }
 0x241   : > { %1014 = vrot.lane.b32.xlu0 %v10380_v24, %s10015_s30  ;;  %984 = vrot.lane.b32.xlu1 %v10395_v16, %s10014_s29  ;;  %v854_v31 = vpop.f32.mrb[7].mxu0 }
 0x242   : > { %v10417_v32 = vadd.f32 %v10377_v25, %v854_v31  ;;  %v10419_v0 = vpop.f32.mrb[4].mxu1 }
 0x243   : > { %v883_v34 = vpop.f32.mrb[5].mxu1 }
 0x244   : > { %v10422_v20 = vadd.f32 %v10377_v25, %v883_v34  ;;  %v10424_v38 = vpop.f32.mrb[6].mxu1 }
 0x245   : > { %1030 = vrot.lane.b32.xlu0 %v10388_v15, %s10015_s30  ;;  %1016 = vrot.lane.b32.xlu1 %v10385_v54, %s10015_s30  ;;  %v886_v39 = vpop.f32.mrb[7].mxu1 }
 0x246   : > { %v10431_v40 = vadd.f32 %v10377_v25, %v886_v39  ;;  %v10433_v41 = vpop.f32.mrb[8].mxu0 }
 0x247   : > { %v10438_v43 = vpop.f32.mrb[9].mxu0 }
 0x248   : > { %v10440_v1 = vpop.f32.mrb[10].mxu0 }
 0x249   : > { %914 = vrot.lane.b32.xlu0 %v10436_v42, %s10013_s28  ;;  %1032 = vrot.lane.b32.xlu1 %v10395_v16, %s10015_s30  ;;  %v10446_v36 = vpop.f32.mrb[11].mxu0 }
 0x24a   : > { %v10448_v46 = vpop.f32.mrb[8].mxu1 }
 0x24b   : > { %v10456_v49 = vpop.f32.mrb[9].mxu1 }
 0x24c   : > { %v10458_v50 = vpop.f32.mrb[10].mxu1 }
 0x24d   : > { %916 = vrot.lane.b32.xlu1 %v10451_v10, %s10013_s28  ;;  %930 = vrot.lane.b32.xlu0 %v10454_v48, %s10013_s28  ;;  %v10464_v51 = vpop.f32.mrb[11].mxu1 }
 0x24e   : > { %v10466_v52 = vpop.f32.mrb[12].mxu0 }
 0x24f   : > { %v6404_v44 = vpop.f32.mrb[13].mxu0 }
 0x250   : > { %v10477_v23 = vadd.f32 %v10474_v11, %v6404_v44  ;;  %v10479_v56 = vpop.f32.mrb[14].mxu0  ;;  %v10561_v44 = vadd.f32 %v10410_v55, %v10377_v25 }
 0x251   : > { %932 = vrot.lane.b32.xlu1 %v10469_v28, %s10013_s28  ;;  %962 = vrot.lane.b32.xlu0 %v10436_v42, %s10014_s29  ;;  %v6407_v29 = vpop.f32.mrb[15].mxu0 }
 0x252   : > { %v10486_v53 = vadd.f32 %v10474_v11, %v6407_v29  ;;  %v10488_v58 = vpop.f32.mrb[12].mxu1  ;;  %v10565_v29 = vadd.f32 %v10419_v0, %v10377_v25 }
 0x253   : > { %v3628_v60 = vpop.f32.mrb[13].mxu1 }
 0x254   : > { %v10496_v61 = vadd.f32 %v10493_v59, %v3628_v60  ;;  %v10498_v37 = vpop.f32.mrb[14].mxu1 }
 0x255   : > { %964 = vrot.lane.b32.xlu1 %v10451_v10, %s10014_s29  ;;  %978 = vrot.lane.b32.xlu0 %v10454_v48, %s10014_s29  ;;  %v3631_v17 = vpop.f32.mrb[15].mxu1 }
 0x256   : > { %v10505_v63 = vadd.f32 %v10493_v59, %v3631_v17  ;;  %v9912_v35 = vpop.f32.mrb[16].mxu0 }
 0x257   : > { %v10508_v57 = vadd.f32 %v9912_v35, %v10474_v11  ;;  %v6420_v2 = vpop.f32.mrb[17].mxu0 }
 0x258   : > { %v10511_v3 = vadd.f32 %v10474_v11, %v6420_v2  ;;  %v9913_v4 = vpop.f32.mrb[18].mxu0 }
 0x259   : > { %v10514_v5 = vadd.f32 %v9913_v4, %v10474_v11  ;;  %980 = vrot.lane.b32.xlu1 %v10469_v28, %s10014_s29  ;;  %1010 = vrot.lane.b32.xlu0 %v10436_v42, %s10015_s30  ;;  %v6423_v6 = vpop.f32.mrb[19].mxu0 }
 0x25a   : > { %v10521_v7 = vadd.f32 %v10474_v11, %v6423_v6  ;;  %v9892_v21 = vpop.f32.mrb[16].mxu1  ;;  %v10585_v6 = vadd.f32 %v10424_v38, %v10377_v25  ;;  %v10629_v25 = vadd.f32 %v10448_v46, %v10493_v59  ;;  %v10637_v38 = vadd.f32 %v10458_v50, %v10493_v59 }
 0x25b   : > { %v10524_v45 = vadd.f32 %v9892_v21, %v10493_v59  ;;  %v3644_v47 = vpop.f32.mrb[17].mxu1  ;;  %v10649_v46 = vadd.f32 %v10433_v41, %v10474_v11  ;;  %v10657_v50 = vadd.f32 %v10440_v1, %v10474_v11  ;;  %v10669_v41 = vadd.f32 %v10493_v59, %v10456_v49 }
 0x25c   : > { %v10527_v8 = vadd.f32 %v10493_v59, %v3644_v47  ;;  %v9893_v9 = vpop.f32.mrb[18].mxu1  ;;  %12627 = vst [vmem:[#allocation6_spill] sm:$0xff] %v10629_v25  ;;  %12628 = vst [vmem:[#allocation7_spill] sm:$0xff] %v10637_v38 }
 0x25d   : > { %v10530_v33 = vadd.f32 %v9893_v9, %v10493_v59  ;;  %1012 = vrot.lane.b32.xlu1 %v10451_v10, %s10015_s30  ;;  %1026 = vrot.lane.b32.xlu0 %v10454_v48, %s10015_s30  ;;  %v3647_v62 = vpop.f32.mrb[19].mxu1  ;;  %12629 = vst [vmem:[#allocation8_spill] sm:$0xff] %v10649_v46  ;;  %12630 = vst [vmem:[#allocation9_spill] sm:$0xff] %v10657_v50  ;;  %v10016_v9 = vmov 1983009808  }
 0x25e   : > { %v10537_v12 = vadd.f32 %v10493_v59, %v3647_v62  ;;  %v9916_v13 = vpop.f32.mrb[20].mxu0  ;;  %12631 = vst [vmem:[#allocation10_spill] sm:$0xff] %v10669_v41  ;;  %v1061_v62 = vunpack.c.l.s4 %v10016_v9 }
 0x25f   : > { %v10544_v18 = vadd.f32 %v9916_v13, %v10474_v11  ;;  %v6436_v19 = vpop.f32.mrb[21].mxu0  ;;  %v1063_v13 = vlaneseq }
 0x260   : > { %v10547_v22 = vadd.f32 %v10474_v11, %v6436_v19  ;;  %v9917_v27 = vpop.f32.mrb[22].mxu0  ;;  %v10017_v19 = vmov 1934713408  }
 0x261   : > { %v10550_v31 = vadd.f32 %v9917_v27, %v10474_v11  ;;  %1028 = vrot.lane.b32.xlu1 %v10469_v28, %s10015_s30  ;;  %926 = vrot.lane.b32.xlu0 %v10541_v14, %s10013_s28  ;;  %v6439_v34 = vpop.f32.mrb[23].mxu0  ;;  %v1093_v27 = vunpack.c.l.s4 %v10017_v19 }
 0x262   : > { %12623 = vst [vmem:[#allocation2_spill] sm:$0xff] %v10547_v22  ;;  %v10557_v26 = vadd.f32 %v10474_v11, %v6439_v34  ;;  %v9896_v39 = vpop.f32.mrb[20].mxu1  ;;  %v10681_v34 = vadd.f32 %v10493_v59, %v10464_v51 }
 0x263   : > { %v10568_v60 = vadd.f32 %v9896_v39, %v10493_v59  ;;  %v3660_v17 = vpop.f32.mrb[21].mxu1 }
 0x264   : > { %12624 = vst [vmem:[#allocation3_spill] sm:$0xff] %v10557_v26  ;;  %v10571_v35 = vadd.f32 %v10493_v59, %v3660_v17  ;;  %v9897_v2 = vpop.f32.mrb[22].mxu1  ;;  %12632 = vst [vmem:[#allocation11_spill] sm:$0xff] %v10681_v34  ;;  %v1062_v17 = vunpack.c.0.s8 %v1061_v62  ;;  %v10699_v62 = vadd.f32 %v10474_v11, %v10438_v43 }
 0x265   : > { %v10574_v4 = vadd.f32 %v9897_v2, %v10493_v59  ;;  %928 = vrot.lane.b32.xlu1 %v10561_v44, %s10013_s28  ;;  %942 = vrot.lane.b32.xlu0 %v10565_v29, %s10013_s28  ;;  %v3663_v55 = vpop.f32.mrb[23].mxu1  ;;  %v1064_v2 = vshrl.u32 %v1063_v13, 7 }
 0x266   : > { %12625 = vst [vmem:[#allocation4_spill] sm:$0xff] %v10571_v35  ;;  %v10581_v0 = vadd.f32 %v10493_v59, %v3663_v55  ;;  %v1094_v55 = vunpack.c.0.s8 %v1093_v27  ;;  %12633 = vst [vmem:[#allocation12_spill] sm:$0xff] %v10699_v62 }
 0x268   : > { %12626 = vst [vmem:[#allocation5_spill] sm:$0xff] %v10581_v0 }
 0x269   : > { %974 = vrot.lane.b32.xlu0 %v10541_v14, %s10014_s29  ;;  %944 = vrot.lane.b32.xlu1 %v10585_v6, %s10013_s28 }
 0x26d   : > { %990 = vrot.lane.b32.xlu0 %v10565_v29, %s10014_s29  ;;  %976 = vrot.lane.b32.xlu1 %v10561_v44, %s10014_s29 }
 0x271   : > { %1022 = vrot.lane.b32.xlu0 %v10541_v14, %s10015_s30  ;;  %992 = vrot.lane.b32.xlu1 %v10585_v6, %s10014_s29 }
 0x275   : > { %1038 = vrot.lane.b32.xlu0 %v10565_v29, %s10015_s30  ;;  %1024 = vrot.lane.b32.xlu1 %v10561_v44, %s10015_s30 }
 0x279   : > { %922 = vrot.lane.b32.xlu0 %v10408_v30, %s10013_s28  ;;  %1040 = vrot.lane.b32.xlu1 %v10585_v6, %s10015_s30 }
 0x27d   : > { %924 = vrot.lane.b32.xlu1 %v10417_v32, %s10013_s28  ;;  %938 = vrot.lane.b32.xlu0 %v10422_v20, %s10013_s28 }
 0x281   : > { %940 = vrot.lane.b32.xlu1 %v10431_v40, %s10013_s28  ;;  %970 = vrot.lane.b32.xlu0 %v10408_v30, %s10014_s29 }
 0x285   : > { %972 = vrot.lane.b32.xlu1 %v10417_v32, %s10014_s29  ;;  %986 = vrot.lane.b32.xlu0 %v10422_v20, %s10014_s29 }
 0x289   : > { %988 = vrot.lane.b32.xlu1 %v10431_v40, %s10014_s29  ;;  %1018 = vrot.lane.b32.xlu0 %v10408_v30, %s10015_s30 }
 0x28d   : > { %1020 = vrot.lane.b32.xlu1 %v10417_v32, %s10015_s30  ;;  %1034 = vrot.lane.b32.xlu0 %v10422_v20, %s10015_s30 }
 0x291   : > { %1036 = vrot.lane.b32.xlu1 %v10431_v40, %s10015_s30  ;;  %3695 = vrot.lane.b32.xlu0 %v10629_v25, %s10013_s28 }
 0x295   : > { %3697 = vrot.lane.b32.xlu1 %v10637_v38, %s10013_s28  ;;  %3743 = vrot.lane.b32.xlu0 %v10629_v25, %s10014_s29 }
 0x299   : > { %3745 = vrot.lane.b32.xlu1 %v10637_v38, %s10014_s29  ;;  %3791 = vrot.lane.b32.xlu0 %v10629_v25, %s10015_s30 }
 0x29d   : > { %3793 = vrot.lane.b32.xlu1 %v10637_v38, %s10015_s30  ;;  %6471 = vrot.lane.b32.xlu0 %v10649_v46, %s10013_s28  ;;  %v10707_v38 = vadd.f32 %v10474_v11, %v10446_v36 }
 0x2a1   : > { %6473 = vrot.lane.b32.xlu1 %v10657_v50, %s10013_s28  ;;  %6519 = vrot.lane.b32.xlu0 %v10649_v46, %s10014_s29 }
 0x2a3   : > { %v919_v21 = vpop.permute.xlu1 %918 }
 0x2a5   : > { %6521 = vrot.lane.b32.xlu1 %v10657_v50, %s10014_s29  ;;  %6567 = vrot.lane.b32.xlu0 %v10649_v46, %s10015_s30  ;;  %v10689_v46 = vsub.s32 %v1062_v17, %v1064_v2  ;;  %v10703_v17 = vsub.s32 %v1094_v55, %v1064_v2  ;;  %v10723_v2 = vadd.f32 %v10488_v58, %v10493_v59 }
 0x2a7   : > { %v10671_v47 = vpop.permute.xlu1 %920  ;;  %v10673_v1 = vpop.permute.xlu0 %934 }
 0x2a9   : > { %6569 = vrot.lane.b32.xlu1 %v10657_v50, %s10015_s30  ;;  %3691 = vrot.lane.b32.xlu0 %v10669_v41, %s10013_s28 }
 0x2ab   : > { %v10683_v49 = vpop.permute.xlu1 %936  ;;  %v967_v39 = vpop.permute.xlu0 %966 }
 0x2ac   : > { %v1194_v19 = vcombine.low %v10380_v24, %v967_v39  ;;  %v1195_v51 = vcombine.high %v10380_v24, %v967_v39  ;;  %v10711_v24 = vadd.f32 %v10466_v52, %v10474_v11  ;;  %v10727_v52 = vadd.f32 %v10498_v37, %v10493_v59 }
 0x2ad   : > { %3693 = vrot.lane.b32.xlu1 %v10681_v34, %s10013_s28  ;;  %3739 = vrot.lane.b32.xlu0 %v10669_v41, %s10014_s29 }
 0x2af   : > { %v969_v9 = vpop.permute.xlu1 %968  ;;  %v983_v50 = vpop.permute.xlu0 %982 }
 0x2b0   : > { %v1262_v13 = vcombine.low %v10385_v54, %v969_v9  ;;  %v1263_v27 = vcombine.high %v10385_v54, %v969_v9  ;;  %v1738_v39 = vcombine.low %v10388_v15, %v983_v50  ;;  %v10719_v54 = vadd.f32 %v10479_v56, %v10474_v11 }
 0x2b1   : > { %3741 = vrot.lane.b32.xlu1 %v10681_v34, %s10014_s29  ;;  %3787 = vrot.lane.b32.xlu0 %v10669_v41, %s10015_s30  ;;  %v1739_v41 = vcombine.high %v10388_v15, %v983_v50  ;;  %v1202_v9 = vrot.slane %v1194_v19, %v10689_v46  ;;  %v1209_v15 = vrot.slane %v1195_v51, %v10689_v46 }
 0x2b2   : > { %v1270_v11 = vrot.slane %v1262_v13, %v10689_v46  ;;  %v1277_v56 = vrot.slane %v1263_v27, %v10689_v46  ;;  %v10740_v59 = vrot.slane %v1738_v39, %v10689_v46 }
 0x2b3   : > { %v10715_v43 = vpop.permute.xlu1 %984  ;;  %v1015_v25 = vpop.permute.xlu0 %1014  ;;  %v10743_v37 = vrot.slane %v1739_v41, %v10689_v46 }
 0x2b4   : > { %v1210_v36 = vcombine.low %v919_v21, %v1015_v25  ;;  %v1211_v55 = vcombine.high %v919_v21, %v1015_v25 }
 0x2b5   : > { %3789 = vrot.lane.b32.xlu1 %v10681_v34, %s10015_s30  ;;  %6467 = vrot.lane.b32.xlu0 %v10699_v62, %s10013_s28 }
 0x2b6   : > { %v1218_v58 = vrot.slane %v1210_v36, %v10689_v46  ;;  %v1225_v25 = vrot.slane %v1211_v55, %v10689_v46 }
 0x2b7   : > { %v1017_v19 = vpop.permute.xlu1 %1016  ;;  %v1031_v51 = vpop.permute.xlu0 %1030 }
 0x2b8   : > { %v1226_v13 = vcombine.low %v1202_v9, %v1218_v58  ;;  %v1227_v27 = vcombine.high %v1202_v9, %v1218_v58  ;;  %v1242_v34 = vcombine.low %v1209_v15, %v1225_v25  ;;  %v1243_v36 = vcombine.high %v1209_v15, %v1225_v25 }
 0x2b9   : > { %v1278_v55 = vcombine.low %v10671_v47, %v1017_v19  ;;  %v1279_v39 = vcombine.high %v10671_v47, %v1017_v19  ;;  %v1754_v26 = vcombine.low %v10673_v1, %v1031_v51  ;;  %v1755_v41 = vcombine.high %v10673_v1, %v1031_v51  ;;  %6469 = vrot.lane.b32.xlu1 %v10707_v38, %s10013_s28 }
 0x2ba   : > { %v1234_v50 = vrot.slane %v1226_v13, %v10703_v17  ;;  %v1241_v21 = vrot.slane %v1227_v27, %v10703_v17  ;;  %v1250_v22 = vrot.slane %v1242_v34, %v10703_v17  ;;  %v1257_v9 = vrot.slane %v1243_v36, %v10703_v17  ;;  %6515 = vrot.lane.b32.xlu0 %v10699_v62, %s10014_s29 }
 0x2bb   : > { %v1286_v47 = vrot.slane %v1278_v55, %v10689_v46  ;;  %v1293_v15 = vrot.slane %v1279_v39, %v10689_v46  ;;  %v10764_v1 = vrot.slane %v1754_v26, %v10689_v46  ;;  %v10767_v58 = vrot.slane %v1755_v41, %v10689_v46 }
 0x2bc   : > { %v2282_v25 = vcombine.low %v1234_v50, %v1241_v21  ;;  %v9324_v19 = vcombine.high %v1234_v50, %v1241_v21  ;;  %v2298_v51 = vcombine.low %v1250_v22, %v1257_v9  ;;  %v9325_v13 = vcombine.high %v1250_v22, %v1257_v9 }
 0x2bd   : > { %v1294_v34 = vcombine.low %v1270_v11, %v1286_v47  ;;  %v1295_v27 = vcombine.high %v1270_v11, %v1286_v47  ;;  %v1310_v36 = vcombine.low %v1277_v56, %v1293_v15  ;;  %v1311_v0 = vcombine.high %v1277_v56, %v1293_v15  ;;  %6517 = vrot.lane.b32.xlu1 %v10707_v38, %s10014_s29 }
 0x2be   : > { %v2289_v55 = vrot.slane %v2282_v25, %v10689_v46  ;;  %v2297_v26 = vrot.slane %v9324_v19, %v10689_v46  ;;  %v2305_v39 = vrot.slane %v2298_v51, %v10689_v46  ;;  %v2313_v41 = vrot.slane %v9325_v13, %v10689_v46  ;;  %6563 = vrot.lane.b32.xlu0 %v10699_v62, %s10015_s30  ;;  %v10781_v25 = vpop.permute.xlu1 %1032  ;;  %v10783_v19 = vpop.permute.xlu0 %914 }
 0x2bf   : > { %v1302_v22 = vrot.slane %v1294_v34, %v10703_v17  ;;  %v1309_v11 = vrot.slane %v1295_v27, %v10703_v17  ;;  %v1318_v56 = vrot.slane %v1310_v36, %v10703_v17  ;;  %v1325_v50 = vrot.slane %v1311_v0, %v10703_v17 }
 0x2c0   : > { %v2314_v21 = vcombine.low %v2289_v55, %v2297_v26  ;;  %v2315_v9 = vcombine.high %v2289_v55, %v2297_v26  ;;  %v2330_v47 = vcombine.low %v2305_v39, %v2313_v41  ;;  %v2331_v15 = vcombine.high %v2305_v39, %v2313_v41 }
 0x2c1   : > { %v2350_v51 = vcombine.low %v1302_v22, %v1309_v11  ;;  %v9326_v13 = vcombine.high %v1302_v22, %v1309_v11  ;;  %v2366_v62 = vcombine.low %v1318_v56, %v1325_v50  ;;  %v9327_v35 = vcombine.high %v1318_v56, %v1325_v50  ;;  %6565 = vrot.lane.b32.xlu1 %v10707_v38, %s10015_s30 }
 0x2c2   : > { %v2322_v0 = vrot.slane %v2314_v21, %v10703_v17  ;;  %v2329_v34 = vrot.slane %v2315_v9, %v10703_v17  ;;  %v2338_v27 = vrot.slane %v2330_v47, %v10703_v17  ;;  %v2345_v36 = vrot.slane %v2331_v15, %v10703_v17  ;;  %3703 = vrot.lane.b32.xlu0 %v10723_v2, %s10013_s28 }
 0x2c3   : > { %v2357_v55 = vrot.slane %v2350_v51, %v10689_v46  ;;  %v2365_v26 = vrot.slane %v9326_v13, %v10689_v46  ;;  %v2373_v39 = vrot.slane %v2366_v62, %v10689_v46  ;;  %v2381_v41 = vrot.slane %v9327_v35, %v10689_v46 }
 0x2c4   : > { %v2346_v22 = vcombine.low %v2322_v0, %v2338_v27  ;;  %v2347_v11 = vcombine.high %v2322_v0, %v2338_v27  ;;  %v2348_v56 = vcombine.low %v2329_v34, %v2345_v36  ;;  %v2349_v50 = vcombine.high %v2329_v34, %v2345_v36  ;;  %v10808_v0 = vpop.permute.xlu1 %916  ;;  %v10810_v34 = vpop.permute.xlu0 %930 }
 0x2c5   : > { %v2382_v21 = vcombine.low %v2357_v55, %v2365_v26  ;;  %v2383_v9 = vcombine.high %v2357_v55, %v2365_v26  ;;  %v2398_v47 = vcombine.low %v2373_v39, %v2381_v41  ;;  %v2399_v15 = vcombine.high %v2373_v39, %v2381_v41  ;;  %3705 = vrot.lane.b32.xlu1 %v10727_v52, %s10013_s28 }
 0x2c6   : > { %v9638_v35 = vpack.c.bf16 %v2346_v22, %v2346_v22  ;;  %v9654_v62 = vpack.c.bf16 %v2347_v11, %v2347_v11  ;;  %v9670_v51 = vpack.c.bf16 %v2348_v56, %v2348_v56  ;;  %v9686_v13 = vpack.c.bf16 %v2349_v50, %v2349_v50  ;;  %3751 = vrot.lane.b32.xlu0 %v10723_v2, %s10014_s29 }
 0x2c7   : > { %v2390_v27 = vrot.slane %v2382_v21, %v10703_v17  ;;  %v2397_v36 = vrot.slane %v2383_v9, %v10703_v17  ;;  %v2406_v55 = vrot.slane %v2398_v47, %v10703_v17  ;;  %v2413_v26 = vrot.slane %v2399_v15, %v10703_v17 }
 0x2c8   : > { %3493 = vst.msk [vmem:[%s10804_s22 + $0x8] sm:$0xf] %vm3490_vm1, %v9638_v35  ;;  %3509 = vst.msk [vmem:[%s10804_s22 + $0x48] sm:$0xf] %vm3490_vm1, %v9654_v62  ;;  %v1770_v39 = vcombine.low %v10740_v59, %v10764_v1  ;;  %v1771_v41 = vcombine.high %v10740_v59, %v10764_v1  ;;  %v1786_v22 = vcombine.low %v10743_v37, %v10767_v58 }
 0x2c9   : > { %3525 = vst.msk [vmem:[%s10804_s22 + $0x88] sm:$0xf] %vm3490_vm1, %v9670_v51  ;;  %3541 = vst.msk [vmem:[%s10804_s22 + $0xc8] sm:$0xf] %vm3490_vm1, %v9686_v13  ;;  %v1787_v11 = vcombine.high %v10743_v37, %v10767_v58  ;;  %v2414_v56 = vcombine.low %v2390_v27, %v2406_v55  ;;  %v2415_v50 = vcombine.high %v2390_v27, %v2406_v55  ;;  %3753 = vrot.lane.b32.xlu1 %v10727_v52, %s10014_s29  ;;  %v10842_v55 = vpop.permute.xlu1 %932 }
 0x2ca   : > { %v2416_v21 = vcombine.low %v2397_v36, %v2413_v26  ;;  %v2417_v9 = vcombine.high %v2397_v36, %v2413_v26  ;;  %v1778_v47 = vrot.slane %v1770_v39, %v10703_v17  ;;  %v1785_v15 = vrot.slane %v1771_v41, %v10703_v17  ;;  %3799 = vrot.lane.b32.xlu0 %v10723_v2, %s10015_s30  ;;  %v10844_v26 = vpop.permute.xlu0 %962 }
 0x2cb   : > { %v1794_v59 = vrot.slane %v1786_v22, %v10703_v17  ;;  %v1801_v1 = vrot.slane %v1787_v11, %v10703_v17  ;;  %v9639_v37 = vpack.c.bf16 %v2414_v56, %v2414_v56  ;;  %v9655_v58 = vpack.c.bf16 %v2415_v50, %v2415_v50 }
 0x2cc   : > { %v9671_v35 = vpack.c.bf16 %v2416_v21, %v2416_v21  ;;  %v9687_v62 = vpack.c.bf16 %v2417_v9, %v2417_v9  ;;  %v2826_v51 = vcombine.low %v1778_v47, %v1785_v15  ;;  %v9340_v13 = vcombine.high %v1778_v47, %v1785_v15 }
 0x2cd   : > { %v2842_v27 = vcombine.low %v1794_v59, %v1801_v1  ;;  %v9341_v36 = vcombine.high %v1794_v59, %v1801_v1  ;;  %v12634_v39 = vcombine.low %v10395_v16, %v10715_v43  ;;  %v12635_v22 = vcombine.high %v10395_v16, %v10715_v43  ;;  %3494 = vst.msk [vmem:[%s10804_s22 + $0xc] sm:$0xf] %vm3490_vm1, %v9639_v37 }
 0x2ce   : > { %3510 = vst.msk [vmem:[%s10804_s22 + $0x4c] sm:$0xf] %vm3490_vm1, %v9655_v58  ;;  %3526 = vst.msk [vmem:[%s10804_s22 + $0x8c] sm:$0xf] %vm3490_vm1, %v9671_v35  ;;  %v1822_v56 = vcombine.low %v10683_v49, %v10781_v25  ;;  %v1823_v50 = vcombine.high %v10683_v49, %v10781_v25  ;;  %3801 = vrot.lane.b32.xlu1 %v10727_v52, %s10015_s30  ;;  %v2833_v16 = vrot.slane %v2826_v51, %v10689_v46 }
 0x2cf   : > { %v1814_v41 = vrot.slane %v12634_v39, %v10689_v46  ;;  %v1821_v11 = vrot.slane %v12635_v22, %v10689_v46  ;;  %3542 = vst.msk [vmem:[%s10804_s22 + $0xcc] sm:$0xf] %vm3490_vm1, %v9687_v62  ;;  %v2841_v43 = vrot.slane %v9340_v13, %v10689_v46  ;;  %v2849_v21 = vrot.slane %v2842_v27, %v10689_v46 }
 0x2d0   : > { %v2857_v9 = vrot.slane %v9341_v36, %v10689_v46  ;;  %6479 = vrot.lane.b32.xlu0 %v10711_v24, %s10013_s28  ;;  %v1830_v47 = vrot.slane %v1822_v56, %v10689_v46  ;;  %v1837_v15 = vrot.slane %v1823_v50, %v10689_v46  ;;  %v1058_v49 = vcombine.low %v10436_v42, %v10844_v26 }
 0x2d1   : > { %v1059_v25 = vcombine.high %v10436_v42, %v10844_v26  ;;  %v2858_v59 = vcombine.low %v2833_v16, %v2841_v43  ;;  %v2859_v1 = vcombine.high %v2833_v16, %v2841_v43  ;;  %v965_v42 = vpop.permute.xlu1 %964  ;;  %v979_v26 = vpop.permute.xlu0 %978 }
 0x2d2   : > { %v2874_v37 = vcombine.low %v2849_v21, %v2857_v9  ;;  %v2875_v58 = vcombine.high %v2849_v21, %v2857_v9  ;;  %v1838_v35 = vcombine.low %v1814_v41, %v1830_v47  ;;  %v1839_v62 = vcombine.high %v1814_v41, %v1830_v47  ;;  %6481 = vrot.lane.b32.xlu1 %v10719_v54, %s10013_s28 }
 0x2d3   : > { %v1854_v51 = vcombine.low %v1821_v11, %v1837_v15  ;;  %v1855_v13 = vcombine.high %v1821_v11, %v1837_v15  ;;  %v2866_v27 = vrot.slane %v2858_v59, %v10703_v17  ;;  %v2873_v36 = vrot.slane %v2859_v1, %v10703_v17 }
 0x2d4   : > { %v2882_v39 = vrot.slane %v2874_v37, %v10703_v17  ;;  %v2889_v22 = vrot.slane %v2875_v58, %v10703_v17  ;;  %6527 = vrot.lane.b32.xlu0 %v10711_v24, %s10014_s29  ;;  %v1846_v41 = vrot.slane %v1838_v35, %v10703_v17  ;;  %v1853_v11 = vrot.slane %v1839_v62, %v10703_v17 }
 0x2d5   : > { %v1862_v56 = vrot.slane %v1854_v51, %v10703_v17  ;;  %v1869_v50 = vrot.slane %v1855_v13, %v10703_v17 }
 0x2d6   : > { %v2890_v16 = vcombine.low %v2866_v27, %v2882_v39  ;;  %v2891_v43 = vcombine.high %v2866_v27, %v2882_v39  ;;  %v2892_v21 = vcombine.low %v2873_v36, %v2889_v22  ;;  %v2893_v9 = vcombine.high %v2873_v36, %v2889_v22  ;;  %6529 = vrot.lane.b32.xlu1 %v10719_v54, %s10014_s29 }
 0x2d7   : > { %v2894_v47 = vcombine.low %v1846_v41, %v1853_v11  ;;  %v9342_v15 = vcombine.high %v1846_v41, %v1853_v11  ;;  %v2910_v59 = vcombine.low %v1862_v56, %v1869_v50  ;;  %v9343_v1 = vcombine.high %v1862_v56, %v1869_v50  ;;  %v10912_v56 = vpop.permute.xlu1 %980  ;;  %v1011_v50 = vpop.permute.xlu0 %1010 }
 0x2d8   : > { %v9646_v37 = vpack.c.bf16 %v2890_v16, %v2890_v16  ;;  %v9662_v58 = vpack.c.bf16 %v2891_v43, %v2891_v43  ;;  %v9678_v35 = vpack.c.bf16 %v2892_v21, %v2892_v21  ;;  %v9694_v62 = vpack.c.bf16 %v2893_v9, %v2893_v9  ;;  %6575 = vrot.lane.b32.xlu0 %v10711_v24, %s10015_s30 }
 0x2d9   : > { %v2901_v51 = vrot.slane %v2894_v47, %v10689_v46  ;;  %v2909_v13 = vrot.slane %v9342_v15, %v10689_v46  ;;  %v2917_v27 = vrot.slane %v2910_v59, %v10689_v46  ;;  %v2925_v36 = vrot.slane %v9343_v1, %v10689_v46 }
 0x2da   : > { %3501 = vst.msk [vmem:[%s10804_s22 + $0x28] sm:$0xf] %vm3490_vm1, %v9646_v37  ;;  %3517 = vst.msk [vmem:[%s10804_s22 + $0x68] sm:$0xf] %vm3490_vm1, %v9662_v58  ;;  %v1126_v39 = vcombine.low %v10451_v10, %v965_v42  ;;  %v1127_v22 = vcombine.high %v10451_v10, %v965_v42  ;;  %v1602_v41 = vcombine.low %v10454_v48, %v979_v26  ;;  %6577 = vrot.lane.b32.xlu1 %v10719_v54, %s10015_s30 }
 0x2db   : > { %3533 = vst.msk [vmem:[%s10804_s22 + $0xa8] sm:$0xf] %vm3490_vm1, %v9678_v35  ;;  %3549 = vst.msk [vmem:[%s10804_s22 + $0xe8] sm:$0xf] %vm3490_vm1, %v9694_v62  ;;  %v1603_v11 = vcombine.high %v10454_v48, %v979_v26  ;;  %v2926_v16 = vcombine.low %v2901_v51, %v2909_v13  ;;  %v2927_v43 = vcombine.high %v2901_v51, %v2909_v13 }
 0x2dc   : > { %v2942_v21 = vcombine.low %v2917_v27, %v2925_v36  ;;  %v2943_v9 = vcombine.high %v2917_v27, %v2925_v36  ;;  %v1066_v47 = vrot.slane %v1058_v49, %v10689_v46  ;;  %v1073_v15 = vrot.slane %v1059_v25, %v10689_v46  ;;  %3699 = vrot.lane.b32.xlu0 %v10496_v61, %s10013_s28 }
 0x2dd   : > { %v10919_v10 = vrot.slane %v1126_v39, %v10689_v46  ;;  %v10922_v42 = vrot.slane %v1127_v22, %v10689_v46  ;;  %v2934_v48 = vrot.slane %v2926_v16, %v10703_v17  ;;  %v2941_v26 = vrot.slane %v2927_v43, %v10703_v17  ;;  %v1013_v22 = vpop.permute.xlu1 %1012 }
 0x2de   : > { %v2950_v59 = vrot.slane %v2942_v21, %v10703_v17  ;;  %v2957_v1 = vrot.slane %v2943_v9, %v10703_v17  ;;  %v10931_v49 = vrot.slane %v1602_v41, %v10689_v46  ;;  %v10934_v25 = vrot.slane %v1603_v11, %v10689_v46  ;;  %3701 = vrot.lane.b32.xlu1 %v10505_v63, %s10013_s28  ;;  %v1027_v41 = vpop.permute.xlu0 %1026 }
 0x2df   : > { %v1074_v37 = vcombine.low %v10783_v19, %v1011_v50  ;;  %v1075_v58 = vcombine.high %v10783_v19, %v1011_v50  ;;  %v1670_v27 = vcombine.low %v10469_v28, %v10912_v56  ;;  %v1671_v36 = vcombine.high %v10469_v28, %v10912_v56 }
 0x2e0   : > { %v2958_v35 = vcombine.low %v2934_v48, %v2950_v59  ;;  %v2959_v62 = vcombine.high %v2934_v48, %v2950_v59  ;;  %v2960_v51 = vcombine.low %v2941_v26, %v2957_v1  ;;  %v2961_v13 = vcombine.high %v2941_v26, %v2957_v1  ;;  %3747 = vrot.lane.b32.xlu0 %v10496_v61, %s10014_s29 }
 0x2e1   : > { %v1082_v39 = vrot.slane %v1074_v37, %v10689_v46  ;;  %v1089_v19 = vrot.slane %v1075_v58, %v10689_v46  ;;  %v1142_v59 = vcombine.low %v10808_v0, %v1013_v22  ;;  %v1143_v1 = vcombine.high %v10808_v0, %v1013_v22 }
 0x2e2   : > { %v9647_v11 = vpack.c.bf16 %v2958_v35, %v2958_v35  ;;  %v9663_v50 = vpack.c.bf16 %v2959_v62, %v2959_v62  ;;  %v9679_v16 = vpack.c.bf16 %v2960_v51, %v2960_v51  ;;  %v9695_v43 = vpack.c.bf16 %v2961_v13, %v2961_v13  ;;  %3749 = vrot.lane.b32.xlu1 %v10505_v63, %s10014_s29 }
 0x2e3   : > { %v1090_v21 = vcombine.low %v1066_v47, %v1082_v39  ;;  %v1091_v9 = vcombine.high %v1066_v47, %v1082_v39  ;;  %v1106_v48 = vcombine.low %v1073_v15, %v1089_v19  ;;  %v1107_v26 = vcombine.high %v1073_v15, %v1089_v19 }
 0x2e4   : > { %3502 = vst.msk [vmem:[%s10804_s22 + $0x2c] sm:$0xf] %vm3490_vm1, %v9647_v11  ;;  %3518 = vst.msk [vmem:[%s10804_s22 + $0x6c] sm:$0xf] %vm3490_vm1, %v9663_v50  ;;  %v1618_v37 = vcombine.low %v10810_v34, %v1027_v41  ;;  %v1619_v58 = vcombine.high %v10810_v34, %v1027_v41  ;;  %3795 = vrot.lane.b32.xlu0 %v10496_v61, %s10015_s30  ;;  %v1150_v0 = vrot.slane %v1142_v59, %v10689_v46 }
 0x2e5   : > { %3534 = vst.msk [vmem:[%s10804_s22 + $0xac] sm:$0xf] %vm3490_vm1, %v9679_v16  ;;  %3550 = vst.msk [vmem:[%s10804_s22 + $0xec] sm:$0xf] %vm3490_vm1, %v9695_v43  ;;  %v1098_v47 = vrot.slane %v1090_v21, %v10703_v17  ;;  %v1105_v15 = vrot.slane %v1091_v9, %v10703_v17  ;;  %v1114_v35 = vrot.slane %v1106_v48, %v10703_v17 }
 0x2e6   : > { %v1121_v62 = vrot.slane %v1107_v26, %v10703_v17  ;;  %v1157_v51 = vrot.slane %v1143_v1, %v10689_v46  ;;  %v10971_v34 = vrot.slane %v1618_v37, %v10689_v46  ;;  %v10974_v13 = vrot.slane %v1619_v58, %v10689_v46  ;;  %3797 = vrot.lane.b32.xlu1 %v10505_v63, %s10015_s30 }
 0x2e7   : > { %v2146_v39 = vcombine.low %v1098_v47, %v1105_v15  ;;  %v9320_v19 = vcombine.high %v1098_v47, %v1105_v15  ;;  %v1158_v11 = vcombine.low %v10919_v10, %v1150_v0  ;;  %v1159_v50 = vcombine.high %v10919_v10, %v1150_v0 }
 0x2e8   : > { %v2162_v22 = vcombine.low %v1114_v35, %v1121_v62  ;;  %v9321_v41 = vcombine.high %v1114_v35, %v1121_v62  ;;  %v1174_v16 = vcombine.low %v10922_v42, %v1157_v51  ;;  %v1175_v43 = vcombine.high %v10922_v42, %v1157_v51  ;;  %6475 = vrot.lane.b32.xlu0 %v10477_v23, %s10013_s28  ;;  %v10992_v35 = vpop.permute.xlu1 %1028  ;;  %v10994_v62 = vpop.permute.xlu0 %926 }
 0x2e9   : > { %v2153_v21 = vrot.slane %v2146_v39, %v10689_v46  ;;  %v2161_v9 = vrot.slane %v9320_v19, %v10689_v46  ;;  %v1166_v10 = vrot.slane %v1158_v11, %v10703_v17  ;;  %v1173_v59 = vrot.slane %v1159_v50, %v10703_v17 }
 0x2ea   : > { %v2169_v48 = vrot.slane %v2162_v22, %v10689_v46  ;;  %v2177_v26 = vrot.slane %v9321_v41, %v10689_v46  ;;  %v1182_v42 = vrot.slane %v1174_v16, %v10703_v17  ;;  %v1189_v1 = vrot.slane %v1175_v43, %v10703_v17  ;;  %6477 = vrot.lane.b32.xlu1 %v10486_v53, %s10013_s28 }
 0x2eb   : > { %v2178_v37 = vcombine.low %v2153_v21, %v2161_v9  ;;  %v2179_v58 = vcombine.high %v2153_v21, %v2161_v9  ;;  %v2214_v0 = vcombine.low %v1166_v10, %v1173_v59  ;;  %v9322_v51 = vcombine.high %v1166_v10, %v1173_v59 }
 0x2ec   : > { %v2194_v47 = vcombine.low %v2169_v48, %v2177_v26  ;;  %v2195_v15 = vcombine.high %v2169_v48, %v2177_v26  ;;  %v2230_v39 = vcombine.low %v1182_v42, %v1189_v1  ;;  %v9323_v19 = vcombine.high %v1182_v42, %v1189_v1  ;;  %6523 = vrot.lane.b32.xlu0 %v10477_v23, %s10014_s29 }
 0x2ed   : > { %v2186_v22 = vrot.slane %v2178_v37, %v10703_v17  ;;  %v2193_v41 = vrot.slane %v2179_v58, %v10703_v17  ;;  %v2221_v16 = vrot.slane %v2214_v0, %v10689_v46  ;;  %v2229_v43 = vrot.slane %v9322_v51, %v10689_v46 }
 0x2ee   : > { %v2202_v11 = vrot.slane %v2194_v47, %v10703_v17  ;;  %v2209_v50 = vrot.slane %v2195_v15, %v10703_v17  ;;  %v2237_v21 = vrot.slane %v2230_v39, %v10689_v46  ;;  %v2245_v9 = vrot.slane %v9323_v19, %v10689_v46  ;;  %6525 = vrot.lane.b32.xlu1 %v10486_v53, %s10014_s29  ;;  %v11010_v39 = vpop.permute.xlu1 %928  ;;  %v11012_v19 = vpop.permute.xlu0 %942 }
 0x2ef   : > { %v2246_v42 = vcombine.low %v2221_v16, %v2229_v43  ;;  %v2247_v1 = vcombine.high %v2221_v16, %v2229_v43  ;;  %v1634_v16 = vcombine.low %v10931_v49, %v10971_v34  ;;  %v1635_v43 = vcombine.high %v10931_v49, %v10971_v34 }
 0x2f0   : > { %v2210_v48 = vcombine.low %v2186_v22, %v2202_v11  ;;  %v2211_v26 = vcombine.high %v2186_v22, %v2202_v11  ;;  %v2212_v10 = vcombine.low %v2193_v41, %v2209_v50  ;;  %v2213_v59 = vcombine.high %v2193_v41, %v2209_v50  ;;  %6571 = vrot.lane.b32.xlu0 %v10477_v23, %s10015_s30 }
 0x2f1   : > { %v2262_v37 = vcombine.low %v2237_v21, %v2245_v9  ;;  %v2263_v58 = vcombine.high %v2237_v21, %v2245_v9  ;;  %v2254_v22 = vrot.slane %v2246_v42, %v10703_v17  ;;  %v2261_v41 = vrot.slane %v2247_v1, %v10703_v17 }
 0x2f2   : > { %v9636_v47 = vpack.c.bf16 %v2210_v48, %v2210_v48  ;;  %v9652_v15 = vpack.c.bf16 %v2211_v26, %v2211_v26  ;;  %v9668_v0 = vpack.c.bf16 %v2212_v10, %v2212_v10  ;;  %v9684_v51 = vpack.c.bf16 %v2213_v59, %v2213_v59  ;;  %6573 = vrot.lane.b32.xlu1 %v10486_v53, %s10015_s30 }
 0x2f3   : > { %v2270_v11 = vrot.slane %v2262_v37, %v10703_v17  ;;  %v2277_v50 = vrot.slane %v2263_v58, %v10703_v17  ;;  %v1650_v21 = vcombine.low %v10934_v25, %v10974_v13  ;;  %v1651_v9 = vcombine.high %v10934_v25, %v10974_v13 }
 0x2f4   : > { %3491 = vst.msk [vmem:[%s10804_s22] sm:$0xf] %vm3490_vm1, %v9636_v47  ;;  %3507 = vst.msk [vmem:[%s10804_s22 + $0x40] sm:$0xf] %vm3490_vm1, %v9652_v15  ;;  %v1642_v42 = vrot.slane %v1634_v16, %v10703_v17  ;;  %v1649_v1 = vrot.slane %v1635_v43, %v10703_v17  ;;  %3711 = vrot.lane.b32.xlu0 %v10524_v45, %s10013_s28  ;;  %v1686_v16 = vcombine.low %v10842_v55, %v10992_v35 }
 0x2f5   : > { %3523 = vst.msk [vmem:[%s10804_s22 + $0x80] sm:$0xf] %vm3490_vm1, %v9668_v0  ;;  %3539 = vst.msk [vmem:[%s10804_s22 + $0xc0] sm:$0xf] %vm3490_vm1, %v9684_v51  ;;  %v2278_v48 = vcombine.low %v2254_v22, %v2270_v11  ;;  %v2279_v26 = vcombine.high %v2254_v22, %v2270_v11  ;;  %v2280_v10 = vcombine.low %v2261_v41, %v2277_v50  ;;  %v11044_v22 = vpop.permute.xlu1 %944 }
 0x2f6   : > { %v2281_v59 = vcombine.high %v2261_v41, %v2277_v50  ;;  %v1658_v49 = vrot.slane %v1650_v21, %v10703_v17  ;;  %v1665_v34 = vrot.slane %v1651_v9, %v10703_v17  ;;  %v2690_v47 = vcombine.low %v1642_v42, %v1649_v1  ;;  %v11046_v41 = vpop.permute.xlu0 %974  ;;  %3713 = vrot.lane.b32.xlu1 %v10530_v33, %s10013_s28 }
 0x2f7   : > { %v9637_v25 = vpack.c.bf16 %v2278_v48, %v2278_v48  ;;  %v9653_v13 = vpack.c.bf16 %v2279_v26, %v2279_v26  ;;  %v9669_v37 = vpack.c.bf16 %v2280_v10, %v2280_v10  ;;  %v9336_v15 = vcombine.high %v1642_v42, %v1649_v1 }
 0x2f8   : > { %v9685_v58 = vpack.c.bf16 %v2281_v59, %v2281_v59  ;;  %v2706_v0 = vcombine.low %v1658_v49, %v1665_v34  ;;  %v9337_v51 = vcombine.high %v1658_v49, %v1665_v34  ;;  %v1678_v11 = vrot.slane %v1670_v27, %v10689_v46  ;;  %3759 = vrot.lane.b32.xlu0 %v10524_v45, %s10014_s29 }
 0x2f9   : > { %v1685_v50 = vrot.slane %v1671_v36, %v10689_v46  ;;  %3492 = vst.msk [vmem:[%s10804_s22 + $0x4] sm:$0xf] %vm3490_vm1, %v9637_v25  ;;  %3508 = vst.msk [vmem:[%s10804_s22 + $0x44] sm:$0xf] %vm3490_vm1, %v9653_v13  ;;  %v1687_v43 = vcombine.high %v10842_v55, %v10992_v35  ;;  %v2697_v28 = vrot.slane %v2690_v47, %v10689_v46 }
 0x2fa   : > { %3524 = vst.msk [vmem:[%s10804_s22 + $0x84] sm:$0xf] %vm3490_vm1, %v9669_v37  ;;  %3540 = vst.msk [vmem:[%s10804_s22 + $0xc4] sm:$0xf] %vm3490_vm1, %v9685_v58  ;;  %v2705_v56 = vrot.slane %v9336_v15, %v10689_v46  ;;  %v2713_v27 = vrot.slane %v2706_v0, %v10689_v46  ;;  %v2721_v36 = vrot.slane %v9337_v51, %v10689_v46  ;;  %3761 = vrot.lane.b32.xlu1 %v10530_v33, %s10014_s29  ;;  %v991_v47 = vpop.permute.xlu0 %990 }
 0x2fb   : > { %v1694_v21 = vrot.slane %v1686_v16, %v10689_v46  ;;  %v1701_v9 = vrot.slane %v1687_v43, %v10689_v46  ;;  %v1466_v55 = vcombine.low %v10541_v14, %v11046_v41  ;;  %v1467_v35 = vcombine.high %v10541_v14, %v11046_v41  ;;  %v977_v14 = vpop.permute.xlu1 %976 }
 0x2fc   : > { %v2722_v48 = vcombine.low %v2697_v28, %v2705_v56  ;;  %v2723_v26 = vcombine.high %v2697_v28, %v2705_v56  ;;  %v2738_v10 = vcombine.low %v2713_v27, %v2721_v36  ;;  %v2739_v59 = vcombine.high %v2713_v27, %v2721_v36  ;;  %3807 = vrot.lane.b32.xlu0 %v10524_v45, %s10015_s30 }
 0x2fd   : > { %v1702_v42 = vcombine.low %v1678_v11, %v1694_v21  ;;  %v1703_v1 = vcombine.high %v1678_v11, %v1694_v21  ;;  %v1718_v49 = vcombine.low %v1685_v50, %v1701_v9  ;;  %v1719_v34 = vcombine.high %v1685_v50, %v1701_v9 }
 0x2fe   : > { %v2730_v25 = vrot.slane %v2722_v48, %v10703_v17  ;;  %v2737_v13 = vrot.slane %v2723_v26, %v10703_v17  ;;  %v2746_v37 = vrot.slane %v2738_v10, %v10703_v17  ;;  %v2753_v58 = vrot.slane %v2739_v59, %v10703_v17  ;;  %3809 = vrot.lane.b32.xlu1 %v10530_v33, %s10015_s30 }
 0x2ff   : > { %v1710_v15 = vrot.slane %v1702_v42, %v10703_v17  ;;  %v1717_v0 = vrot.slane %v1703_v1, %v10703_v17  ;;  %v1726_v51 = vrot.slane %v1718_v49, %v10703_v17  ;;  %v1733_v41 = vrot.slane %v1719_v34, %v10703_v17 }
 0x300   : > { %v2754_v11 = vcombine.low %v2730_v25, %v2746_v37  ;;  %v2755_v50 = vcombine.high %v2730_v25, %v2746_v37  ;;  %v2756_v16 = vcombine.low %v2737_v13, %v2753_v58  ;;  %v2757_v43 = vcombine.high %v2737_v13, %v2753_v58  ;;  %6487 = vrot.lane.b32.xlu0 %v10508_v57, %s10013_s28  ;;  %v11114_v37 = vpop.permute.xlu1 %992  ;;  %v1023_v58 = vpop.permute.xlu0 %1022 }
 0x301   : > { %v2758_v28 = vcombine.low %v1710_v15, %v1717_v0  ;;  %v9338_v56 = vcombine.high %v1710_v15, %v1717_v0  ;;  %v2774_v27 = vcombine.low %v1726_v51, %v1733_v41  ;;  %v9339_v36 = vcombine.high %v1726_v51, %v1733_v41 }
 0x302   : > { %v9644_v21 = vpack.c.bf16 %v2754_v11, %v2754_v11  ;;  %v9660_v9 = vpack.c.bf16 %v2755_v50, %v2755_v50  ;;  %v9676_v48 = vpack.c.bf16 %v2756_v16, %v2756_v16  ;;  %v9692_v26 = vpack.c.bf16 %v2757_v43, %v2757_v43  ;;  %6489 = vrot.lane.b32.xlu1 %v10514_v5, %s10013_s28 }
 0x303   : > { %v2765_v10 = vrot.slane %v2758_v28, %v10689_v46  ;;  %v2773_v59 = vrot.slane %v9338_v56, %v10689_v46  ;;  %v2781_v42 = vrot.slane %v2774_v27, %v10689_v46  ;;  %v2789_v1 = vrot.slane %v9339_v36, %v10689_v46 }
 0x304   : > { %3499 = vst.msk [vmem:[%s10804_s22 + $0x20] sm:$0xf] %vm3490_vm1, %v9644_v21  ;;  %3515 = vst.msk [vmem:[%s10804_s22 + $0x60] sm:$0xf] %vm3490_vm1, %v9660_v9  ;;  %v1534_v49 = vcombine.low %v10561_v44, %v977_v14  ;;  %v1535_v34 = vcombine.high %v10561_v44, %v977_v14  ;;  %v2010_v25 = vcombine.low %v10565_v29, %v991_v47  ;;  %6535 = vrot.lane.b32.xlu0 %v10508_v57, %s10014_s29 }
 0x305   : > { %3531 = vst.msk [vmem:[%s10804_s22 + $0xa0] sm:$0xf] %vm3490_vm1, %v9676_v48  ;;  %3547 = vst.msk [vmem:[%s10804_s22 + $0xe0] sm:$0xf] %vm3490_vm1, %v9692_v26  ;;  %v2011_v13 = vcombine.high %v10565_v29, %v991_v47  ;;  %v2790_v15 = vcombine.low %v2765_v10, %v2773_v59  ;;  %v2791_v0 = vcombine.high %v2765_v10, %v2773_v59  ;;  %v1025_v59 = vpop.permute.xlu1 %1024 }
 0x306   : > { %v2806_v51 = vcombine.low %v2781_v42, %v2789_v1  ;;  %v2807_v41 = vcombine.high %v2781_v42, %v2789_v1  ;;  %v1474_v11 = vrot.slane %v1466_v55, %v10689_v46  ;;  %v1481_v50 = vrot.slane %v1467_v35, %v10689_v46  ;;  %6537 = vrot.lane.b32.xlu1 %v10514_v5, %s10014_s29  ;;  %v1039_v42 = vpop.permute.xlu0 %1038 }
 0x307   : > { %v11121_v44 = vrot.slane %v1534_v49, %v10689_v46  ;;  %v11124_v14 = vrot.slane %v1535_v34, %v10689_v46  ;;  %v2798_v29 = vrot.slane %v2790_v15, %v10703_v17  ;;  %v2805_v47 = vrot.slane %v2791_v0, %v10703_v17 }
 0x308   : > { %v2814_v16 = vrot.slane %v2806_v51, %v10703_v17  ;;  %v2821_v43 = vrot.slane %v2807_v41, %v10703_v17  ;;  %v11133_v55 = vrot.slane %v2010_v25, %v10689_v46  ;;  %v11136_v35 = vrot.slane %v2011_v13, %v10689_v46  ;;  %6583 = vrot.lane.b32.xlu0 %v10508_v57, %s10015_s30 }
 0x309   : > { %v1482_v28 = vcombine.low %v10994_v62, %v1023_v58  ;;  %v1483_v56 = vcombine.high %v10994_v62, %v1023_v58  ;;  %v2078_v48 = vcombine.low %v10585_v6, %v11114_v37  ;;  %v2079_v26 = vcombine.high %v10585_v6, %v11114_v37 }
 0x30a   : > { %v2822_v27 = vcombine.low %v2798_v29, %v2814_v16  ;;  %v2823_v36 = vcombine.high %v2798_v29, %v2814_v16  ;;  %v2824_v21 = vcombine.low %v2805_v47, %v2821_v43  ;;  %v2825_v9 = vcombine.high %v2805_v47, %v2821_v43  ;;  %6585 = vrot.lane.b32.xlu1 %v10514_v5, %s10015_s30 }
 0x30b   : > { %v1490_v10 = vrot.slane %v1482_v28, %v10689_v46  ;;  %v1497_v62 = vrot.slane %v1483_v56, %v10689_v46  ;;  %v1550_v51 = vcombine.low %v11010_v39, %v1025_v59  ;;  %v1551_v41 = vcombine.high %v11010_v39, %v1025_v59 }
 0x30c   : > { %v9645_v1 = vpack.c.bf16 %v2822_v27, %v2822_v27  ;;  %v9661_v49 = vpack.c.bf16 %v2823_v36, %v2823_v36  ;;  %v9677_v34 = vpack.c.bf16 %v2824_v21, %v2824_v21  ;;  %v9693_v25 = vpack.c.bf16 %v2825_v9, %v2825_v9  ;;  %3707 = vrot.lane.b32.xlu0 %v10527_v8, %s10013_s28 }
 0x30d   : > { %v1498_v13 = vcombine.low %v1474_v11, %v1490_v10  ;;  %v1499_v58 = vcombine.high %v1474_v11, %v1490_v10  ;;  %v1514_v15 = vcombine.low %v1481_v50, %v1497_v62  ;;  %v1515_v0 = vcombine.high %v1481_v50, %v1497_v62 }
 0x30e   : > { %3500 = vst.msk [vmem:[%s10804_s22 + $0x24] sm:$0xf] %vm3490_vm1, %v9645_v1  ;;  %3516 = vst.msk [vmem:[%s10804_s22 + $0x64] sm:$0xf] %vm3490_vm1, %v9661_v49  ;;  %v2026_v29 = vcombine.low %v11012_v19, %v1039_v42  ;;  %v2027_v47 = vcombine.high %v11012_v19, %v1039_v42  ;;  %v1558_v39 = vrot.slane %v1550_v51, %v10689_v46  ;;  %3709 = vrot.lane.b32.xlu1 %v10537_v12, %s10013_s28 }
 0x30f   : > { %3532 = vst.msk [vmem:[%s10804_s22 + $0xa4] sm:$0xf] %vm3490_vm1, %v9677_v34  ;;  %3548 = vst.msk [vmem:[%s10804_s22 + $0xe4] sm:$0xf] %vm3490_vm1, %v9693_v25  ;;  %v1506_v11 = vrot.slane %v1498_v13, %v10703_v17  ;;  %v1513_v50 = vrot.slane %v1499_v58, %v10703_v17  ;;  %v1522_v16 = vrot.slane %v1514_v15, %v10703_v17 }
 0x310   : > { %v1529_v43 = vrot.slane %v1515_v0, %v10703_v17  ;;  %v1565_v28 = vrot.slane %v1551_v41, %v10689_v46  ;;  %v11173_v19 = vrot.slane %v2026_v29, %v10689_v46  ;;  %v11176_v56 = vrot.slane %v2027_v47, %v10689_v46  ;;  %3755 = vrot.lane.b32.xlu0 %v10527_v8, %s10014_s29  ;;  %v11194_v29 = vpop.permute.xlu1 %1040  ;;  %v11196_v47 = vpop.permute.xlu0 %922 }
 0x311   : > { %v2554_v27 = vcombine.low %v1506_v11, %v1513_v50  ;;  %v9332_v36 = vcombine.high %v1506_v11, %v1513_v50  ;;  %v1566_v10 = vcombine.low %v11121_v44, %v1558_v39  ;;  %v1567_v62 = vcombine.high %v11121_v44, %v1558_v39 }
 0x312   : > { %v2570_v21 = vcombine.low %v1522_v16, %v1529_v43  ;;  %v9333_v9 = vcombine.high %v1522_v16, %v1529_v43  ;;  %v1582_v59 = vcombine.low %v11124_v14, %v1565_v28  ;;  %v1583_v42 = vcombine.high %v11124_v14, %v1565_v28  ;;  %3757 = vrot.lane.b32.xlu1 %v10537_v12, %s10014_s29 }
 0x313   : > { %v2561_v1 = vrot.slane %v2554_v27, %v10689_v46  ;;  %v2569_v49 = vrot.slane %v9332_v36, %v10689_v46  ;;  %v1574_v44 = vrot.slane %v1566_v10, %v10703_v17  ;;  %v1581_v13 = vrot.slane %v1567_v62, %v10703_v17 }
 0x314   : > { %v2577_v34 = vrot.slane %v2570_v21, %v10689_v46  ;;  %v2585_v25 = vrot.slane %v9333_v9, %v10689_v46  ;;  %v1590_v14 = vrot.slane %v1582_v59, %v10703_v17  ;;  %v1597_v58 = vrot.slane %v1583_v42, %v10703_v17  ;;  %3803 = vrot.lane.b32.xlu0 %v10527_v8, %s10015_s30 }
 0x315   : > { %v2586_v15 = vcombine.low %v2561_v1, %v2569_v49  ;;  %v2587_v0 = vcombine.high %v2561_v1, %v2569_v49  ;;  %v2622_v11 = vcombine.low %v1574_v44, %v1581_v13  ;;  %v9334_v50 = vcombine.high %v1574_v44, %v1581_v13 }
 0x316   : > { %v2602_v51 = vcombine.low %v2577_v34, %v2585_v25  ;;  %v2603_v41 = vcombine.high %v2577_v34, %v2585_v25  ;;  %v2638_v16 = vcombine.low %v1590_v14, %v1597_v58  ;;  %v9335_v43 = vcombine.high %v1590_v14, %v1597_v58  ;;  %3805 = vrot.lane.b32.xlu1 %v10537_v12, %s10015_s30 }
 0x317   : > { %v2594_v39 = vrot.slane %v2586_v15, %v10703_v17  ;;  %v2601_v28 = vrot.slane %v2587_v0, %v10703_v17  ;;  %v2629_v21 = vrot.slane %v2622_v11, %v10689_v46  ;;  %v2637_v9 = vrot.slane %v9334_v50, %v10689_v46 }
 0x318   : > { %v2610_v27 = vrot.slane %v2602_v51, %v10703_v17  ;;  %v2617_v36 = vrot.slane %v2603_v41, %v10703_v17  ;;  %v2645_v10 = vrot.slane %v2638_v16, %v10689_v46  ;;  %v2653_v62 = vrot.slane %v9335_v43, %v10689_v46  ;;  %v11212_v51 = vpop.permute.xlu1 %924  ;;  %v11214_v41 = vpop.permute.xlu0 %938  ;;  %6483 = vrot.lane.b32.xlu0 %v10511_v3, %s10013_s28 }
 0x319   : > { %v2654_v34 = vcombine.low %v2629_v21, %v2637_v9  ;;  %v2655_v25 = vcombine.high %v2629_v21, %v2637_v9 }
 0x31a   : > { %v2618_v59 = vcombine.low %v2594_v39, %v2610_v27  ;;  %v2619_v42 = vcombine.high %v2594_v39, %v2610_v27  ;;  %v2620_v1 = vcombine.low %v2601_v28, %v2617_v36  ;;  %v2621_v49 = vcombine.high %v2601_v28, %v2617_v36  ;;  %6485 = vrot.lane.b32.xlu1 %v10521_v7, %s10013_s28 }
 0x31b   : > { %v2670_v44 = vcombine.low %v2645_v10, %v2653_v62  ;;  %v2671_v13 = vcombine.high %v2645_v10, %v2653_v62  ;;  %v2662_v11 = vrot.slane %v2654_v34, %v10703_v17  ;;  %v2669_v50 = vrot.slane %v2655_v25, %v10703_v17 }
 0x31c   : > { %v9642_v14 = vpack.c.bf16 %v2618_v59, %v2618_v59  ;;  %v9658_v58 = vpack.c.bf16 %v2619_v42, %v2619_v42  ;;  %v9674_v15 = vpack.c.bf16 %v2620_v1, %v2620_v1  ;;  %v9690_v0 = vpack.c.bf16 %v2621_v49, %v2621_v49  ;;  %6531 = vrot.lane.b32.xlu0 %v10511_v3, %s10014_s29 }
 0x31d   : > { %v2678_v16 = vrot.slane %v2670_v44, %v10703_v17  ;;  %v2685_v43 = vrot.slane %v2671_v13, %v10703_v17  ;;  %v2042_v39 = vcombine.low %v11133_v55, %v11173_v19  ;;  %v2043_v28 = vcombine.high %v11133_v55, %v11173_v19 }
 0x31e   : > { %3497 = vst.msk [vmem:[%s10804_s22 + $0x18] sm:$0xf] %vm3490_vm1, %v9642_v14  ;;  %3513 = vst.msk [vmem:[%s10804_s22 + $0x58] sm:$0xf] %vm3490_vm1, %v9658_v58  ;;  %v2058_v27 = vcombine.low %v11136_v35, %v11176_v56  ;;  %v2059_v36 = vcombine.high %v11136_v35, %v11176_v56  ;;  %v11246_v14 = vpop.permute.xlu1 %940  ;;  %v11248_v58 = vpop.permute.xlu0 %970  ;;  %6533 = vrot.lane.b32.xlu1 %v10521_v7, %s10014_s29 }
 0x31f   : > { %3529 = vst.msk [vmem:[%s10804_s22 + $0x98] sm:$0xf] %vm3490_vm1, %v9674_v15  ;;  %3545 = vst.msk [vmem:[%s10804_s22 + $0xd8] sm:$0xf] %vm3490_vm1, %v9690_v0  ;;  %v2686_v21 = vcombine.low %v2662_v11, %v2678_v16  ;;  %v2687_v9 = vcombine.high %v2662_v11, %v2678_v16  ;;  %v2688_v10 = vcombine.low %v2669_v50, %v2685_v43 }
 0x320   : > { %v2689_v62 = vcombine.high %v2669_v50, %v2685_v43  ;;  %v2050_v59 = vrot.slane %v2042_v39, %v10703_v17  ;;  %v2057_v42 = vrot.slane %v2043_v28, %v10703_v17  ;;  %v2066_v55 = vrot.slane %v2058_v27, %v10703_v17  ;;  %6579 = vrot.lane.b32.xlu0 %v10511_v3, %s10015_s30 }
 0x321   : > { %v2073_v19 = vrot.slane %v2059_v36, %v10703_v17  ;;  %v9643_v35 = vpack.c.bf16 %v2686_v21, %v2686_v21  ;;  %v9659_v56 = vpack.c.bf16 %v2687_v9, %v2687_v9  ;;  %v9675_v1 = vpack.c.bf16 %v2688_v10, %v2688_v10 }
 0x322   : > { %v9691_v49 = vpack.c.bf16 %v2689_v62, %v2689_v62  ;;  %v3098_v34 = vcombine.low %v2050_v59, %v2057_v42  ;;  %v9348_v25 = vcombine.high %v2050_v59, %v2057_v42  ;;  %v2086_v15 = vrot.slane %v2078_v48, %v10689_v46  ;;  %6581 = vrot.lane.b32.xlu1 %v10521_v7, %s10015_s30 }
 0x323   : > { %v3114_v44 = vcombine.low %v2066_v55, %v2073_v19  ;;  %v9349_v13 = vcombine.high %v2066_v55, %v2073_v19  ;;  %v2093_v0 = vrot.slane %v2079_v26, %v10689_v46  ;;  %3498 = vst.msk [vmem:[%s10804_s22 + $0x1c] sm:$0xf] %vm3490_vm1, %v9643_v35  ;;  %3514 = vst.msk [vmem:[%s10804_s22 + $0x5c] sm:$0xf] %vm3490_vm1, %v9659_v56  ;;  %v987_v35 = vpop.permute.xlu0 %986 }
 0x324   : > { %3530 = vst.msk [vmem:[%s10804_s22 + $0x9c] sm:$0xf] %vm3490_vm1, %v9675_v1  ;;  %3546 = vst.msk [vmem:[%s10804_s22 + $0xdc] sm:$0xf] %vm3490_vm1, %v9691_v49  ;;  %v2094_v11 = vcombine.low %v11044_v22, %v11194_v29  ;;  %v2095_v50 = vcombine.high %v11044_v22, %v11194_v29  ;;  %v3105_v6 = vrot.slane %v3098_v34, %v10689_v46  ;;  %3719 = vrot.lane.b32.xlu0 %v10568_v60, %s10013_s28 }
 0x325   : > { %v3113_v37 = vrot.slane %v9348_v25, %v10689_v46  ;;  %v3121_v48 = vrot.slane %v3114_v44, %v10689_v46  ;;  %v3129_v26 = vrot.slane %v9349_v13, %v10689_v46  ;;  %v1330_v22 = vcombine.low %v10408_v30, %v11248_v58 }
 0x326   : > { %v2102_v16 = vrot.slane %v2094_v11, %v10689_v46  ;;  %v2109_v43 = vrot.slane %v2095_v50, %v10689_v46  ;;  %v1331_v29 = vcombine.high %v10408_v30, %v11248_v58  ;;  %v973_v30 = vpop.permute.xlu1 %972  ;;  %3721 = vrot.lane.b32.xlu1 %v10574_v4, %s10013_s28 }
 0x327   : > { %v3130_v39 = vcombine.low %v3105_v6, %v3113_v37  ;;  %v3131_v28 = vcombine.high %v3105_v6, %v3113_v37  ;;  %v3146_v27 = vcombine.low %v3121_v48, %v3129_v26  ;;  %v3147_v36 = vcombine.high %v3121_v48, %v3129_v26 }
 0x328   : > { %v2110_v21 = vcombine.low %v2086_v15, %v2102_v16  ;;  %v2111_v9 = vcombine.high %v2086_v15, %v2102_v16  ;;  %v2126_v10 = vcombine.low %v2093_v0, %v2109_v43  ;;  %v2127_v62 = vcombine.high %v2093_v0, %v2109_v43  ;;  %3767 = vrot.lane.b32.xlu0 %v10568_v60, %s10014_s29 }
 0x329   : > { %v3138_v59 = vrot.slane %v3130_v39, %v10703_v17  ;;  %v3145_v42 = vrot.slane %v3131_v28, %v10703_v17  ;;  %v3154_v55 = vrot.slane %v3146_v27, %v10703_v17  ;;  %v3161_v19 = vrot.slane %v3147_v36, %v10703_v17 }
 0x32a   : > { %v2118_v56 = vrot.slane %v2110_v21, %v10703_v17  ;;  %v2125_v1 = vrot.slane %v2111_v9, %v10703_v17  ;;  %v2134_v49 = vrot.slane %v2126_v10, %v10703_v17  ;;  %v2141_v34 = vrot.slane %v2127_v62, %v10703_v17  ;;  %v11316_v10 = vpop.permute.xlu1 %988  ;;  %v1019_v62 = vpop.permute.xlu0 %1018  ;;  %3769 = vrot.lane.b32.xlu1 %v10574_v4, %s10014_s29 }
 0x32b   : > { %v3162_v25 = vcombine.low %v3138_v59, %v3154_v55  ;;  %v3163_v44 = vcombine.high %v3138_v59, %v3154_v55  ;;  %v3164_v13 = vcombine.low %v3145_v42, %v3161_v19  ;;  %v3165_v58 = vcombine.high %v3145_v42, %v3161_v19 }
 0x32c   : > { %v3166_v15 = vcombine.low %v2118_v56, %v2125_v1  ;;  %v9350_v0 = vcombine.high %v2118_v56, %v2125_v1  ;;  %v3182_v11 = vcombine.low %v2134_v49, %v2141_v34  ;;  %v9351_v50 = vcombine.high %v2134_v49, %v2141_v34  ;;  %3815 = vrot.lane.b32.xlu0 %v10568_v60, %s10015_s30 }
 0x32d   : > { %v9650_v6 = vpack.c.bf16 %v3162_v25, %v3162_v25  ;;  %v9666_v37 = vpack.c.bf16 %v3163_v44, %v3163_v44  ;;  %v9682_v48 = vpack.c.bf16 %v3164_v13, %v3164_v13  ;;  %v9698_v26 = vpack.c.bf16 %v3165_v58, %v3165_v58 }
 0x32e   : > { %v3173_v16 = vrot.slane %v3166_v15, %v10689_v46  ;;  %v3181_v43 = vrot.slane %v9350_v0, %v10689_v46  ;;  %v3189_v39 = vrot.slane %v3182_v11, %v10689_v46  ;;  %v3197_v28 = vrot.slane %v9351_v50, %v10689_v46  ;;  %3817 = vrot.lane.b32.xlu1 %v10574_v4, %s10015_s30 }
 0x32f   : > { %3505 = vst.msk [vmem:[%s10804_s22 + $0x38] sm:$0xf] %vm3490_vm1, %v9650_v6  ;;  %3521 = vst.msk [vmem:[%s10804_s22 + $0x78] sm:$0xf] %vm3490_vm1, %v9666_v37  ;;  %v1398_v27 = vcombine.low %v10417_v32, %v973_v30  ;;  %v1399_v36 = vcombine.high %v10417_v32, %v973_v30  ;;  %v1874_v21 = vcombine.low %v10422_v20, %v987_v35  ;;  %v1021_v37 = vpop.permute.xlu1 %1020 }
 0x330   : > { %3537 = vst.msk [vmem:[%s10804_s22 + $0xb8] sm:$0xf] %vm3490_vm1, %v9682_v48  ;;  %3553 = vst.msk [vmem:[%s10804_s22 + $0xf8] sm:$0xf] %vm3490_vm1, %v9698_v26  ;;  %v1875_v9 = vcombine.high %v10422_v20, %v987_v35  ;;  %v3198_v59 = vcombine.low %v3173_v16, %v3181_v43  ;;  %v3199_v42 = vcombine.high %v3173_v16, %v3181_v43  ;;  %v1035_v48 = vpop.permute.xlu0 %1034  ;;  %6495 = vrot.lane.b32.xlu0 %v10544_v18, %s10013_s28 }
 0x331   : > { %v3214_v55 = vcombine.low %v3189_v39, %v3197_v28  ;;  %v3215_v19 = vcombine.high %v3189_v39, %v3197_v28  ;;  %v1338_v56 = vrot.slane %v1330_v22, %v10689_v46  ;;  %v1345_v1 = vrot.slane %v1331_v29, %v10689_v46 }
 0x332   : > { %v11323_v32 = vrot.slane %v1398_v27, %v10689_v46  ;;  %v11326_v30 = vrot.slane %v1399_v36, %v10689_v46  ;;  %v3206_v20 = vrot.slane %v3198_v59, %v10703_v17  ;;  %v3213_v35 = vrot.slane %v3199_v42, %v10703_v17  ;;  %6497 = vrot.lane.b32.xlu1 %v10550_v31, %s10013_s28 }
 0x333   : > { %v3222_v49 = vrot.slane %v3214_v55, %v10703_v17  ;;  %v3229_v34 = vrot.slane %v3215_v19, %v10703_v17  ;;  %v11335_v22 = vrot.slane %v1874_v21, %v10689_v46  ;;  %v11338_v29 = vrot.slane %v1875_v9, %v10689_v46 }
 0x334   : > { %v1346_v25 = vcombine.low %v11196_v47, %v1019_v62  ;;  %v1347_v44 = vcombine.high %v11196_v47, %v1019_v62  ;;  %v1942_v11 = vcombine.low %v10431_v40, %v11316_v10  ;;  %v1943_v50 = vcombine.high %v10431_v40, %v11316_v10  ;;  %6543 = vrot.lane.b32.xlu0 %v10544_v18, %s10014_s29 }
 0x335   : > { %v3230_v13 = vcombine.low %v3206_v20, %v3222_v49  ;;  %v3231_v58 = vcombine.high %v3206_v20, %v3222_v49  ;;  %v3232_v15 = vcombine.low %v3213_v35, %v3229_v34  ;;  %v3233_v0 = vcombine.high %v3213_v35, %v3229_v34 }
 0x336   : > { %v1354_v6 = vrot.slane %v1346_v25, %v10689_v46  ;;  %v1361_v47 = vrot.slane %v1347_v44, %v10689_v46  ;;  %v1414_v9 = vcombine.low %v11212_v51, %v1021_v37  ;;  %v1415_v62 = vcombine.high %v11212_v51, %v1021_v37  ;;  %6545 = vrot.lane.b32.xlu1 %v10550_v31, %s10014_s29 }
 0x337   : > { %v9651_v26 = vpack.c.bf16 %v3230_v13, %v3230_v13  ;;  %v9667_v16 = vpack.c.bf16 %v3231_v58, %v3231_v58  ;;  %v9683_v43 = vpack.c.bf16 %v3232_v15, %v3232_v15  ;;  %v9699_v39 = vpack.c.bf16 %v3233_v0, %v3233_v0 }
 0x338   : > { %v1362_v28 = vcombine.low %v1338_v56, %v1354_v6  ;;  %v1363_v27 = vcombine.high %v1338_v56, %v1354_v6  ;;  %v1378_v36 = vcombine.low %v1345_v1, %v1361_v47  ;;  %v1379_v21 = vcombine.high %v1345_v1, %v1361_v47 }
 0x339   : > { %3506 = vst.msk [vmem:[%s10804_s22 + $0x3c] sm:$0xf] %vm3490_vm1, %v9651_v26  ;;  %3522 = vst.msk [vmem:[%s10804_s22 + $0x7c] sm:$0xf] %vm3490_vm1, %v9667_v16  ;;  %v1890_v59 = vcombine.low %v11214_v41, %v1035_v48  ;;  %v1891_v42 = vcombine.high %v11214_v41, %v1035_v48  ;;  %v1422_v51 = vrot.slane %v1414_v9, %v10689_v46  ;;  %v12636_v26 = vld [vmem:[#allocation4_spill] sm:$0xff] }
 0x33a   : > { %3538 = vst.msk [vmem:[%s10804_s22 + $0xbc] sm:$0xf] %vm3490_vm1, %v9683_v43  ;;  %3554 = vst.msk [vmem:[%s10804_s22 + $0xfc] sm:$0xf] %vm3490_vm1, %v9699_v39  ;;  %v1370_v55 = vrot.slane %v1362_v28, %v10703_v17  ;;  %v1377_v19 = vrot.slane %v1363_v27, %v10703_v17  ;;  %v1386_v56 = vrot.slane %v1378_v36, %v10703_v17  ;;  %3715 = vrot.lane.b32.xlu0 %v12636_v26, %s10013_s28 }
 0x33b   : > { %v1393_v1 = vrot.slane %v1379_v21, %v10703_v17  ;;  %v1429_v20 = vrot.slane %v1415_v62, %v10689_v46  ;;  %v11375_v41 = vrot.slane %v1890_v59, %v10689_v46  ;;  %v11378_v35 = vrot.slane %v1891_v42, %v10689_v46  ;;  %v12637_v42 = vld [vmem:[#allocation5_spill] sm:$0xff] }
 0x33c   : > { %v2418_v49 = vcombine.low %v1370_v55, %v1377_v19  ;;  %v9328_v34 = vcombine.high %v1370_v55, %v1377_v19  ;;  %v1430_v13 = vcombine.low %v11323_v32, %v1422_v51  ;;  %v1431_v58 = vcombine.high %v11323_v32, %v1422_v51  ;;  %3717 = vrot.lane.b32.xlu1 %v12637_v42, %s10013_s28 }
 0x33d   : > { %v2434_v25 = vcombine.low %v1386_v56, %v1393_v1  ;;  %v9329_v44 = vcombine.high %v1386_v56, %v1393_v1  ;;  %v1446_v15 = vcombine.low %v11326_v30, %v1429_v20  ;;  %v1447_v0 = vcombine.high %v11326_v30, %v1429_v20 }
 0x33e   : > { %v2425_v6 = vrot.slane %v2418_v49, %v10689_v46  ;;  %v2433_v47 = vrot.slane %v9328_v34, %v10689_v46  ;;  %v1438_v32 = vrot.slane %v1430_v13, %v10703_v17  ;;  %v1445_v16 = vrot.slane %v1431_v58, %v10703_v17  ;;  %3763 = vrot.lane.b32.xlu0 %v12636_v26, %s10014_s29 }
 0x33f   : > { %v2441_v37 = vrot.slane %v2434_v25, %v10689_v46  ;;  %v2449_v48 = vrot.slane %v9329_v44, %v10689_v46  ;;  %v1454_v30 = vrot.slane %v1446_v15, %v10703_v17  ;;  %v1461_v43 = vrot.slane %v1447_v0, %v10703_v17 }
 0x340   : > { %v2450_v39 = vcombine.low %v2425_v6, %v2433_v47  ;;  %v2451_v28 = vcombine.high %v2425_v6, %v2433_v47  ;;  %v2486_v21 = vcombine.low %v1438_v32, %v1445_v16  ;;  %v9330_v9 = vcombine.high %v1438_v32, %v1445_v16  ;;  %3765 = vrot.lane.b32.xlu1 %v12637_v42, %s10014_s29 }
 0x341   : > { %v2466_v27 = vcombine.low %v2441_v37, %v2449_v48  ;;  %v2467_v36 = vcombine.high %v2441_v37, %v2449_v48  ;;  %v2502_v62 = vcombine.low %v1454_v30, %v1461_v43  ;;  %v9331_v59 = vcombine.high %v1454_v30, %v1461_v43  ;;  %v11410_v30 = vpop.permute.xlu0 %3695 }
 0x342   : > { %v2458_v55 = vrot.slane %v2450_v39, %v10703_v17  ;;  %v2465_v19 = vrot.slane %v2451_v28, %v10703_v17  ;;  %v2493_v51 = vrot.slane %v2486_v21, %v10689_v46  ;;  %v2501_v20 = vrot.slane %v9330_v9, %v10689_v46  ;;  %3811 = vrot.lane.b32.xlu0 %v12636_v26, %s10015_s30 }
 0x343   : > { %v2474_v56 = vrot.slane %v2466_v27, %v10703_v17  ;;  %v2481_v1 = vrot.slane %v2467_v36, %v10703_v17  ;;  %v2509_v49 = vrot.slane %v2502_v62, %v10689_v46  ;;  %v2517_v34 = vrot.slane %v9331_v59, %v10689_v46 }
 0x344   : > { %v2518_v15 = vcombine.low %v2493_v51, %v2501_v20  ;;  %v2519_v0 = vcombine.high %v2493_v51, %v2501_v20  ;;  %v1906_v36 = vcombine.low %v11335_v22, %v11375_v41  ;;  %v1907_v21 = vcombine.high %v11335_v22, %v11375_v41  ;;  %3813 = vrot.lane.b32.xlu1 %v12637_v42, %s10015_s30  ;;  %v1037_v20 = vpop.permute.xlu1 %1036 }
 0x345   : > { %v2482_v25 = vcombine.low %v2458_v55, %v2474_v56  ;;  %v2483_v44 = vcombine.high %v2458_v55, %v2474_v56  ;;  %v2484_v13 = vcombine.low %v2465_v19, %v2481_v1  ;;  %v2485_v58 = vcombine.high %v2465_v19, %v2481_v1 }
 0x346   : > { %v2534_v6 = vcombine.low %v2509_v49, %v2517_v34  ;;  %v2535_v47 = vcombine.high %v2509_v49, %v2517_v34  ;;  %v2526_v43 = vrot.slane %v2518_v15, %v10703_v17  ;;  %v2533_v39 = vrot.slane %v2519_v0, %v10703_v17  ;;  %v11442_v0 = vpop.permute.xlu0 %3743 }
 0x347   : > { %v9640_v37 = vpack.c.bf16 %v2482_v25, %v2482_v25  ;;  %v9656_v48 = vpack.c.bf16 %v2483_v44, %v2483_v44  ;;  %v9672_v32 = vpack.c.bf16 %v2484_v13, %v2484_v13  ;;  %v9688_v16 = vpack.c.bf16 %v2485_v58, %v2485_v58 }
 0x348   : > { %v2542_v28 = vrot.slane %v2534_v6, %v10703_v17  ;;  %v2549_v27 = vrot.slane %v2535_v47, %v10703_v17  ;;  %v1922_v9 = vcombine.low %v11338_v29, %v11378_v35  ;;  %v1923_v62 = vcombine.high %v11338_v29, %v11378_v35  ;;  %v12638_v29 = vld [vmem:[#allocation2_spill] sm:$0xff] }
 0x349   : > { %3495 = vst.msk [vmem:[%s10804_s22 + $0x10] sm:$0xf] %vm3490_vm1, %v9640_v37  ;;  %3511 = vst.msk [vmem:[%s10804_s22 + $0x50] sm:$0xf] %vm3490_vm1, %v9656_v48  ;;  %v1914_v1 = vrot.slane %v1906_v36, %v10703_v17  ;;  %v1921_v51 = vrot.slane %v1907_v21, %v10703_v17  ;;  %6491 = vrot.lane.b32.xlu0 %v12638_v29, %s10013_s28  ;;  %v1950_v6 = vrot.slane %v1942_v11, %v10689_v46 }
 0x34a   : > { %3527 = vst.msk [vmem:[%s10804_s22 + $0x90] sm:$0xf] %vm3490_vm1, %v9672_v32  ;;  %3543 = vst.msk [vmem:[%s10804_s22 + $0xd0] sm:$0xf] %vm3490_vm1, %v9688_v16  ;;  %v2550_v59 = vcombine.low %v2526_v43, %v2542_v28  ;;  %v2551_v55 = vcombine.high %v2526_v43, %v2542_v28  ;;  %v2552_v19 = vcombine.low %v2533_v39, %v2549_v27  ;;  %v12639_v32 = vld [vmem:[#allocation3_spill] sm:$0xff] }
 0x34b   : > { %v2553_v56 = vcombine.high %v2533_v39, %v2549_v27  ;;  %v1930_v22 = vrot.slane %v1922_v9, %v10703_v17  ;;  %v1937_v41 = vrot.slane %v1923_v62, %v10703_v17  ;;  %v2962_v44 = vcombine.low %v1914_v1, %v1921_v51  ;;  %6493 = vrot.lane.b32.xlu1 %v12639_v32, %s10013_s28  ;;  %s11626_s28 = scalar_lea.vmem %s12604_s11, %s10788_s16 }
 0x34c   : > { %v9641_v35 = vpack.c.bf16 %v2550_v59, %v2550_v59  ;;  %v9657_v49 = vpack.c.bf16 %v2551_v55, %v2551_v55  ;;  %v9673_v34 = vpack.c.bf16 %v2552_v19, %v2552_v19  ;;  %v9344_v13 = vcombine.high %v1914_v1, %v1921_v51 }
 0x34d   : > { %v9689_v25 = vpack.c.bf16 %v2553_v56, %v2553_v56  ;;  %v2978_v58 = vcombine.low %v1930_v22, %v1937_v41  ;;  %v9345_v15 = vcombine.high %v1930_v22, %v1937_v41  ;;  %v1957_v47 = vrot.slane %v1943_v50, %v10689_v46  ;;  %6539 = vrot.lane.b32.xlu0 %v12638_v29, %s10014_s29  ;;  %v11476_v56 = vpop.permute.xlu1 %3697 }
 0x34e   : > { %3496 = vst.msk [vmem:[%s10804_s22 + $0x14] sm:$0xf] %vm3490_vm1, %v9641_v35  ;;  %3512 = vst.msk [vmem:[%s10804_s22 + $0x54] sm:$0xf] %vm3490_vm1, %v9657_v49  ;;  %v1958_v37 = vcombine.low %v11246_v14, %v1037_v20  ;;  %v1959_v48 = vcombine.high %v11246_v14, %v1037_v20  ;;  %v2969_v11 = vrot.slane %v2962_v44, %v10689_v46  ;;  %v12640_v14 = vld [vmem:[#allocation6_spill] sm:$0xff] }
 0x34f   : > { %3528 = vst.msk [vmem:[%s10804_s22 + $0x94] sm:$0xf] %vm3490_vm1, %v9673_v34  ;;  %3544 = vst.msk [vmem:[%s10804_s22 + $0xd4] sm:$0xf] %vm3490_vm1, %v9689_v25  ;;  %v2977_v40 = vrot.slane %v9344_v13, %v10689_v46  ;;  %v2985_v10 = vrot.slane %v2978_v58, %v10689_v46  ;;  %v2993_v50 = vrot.slane %v9345_v15, %v10689_v46  ;;  %6541 = vrot.lane.b32.xlu1 %v12639_v32, %s10014_s29  ;;  %v3792_v15 = vpop.permute.xlu0 %3791 }
 0x350   : > { %v1966_v16 = vrot.slane %v1958_v37, %v10689_v46  ;;  %v1973_v43 = vrot.slane %v1959_v48, %v10689_v46  ;;  %v3971_v39 = vcombine.low %v12640_v14, %v11442_v0  ;;  %v3972_v28 = vcombine.high %v12640_v14, %v11442_v0 }
 0x351   : > { %v2994_v27 = vcombine.low %v2969_v11, %v2977_v40  ;;  %v2995_v36 = vcombine.high %v2969_v11, %v2977_v40  ;;  %v3010_v21 = vcombine.low %v2985_v10, %v2993_v50  ;;  %v3011_v9 = vcombine.high %v2985_v10, %v2993_v50  ;;  %6587 = vrot.lane.b32.xlu0 %v12638_v29, %s10015_s30 }
 0x352   : > { %v1974_v62 = vcombine.low %v1950_v6, %v1966_v16  ;;  %v1975_v59 = vcombine.high %v1950_v6, %v1966_v16  ;;  %v1990_v55 = vcombine.low %v1957_v47, %v1973_v43  ;;  %v1991_v19 = vcombine.high %v1957_v47, %v1973_v43 }
 0x353   : > { %v3002_v1 = vrot.slane %v2994_v27, %v10703_v17  ;;  %v3009_v51 = vrot.slane %v2995_v36, %v10703_v17  ;;  %v3018_v22 = vrot.slane %v3010_v21, %v10703_v17  ;;  %v3025_v41 = vrot.slane %v3011_v9, %v10703_v17  ;;  %6589 = vrot.lane.b32.xlu1 %v12639_v32, %s10015_s30  ;;  %v3746_v27 = vpop.permute.xlu1 %3745 }
 0x354   : > { %v1982_v20 = vrot.slane %v1974_v62, %v10703_v17  ;;  %v1989_v35 = vrot.slane %v1975_v59, %v10703_v17  ;;  %v1998_v49 = vrot.slane %v1990_v55, %v10703_v17  ;;  %v2005_v34 = vrot.slane %v1991_v19, %v10703_v17 }
 0x355   : > { %v3026_v25 = vcombine.low %v3002_v1, %v3018_v22  ;;  %v3027_v44 = vcombine.high %v3002_v1, %v3018_v22  ;;  %v3028_v13 = vcombine.low %v3009_v51, %v3025_v41  ;;  %v3029_v58 = vcombine.high %v3009_v51, %v3025_v41  ;;  %6591 = vrot.lane.b32.xlu0 %v10544_v18, %s10015_s30  ;;  %v12641_v51 = vld [vmem:[#allocation7_spill] sm:$0xff] }
 0x356   : > { %v3030_v0 = vcombine.low %v1982_v20, %v1989_v35  ;;  %v9346_v6 = vcombine.high %v1982_v20, %v1989_v35  ;;  %v3046_v47 = vcombine.low %v1998_v49, %v2005_v34  ;;  %v9347_v37 = vcombine.high %v1998_v49, %v2005_v34 }
 0x357   : > { %v9648_v48 = vpack.c.bf16 %v3026_v25, %v3026_v25  ;;  %v9664_v11 = vpack.c.bf16 %v3027_v44, %v3027_v44  ;;  %v9680_v40 = vpack.c.bf16 %v3028_v13, %v3028_v13  ;;  %v9696_v10 = vpack.c.bf16 %v3029_v58, %v3029_v58  ;;  %6593 = vrot.lane.b32.xlu1 %v10550_v31, %s10015_s30 }
 0x358   : > { %v3037_v50 = vrot.slane %v3030_v0, %v10689_v46  ;;  %v3045_v16 = vrot.slane %v9346_v6, %v10689_v46  ;;  %v3053_v43 = vrot.slane %v3046_v47, %v10689_v46  ;;  %v3061_v14 = vrot.slane %v9347_v37, %v10689_v46 }
 0x359   : > { %3503 = vst.msk [vmem:[%s10804_s22 + $0x30] sm:$0xf] %vm3490_vm1, %v9648_v48  ;;  %3519 = vst.msk [vmem:[%s10804_s22 + $0x70] sm:$0xf] %vm3490_vm1, %v9664_v11  ;;  %v3979_v36 = vrot.slane %v3971_v39, %v10689_v46  ;;  %v3986_v21 = vrot.slane %v3972_v28, %v10689_v46  ;;  %v3987_v9 = vcombine.low %v11410_v30, %v3792_v15  ;;  %v11516_v28 = vpop.permute.xlu0 %6471 }
 0x35a   : > { %3535 = vst.msk [vmem:[%s10804_s22 + $0xb0] sm:$0xf] %vm3490_vm1, %v9680_v40  ;;  %3551 = vst.msk [vmem:[%s10804_s22 + $0xf0] sm:$0xf] %vm3490_vm1, %v9696_v10  ;;  %v3988_v62 = vcombine.high %v11410_v30, %v3792_v15  ;;  %v3062_v59 = vcombine.low %v3037_v50, %v3045_v16  ;;  %v3063_v55 = vcombine.high %v3037_v50, %v3045_v16  ;;  %v3794_v10 = vpop.permute.xlu1 %3793 }
 0x35b   : > { %v3078_v19 = vcombine.low %v3053_v43, %v3061_v14  ;;  %v3079_v1 = vcombine.high %v3053_v43, %v3061_v14  ;;  %v4039_v22 = vcombine.low %v12641_v51, %v3746_v27  ;;  %v4040_v41 = vcombine.high %v12641_v51, %v3746_v27 }
 0x35c   : > { %v3995_v20 = vrot.slane %v3987_v9, %v10689_v46  ;;  %v4002_v39 = vrot.slane %v3988_v62, %v10689_v46  ;;  %v3070_v35 = vrot.slane %v3062_v59, %v10703_v17  ;;  %v3077_v30 = vrot.slane %v3063_v55, %v10703_v17 }
 0x35d   : > { %v3086_v49 = vrot.slane %v3078_v19, %v10703_v17  ;;  %v3093_v34 = vrot.slane %v3079_v1, %v10703_v17  ;;  %v6520_v62 = vpop.permute.xlu0 %6519  ;;  %v4047_v59 = vrot.slane %v4039_v22, %v10689_v46  ;;  %v4054_v55 = vrot.slane %v4040_v41, %v10689_v46 }
 0x35e   : > { %v4003_v25 = vcombine.low %v3979_v36, %v3995_v20  ;;  %v4004_v44 = vcombine.high %v3979_v36, %v3995_v20  ;;  %v4019_v13 = vcombine.low %v3986_v21, %v4002_v39  ;;  %v4020_v58 = vcombine.high %v3986_v21, %v4002_v39 }
 0x35f   : > { %v3094_v15 = vcombine.low %v3070_v35, %v3086_v49  ;;  %v3095_v0 = vcombine.high %v3070_v35, %v3086_v49  ;;  %v3096_v6 = vcombine.low %v3077_v30, %v3093_v34  ;;  %v3097_v47 = vcombine.high %v3077_v30, %v3093_v34  ;;  %v12642_v34 = vld [vmem:[#allocation8_spill] sm:$0xff] }
 0x360   : > { %v4011_v37 = vrot.slane %v4003_v25, %v10703_v17  ;;  %v4018_v48 = vrot.slane %v4004_v44, %v10703_v17  ;;  %v4027_v11 = vrot.slane %v4019_v13, %v10703_v17  ;;  %v4034_v40 = vrot.slane %v4020_v58, %v10703_v17 }
 0x361   : > { %v9649_v50 = vpack.c.bf16 %v3094_v15, %v3094_v15  ;;  %v9665_v16 = vpack.c.bf16 %v3095_v0, %v3095_v0  ;;  %v9681_v43 = vpack.c.bf16 %v3096_v6, %v3096_v6  ;;  %v9697_v14 = vpack.c.bf16 %v3097_v47, %v3097_v47  ;;  %v11546_v47 = vpop.permute.xlu1 %6473 }
 0x362   : > { %v5059_v27 = vcombine.low %v4011_v37, %v4018_v48  ;;  %v9431_v36 = vcombine.high %v4011_v37, %v4018_v48  ;;  %v5075_v21 = vcombine.low %v4027_v11, %v4034_v40  ;;  %v9432_v9 = vcombine.high %v4027_v11, %v4034_v40 }
 0x363   : > { %3504 = vst.msk [vmem:[%s10804_s22 + $0x34] sm:$0xf] %vm3490_vm1, %v9649_v50  ;;  %3520 = vst.msk [vmem:[%s10804_s22 + $0x74] sm:$0xf] %vm3490_vm1, %v9665_v16  ;;  %v4055_v19 = vcombine.low %v11476_v56, %v3794_v10  ;;  %v4056_v1 = vcombine.high %v11476_v56, %v3794_v10  ;;  %v6747_v22 = vcombine.low %v12642_v34, %v6520_v62 }
 0x364   : > { %3536 = vst.msk [vmem:[%s10804_s22 + $0xb4] sm:$0xf] %vm3490_vm1, %v9681_v43  ;;  %3552 = vst.msk [vmem:[%s10804_s22 + $0xf4] sm:$0xf] %vm3490_vm1, %v9697_v14  ;;  %v5066_v51 = vrot.slane %v5059_v27, %v10689_v46  ;;  %v5074_v20 = vrot.slane %v9431_v36, %v10689_v46  ;;  %v5082_v39 = vrot.slane %v5075_v21, %v10689_v46 }
 0x365   : > { %v5090_v35 = vrot.slane %v9432_v9, %v10689_v46  ;;  %v4063_v30 = vrot.slane %v4055_v19, %v10689_v46  ;;  %v4070_v49 = vrot.slane %v4056_v1, %v10689_v46  ;;  %v6748_v41 = vcombine.high %v12642_v34, %v6520_v62  ;;  %v6568_v9 = vpop.permute.xlu0 %6567 }
 0x366   : > { %v5091_v25 = vcombine.low %v5066_v51, %v5074_v20  ;;  %v5092_v44 = vcombine.high %v5066_v51, %v5074_v20 }
 0x367   : > { %v5107_v13 = vcombine.low %v5082_v39, %v5090_v35  ;;  %v5108_v56 = vcombine.high %v5082_v39, %v5090_v35  ;;  %v4071_v58 = vcombine.low %v4047_v59, %v4063_v30  ;;  %v4072_v15 = vcombine.high %v4047_v59, %v4063_v30 }
 0x368   : > { %v4087_v0 = vcombine.low %v4054_v55, %v4070_v49  ;;  %v4088_v6 = vcombine.high %v4054_v55, %v4070_v49  ;;  %v5099_v37 = vrot.slane %v5091_v25, %v10703_v17  ;;  %v5106_v48 = vrot.slane %v5092_v44, %v10703_v17  ;;  %v6522_v25 = vpop.permute.xlu1 %6521 }
 0x369   : > { %v5115_v11 = vrot.slane %v5107_v13, %v10703_v17  ;;  %v5122_v40 = vrot.slane %v5108_v56, %v10703_v17  ;;  %v4079_v10 = vrot.slane %v4071_v58, %v10703_v17  ;;  %v4086_v50 = vrot.slane %v4072_v15, %v10703_v17 }
 0x36a   : > { %v4095_v16 = vrot.slane %v4087_v0, %v10703_v17  ;;  %v4102_v43 = vrot.slane %v4088_v6, %v10703_v17  ;;  %v6755_v44 = vrot.slane %v6747_v22, %v10689_v46  ;;  %v6762_v13 = vrot.slane %v6748_v41, %v10689_v46 }
 0x36b   : > { %v5123_v14 = vcombine.low %v5099_v37, %v5115_v11  ;;  %v5124_v27 = vcombine.high %v5099_v37, %v5115_v11  ;;  %v5125_v36 = vcombine.low %v5106_v48, %v5122_v40  ;;  %v5126_v21 = vcombine.high %v5106_v48, %v5122_v40  ;;  %v12643_v48 = vld [vmem:[#allocation9_spill] sm:$0xff] }
 0x36c   : > { %v5127_v62 = vcombine.low %v4079_v10, %v4086_v50  ;;  %v9433_v59 = vcombine.high %v4079_v10, %v4086_v50  ;;  %v5143_v55 = vcombine.low %v4095_v16, %v4102_v43  ;;  %v9434_v19 = vcombine.high %v4095_v16, %v4102_v43  ;;  %v11582_v16 = vpop.permute.xlu0 %3691 }
 0x36d   : > { %v9702_v1 = vpack.c.bf16 %v5123_v14, %v5123_v14  ;;  %v9718_v51 = vpack.c.bf16 %v5124_v27, %v5124_v27  ;;  %v9734_v20 = vpack.c.bf16 %v5125_v36, %v5125_v36  ;;  %v9750_v39 = vpack.c.bf16 %v5126_v21, %v5126_v21 }
 0x36e   : > { %v5134_v35 = vrot.slane %v5127_v62, %v10689_v46  ;;  %v5142_v30 = vrot.slane %v9433_v59, %v10689_v46  ;;  %v5150_v49 = vrot.slane %v5143_v55, %v10689_v46  ;;  %v5158_v34 = vrot.slane %v9434_v19, %v10689_v46 }
 0x36f   : > { %6269 = vst.msk [vmem:[%s11560_s25 + $0x8] sm:$0xf] %vm3490_vm1, %v9702_v1  ;;  %6285 = vst.msk [vmem:[%s11560_s25 + $0x48] sm:$0xf] %vm3490_vm1, %v9718_v51  ;;  %v6763_v56 = vcombine.low %v11516_v28, %v6568_v9  ;;  %v6764_v58 = vcombine.high %v11516_v28, %v6568_v9  ;;  %v6815_v11 = vcombine.low %v12643_v48, %v6522_v25 }
 0x370   : > { %6301 = vst.msk [vmem:[%s11560_s25 + $0x88] sm:$0xf] %vm3490_vm1, %v9734_v20  ;;  %6317 = vst.msk [vmem:[%s11560_s25 + $0xc8] sm:$0xf] %vm3490_vm1, %v9750_v39  ;;  %v5159_v15 = vcombine.low %v5134_v35, %v5142_v30  ;;  %v5160_v0 = vcombine.high %v5134_v35, %v5142_v30  ;;  %v5175_v6 = vcombine.low %v5150_v49, %v5158_v34  ;;  %v6570_v39 = vpop.permute.xlu1 %6569 }
 0x371   : > { %v5176_v37 = vcombine.high %v5150_v49, %v5158_v34  ;;  %v6816_v40 = vcombine.high %v12643_v48, %v6522_v25  ;;  %v6771_v10 = vrot.slane %v6763_v56, %v10689_v46  ;;  %v6778_v50 = vrot.slane %v6764_v58, %v10689_v46  ;;  %v3740_v58 = vpop.permute.xlu0 %3739 }
 0x372   : > { %v5167_v22 = vrot.slane %v5159_v15, %v10703_v17  ;;  %v5174_v41 = vrot.slane %v5160_v0, %v10703_v17  ;;  %v5183_v28 = vrot.slane %v5175_v6, %v10703_v17  ;;  %v6823_v15 = vrot.slane %v6815_v11, %v10689_v46 }
 0x373   : > { %v5190_v43 = vrot.slane %v5176_v37, %v10703_v17  ;;  %v6779_v14 = vcombine.low %v6755_v44, %v6771_v10  ;;  %v6780_v27 = vcombine.high %v6755_v44, %v6771_v10  ;;  %v6795_v36 = vcombine.low %v6762_v13, %v6778_v50 }
 0x374   : > { %v6796_v21 = vcombine.high %v6762_v13, %v6778_v50  ;;  %v5191_v9 = vcombine.low %v5167_v22, %v5183_v28  ;;  %v5192_v62 = vcombine.high %v5167_v22, %v5183_v28  ;;  %v6830_v0 = vrot.slane %v6816_v40, %v10689_v46 }
 0x375   : > { %v5193_v59 = vcombine.low %v5174_v41, %v5190_v43  ;;  %v5194_v55 = vcombine.high %v5174_v41, %v5190_v43  ;;  %v6787_v19 = vrot.slane %v6779_v14, %v10703_v17  ;;  %v6794_v1 = vrot.slane %v6780_v27, %v10703_v17  ;;  %v12644_v43 = vld [vmem:[#allocation10_spill] sm:$0xff] }
 0x376   : > { %v6803_v51 = vrot.slane %v6795_v36, %v10703_v17  ;;  %v6810_v20 = vrot.slane %v6796_v21, %v10703_v17  ;;  %v9703_v35 = vpack.c.bf16 %v5191_v9, %v5191_v9  ;;  %v9719_v30 = vpack.c.bf16 %v5192_v62, %v5192_v62 }
 0x377   : > { %v9735_v49 = vpack.c.bf16 %v5193_v59, %v5193_v59  ;;  %v9751_v34 = vpack.c.bf16 %v5194_v55, %v5194_v55  ;;  %v7835_v25 = vcombine.low %v6787_v19, %v6794_v1  ;;  %v9538_v44 = vcombine.high %v6787_v19, %v6794_v1  ;;  %v11612_v55 = vpop.permute.xlu1 %3693 }
 0x378   : > { %v7851_v13 = vcombine.low %v6803_v51, %v6810_v20  ;;  %v9539_v56 = vcombine.high %v6803_v51, %v6810_v20  ;;  %6270 = vst.msk [vmem:[%s11560_s25 + $0xc] sm:$0xf] %vm3490_vm1, %v9703_v35  ;;  %6286 = vst.msk [vmem:[%s11560_s25 + $0x4c] sm:$0xf] %vm3490_vm1, %v9719_v30  ;;  %v6831_v6 = vcombine.low %v11546_v47, %v6570_v39 }
 0x379   : > { %6302 = vst.msk [vmem:[%s11560_s25 + $0x8c] sm:$0xf] %vm3490_vm1, %v9735_v49  ;;  %6318 = vst.msk [vmem:[%s11560_s25 + $0xcc] sm:$0xf] %vm3490_vm1, %v9751_v34  ;;  %v6832_v37 = vcombine.high %v11546_v47, %v6570_v39  ;;  %v7842_v48 = vrot.slane %v7835_v25, %v10689_v46  ;;  %v7850_v10 = vrot.slane %v9538_v44, %v10689_v46 }
 0x37a   : > { %v7858_v50 = vrot.slane %v7851_v13, %v10689_v46  ;;  %v7866_v22 = vrot.slane %v9539_v56, %v10689_v46  ;;  %v6839_v41 = vrot.slane %v6831_v6, %v10689_v46  ;;  %v3835_v11 = vcombine.low %v12644_v43, %v3740_v58  ;;  %v3788_v56 = vpop.permute.xlu0 %3787 }
 0x37b   : > { %v6846_v28 = vrot.slane %v6832_v37, %v10689_v46  ;;  %v3836_v40 = vcombine.high %v12644_v43, %v3740_v58  ;;  %v7867_v14 = vcombine.low %v7842_v48, %v7850_v10  ;;  %v7868_v27 = vcombine.high %v7842_v48, %v7850_v10 }
 0x37c   : > { %v7883_v36 = vcombine.low %v7858_v50, %v7866_v22  ;;  %v7884_v47 = vcombine.high %v7858_v50, %v7866_v22  ;;  %v6847_v21 = vcombine.low %v6823_v15, %v6839_v41  ;;  %v6848_v9 = vcombine.high %v6823_v15, %v6839_v41 }
 0x37d   : > { %v6863_v62 = vcombine.low %v6830_v0, %v6846_v28  ;;  %v6864_v59 = vcombine.high %v6830_v0, %v6846_v28  ;;  %v7875_v19 = vrot.slane %v7867_v14, %v10703_v17  ;;  %v7882_v1 = vrot.slane %v7868_v27, %v10703_v17  ;;  %v3742_v14 = vpop.permute.xlu1 %3741 }
 0x37e   : > { %v7891_v51 = vrot.slane %v7883_v36, %v10703_v17  ;;  %v7898_v20 = vrot.slane %v7884_v47, %v10703_v17  ;;  %v6855_v39 = vrot.slane %v6847_v21, %v10703_v17  ;;  %v6862_v35 = vrot.slane %v6848_v9, %v10703_v17 }
 0x37f   : > { %v6871_v30 = vrot.slane %v6863_v62, %v10703_v17  ;;  %v6878_v49 = vrot.slane %v6864_v59, %v10703_v17  ;;  %v3843_v27 = vrot.slane %v3835_v11, %v10689_v46  ;;  %v3850_v36 = vrot.slane %v3836_v40, %v10689_v46 }
 0x380   : > { %v7899_v34 = vcombine.low %v7875_v19, %v7891_v51  ;;  %v7900_v25 = vcombine.high %v7875_v19, %v7891_v51  ;;  %v7901_v44 = vcombine.low %v7882_v1, %v7898_v20  ;;  %v7902_v13 = vcombine.high %v7882_v1, %v7898_v20  ;;  %v12645_v1 = vld [vmem:[#allocation11_spill] sm:$0xff] }
 0x381   : > { %v7903_v58 = vcombine.low %v6855_v39, %v6862_v35  ;;  %v9540_v15 = vcombine.high %v6855_v39, %v6862_v35  ;;  %v7919_v0 = vcombine.low %v6871_v30, %v6878_v49  ;;  %v9541_v6 = vcombine.high %v6871_v30, %v6878_v49  ;;  %v11648_v30 = vpop.permute.xlu0 %6467 }
 0x382   : > { %v9766_v37 = vpack.c.bf16 %v7899_v34, %v7899_v34  ;;  %v9782_v48 = vpack.c.bf16 %v7900_v25, %v7900_v25  ;;  %v9798_v10 = vpack.c.bf16 %v7901_v44, %v7901_v44  ;;  %v9814_v50 = vpack.c.bf16 %v7902_v13, %v7902_v13 }
 0x383   : > { %v7910_v22 = vrot.slane %v7903_v58, %v10689_v46  ;;  %v7918_v41 = vrot.slane %v9540_v15, %v10689_v46  ;;  %v7926_v28 = vrot.slane %v7919_v0, %v10689_v46  ;;  %v7934_v43 = vrot.slane %v9541_v6, %v10689_v46 }
 0x384   : > { %9045 = vst.msk [vmem:[%s11626_s28 + $0x8] sm:$0xf] %vm3490_vm1, %v9766_v37  ;;  %9061 = vst.msk [vmem:[%s11626_s28 + $0x48] sm:$0xf] %vm3490_vm1, %v9782_v48  ;;  %v3851_v47 = vcombine.low %v11582_v16, %v3788_v56  ;;  %v3852_v21 = vcombine.high %v11582_v16, %v3788_v56  ;;  %v3903_v51 = vcombine.low %v12645_v1, %v3742_v14 }
 0x385   : > { %9077 = vst.msk [vmem:[%s11626_s28 + $0x88] sm:$0xf] %vm3490_vm1, %v9798_v10  ;;  %9093 = vst.msk [vmem:[%s11626_s28 + $0xc8] sm:$0xf] %vm3490_vm1, %v9814_v50  ;;  %v7935_v9 = vcombine.low %v7910_v22, %v7918_v41  ;;  %v7936_v62 = vcombine.high %v7910_v22, %v7918_v41  ;;  %v7951_v59 = vcombine.low %v7926_v28, %v7934_v43  ;;  %v3790_v50 = vpop.permute.xlu1 %3789 }
 0x386   : > { %v7952_v19 = vcombine.high %v7926_v28, %v7934_v43  ;;  %v3904_v20 = vcombine.high %v12645_v1, %v3742_v14  ;;  %v3859_v39 = vrot.slane %v3851_v47, %v10689_v46  ;;  %v3866_v35 = vrot.slane %v3852_v21, %v10689_v46  ;;  %v6516_v21 = vpop.permute.xlu0 %6515 }
 0x387   : > { %v7943_v11 = vrot.slane %v7935_v9, %v10703_v17  ;;  %v7950_v40 = vrot.slane %v7936_v62, %v10703_v17  ;;  %v7959_v16 = vrot.slane %v7951_v59, %v10703_v17  ;;  %v3911_v9 = vrot.slane %v3903_v51, %v10689_v46 }
 0x388   : > { %v7966_v49 = vrot.slane %v7952_v19, %v10703_v17  ;;  %v3867_v34 = vcombine.low %v3843_v27, %v3859_v39  ;;  %v3868_v25 = vcombine.high %v3843_v27, %v3859_v39  ;;  %v3883_v44 = vcombine.low %v3850_v36, %v3866_v35 }
 0x389   : > { %v3884_v13 = vcombine.high %v3850_v36, %v3866_v35  ;;  %v7967_v56 = vcombine.low %v7943_v11, %v7959_v16  ;;  %v7968_v58 = vcombine.high %v7943_v11, %v7959_v16  ;;  %v3918_v62 = vrot.slane %v3904_v20, %v10689_v46 }
 0x38a   : > { %v7969_v15 = vcombine.low %v7950_v40, %v7966_v49  ;;  %v7970_v0 = vcombine.high %v7950_v40, %v7966_v49  ;;  %v3875_v6 = vrot.slane %v3867_v34, %v10703_v17  ;;  %v3882_v37 = vrot.slane %v3868_v25, %v10703_v17  ;;  %v12646_v49 = vld [vmem:[#allocation12_spill] sm:$0xff] }
 0x38b   : > { %v3891_v48 = vrot.slane %v3883_v44, %v10703_v17  ;;  %v3898_v10 = vrot.slane %v3884_v13, %v10703_v17  ;;  %v9767_v22 = vpack.c.bf16 %v7967_v56, %v7967_v56  ;;  %v9783_v41 = vpack.c.bf16 %v7968_v58, %v7968_v58 }
 0x38c   : > { %v9799_v28 = vpack.c.bf16 %v7969_v15, %v7969_v15  ;;  %v9815_v43 = vpack.c.bf16 %v7970_v0, %v7970_v0  ;;  %v4923_v14 = vcombine.low %v3875_v6, %v3882_v37  ;;  %v9427_v27 = vcombine.high %v3875_v6, %v3882_v37  ;;  %v11678_v0 = vpop.permute.xlu1 %6469 }
 0x38d   : > { %v4939_v36 = vcombine.low %v3891_v48, %v3898_v10  ;;  %v9428_v47 = vcombine.high %v3891_v48, %v3898_v10  ;;  %9046 = vst.msk [vmem:[%s11626_s28 + $0xc] sm:$0xf] %vm3490_vm1, %v9767_v22  ;;  %9062 = vst.msk [vmem:[%s11626_s28 + $0x4c] sm:$0xf] %vm3490_vm1, %v9783_v41  ;;  %v3919_v59 = vcombine.low %v11612_v55, %v3790_v50 }
 0x38e   : > { %9078 = vst.msk [vmem:[%s11626_s28 + $0x8c] sm:$0xf] %vm3490_vm1, %v9799_v28  ;;  %9094 = vst.msk [vmem:[%s11626_s28 + $0xcc] sm:$0xf] %vm3490_vm1, %v9815_v43  ;;  %v3920_v19 = vcombine.high %v11612_v55, %v3790_v50  ;;  %v4930_v1 = vrot.slane %v4923_v14, %v10689_v46  ;;  %v4938_v39 = vrot.slane %v9427_v27, %v10689_v46 }
 0x38f   : > { %v4946_v35 = vrot.slane %v4939_v36, %v10689_v46  ;;  %v4954_v11 = vrot.slane %v9428_v47, %v10689_v46  ;;  %v3927_v40 = vrot.slane %v3919_v59, %v10689_v46  ;;  %v6611_v51 = vcombine.low %v12646_v49, %v6516_v21  ;;  %v6564_v47 = vpop.permute.xlu0 %6563 }
 0x390   : > { %v3934_v16 = vrot.slane %v3920_v19, %v10689_v46  ;;  %v6612_v20 = vcombine.high %v12646_v49, %v6516_v21  ;;  %v4955_v34 = vcombine.low %v4930_v1, %v4938_v39  ;;  %v4956_v25 = vcombine.high %v4930_v1, %v4938_v39 }
 0x391   : > { %v4971_v44 = vcombine.low %v4946_v35, %v4954_v11  ;;  %v4972_v55 = vcombine.high %v4946_v35, %v4954_v11  ;;  %v3935_v13 = vcombine.low %v3911_v9, %v3927_v40  ;;  %v3936_v56 = vcombine.high %v3911_v9, %v3927_v40 }
 0x392   : > { %v3951_v58 = vcombine.low %v3918_v62, %v3934_v16  ;;  %v3952_v15 = vcombine.high %v3918_v62, %v3934_v16  ;;  %v4963_v6 = vrot.slane %v4955_v34, %v10703_v17  ;;  %v4970_v37 = vrot.slane %v4956_v25, %v10703_v17  ;;  %v6518_v34 = vpop.permute.xlu1 %6517 }
 0x393   : > { %v4979_v48 = vrot.slane %v4971_v44, %v10703_v17  ;;  %v4986_v10 = vrot.slane %v4972_v55, %v10703_v17  ;;  %v3943_v50 = vrot.slane %v3935_v13, %v10703_v17  ;;  %v3950_v22 = vrot.slane %v3936_v56, %v10703_v17 }
 0x394   : > { %v3959_v41 = vrot.slane %v3951_v58, %v10703_v17  ;;  %v3966_v28 = vrot.slane %v3952_v15, %v10703_v17  ;;  %v6619_v25 = vrot.slane %v6611_v51, %v10689_v46  ;;  %v6626_v44 = vrot.slane %v6612_v20, %v10689_v46 }
 0x395   : > { %v4987_v43 = vcombine.low %v4963_v6, %v4979_v48  ;;  %v4988_v14 = vcombine.high %v4963_v6, %v4979_v48  ;;  %v4989_v27 = vcombine.low %v4970_v37, %v4986_v10  ;;  %v4990_v36 = vcombine.high %v4970_v37, %v4986_v10 }
 0x396   : > { %v4991_v21 = vcombine.low %v3943_v50, %v3950_v22  ;;  %v9429_v9 = vcombine.high %v3943_v50, %v3950_v22  ;;  %v5007_v62 = vcombine.low %v3959_v41, %v3966_v28  ;;  %v9430_v59 = vcombine.high %v3959_v41, %v3966_v28  ;;  %v11708_v22 = vpop.permute.xlu0 %3703 }
 0x397   : > { %v9700_v19 = vpack.c.bf16 %v4987_v43, %v4987_v43  ;;  %v9716_v1 = vpack.c.bf16 %v4988_v14, %v4988_v14  ;;  %v9732_v39 = vpack.c.bf16 %v4989_v27, %v4989_v27  ;;  %v9748_v35 = vpack.c.bf16 %v4990_v36, %v4990_v36 }
 0x398   : > { %v4998_v11 = vrot.slane %v4991_v21, %v10689_v46  ;;  %v5006_v40 = vrot.slane %v9429_v9, %v10689_v46  ;;  %v5014_v16 = vrot.slane %v5007_v62, %v10689_v46  ;;  %v5022_v49 = vrot.slane %v9430_v59, %v10689_v46 }
 0x399   : > { %6267 = vst.msk [vmem:[%s11560_s25] sm:$0xf] %vm3490_vm1, %v9700_v19  ;;  %6283 = vst.msk [vmem:[%s11560_s25 + $0x40] sm:$0xf] %vm3490_vm1, %v9716_v1  ;;  %v6627_v55 = vcombine.low %v11648_v30, %v6564_v47  ;;  %v6628_v13 = vcombine.high %v11648_v30, %v6564_v47  ;;  %v6679_v37 = vcombine.low %v10707_v38, %v6518_v34  ;;  %v6566_v1 = vpop.permute.xlu1 %6565 }
 0x39a   : > { %6299 = vst.msk [vmem:[%s11560_s25 + $0x80] sm:$0xf] %vm3490_vm1, %v9732_v39  ;;  %6315 = vst.msk [vmem:[%s11560_s25 + $0xc0] sm:$0xf] %vm3490_vm1, %v9748_v35  ;;  %v5023_v56 = vcombine.low %v4998_v11, %v5006_v40  ;;  %v5024_v58 = vcombine.high %v4998_v11, %v5006_v40  ;;  %v5039_v15 = vcombine.low %v5014_v16, %v5022_v49 }
 0x39b   : > { %v5040_v6 = vcombine.high %v5014_v16, %v5022_v49  ;;  %v6680_v48 = vcombine.high %v10707_v38, %v6518_v34  ;;  %v6635_v10 = vrot.slane %v6627_v55, %v10689_v46  ;;  %v6642_v50 = vrot.slane %v6628_v13, %v10689_v46 }
 0x39c   : > { %v5031_v51 = vrot.slane %v5023_v56, %v10703_v17  ;;  %v5038_v20 = vrot.slane %v5024_v58, %v10703_v17  ;;  %v5047_v30 = vrot.slane %v5039_v15, %v10703_v17  ;;  %v6687_v55 = vrot.slane %v6679_v37, %v10689_v46 }
 0x39d   : > { %v5054_v41 = vrot.slane %v5040_v6, %v10703_v17  ;;  %v6643_v28 = vcombine.low %v6619_v25, %v6635_v10  ;;  %v6644_v43 = vcombine.high %v6619_v25, %v6635_v10  ;;  %v6659_v14 = vcombine.low %v6626_v44, %v6642_v50 }
 0x39e   : > { %v6660_v27 = vcombine.high %v6626_v44, %v6642_v50  ;;  %v5055_v36 = vcombine.low %v5031_v51, %v5047_v30  ;;  %v5056_v38 = vcombine.high %v5031_v51, %v5047_v30  ;;  %v3752_v44 = vpop.permute.xlu0 %3751  ;;  %v6694_v13 = vrot.slane %v6680_v48, %v10689_v46 }
 0x39f   : > { %v5057_v47 = vcombine.low %v5038_v20, %v5054_v41  ;;  %v5058_v21 = vcombine.high %v5038_v20, %v5054_v41  ;;  %v6651_v9 = vrot.slane %v6643_v28, %v10703_v17  ;;  %v6658_v62 = vrot.slane %v6644_v43, %v10703_v17 }
 0x3a0   : > { %v6667_v59 = vrot.slane %v6659_v14, %v10703_v17  ;;  %v6674_v19 = vrot.slane %v6660_v27, %v10703_v17  ;;  %v9701_v39 = vpack.c.bf16 %v5055_v36, %v5055_v36  ;;  %v9717_v35 = vpack.c.bf16 %v5056_v38, %v5056_v38  ;;  %v11738_v38 = vpop.permute.xlu1 %3705 }
 0x3a1   : > { %v9733_v11 = vpack.c.bf16 %v5057_v47, %v5057_v47  ;;  %v9749_v40 = vpack.c.bf16 %v5058_v21, %v5058_v21  ;;  %v7699_v16 = vcombine.low %v6651_v9, %v6658_v62  ;;  %v9534_v49 = vcombine.high %v6651_v9, %v6658_v62 }
 0x3a2   : > { %v7715_v34 = vcombine.low %v6667_v59, %v6674_v19  ;;  %v9535_v25 = vcombine.high %v6667_v59, %v6674_v19  ;;  %6268 = vst.msk [vmem:[%s11560_s25 + $0x4] sm:$0xf] %vm3490_vm1, %v9701_v39  ;;  %6284 = vst.msk [vmem:[%s11560_s25 + $0x44] sm:$0xf] %vm3490_vm1, %v9717_v35  ;;  %v6695_v56 = vcombine.low %v11678_v0, %v6566_v1 }
 0x3a3   : > { %6300 = vst.msk [vmem:[%s11560_s25 + $0x84] sm:$0xf] %vm3490_vm1, %v9733_v11  ;;  %6316 = vst.msk [vmem:[%s11560_s25 + $0xc4] sm:$0xf] %vm3490_vm1, %v9749_v40  ;;  %v6696_v58 = vcombine.high %v11678_v0, %v6566_v1  ;;  %v7706_v15 = vrot.slane %v7699_v16, %v10689_v46  ;;  %v7714_v6 = vrot.slane %v9534_v49, %v10689_v46  ;;  %v3800_v16 = vpop.permute.xlu0 %3799 }
 0x3a4   : > { %v7722_v10 = vrot.slane %v7715_v34, %v10689_v46  ;;  %v7730_v50 = vrot.slane %v9535_v25, %v10689_v46  ;;  %v6703_v51 = vrot.slane %v6695_v56, %v10689_v46  ;;  %v4243_v37 = vcombine.low %v10723_v2, %v3752_v44 }
 0x3a5   : > { %v6710_v20 = vrot.slane %v6696_v58, %v10689_v46  ;;  %v4244_v48 = vcombine.high %v10723_v2, %v3752_v44  ;;  %v7731_v30 = vcombine.low %v7706_v15, %v7714_v6  ;;  %v7732_v41 = vcombine.high %v7706_v15, %v7714_v6 }
 0x3a6   : > { %v7747_v28 = vcombine.low %v7722_v10, %v7730_v50  ;;  %v7748_v0 = vcombine.high %v7722_v10, %v7730_v50  ;;  %v6711_v43 = vcombine.low %v6687_v55, %v6703_v51  ;;  %v6712_v14 = vcombine.high %v6687_v55, %v6703_v51  ;;  %v3754_v51 = vpop.permute.xlu1 %3753 }
 0x3a7   : > { %v6727_v27 = vcombine.low %v6694_v13, %v6710_v20  ;;  %v6728_v36 = vcombine.high %v6694_v13, %v6710_v20  ;;  %v7739_v47 = vrot.slane %v7731_v30, %v10703_v17  ;;  %v7746_v21 = vrot.slane %v7732_v41, %v10703_v17 }
 0x3a8   : > { %v7755_v9 = vrot.slane %v7747_v28, %v10703_v17  ;;  %v7762_v62 = vrot.slane %v7748_v0, %v10703_v17  ;;  %v6719_v2 = vrot.slane %v6711_v43, %v10703_v17  ;;  %v6726_v59 = vrot.slane %v6712_v14, %v10703_v17 }
 0x3a9   : > { %v6735_v19 = vrot.slane %v6727_v27, %v10703_v17  ;;  %v6742_v1 = vrot.slane %v6728_v36, %v10703_v17  ;;  %v4251_v20 = vrot.slane %v4243_v37, %v10689_v46  ;;  %v4258_v30 = vrot.slane %v4244_v48, %v10689_v46 }
 0x3aa   : > { %v7763_v39 = vcombine.low %v7739_v47, %v7755_v9  ;;  %v7764_v35 = vcombine.high %v7739_v47, %v7755_v9  ;;  %v7765_v11 = vcombine.low %v7746_v21, %v7762_v62  ;;  %v7766_v40 = vcombine.high %v7746_v21, %v7762_v62  ;;  %v11768_v62 = vpop.permute.xlu0 %6479 }
 0x3ab   : > { %v7767_v49 = vcombine.low %v6719_v2, %v6726_v59  ;;  %v9536_v34 = vcombine.high %v6719_v2, %v6726_v59  ;;  %v7783_v25 = vcombine.low %v6735_v19, %v6742_v1  ;;  %v9537_v44 = vcombine.high %v6735_v19, %v6742_v1 }
 0x3ac   : > { %v9764_v55 = vpack.c.bf16 %v7763_v39, %v7763_v39  ;;  %v9780_v13 = vpack.c.bf16 %v7764_v35, %v7764_v35  ;;  %v9796_v56 = vpack.c.bf16 %v7765_v11, %v7765_v11  ;;  %v9812_v58 = vpack.c.bf16 %v7766_v40, %v7766_v40 }
 0x3ad   : > { %v7774_v15 = vrot.slane %v7767_v49, %v10689_v46  ;;  %v7782_v6 = vrot.slane %v9536_v34, %v10689_v46  ;;  %v7790_v10 = vrot.slane %v7783_v25, %v10689_v46  ;;  %v7798_v50 = vrot.slane %v9537_v44, %v10689_v46  ;;  %v3802_v44 = vpop.permute.xlu1 %3801 }
 0x3ae   : > { %9043 = vst.msk [vmem:[%s11626_s28] sm:$0xf] %vm3490_vm1, %v9764_v55  ;;  %9059 = vst.msk [vmem:[%s11626_s28 + $0x40] sm:$0xf] %vm3490_vm1, %v9780_v13  ;;  %v4259_v41 = vcombine.low %v11708_v22, %v3800_v16  ;;  %v4260_v28 = vcombine.high %v11708_v22, %v3800_v16  ;;  %v4311_v36 = vcombine.low %v10727_v52, %v3754_v51 }
 0x3af   : > { %9075 = vst.msk [vmem:[%s11626_s28 + $0x80] sm:$0xf] %vm3490_vm1, %v9796_v56  ;;  %9091 = vst.msk [vmem:[%s11626_s28 + $0xc0] sm:$0xf] %vm3490_vm1, %v9812_v58  ;;  %v7799_v0 = vcombine.low %v7774_v15, %v7782_v6  ;;  %v7800_v43 = vcombine.high %v7774_v15, %v7782_v6  ;;  %v7815_v14 = vcombine.low %v7790_v10, %v7798_v50 }
 0x3b0   : > { %v7816_v27 = vcombine.high %v7790_v10, %v7798_v50  ;;  %v4312_v47 = vcombine.high %v10727_v52, %v3754_v51  ;;  %v4267_v21 = vrot.slane %v4259_v41, %v10689_v46  ;;  %v4274_v9 = vrot.slane %v4260_v28, %v10689_v46  ;;  %v6528_v51 = vpop.permute.xlu0 %6527 }
 0x3b1   : > { %v7807_v37 = vrot.slane %v7799_v0, %v10703_v17  ;;  %v7814_v48 = vrot.slane %v7800_v43, %v10703_v17  ;;  %v7823_v22 = vrot.slane %v7815_v14, %v10703_v17  ;;  %v4327_v41 = vcombine.low %v11738_v38, %v3802_v44 }
 0x3b2   : > { %v7830_v2 = vrot.slane %v7816_v27, %v10703_v17  ;;  %v4275_v59 = vcombine.low %v4251_v20, %v4267_v21  ;;  %v4276_v19 = vcombine.high %v4251_v20, %v4267_v21  ;;  %v4291_v1 = vcombine.low %v4258_v30, %v4274_v9 }
 0x3b3   : > { %v4292_v39 = vcombine.high %v4258_v30, %v4274_v9  ;;  %v7831_v35 = vcombine.low %v7807_v37, %v7823_v22  ;;  %v7832_v52 = vcombine.high %v7807_v37, %v7823_v22  ;;  %v4319_v20 = vrot.slane %v4311_v36, %v10689_v46 }
 0x3b4   : > { %v7833_v11 = vcombine.low %v7814_v48, %v7830_v2  ;;  %v7834_v40 = vcombine.high %v7814_v48, %v7830_v2  ;;  %v4283_v16 = vrot.slane %v4275_v59, %v10703_v17  ;;  %v4290_v49 = vrot.slane %v4276_v19, %v10703_v17 }
 0x3b5   : > { %v4299_v34 = vrot.slane %v4291_v1, %v10703_v17  ;;  %v4306_v25 = vrot.slane %v4292_v39, %v10703_v17  ;;  %v9765_v55 = vpack.c.bf16 %v7831_v35, %v7831_v35  ;;  %v9781_v13 = vpack.c.bf16 %v7832_v52, %v7832_v52  ;;  %v11798_v39 = vpop.permute.xlu1 %6481 }
 0x3b6   : > { %v9797_v56 = vpack.c.bf16 %v7833_v11, %v7833_v11  ;;  %v9813_v58 = vpack.c.bf16 %v7834_v40, %v7834_v40  ;;  %v5331_v15 = vcombine.low %v4283_v16, %v4290_v49  ;;  %v9439_v6 = vcombine.high %v4283_v16, %v4290_v49 }
 0x3b7   : > { %v5347_v10 = vcombine.low %v4299_v34, %v4306_v25  ;;  %v9440_v50 = vcombine.high %v4299_v34, %v4306_v25  ;;  %9044 = vst.msk [vmem:[%s11626_s28 + $0x4] sm:$0xf] %vm3490_vm1, %v9765_v55  ;;  %9060 = vst.msk [vmem:[%s11626_s28 + $0x44] sm:$0xf] %vm3490_vm1, %v9781_v13  ;;  %v4326_v30 = vrot.slane %v4312_v47, %v10689_v46 }
 0x3b8   : > { %9076 = vst.msk [vmem:[%s11626_s28 + $0x84] sm:$0xf] %vm3490_vm1, %v9797_v56  ;;  %9092 = vst.msk [vmem:[%s11626_s28 + $0xc4] sm:$0xf] %vm3490_vm1, %v9813_v58  ;;  %v4328_v28 = vcombine.high %v11738_v38, %v3802_v44  ;;  %v5338_v0 = vrot.slane %v5331_v15, %v10689_v46  ;;  %v5346_v43 = vrot.slane %v9439_v6, %v10689_v46  ;;  %v6576_v56 = vpop.permute.xlu0 %6575 }
 0x3b9   : > { %v5354_v14 = vrot.slane %v5347_v10, %v10689_v46  ;;  %v5362_v27 = vrot.slane %v9440_v50, %v10689_v46  ;;  %v4335_v21 = vrot.slane %v4327_v41, %v10689_v46  ;;  %v7019_v36 = vcombine.low %v10711_v24, %v6528_v51 }
 0x3ba   : > { %v4342_v9 = vrot.slane %v4328_v28, %v10689_v46  ;;  %v7020_v47 = vcombine.high %v10711_v24, %v6528_v51  ;;  %v5363_v37 = vcombine.low %v5338_v0, %v5346_v43  ;;  %v5364_v48 = vcombine.high %v5338_v0, %v5346_v43 }
 0x3bb   : > { %v5379_v22 = vcombine.low %v5354_v14, %v5362_v27  ;;  %v5380_v38 = vcombine.high %v5354_v14, %v5362_v27  ;;  %v4343_v2 = vcombine.low %v4319_v20, %v4335_v21  ;;  %v4344_v59 = vcombine.high %v4319_v20, %v4335_v21  ;;  %v6530_v14 = vpop.permute.xlu1 %6529 }
 0x3bc   : > { %v4359_v19 = vcombine.low %v4326_v30, %v4342_v9  ;;  %v4360_v1 = vcombine.high %v4326_v30, %v4342_v9  ;;  %v5371_v35 = vrot.slane %v5363_v37, %v10703_v17  ;;  %v5378_v52 = vrot.slane %v5364_v48, %v10703_v17 }
 0x3bd   : > { %v5387_v11 = vrot.slane %v5379_v22, %v10703_v17  ;;  %v5394_v40 = vrot.slane %v5380_v38, %v10703_v17  ;;  %v4351_v24 = vrot.slane %v4343_v2, %v10703_v17  ;;  %v4358_v16 = vrot.slane %v4344_v59, %v10703_v17 }
 0x3be   : > { %v4367_v49 = vrot.slane %v4359_v19, %v10703_v17  ;;  %v4374_v34 = vrot.slane %v4360_v1, %v10703_v17  ;;  %v7027_v27 = vrot.slane %v7019_v36, %v10689_v46  ;;  %v7034_v21 = vrot.slane %v7020_v47, %v10689_v46 }
 0x3bf   : > { %v5395_v25 = vcombine.low %v5371_v35, %v5387_v11  ;;  %v5396_v44 = vcombine.high %v5371_v35, %v5387_v11  ;;  %v5397_v55 = vcombine.low %v5378_v52, %v5394_v40  ;;  %v5398_v13 = vcombine.high %v5378_v52, %v5394_v40  ;;  %v11828_v52 = vpop.permute.xlu0 %3699 }
 0x3c0   : > { %v5399_v58 = vcombine.low %v4351_v24, %v4358_v16  ;;  %v9441_v15 = vcombine.high %v4351_v24, %v4358_v16  ;;  %v5415_v6 = vcombine.low %v4367_v49, %v4374_v34  ;;  %v9442_v10 = vcombine.high %v4367_v49, %v4374_v34 }
 0x3c1   : > { %v9706_v50 = vpack.c.bf16 %v5395_v25, %v5395_v25  ;;  %v9722_v51 = vpack.c.bf16 %v5396_v44, %v5396_v44  ;;  %v9738_v20 = vpack.c.bf16 %v5397_v55, %v5397_v55  ;;  %v9754_v30 = vpack.c.bf16 %v5398_v13, %v5398_v13 }
 0x3c2   : > { %v5406_v41 = vrot.slane %v5399_v58, %v10689_v46  ;;  %v5414_v28 = vrot.slane %v9441_v15, %v10689_v46  ;;  %v5422_v0 = vrot.slane %v5415_v6, %v10689_v46  ;;  %v5430_v43 = vrot.slane %v9442_v10, %v10689_v46  ;;  %v6578_v15 = vpop.permute.xlu1 %6577 }
 0x3c3   : > { %6273 = vst.msk [vmem:[%s11560_s25 + $0x18] sm:$0xf] %vm3490_vm1, %v9706_v50  ;;  %6289 = vst.msk [vmem:[%s11560_s25 + $0x58] sm:$0xf] %vm3490_vm1, %v9722_v51  ;;  %v7035_v9 = vcombine.low %v11768_v62, %v6576_v56  ;;  %v7036_v37 = vcombine.high %v11768_v62, %v6576_v56  ;;  %v7087_v59 = vcombine.low %v10719_v54, %v6530_v14 }
 0x3c4   : > { %6305 = vst.msk [vmem:[%s11560_s25 + $0x98] sm:$0xf] %vm3490_vm1, %v9738_v20  ;;  %6321 = vst.msk [vmem:[%s11560_s25 + $0xd8] sm:$0xf] %vm3490_vm1, %v9754_v30  ;;  %v5431_v48 = vcombine.low %v5406_v41, %v5414_v28  ;;  %v5432_v22 = vcombine.high %v5406_v41, %v5414_v28  ;;  %v5447_v38 = vcombine.low %v5422_v0, %v5430_v43 }
 0x3c5   : > { %v5448_v2 = vcombine.high %v5422_v0, %v5430_v43  ;;  %v7088_v19 = vcombine.high %v10719_v54, %v6530_v14  ;;  %v7043_v1 = vrot.slane %v7035_v9, %v10689_v46  ;;  %v7050_v35 = vrot.slane %v7036_v37, %v10689_v46  ;;  %v3748_v0 = vpop.permute.xlu0 %3747 }
 0x3c6   : > { %v5439_v36 = vrot.slane %v5431_v48, %v10703_v17  ;;  %v5446_v47 = vrot.slane %v5432_v22, %v10703_v17  ;;  %v5455_v62 = vrot.slane %v5447_v38, %v10703_v17  ;;  %v7095_v43 = vrot.slane %v7087_v59, %v10689_v46 }
 0x3c7   : > { %v5462_v11 = vrot.slane %v5448_v2, %v10703_v17  ;;  %v7051_v40 = vcombine.low %v7027_v27, %v7043_v1  ;;  %v7052_v24 = vcombine.high %v7027_v27, %v7043_v1  ;;  %v7067_v16 = vcombine.low %v7034_v21, %v7050_v35 }
 0x3c8   : > { %v7068_v49 = vcombine.high %v7034_v21, %v7050_v35  ;;  %v5463_v34 = vcombine.low %v5439_v36, %v5455_v62  ;;  %v5464_v54 = vcombine.high %v5439_v36, %v5455_v62  ;;  %v7102_v14 = vrot.slane %v7088_v19, %v10689_v46 }
 0x3c9   : > { %v5465_v25 = vcombine.low %v5446_v47, %v5462_v11  ;;  %v5466_v44 = vcombine.high %v5446_v47, %v5462_v11  ;;  %v7059_v55 = vrot.slane %v7051_v40, %v10703_v17  ;;  %v7066_v13 = vrot.slane %v7052_v24, %v10703_v17  ;;  %v11858_v24 = vpop.permute.xlu1 %3701 }
 0x3ca   : > { %v7075_v56 = vrot.slane %v7067_v16, %v10703_v17  ;;  %v7082_v58 = vrot.slane %v7068_v49, %v10703_v17  ;;  %v9707_v6 = vpack.c.bf16 %v5463_v34, %v5463_v34  ;;  %v9723_v10 = vpack.c.bf16 %v5464_v54, %v5464_v54 }
 0x3cb   : > { %v9739_v50 = vpack.c.bf16 %v5465_v25, %v5465_v25  ;;  %v9755_v51 = vpack.c.bf16 %v5466_v44, %v5466_v44  ;;  %v8107_v20 = vcombine.low %v7059_v55, %v7066_v13  ;;  %v9546_v30 = vcombine.high %v7059_v55, %v7066_v13 }
 0x3cc   : > { %v8123_v41 = vcombine.low %v7075_v56, %v7082_v58  ;;  %v9547_v28 = vcombine.high %v7075_v56, %v7082_v58  ;;  %6274 = vst.msk [vmem:[%s11560_s25 + $0x1c] sm:$0xf] %vm3490_vm1, %v9707_v6  ;;  %6290 = vst.msk [vmem:[%s11560_s25 + $0x5c] sm:$0xf] %vm3490_vm1, %v9723_v10  ;;  %v7103_v27 = vcombine.low %v11798_v39, %v6578_v15  ;;  %v3796_v6 = vpop.permute.xlu0 %3795 }
 0x3cd   : > { %6306 = vst.msk [vmem:[%s11560_s25 + $0x9c] sm:$0xf] %vm3490_vm1, %v9739_v50  ;;  %6322 = vst.msk [vmem:[%s11560_s25 + $0xdc] sm:$0xf] %vm3490_vm1, %v9755_v51  ;;  %v7104_v21 = vcombine.high %v11798_v39, %v6578_v15  ;;  %v8114_v9 = vrot.slane %v8107_v20, %v10689_v46  ;;  %v8122_v37 = vrot.slane %v9546_v30, %v10689_v46 }
 0x3ce   : > { %v8130_v48 = vrot.slane %v8123_v41, %v10689_v46  ;;  %v8138_v22 = vrot.slane %v9547_v28, %v10689_v46  ;;  %v7111_v38 = vrot.slane %v7103_v27, %v10689_v46  ;;  %v4107_v59 = vcombine.low %v10496_v61, %v3748_v0 }
 0x3cf   : > { %v7118_v2 = vrot.slane %v7104_v21, %v10689_v46  ;;  %v4108_v19 = vcombine.high %v10496_v61, %v3748_v0  ;;  %v8139_v1 = vcombine.low %v8114_v9, %v8122_v37  ;;  %v8140_v35 = vcombine.high %v8114_v9, %v8122_v37  ;;  %v3750_v9 = vpop.permute.xlu1 %3749 }
 0x3d0   : > { %v8155_v36 = vcombine.low %v8130_v48, %v8138_v22  ;;  %v8156_v39 = vcombine.high %v8130_v48, %v8138_v22  ;;  %v7119_v47 = vcombine.low %v7095_v43, %v7111_v38  ;;  %v7120_v62 = vcombine.high %v7095_v43, %v7111_v38 }
 0x3d1   : > { %v7135_v11 = vcombine.low %v7102_v14, %v7118_v2  ;;  %v7136_v40 = vcombine.high %v7102_v14, %v7118_v2  ;;  %v8147_v16 = vrot.slane %v8139_v1, %v10703_v17  ;;  %v8154_v49 = vrot.slane %v8140_v35, %v10703_v17 }
 0x3d2   : > { %v8163_v34 = vrot.slane %v8155_v36, %v10703_v17  ;;  %v8170_v54 = vrot.slane %v8156_v39, %v10703_v17  ;;  %v7127_v61 = vrot.slane %v7119_v47, %v10703_v17  ;;  %v7134_v25 = vrot.slane %v7120_v62, %v10703_v17 }
 0x3d3   : > { %v7143_v44 = vrot.slane %v7135_v11, %v10703_v17  ;;  %v7150_v55 = vrot.slane %v7136_v40, %v10703_v17  ;;  %v4115_v37 = vrot.slane %v4107_v59, %v10689_v46  ;;  %v4122_v48 = vrot.slane %v4108_v19, %v10689_v46  ;;  %v11888_v40 = vpop.permute.xlu0 %6475 }
 0x3d4   : > { %v8171_v13 = vcombine.low %v8147_v16, %v8163_v34  ;;  %v8172_v56 = vcombine.high %v8147_v16, %v8163_v34  ;;  %v8173_v58 = vcombine.low %v8154_v49, %v8170_v54  ;;  %v8174_v15 = vcombine.high %v8154_v49, %v8170_v54 }
 0x3d5   : > { %v8175_v10 = vcombine.low %v7127_v61, %v7134_v25  ;;  %v9548_v50 = vcombine.high %v7127_v61, %v7134_v25  ;;  %v8191_v51 = vcombine.low %v7143_v44, %v7150_v55  ;;  %v9549_v20 = vcombine.high %v7143_v44, %v7150_v55 }
 0x3d6   : > { %v9770_v30 = vpack.c.bf16 %v8171_v13, %v8171_v13  ;;  %v9786_v41 = vpack.c.bf16 %v8172_v56, %v8172_v56  ;;  %v9802_v28 = vpack.c.bf16 %v8173_v58, %v8173_v58  ;;  %v9818_v0 = vpack.c.bf16 %v8174_v15, %v8174_v15 }
 0x3d7   : > { %v8182_v43 = vrot.slane %v8175_v10, %v10689_v46  ;;  %v8190_v14 = vrot.slane %v9548_v50, %v10689_v46  ;;  %v8198_v27 = vrot.slane %v8191_v51, %v10689_v46  ;;  %v8206_v21 = vrot.slane %v9549_v20, %v10689_v46 }
 0x3d8   : > { %9049 = vst.msk [vmem:[%s11626_s28 + $0x18] sm:$0xf] %vm3490_vm1, %v9770_v30  ;;  %9065 = vst.msk [vmem:[%s11626_s28 + $0x58] sm:$0xf] %vm3490_vm1, %v9786_v41  ;;  %v4123_v22 = vcombine.low %v11828_v52, %v3796_v6  ;;  %v4124_v38 = vcombine.high %v11828_v52, %v3796_v6  ;;  %v4175_v39 = vcombine.low %v10505_v63, %v3750_v9  ;;  %v3798_v6 = vpop.permute.xlu1 %3797 }
 0x3d9   : > { %9081 = vst.msk [vmem:[%s11626_s28 + $0x98] sm:$0xf] %vm3490_vm1, %v9802_v28  ;;  %9097 = vst.msk [vmem:[%s11626_s28 + $0xd8] sm:$0xf] %vm3490_vm1, %v9818_v0  ;;  %v8207_v2 = vcombine.low %v8182_v43, %v8190_v14  ;;  %v8208_v1 = vcombine.high %v8182_v43, %v8190_v14  ;;  %v8223_v35 = vcombine.low %v8198_v27, %v8206_v21  ;;  %v6524_v43 = vpop.permute.xlu0 %6523 }
 0x3da   : > { %v8224_v36 = vcombine.high %v8198_v27, %v8206_v21  ;;  %v4176_v47 = vcombine.high %v10505_v63, %v3750_v9  ;;  %v4131_v62 = vrot.slane %v4123_v22, %v10689_v46  ;;  %v4138_v11 = vrot.slane %v4124_v38, %v10689_v46 }
 0x3db   : > { %v8215_v59 = vrot.slane %v8207_v2, %v10703_v17  ;;  %v8222_v19 = vrot.slane %v8208_v1, %v10703_v17  ;;  %v8231_v52 = vrot.slane %v8223_v35, %v10703_v17  ;;  %v4183_v14 = vrot.slane %v4175_v39, %v10689_v46 }
 0x3dc   : > { %v8238_v16 = vrot.slane %v8224_v36, %v10703_v17  ;;  %v4139_v49 = vcombine.low %v4115_v37, %v4131_v62  ;;  %v4140_v34 = vcombine.high %v4115_v37, %v4131_v62  ;;  %v4155_v54 = vcombine.low %v4122_v48, %v4138_v11 }
 0x3dd   : > { %v4156_v61 = vcombine.high %v4122_v48, %v4138_v11  ;;  %v8239_v25 = vcombine.low %v8215_v59, %v8231_v52  ;;  %v8240_v63 = vcombine.high %v8215_v59, %v8231_v52  ;;  %v4190_v27 = vrot.slane %v4176_v47, %v10689_v46 }
 0x3de   : > { %v8241_v44 = vcombine.low %v8222_v19, %v8238_v16  ;;  %v8242_v55 = vcombine.high %v8222_v19, %v8238_v16  ;;  %v4147_v13 = vrot.slane %v4139_v49, %v10703_v17  ;;  %v4154_v56 = vrot.slane %v4140_v34, %v10703_v17  ;;  %v11918_v16 = vpop.permute.xlu1 %6477 }
 0x3df   : > { %v4163_v58 = vrot.slane %v4155_v54, %v10703_v17  ;;  %v4170_v15 = vrot.slane %v4156_v61, %v10703_v17  ;;  %v9771_v10 = vpack.c.bf16 %v8239_v25, %v8239_v25  ;;  %v9787_v50 = vpack.c.bf16 %v8240_v63, %v8240_v63  ;;  %v6572_v25 = vpop.permute.xlu0 %6571 }
 0x3e0   : > { %v9803_v51 = vpack.c.bf16 %v8241_v44, %v8241_v44  ;;  %v9819_v20 = vpack.c.bf16 %v8242_v55, %v8242_v55  ;;  %v5195_v30 = vcombine.low %v4147_v13, %v4154_v56  ;;  %v9435_v41 = vcombine.high %v4147_v13, %v4154_v56 }
 0x3e1   : > { %v5211_v28 = vcombine.low %v4163_v58, %v4170_v15  ;;  %v9436_v0 = vcombine.high %v4163_v58, %v4170_v15  ;;  %9050 = vst.msk [vmem:[%s11626_s28 + $0x1c] sm:$0xf] %vm3490_vm1, %v9771_v10  ;;  %9066 = vst.msk [vmem:[%s11626_s28 + $0x5c] sm:$0xf] %vm3490_vm1, %v9787_v50  ;;  %v4191_v21 = vcombine.low %v11858_v24, %v3798_v6 }
 0x3e2   : > { %9082 = vst.msk [vmem:[%s11626_s28 + $0x9c] sm:$0xf] %vm3490_vm1, %v9803_v51  ;;  %9098 = vst.msk [vmem:[%s11626_s28 + $0xdc] sm:$0xf] %vm3490_vm1, %v9819_v20  ;;  %v4192_v9 = vcombine.high %v11858_v24, %v3798_v6  ;;  %v5202_v37 = vrot.slane %v5195_v30, %v10689_v46  ;;  %v5210_v48 = vrot.slane %v9435_v41, %v10689_v46 }
 0x3e3   : > { %v5218_v22 = vrot.slane %v5211_v28, %v10689_v46  ;;  %v5226_v38 = vrot.slane %v9436_v0, %v10689_v46  ;;  %v4199_v2 = vrot.slane %v4191_v21, %v10689_v46  ;;  %v6883_v35 = vcombine.low %v10477_v23, %v6524_v43  ;;  %v6526_v21 = vpop.permute.xlu1 %6525 }
 0x3e4   : > { %v4206_v1 = vrot.slane %v4192_v9, %v10689_v46  ;;  %v6884_v36 = vcombine.high %v10477_v23, %v6524_v43  ;;  %v5227_v39 = vcombine.low %v5202_v37, %v5210_v48  ;;  %v5228_v47 = vcombine.high %v5202_v37, %v5210_v48 }
 0x3e5   : > { %v5243_v62 = vcombine.low %v5218_v22, %v5226_v38  ;;  %v5244_v24 = vcombine.high %v5218_v22, %v5226_v38  ;;  %v4207_v11 = vcombine.low %v4183_v14, %v4199_v2  ;;  %v4208_v59 = vcombine.high %v4183_v14, %v4199_v2  ;;  %v11944_v38 = vpop.permute.xlu0 %3711 }
 0x3e6   : > { %v4223_v19 = vcombine.low %v4190_v27, %v4206_v1  ;;  %v4224_v52 = vcombine.high %v4190_v27, %v4206_v1  ;;  %v5235_v49 = vrot.slane %v5227_v39, %v10703_v17  ;;  %v5242_v34 = vrot.slane %v5228_v47, %v10703_v17 }
 0x3e7   : > { %v5251_v54 = vrot.slane %v5243_v62, %v10703_v17  ;;  %v5258_v61 = vrot.slane %v5244_v24, %v10703_v17  ;;  %v4215_v23 = vrot.slane %v4207_v11, %v10703_v17  ;;  %v4222_v63 = vrot.slane %v4208_v59, %v10703_v17 }
 0x3e8   : > { %v4231_v44 = vrot.slane %v4223_v19, %v10703_v17  ;;  %v4238_v55 = vrot.slane %v4224_v52, %v10703_v17  ;;  %v6891_v9 = vrot.slane %v6883_v35, %v10689_v46  ;;  %v6898_v37 = vrot.slane %v6884_v36, %v10689_v46 }
 0x3e9   : > { %v5259_v13 = vcombine.low %v5235_v49, %v5251_v54  ;;  %v5260_v56 = vcombine.high %v5235_v49, %v5251_v54  ;;  %v5261_v58 = vcombine.low %v5242_v34, %v5258_v61  ;;  %v5262_v15 = vcombine.high %v5242_v34, %v5258_v61 }
 0x3ea   : > { %v5263_v6 = vcombine.low %v4215_v23, %v4222_v63  ;;  %v9437_v10 = vcombine.high %v4215_v23, %v4222_v63  ;;  %v5279_v50 = vcombine.low %v4231_v44, %v4238_v55  ;;  %v9438_v51 = vcombine.high %v4231_v44, %v4238_v55 }
 0x3eb   : > { %v9704_v20 = vpack.c.bf16 %v5259_v13, %v5259_v13  ;;  %v9720_v30 = vpack.c.bf16 %v5260_v56, %v5260_v56  ;;  %v9736_v41 = vpack.c.bf16 %v5261_v58, %v5261_v58  ;;  %v9752_v28 = vpack.c.bf16 %v5262_v15, %v5262_v15  ;;  %v6574_v56 = vpop.permute.xlu1 %6573  ;;  %v11958_v58 = vpop.permute.xlu0 %3759 }
 0x3ec   : > { %v5270_v0 = vrot.slane %v5263_v6, %v10689_v46  ;;  %v5278_v43 = vrot.slane %v9437_v10, %v10689_v46  ;;  %v5286_v14 = vrot.slane %v5279_v50, %v10689_v46  ;;  %v5294_v27 = vrot.slane %v9438_v51, %v10689_v46 }
 0x3ed   : > { %6271 = vst.msk [vmem:[%s11560_s25 + $0x10] sm:$0xf] %vm3490_vm1, %v9704_v20  ;;  %6287 = vst.msk [vmem:[%s11560_s25 + $0x50] sm:$0xf] %vm3490_vm1, %v9720_v30  ;;  %v6899_v48 = vcombine.low %v11888_v40, %v6572_v25  ;;  %v6900_v22 = vcombine.high %v11888_v40, %v6572_v25  ;;  %v6951_v62 = vcombine.low %v10486_v53, %v6526_v21 }
 0x3ee   : > { %6303 = vst.msk [vmem:[%s11560_s25 + $0x90] sm:$0xf] %vm3490_vm1, %v9736_v41  ;;  %6319 = vst.msk [vmem:[%s11560_s25 + $0xd0] sm:$0xf] %vm3490_vm1, %v9752_v28  ;;  %v5295_v2 = vcombine.low %v5270_v0, %v5278_v43  ;;  %v5296_v1 = vcombine.high %v5270_v0, %v5278_v43  ;;  %v5311_v39 = vcombine.low %v5286_v14, %v5294_v27 }
 0x3ef   : > { %v5312_v47 = vcombine.high %v5286_v14, %v5294_v27  ;;  %v6952_v24 = vcombine.high %v10486_v53, %v6526_v21  ;;  %v6907_v11 = vrot.slane %v6899_v48, %v10689_v46  ;;  %v6914_v35 = vrot.slane %v6900_v22, %v10689_v46 }
 0x3f0   : > { %v5303_v36 = vrot.slane %v5295_v2, %v10703_v17  ;;  %v5310_v59 = vrot.slane %v5296_v1, %v10703_v17  ;;  %v5319_v40 = vrot.slane %v5311_v39, %v10703_v17  ;;  %v6959_v28 = vrot.slane %v6951_v62, %v10689_v46 }
 0x3f1   : > { %v5326_v19 = vrot.slane %v5312_v47, %v10703_v17  ;;  %v6915_v52 = vcombine.low %v6891_v9, %v6907_v11  ;;  %v6916_v49 = vcombine.high %v6891_v9, %v6907_v11  ;;  %v6931_v34 = vcombine.low %v6898_v37, %v6914_v35  ;;  %v3808_v11 = vpop.permute.xlu0 %3807 }
 0x3f2   : > { %v6932_v54 = vcombine.high %v6898_v37, %v6914_v35  ;;  %v5327_v61 = vcombine.low %v5303_v36, %v5319_v40  ;;  %v5328_v25 = vcombine.high %v5303_v36, %v5319_v40  ;;  %v6966_v0 = vrot.slane %v6952_v24, %v10689_v46  ;;  %v11982_v24 = vpop.permute.xlu1 %3713 }
 0x3f3   : > { %v5329_v23 = vcombine.low %v5310_v59, %v5326_v19  ;;  %v5330_v53 = vcombine.high %v5310_v59, %v5326_v19  ;;  %v6923_v63 = vrot.slane %v6915_v52, %v10703_v17  ;;  %v6930_v44 = vrot.slane %v6916_v49, %v10703_v17 }
 0x3f4   : > { %v6939_v55 = vrot.slane %v6931_v34, %v10703_v17  ;;  %v6946_v13 = vrot.slane %v6932_v54, %v10703_v17  ;;  %v9705_v15 = vpack.c.bf16 %v5327_v61, %v5327_v61  ;;  %v9721_v6 = vpack.c.bf16 %v5328_v25, %v5328_v25 }
 0x3f5   : > { %v9737_v10 = vpack.c.bf16 %v5329_v23, %v5329_v23  ;;  %v9753_v50 = vpack.c.bf16 %v5330_v53, %v5330_v53  ;;  %v7971_v51 = vcombine.low %v6923_v63, %v6930_v44  ;;  %v9542_v20 = vcombine.high %v6923_v63, %v6930_v44 }
 0x3f6   : > { %v7987_v30 = vcombine.low %v6939_v55, %v6946_v13  ;;  %v9543_v41 = vcombine.high %v6939_v55, %v6946_v13  ;;  %6272 = vst.msk [vmem:[%s11560_s25 + $0x14] sm:$0xf] %vm3490_vm1, %v9705_v15  ;;  %6288 = vst.msk [vmem:[%s11560_s25 + $0x54] sm:$0xf] %vm3490_vm1, %v9721_v6  ;;  %v6967_v43 = vcombine.low %v11918_v16, %v6574_v56 }
 0x3f7   : > { %6304 = vst.msk [vmem:[%s11560_s25 + $0x94] sm:$0xf] %vm3490_vm1, %v9737_v10  ;;  %6320 = vst.msk [vmem:[%s11560_s25 + $0xd4] sm:$0xf] %vm3490_vm1, %v9753_v50  ;;  %v6968_v14 = vcombine.high %v11918_v16, %v6574_v56  ;;  %v7978_v27 = vrot.slane %v7971_v51, %v10689_v46  ;;  %v7986_v21 = vrot.slane %v9542_v20, %v10689_v46  ;;  %v3762_v51 = vpop.permute.xlu1 %3761  ;;  %v11992_v20 = vpop.permute.xlu0 %6487 }
 0x3f8   : > { %v7994_v9 = vrot.slane %v7987_v30, %v10689_v46  ;;  %v8002_v37 = vrot.slane %v9543_v41, %v10689_v46  ;;  %v6975_v48 = vrot.slane %v6967_v43, %v10689_v46  ;;  %v4515_v2 = vcombine.low %v10524_v45, %v11958_v58 }
 0x3f9   : > { %v6982_v22 = vrot.slane %v6968_v14, %v10689_v46  ;;  %v4516_v1 = vcombine.high %v10524_v45, %v11958_v58  ;;  %v8003_v39 = vcombine.low %v7978_v27, %v7986_v21  ;;  %v8004_v16 = vcombine.high %v7978_v27, %v7986_v21 }
 0x3fa   : > { %v8019_v47 = vcombine.low %v7994_v9, %v8002_v37  ;;  %v8020_v62 = vcombine.high %v7994_v9, %v8002_v37  ;;  %v6983_v35 = vcombine.low %v6959_v28, %v6975_v48  ;;  %v6984_v36 = vcombine.high %v6959_v28, %v6975_v48 }
 0x3fb   : > { %v6999_v59 = vcombine.low %v6966_v0, %v6982_v22  ;;  %v7000_v40 = vcombine.high %v6966_v0, %v6982_v22  ;;  %v8011_v19 = vrot.slane %v8003_v39, %v10703_v17  ;;  %v8018_v52 = vrot.slane %v8004_v16, %v10703_v17 }
 0x3fc   : > { %v8027_v49 = vrot.slane %v8019_v47, %v10703_v17  ;;  %v8034_v34 = vrot.slane %v8020_v62, %v10703_v17  ;;  %v6991_v45 = vrot.slane %v6983_v35, %v10703_v17  ;;  %v6998_v54 = vrot.slane %v6984_v36, %v10703_v17 }
 0x3fd   : > { %v7007_v61 = vrot.slane %v6999_v59, %v10703_v17  ;;  %v7014_v25 = vrot.slane %v7000_v40, %v10703_v17  ;;  %v4523_v43 = vrot.slane %v4515_v2, %v10689_v46  ;;  %v4530_v14 = vrot.slane %v4516_v1, %v10689_v46 }
 0x3fe   : > { %v8035_v23 = vcombine.low %v8011_v19, %v8027_v49  ;;  %v8036_v53 = vcombine.high %v8011_v19, %v8027_v49  ;;  %v8037_v63 = vcombine.low %v8018_v52, %v8034_v34  ;;  %v8038_v44 = vcombine.high %v8018_v52, %v8034_v34  ;;  %v3810_v19 = vpop.permute.xlu1 %3809  ;;  %v12018_v52 = vpop.permute.xlu0 %6535 }
 0x3ff   : > { %v8039_v55 = vcombine.low %v6991_v45, %v6998_v54  ;;  %v9544_v13 = vcombine.high %v6991_v45, %v6998_v54  ;;  %v8055_v56 = vcombine.low %v7007_v61, %v7014_v25  ;;  %v9545_v58 = vcombine.high %v7007_v61, %v7014_v25 }
 0x400   : > { %v9768_v15 = vpack.c.bf16 %v8035_v23, %v8035_v23  ;;  %v9784_v6 = vpack.c.bf16 %v8036_v53, %v8036_v53  ;;  %v9800_v10 = vpack.c.bf16 %v8037_v63, %v8037_v63  ;;  %v9816_v50 = vpack.c.bf16 %v8038_v44, %v8038_v44 }
 0x401   : > { %v8046_v30 = vrot.slane %v8039_v55, %v10689_v46  ;;  %v8054_v41 = vrot.slane %v9544_v13, %v10689_v46  ;;  %v8062_v28 = vrot.slane %v8055_v56, %v10689_v46  ;;  %v8070_v0 = vrot.slane %v9545_v58, %v10689_v46 }
 0x402   : > { %9047 = vst.msk [vmem:[%s11626_s28 + $0x10] sm:$0xf] %vm3490_vm1, %v9768_v15  ;;  %9063 = vst.msk [vmem:[%s11626_s28 + $0x50] sm:$0xf] %vm3490_vm1, %v9784_v6  ;;  %v4531_v27 = vcombine.low %v11944_v38, %v3808_v11  ;;  %v4532_v21 = vcombine.high %v11944_v38, %v3808_v11  ;;  %v4583_v39 = vcombine.low %v10530_v33, %v3762_v51 }
 0x403   : > { %9079 = vst.msk [vmem:[%s11626_s28 + $0x90] sm:$0xf] %vm3490_vm1, %v9800_v10  ;;  %9095 = vst.msk [vmem:[%s11626_s28 + $0xd0] sm:$0xf] %vm3490_vm1, %v9816_v50  ;;  %v8071_v9 = vcombine.low %v8046_v30, %v8054_v41  ;;  %v8072_v37 = vcombine.high %v8046_v30, %v8054_v41  ;;  %v8087_v48 = vcombine.low %v8062_v28, %v8070_v0 }
 0x404   : > { %v8088_v22 = vcombine.high %v8062_v28, %v8070_v0  ;;  %v4584_v16 = vcombine.high %v10530_v33, %v3762_v51  ;;  %v4539_v47 = vrot.slane %v4531_v27, %v10689_v46  ;;  %v4546_v62 = vrot.slane %v4532_v21, %v10689_v46 }
 0x405   : > { %v8079_v2 = vrot.slane %v8071_v9, %v10703_v17  ;;  %v8086_v1 = vrot.slane %v8072_v37, %v10703_v17  ;;  %v8095_v35 = vrot.slane %v8087_v48, %v10703_v17  ;;  %v4591_v6 = vrot.slane %v4583_v39, %v10689_v46 }
 0x406   : > { %v8102_v38 = vrot.slane %v8088_v22, %v10703_v17  ;;  %v4547_v11 = vcombine.low %v4523_v43, %v4539_v47  ;;  %v4548_v36 = vcombine.high %v4523_v43, %v4539_v47  ;;  %v4563_v59 = vcombine.low %v4530_v14, %v4546_v62  ;;  %v12040_v43 = vpop.permute.xlu1 %6489 }
 0x407   : > { %v4564_v40 = vcombine.high %v4530_v14, %v4546_v62  ;;  %v8103_v33 = vcombine.low %v8079_v2, %v8095_v35  ;;  %v8104_v49 = vcombine.high %v8079_v2, %v8095_v35  ;;  %v4598_v10 = vrot.slane %v4584_v16, %v10689_v46  ;;  %v6584_v14 = vpop.permute.xlu0 %6583 }
 0x408   : > { %v8105_v34 = vcombine.low %v8086_v1, %v8102_v38  ;;  %v8106_v45 = vcombine.high %v8086_v1, %v8102_v38  ;;  %v4555_v54 = vrot.slane %v4547_v11, %v10703_v17  ;;  %v4562_v61 = vrot.slane %v4548_v36, %v10703_v17 }
 0x409   : > { %v4571_v25 = vrot.slane %v4563_v59, %v10703_v17  ;;  %v4578_v23 = vrot.slane %v4564_v40, %v10703_v17  ;;  %v9769_v53 = vpack.c.bf16 %v8103_v33, %v8103_v33  ;;  %v9785_v63 = vpack.c.bf16 %v8104_v49, %v8104_v49 }
 0x40a   : > { %v9801_v44 = vpack.c.bf16 %v8105_v34, %v8105_v34  ;;  %v9817_v55 = vpack.c.bf16 %v8106_v45, %v8106_v45  ;;  %v5603_v13 = vcombine.low %v4555_v54, %v4562_v61  ;;  %v9447_v56 = vcombine.high %v4555_v54, %v4562_v61  ;;  %v12056_v34 = vpop.permute.xlu1 %6537 }
 0x40b   : > { %v5619_v58 = vcombine.low %v4571_v25, %v4578_v23  ;;  %v9448_v15 = vcombine.high %v4571_v25, %v4578_v23  ;;  %9048 = vst.msk [vmem:[%s11626_s28 + $0x14] sm:$0xf] %vm3490_vm1, %v9769_v53  ;;  %9064 = vst.msk [vmem:[%s11626_s28 + $0x54] sm:$0xf] %vm3490_vm1, %v9785_v63  ;;  %v4599_v50 = vcombine.low %v11982_v24, %v3810_v19  ;;  %v12058_v45 = vpop.permute.xlu0 %3707 }
 0x40c   : > { %9080 = vst.msk [vmem:[%s11626_s28 + $0x94] sm:$0xf] %vm3490_vm1, %v9801_v44  ;;  %9096 = vst.msk [vmem:[%s11626_s28 + $0xd4] sm:$0xf] %vm3490_vm1, %v9817_v55  ;;  %v4600_v51 = vcombine.high %v11982_v24, %v3810_v19  ;;  %v5610_v30 = vrot.slane %v5603_v13, %v10689_v46  ;;  %v5618_v41 = vrot.slane %v9447_v56, %v10689_v46 }
 0x40d   : > { %v5626_v28 = vrot.slane %v5619_v58, %v10689_v46  ;;  %v5634_v0 = vrot.slane %v9448_v15, %v10689_v46  ;;  %v4607_v27 = vrot.slane %v4599_v50, %v10689_v46  ;;  %v7291_v9 = vcombine.low %v10508_v57, %v12018_v52 }
 0x40e   : > { %v4614_v21 = vrot.slane %v4600_v51, %v10689_v46  ;;  %v7292_v24 = vcombine.high %v10508_v57, %v12018_v52  ;;  %v5635_v37 = vcombine.low %v5610_v30, %v5618_v41  ;;  %v5636_v48 = vcombine.high %v5610_v30, %v5618_v41 }
 0x40f   : > { %v5651_v22 = vcombine.low %v5626_v28, %v5634_v0  ;;  %v5652_v39 = vcombine.high %v5626_v28, %v5634_v0  ;;  %v4615_v16 = vcombine.low %v4591_v6, %v4607_v27  ;;  %v4616_v47 = vcombine.high %v4591_v6, %v4607_v27 }
 0x410   : > { %v4631_v62 = vcombine.low %v4598_v10, %v4614_v21  ;;  %v4632_v2 = vcombine.high %v4598_v10, %v4614_v21  ;;  %v5643_v1 = vrot.slane %v5635_v37, %v10703_v17  ;;  %v5650_v35 = vrot.slane %v5636_v48, %v10703_v17  ;;  %v6586_v48 = vpop.permute.xlu1 %6585 }
 0x411   : > { %v5659_v38 = vrot.slane %v5651_v22, %v10703_v17  ;;  %v5666_v11 = vrot.slane %v5652_v39, %v10703_v17  ;;  %v4623_v36 = vrot.slane %v4615_v16, %v10703_v17  ;;  %v4630_v57 = vrot.slane %v4616_v47, %v10703_v17 }
 0x412   : > { %v4639_v59 = vrot.slane %v4631_v62, %v10703_v17  ;;  %v4646_v40 = vrot.slane %v4632_v2, %v10703_v17  ;;  %v7299_v6 = vrot.slane %v7291_v9, %v10689_v46  ;;  %v7306_v10 = vrot.slane %v7292_v24, %v10689_v46  ;;  %v12082_v24 = vpop.permute.xlu0 %3755 }
 0x413   : > { %v5667_v19 = vcombine.low %v5643_v1, %v5659_v38  ;;  %v5668_v52 = vcombine.high %v5643_v1, %v5659_v38  ;;  %v5669_v33 = vcombine.low %v5650_v35, %v5666_v11  ;;  %v5670_v49 = vcombine.high %v5650_v35, %v5666_v11 }
 0x414   : > { %v5671_v54 = vcombine.low %v4623_v36, %v4630_v57  ;;  %v9449_v61 = vcombine.high %v4623_v36, %v4630_v57  ;;  %v5687_v25 = vcombine.low %v4639_v59, %v4646_v40  ;;  %v9450_v23 = vcombine.high %v4639_v59, %v4646_v40 }
 0x415   : > { %v9710_v53 = vpack.c.bf16 %v5667_v19, %v5667_v19  ;;  %v9726_v63 = vpack.c.bf16 %v5668_v52, %v5668_v52  ;;  %v9742_v44 = vpack.c.bf16 %v5669_v33, %v5669_v33  ;;  %v9758_v55 = vpack.c.bf16 %v5670_v49, %v5670_v49 }
 0x416   : > { %v5678_v13 = vrot.slane %v5671_v54, %v10689_v46  ;;  %v5686_v56 = vrot.slane %v9449_v61, %v10689_v46  ;;  %v5694_v58 = vrot.slane %v5687_v25, %v10689_v46  ;;  %v5702_v15 = vrot.slane %v9450_v23, %v10689_v46  ;;  %v12092_v25 = vpop.permute.xlu1 %3709  ;;  %v12094_v23 = vpop.permute.xlu0 %3803 }
 0x417   : > { %6277 = vst.msk [vmem:[%s11560_s25 + $0x28] sm:$0xf] %vm3490_vm1, %v9710_v53  ;;  %6293 = vst.msk [vmem:[%s11560_s25 + $0x68] sm:$0xf] %vm3490_vm1, %v9726_v63  ;;  %v7307_v50 = vcombine.low %v11992_v20, %v6584_v14  ;;  %v7308_v51 = vcombine.high %v11992_v20, %v6584_v14  ;;  %v7359_v27 = vcombine.low %v10514_v5, %v12056_v34 }
 0x418   : > { %6309 = vst.msk [vmem:[%s11560_s25 + $0xa8] sm:$0xf] %vm3490_vm1, %v9742_v44  ;;  %6325 = vst.msk [vmem:[%s11560_s25 + $0xe8] sm:$0xf] %vm3490_vm1, %v9758_v55  ;;  %v5703_v30 = vcombine.low %v5678_v13, %v5686_v56  ;;  %v5704_v41 = vcombine.high %v5678_v13, %v5686_v56  ;;  %v5719_v28 = vcombine.low %v5694_v58, %v5702_v15 }
 0x419   : > { %v5720_v0 = vcombine.high %v5694_v58, %v5702_v15  ;;  %v7360_v21 = vcombine.high %v10514_v5, %v12056_v34  ;;  %v7315_v37 = vrot.slane %v7307_v50, %v10689_v46  ;;  %v7322_v9 = vrot.slane %v7308_v51, %v10689_v46 }
 0x41a   : > { %v5711_v22 = vrot.slane %v5703_v30, %v10703_v17  ;;  %v5718_v20 = vrot.slane %v5704_v41, %v10703_v17  ;;  %v5727_v14 = vrot.slane %v5719_v28, %v10703_v17  ;;  %v7367_v53 = vrot.slane %v7359_v27, %v10689_v46 }
 0x41b   : > { %v5734_v39 = vrot.slane %v5720_v0, %v10703_v17  ;;  %v7323_v16 = vcombine.low %v7299_v6, %v7315_v37  ;;  %v7324_v47 = vcombine.high %v7299_v6, %v7315_v37  ;;  %v7339_v62 = vcombine.low %v7306_v10, %v7322_v9 }
 0x41c   : > { %v7340_v2 = vcombine.high %v7306_v10, %v7322_v9  ;;  %v5735_v5 = vcombine.low %v5711_v22, %v5727_v14  ;;  %v5736_v1 = vcombine.high %v5711_v22, %v5727_v14  ;;  %v7374_v63 = vrot.slane %v7360_v21, %v10689_v46  ;;  %v12122_v14 = vpop.permute.xlu1 %3757 }
 0x41d   : > { %v5737_v35 = vcombine.low %v5718_v20, %v5734_v39  ;;  %v5738_v38 = vcombine.high %v5718_v20, %v5734_v39  ;;  %v7331_v11 = vrot.slane %v7323_v16, %v10703_v17  ;;  %v7338_v36 = vrot.slane %v7324_v47, %v10703_v17  ;;  %v12124_v39 = vpop.permute.xlu0 %6483 }
 0x41e   : > { %v7347_v57 = vrot.slane %v7339_v62, %v10703_v17  ;;  %v7354_v59 = vrot.slane %v7340_v2, %v10703_v17  ;;  %v9711_v40 = vpack.c.bf16 %v5735_v5, %v5735_v5  ;;  %v9727_v19 = vpack.c.bf16 %v5736_v1, %v5736_v1 }
 0x41f   : > { %v9743_v52 = vpack.c.bf16 %v5737_v35, %v5737_v35  ;;  %v9759_v33 = vpack.c.bf16 %v5738_v38, %v5738_v38  ;;  %v8379_v49 = vcombine.low %v7331_v11, %v7338_v36  ;;  %v9554_v34 = vcombine.high %v7331_v11, %v7338_v36 }
 0x420   : > { %v8395_v54 = vcombine.low %v7347_v57, %v7354_v59  ;;  %v9555_v61 = vcombine.high %v7347_v57, %v7354_v59  ;;  %6278 = vst.msk [vmem:[%s11560_s25 + $0x2c] sm:$0xf] %vm3490_vm1, %v9711_v40  ;;  %6294 = vst.msk [vmem:[%s11560_s25 + $0x6c] sm:$0xf] %vm3490_vm1, %v9727_v19  ;;  %v7375_v44 = vcombine.low %v12040_v43, %v6586_v48 }
 0x421   : > { %6310 = vst.msk [vmem:[%s11560_s25 + $0xac] sm:$0xf] %vm3490_vm1, %v9743_v52  ;;  %6326 = vst.msk [vmem:[%s11560_s25 + $0xec] sm:$0xf] %vm3490_vm1, %v9759_v33  ;;  %v7376_v55 = vcombine.high %v12040_v43, %v6586_v48  ;;  %v8386_v13 = vrot.slane %v8379_v49, %v10689_v46  ;;  %v8394_v56 = vrot.slane %v9554_v34, %v10689_v46 }
 0x422   : > { %v8402_v58 = vrot.slane %v8395_v54, %v10689_v46  ;;  %v8410_v15 = vrot.slane %v9555_v61, %v10689_v46  ;;  %v7383_v6 = vrot.slane %v7375_v44, %v10689_v46  ;;  %v4379_v50 = vcombine.low %v10527_v8, %v12082_v24  ;;  %v3806_v44 = vpop.permute.xlu1 %3805 }
 0x423   : > { %v7390_v10 = vrot.slane %v7376_v55, %v10689_v46  ;;  %v4380_v51 = vcombine.high %v10527_v8, %v12082_v24  ;;  %v8411_v30 = vcombine.low %v8386_v13, %v8394_v56  ;;  %v8412_v43 = vcombine.high %v8386_v13, %v8394_v56  ;;  %v12148_v55 = vpop.permute.xlu0 %6531 }
 0x424   : > { %v8427_v41 = vcombine.low %v8402_v58, %v8410_v15  ;;  %v8428_v28 = vcombine.high %v8402_v58, %v8410_v15  ;;  %v7391_v0 = vcombine.low %v7367_v53, %v7383_v6  ;;  %v7392_v27 = vcombine.high %v7367_v53, %v7383_v6 }
 0x425   : > { %v7407_v21 = vcombine.low %v7374_v63, %v7390_v10  ;;  %v7408_v37 = vcombine.high %v7374_v63, %v7390_v10  ;;  %v8419_v9 = vrot.slane %v8411_v30, %v10703_v17  ;;  %v8426_v48 = vrot.slane %v8412_v43, %v10703_v17 }
 0x426   : > { %v8435_v22 = vrot.slane %v8427_v41, %v10703_v17  ;;  %v8442_v20 = vrot.slane %v8428_v28, %v10703_v17  ;;  %v7399_v8 = vrot.slane %v7391_v0, %v10703_v17  ;;  %v7406_v24 = vrot.slane %v7392_v27, %v10703_v17 }
 0x427   : > { %v7415_v16 = vrot.slane %v7407_v21, %v10703_v17  ;;  %v7422_v47 = vrot.slane %v7408_v37, %v10703_v17  ;;  %v4387_v54 = vrot.slane %v4379_v50, %v10689_v46  ;;  %v4394_v61 = vrot.slane %v4380_v51, %v10689_v46 }
 0x428   : > { %v8443_v62 = vcombine.low %v8419_v9, %v8435_v22  ;;  %v8444_v2 = vcombine.high %v8419_v9, %v8435_v22  ;;  %v8445_v5 = vcombine.low %v8426_v48, %v8442_v20  ;;  %v8446_v1 = vcombine.high %v8426_v48, %v8442_v20 }
 0x429   : > { %v8447_v35 = vcombine.low %v7399_v8, %v7406_v24  ;;  %v9556_v38 = vcombine.high %v7399_v8, %v7406_v24  ;;  %v8463_v11 = vcombine.low %v7415_v16, %v7422_v47  ;;  %v9557_v36 = vcombine.high %v7415_v16, %v7422_v47  ;;  %v12164_v8 = vpop.permute.xlu1 %6485  ;;  %v12166_v24 = vpop.permute.xlu0 %6579 }
 0x42a   : > { %v9774_v57 = vpack.c.bf16 %v8443_v62, %v8443_v62  ;;  %v9790_v59 = vpack.c.bf16 %v8444_v2, %v8444_v2  ;;  %v9806_v40 = vpack.c.bf16 %v8445_v5, %v8445_v5  ;;  %v9822_v19 = vpack.c.bf16 %v8446_v1, %v8446_v1 }
 0x42b   : > { %v8454_v52 = vrot.slane %v8447_v35, %v10689_v46  ;;  %v8462_v33 = vrot.slane %v9556_v38, %v10689_v46  ;;  %v8470_v49 = vrot.slane %v8463_v11, %v10689_v46  ;;  %v8478_v34 = vrot.slane %v9557_v36, %v10689_v46 }
 0x42c   : > { %9053 = vst.msk [vmem:[%s11626_s28 + $0x28] sm:$0xf] %vm3490_vm1, %v9774_v57  ;;  %9069 = vst.msk [vmem:[%s11626_s28 + $0x68] sm:$0xf] %vm3490_vm1, %v9790_v59  ;;  %v4395_v53 = vcombine.low %v12058_v45, %v12094_v23  ;;  %v4396_v63 = vcombine.high %v12058_v45, %v12094_v23  ;;  %v4447_v6 = vcombine.low %v10537_v12, %v12122_v14 }
 0x42d   : > { %9085 = vst.msk [vmem:[%s11626_s28 + $0xa8] sm:$0xf] %vm3490_vm1, %v9806_v40  ;;  %9101 = vst.msk [vmem:[%s11626_s28 + $0xe8] sm:$0xf] %vm3490_vm1, %v9822_v19  ;;  %v8479_v13 = vcombine.low %v8454_v52, %v8462_v33  ;;  %v8480_v56 = vcombine.high %v8454_v52, %v8462_v33  ;;  %v8495_v58 = vcombine.low %v8470_v49, %v8478_v34 }
 0x42e   : > { %v8496_v15 = vcombine.high %v8470_v49, %v8478_v34  ;;  %v4448_v10 = vcombine.high %v10537_v12, %v12122_v14  ;;  %v4403_v50 = vrot.slane %v4395_v53, %v10689_v46  ;;  %v4410_v51 = vrot.slane %v4396_v63, %v10689_v46 }
 0x42f   : > { %v8487_v30 = vrot.slane %v8479_v13, %v10703_v17  ;;  %v8494_v45 = vrot.slane %v8480_v56, %v10703_v17  ;;  %v8503_v23 = vrot.slane %v8495_v58, %v10703_v17  ;;  %v4455_v11 = vrot.slane %v4447_v6, %v10689_v46  ;;  %v12190_v13 = vpop.permute.xlu1 %6533  ;;  %v12192_v56 = vpop.permute.xlu0 %3719 }
 0x430   : > { %v8510_v43 = vrot.slane %v8496_v15, %v10703_v17  ;;  %v4411_v41 = vcombine.low %v4387_v54, %v4403_v50  ;;  %v4412_v28 = vcombine.high %v4387_v54, %v4403_v50  ;;  %v4427_v0 = vcombine.low %v4394_v61, %v4410_v51 }
 0x431   : > { %v4428_v27 = vcombine.high %v4394_v61, %v4410_v51  ;;  %v8511_v21 = vcombine.low %v8487_v30, %v8503_v23  ;;  %v8512_v37 = vcombine.high %v8487_v30, %v8503_v23  ;;  %v4462_v36 = vrot.slane %v4448_v10, %v10689_v46 }
 0x432   : > { %v8513_v9 = vcombine.low %v8494_v45, %v8510_v43  ;;  %v8514_v12 = vcombine.high %v8494_v45, %v8510_v43  ;;  %v4419_v48 = vrot.slane %v4411_v41, %v10703_v17  ;;  %v4426_v22 = vrot.slane %v4412_v28, %v10703_v17 }
 0x433   : > { %v4435_v20 = vrot.slane %v4427_v0, %v10703_v17  ;;  %v4442_v14 = vrot.slane %v4428_v27, %v10703_v17  ;;  %v9775_v16 = vpack.c.bf16 %v8511_v21, %v8511_v21  ;;  %v9791_v47 = vpack.c.bf16 %v8512_v37, %v8512_v37 }
 0x434   : > { %v9807_v62 = vpack.c.bf16 %v8513_v9, %v8513_v9  ;;  %v9823_v2 = vpack.c.bf16 %v8514_v12, %v8514_v12  ;;  %v5467_v5 = vcombine.low %v4419_v48, %v4426_v22  ;;  %v9443_v1 = vcombine.high %v4419_v48, %v4426_v22 }
 0x435   : > { %v5483_v35 = vcombine.low %v4435_v20, %v4442_v14  ;;  %v9444_v38 = vcombine.high %v4435_v20, %v4442_v14  ;;  %9054 = vst.msk [vmem:[%s11626_s28 + $0x2c] sm:$0xf] %vm3490_vm1, %v9775_v16  ;;  %9070 = vst.msk [vmem:[%s11626_s28 + $0x6c] sm:$0xf] %vm3490_vm1, %v9791_v47  ;;  %v4463_v57 = vcombine.low %v12092_v25, %v3806_v44  ;;  %v12202_v16 = vpop.permute.xlu1 %6581  ;;  %v12204_v47 = vpop.permute.xlu0 %3767 }
 0x436   : > { %9086 = vst.msk [vmem:[%s11626_s28 + $0xac] sm:$0xf] %vm3490_vm1, %v9807_v62  ;;  %9102 = vst.msk [vmem:[%s11626_s28 + $0xec] sm:$0xf] %vm3490_vm1, %v9823_v2  ;;  %v4464_v59 = vcombine.high %v12092_v25, %v3806_v44  ;;  %v5474_v40 = vrot.slane %v5467_v5, %v10689_v46  ;;  %v5482_v19 = vrot.slane %v9443_v1, %v10689_v46 }
 0x437   : > { %v5490_v52 = vrot.slane %v5483_v35, %v10689_v46  ;;  %v5498_v33 = vrot.slane %v9444_v38, %v10689_v46  ;;  %v4471_v49 = vrot.slane %v4463_v57, %v10689_v46  ;;  %v7155_v54 = vcombine.low %v10511_v3, %v12148_v55 }
 0x438   : > { %v4478_v34 = vrot.slane %v4464_v59, %v10689_v46  ;;  %v7156_v61 = vcombine.high %v10511_v3, %v12148_v55  ;;  %v5499_v53 = vcombine.low %v5474_v40, %v5482_v19  ;;  %v5500_v25 = vcombine.high %v5474_v40, %v5482_v19 }
 0x439   : > { %v5515_v63 = vcombine.low %v5490_v52, %v5498_v33  ;;  %v5516_v44 = vcombine.high %v5490_v52, %v5498_v33  ;;  %v4479_v58 = vcombine.low %v4455_v11, %v4471_v49  ;;  %v4480_v15 = vcombine.high %v4455_v11, %v4471_v49 }
 0x43a   : > { %v4495_v6 = vcombine.low %v4462_v36, %v4478_v34  ;;  %v4496_v10 = vcombine.high %v4462_v36, %v4478_v34  ;;  %v5507_v50 = vrot.slane %v5499_v53, %v10703_v17  ;;  %v5514_v51 = vrot.slane %v5500_v25, %v10703_v17 }
 0x43b   : > { %v5523_v30 = vrot.slane %v5515_v63, %v10703_v17  ;;  %v5530_v3 = vrot.slane %v5516_v44, %v10703_v17  ;;  %v4487_v55 = vrot.slane %v4479_v58, %v10703_v17  ;;  %v4494_v45 = vrot.slane %v4480_v15, %v10703_v17  ;;  %v12234_v58 = vpop.permute.xlu1 %3721  ;;  %v12236_v15 = vpop.permute.xlu0 %3815 }
 0x43c   : > { %v4503_v23 = vrot.slane %v4495_v6, %v10703_v17  ;;  %v4510_v43 = vrot.slane %v4496_v10, %v10703_v17  ;;  %v7163_v35 = vrot.slane %v7155_v54, %v10689_v46  ;;  %v7170_v38 = vrot.slane %v7156_v61, %v10689_v46 }
 0x43d   : > { %v5531_v41 = vcombine.low %v5507_v50, %v5523_v30  ;;  %v5532_v28 = vcombine.high %v5507_v50, %v5523_v30  ;;  %v5533_v0 = vcombine.low %v5514_v51, %v5530_v3  ;;  %v5534_v27 = vcombine.high %v5514_v51, %v5530_v3 }
 0x43e   : > { %v5535_v21 = vcombine.low %v4487_v55, %v4494_v45  ;;  %v9445_v37 = vcombine.high %v4487_v55, %v4494_v45  ;;  %v5551_v9 = vcombine.low %v4503_v23, %v4510_v43  ;;  %v9446_v12 = vcombine.high %v4503_v23, %v4510_v43 }
 0x43f   : > { %v9708_v48 = vpack.c.bf16 %v5531_v41, %v5531_v41  ;;  %v9724_v22 = vpack.c.bf16 %v5532_v28, %v5532_v28  ;;  %v9740_v20 = vpack.c.bf16 %v5533_v0, %v5533_v0  ;;  %v9756_v14 = vpack.c.bf16 %v5534_v27, %v5534_v27 }
 0x440   : > { %v5542_v62 = vrot.slane %v5535_v21, %v10689_v46  ;;  %v5550_v2 = vrot.slane %v9445_v37, %v10689_v46  ;;  %v5558_v5 = vrot.slane %v5551_v9, %v10689_v46  ;;  %v5566_v1 = vrot.slane %v9446_v12, %v10689_v46 }
 0x441   : > { %6275 = vst.msk [vmem:[%s11560_s25 + $0x20] sm:$0xf] %vm3490_vm1, %v9708_v48  ;;  %6291 = vst.msk [vmem:[%s11560_s25 + $0x60] sm:$0xf] %vm3490_vm1, %v9724_v22  ;;  %v7171_v11 = vcombine.low %v12124_v39, %v12166_v24  ;;  %v7172_v36 = vcombine.high %v12124_v39, %v12166_v24  ;;  %v7223_v52 = vcombine.low %v10521_v7, %v12190_v13 }
 0x442   : > { %6307 = vst.msk [vmem:[%s11560_s25 + $0xa0] sm:$0xf] %vm3490_vm1, %v9740_v20  ;;  %6323 = vst.msk [vmem:[%s11560_s25 + $0xe0] sm:$0xf] %vm3490_vm1, %v9756_v14  ;;  %v5567_v57 = vcombine.low %v5542_v62, %v5550_v2  ;;  %v5568_v59 = vcombine.high %v5542_v62, %v5550_v2  ;;  %v5583_v40 = vcombine.low %v5558_v5, %v5566_v1  ;;  %v12260_v62 = vpop.permute.xlu1 %3769  ;;  %v12262_v2 = vpop.permute.xlu0 %6495 }
 0x443   : > { %v5584_v19 = vcombine.high %v5558_v5, %v5566_v1  ;;  %v7224_v33 = vcombine.high %v10521_v7, %v12190_v13  ;;  %v7179_v49 = vrot.slane %v7171_v11, %v10689_v46  ;;  %v7186_v34 = vrot.slane %v7172_v36, %v10689_v46 }
 0x444   : > { %v5575_v54 = vrot.slane %v5567_v57, %v10703_v17  ;;  %v5582_v61 = vrot.slane %v5568_v59, %v10703_v17  ;;  %v5591_v39 = vrot.slane %v5583_v40, %v10703_v17  ;;  %v7231_v21 = vrot.slane %v7223_v52, %v10689_v46 }
 0x445   : > { %v5598_v24 = vrot.slane %v5584_v19, %v10703_v17  ;;  %v7187_v53 = vcombine.low %v7163_v35, %v7179_v49  ;;  %v7188_v25 = vcombine.high %v7163_v35, %v7179_v49  ;;  %v7203_v63 = vcombine.low %v7170_v38, %v7186_v34 }
 0x446   : > { %v7204_v44 = vcombine.high %v7170_v38, %v7186_v34  ;;  %v5599_v7 = vcombine.low %v5575_v54, %v5591_v39  ;;  %v5600_v13 = vcombine.high %v5575_v54, %v5591_v39  ;;  %v7238_v37 = vrot.slane %v7224_v33, %v10689_v46 }
 0x447   : > { %v5601_v6 = vcombine.low %v5582_v61, %v5598_v24  ;;  %v5602_v10 = vcombine.high %v5582_v61, %v5598_v24  ;;  %v7195_v50 = vrot.slane %v7187_v53, %v10703_v17  ;;  %v7202_v51 = vrot.slane %v7188_v25, %v10703_v17 }
 0x448   : > { %v7211_v30 = vrot.slane %v7203_v63, %v10703_v17  ;;  %v7218_v3 = vrot.slane %v7204_v44, %v10703_v17  ;;  %v9709_v55 = vpack.c.bf16 %v5599_v7, %v5599_v7  ;;  %v9725_v45 = vpack.c.bf16 %v5600_v13, %v5600_v13  ;;  %v12278_v63 = vpop.permute.xlu1 %3817  ;;  %v12280_v44 = vpop.permute.xlu0 %6543 }
 0x449   : > { %v9741_v23 = vpack.c.bf16 %v5601_v6, %v5601_v6  ;;  %v9757_v43 = vpack.c.bf16 %v5602_v10, %v5602_v10  ;;  %v8243_v41 = vcombine.low %v7195_v50, %v7202_v51  ;;  %v9550_v28 = vcombine.high %v7195_v50, %v7202_v51 }
 0x44a   : > { %v8259_v0 = vcombine.low %v7211_v30, %v7218_v3  ;;  %v9551_v27 = vcombine.high %v7211_v30, %v7218_v3  ;;  %6276 = vst.msk [vmem:[%s11560_s25 + $0x24] sm:$0xf] %vm3490_vm1, %v9709_v55  ;;  %6292 = vst.msk [vmem:[%s11560_s25 + $0x64] sm:$0xf] %vm3490_vm1, %v9725_v45  ;;  %v7239_v9 = vcombine.low %v12164_v8, %v12202_v16 }
 0x44b   : > { %6308 = vst.msk [vmem:[%s11560_s25 + $0xa4] sm:$0xf] %vm3490_vm1, %v9741_v23  ;;  %6324 = vst.msk [vmem:[%s11560_s25 + $0xe4] sm:$0xf] %vm3490_vm1, %v9757_v43  ;;  %v7240_v12 = vcombine.high %v12164_v8, %v12202_v16  ;;  %v8250_v48 = vrot.slane %v8243_v41, %v10689_v46  ;;  %v8258_v22 = vrot.slane %v9550_v28, %v10689_v46 }
 0x44c   : > { %v8266_v20 = vrot.slane %v8259_v0, %v10689_v46  ;;  %v8274_v14 = vrot.slane %v9551_v27, %v10689_v46  ;;  %v7247_v5 = vrot.slane %v7239_v9, %v10689_v46  ;;  %v4787_v35 = vcombine.low %v10568_v60, %v12204_v47 }
 0x44d   : > { %v7254_v1 = vrot.slane %v7240_v12, %v10689_v46  ;;  %v4788_v8 = vcombine.high %v10568_v60, %v12204_v47  ;;  %v8275_v16 = vcombine.low %v8250_v48, %v8258_v22  ;;  %v8276_v38 = vcombine.high %v8250_v48, %v8258_v22 }
 0x44e   : > { %v8291_v11 = vcombine.low %v8266_v20, %v8274_v14  ;;  %v8292_v36 = vcombine.high %v8266_v20, %v8274_v14  ;;  %v7255_v57 = vcombine.low %v7231_v21, %v7247_v5  ;;  %v7256_v59 = vcombine.high %v7231_v21, %v7247_v5  ;;  %v12306_v5 = vpop.permute.xlu1 %6497 }
 0x44f   : > { %v7271_v40 = vcombine.low %v7238_v37, %v7254_v1  ;;  %v7272_v19 = vcombine.high %v7238_v37, %v7254_v1  ;;  %v8283_v52 = vrot.slane %v8275_v16, %v10703_v17  ;;  %v8290_v33 = vrot.slane %v8276_v38, %v10703_v17  ;;  %v12308_v1 = vpop.permute.xlu0 %3715 }
 0x450   : > { %v8299_v49 = vrot.slane %v8291_v11, %v10703_v17  ;;  %v8306_v34 = vrot.slane %v8292_v36, %v10703_v17  ;;  %v7263_v54 = vrot.slane %v7255_v57, %v10703_v17  ;;  %v7270_v60 = vrot.slane %v7256_v59, %v10703_v17 }
 0x451   : > { %v7279_v47 = vrot.slane %v7271_v40, %v10703_v17  ;;  %v7286_v61 = vrot.slane %v7272_v19, %v10703_v17  ;;  %v4795_v41 = vrot.slane %v4787_v35, %v10689_v46  ;;  %v4802_v28 = vrot.slane %v4788_v8, %v10689_v46 }
 0x452   : > { %v8307_v39 = vcombine.low %v8283_v52, %v8299_v49  ;;  %v8308_v24 = vcombine.high %v8283_v52, %v8299_v49  ;;  %v8309_v53 = vcombine.low %v8290_v33, %v8306_v34  ;;  %v8310_v25 = vcombine.high %v8290_v33, %v8306_v34 }
 0x453   : > { %v8311_v7 = vcombine.low %v7263_v54, %v7270_v60  ;;  %v9552_v13 = vcombine.high %v7263_v54, %v7270_v60  ;;  %v8327_v6 = vcombine.low %v7279_v47, %v7286_v61  ;;  %v9553_v10 = vcombine.high %v7279_v47, %v7286_v61 }
 0x454   : > { %v9772_v50 = vpack.c.bf16 %v8307_v39, %v8307_v39  ;;  %v9788_v51 = vpack.c.bf16 %v8308_v24, %v8308_v24  ;;  %v9804_v30 = vpack.c.bf16 %v8309_v53, %v8309_v53  ;;  %v9820_v3 = vpack.c.bf16 %v8310_v25, %v8310_v25  ;;  %v12318_v53 = vpop.permute.xlu1 %6545  ;;  %v12320_v25 = vpop.permute.xlu0 %3763 }
 0x455   : > { %v8318_v55 = vrot.slane %v8311_v7, %v10689_v46  ;;  %v8326_v45 = vrot.slane %v9552_v13, %v10689_v46  ;;  %v8334_v23 = vrot.slane %v8327_v6, %v10689_v46  ;;  %v8342_v43 = vrot.slane %v9553_v10, %v10689_v46 }
 0x456   : > { %9051 = vst.msk [vmem:[%s11626_s28 + $0x20] sm:$0xf] %vm3490_vm1, %v9772_v50  ;;  %9067 = vst.msk [vmem:[%s11626_s28 + $0x60] sm:$0xf] %vm3490_vm1, %v9788_v51  ;;  %v4803_v0 = vcombine.low %v12192_v56, %v12236_v15  ;;  %v4804_v27 = vcombine.high %v12192_v56, %v12236_v15  ;;  %v4855_v48 = vcombine.low %v10574_v4, %v12260_v62 }
 0x457   : > { %9083 = vst.msk [vmem:[%s11626_s28 + $0xa0] sm:$0xf] %vm3490_vm1, %v9804_v30  ;;  %9099 = vst.msk [vmem:[%s11626_s28 + $0xe0] sm:$0xf] %vm3490_vm1, %v9820_v3  ;;  %v8343_v21 = vcombine.low %v8318_v55, %v8326_v45  ;;  %v8344_v37 = vcombine.high %v8318_v55, %v8326_v45  ;;  %v8359_v9 = vcombine.low %v8334_v23, %v8342_v43 }
 0x458   : > { %v8360_v12 = vcombine.high %v8334_v23, %v8342_v43  ;;  %v4856_v22 = vcombine.high %v10574_v4, %v12260_v62  ;;  %v4811_v20 = vrot.slane %v4803_v0, %v10689_v46  ;;  %v4818_v14 = vrot.slane %v4804_v27, %v10689_v46 }
 0x459   : > { %v8351_v56 = vrot.slane %v8343_v21, %v10703_v17  ;;  %v8358_v15 = vrot.slane %v8344_v37, %v10703_v17  ;;  %v8367_v35 = vrot.slane %v8359_v9, %v10703_v17  ;;  %v4863_v7 = vrot.slane %v4855_v48, %v10689_v46 }
 0x45a   : > { %v8374_v8 = vrot.slane %v8360_v12, %v10703_v17  ;;  %v4819_v16 = vcombine.low %v4795_v41, %v4811_v20  ;;  %v4820_v38 = vcombine.high %v4795_v41, %v4811_v20  ;;  %v4835_v11 = vcombine.low %v4802_v28, %v4818_v14  ;;  %v12350_v20 = vpop.permute.xlu1 %3717 }
 0x45b   : > { %v4836_v4 = vcombine.high %v4802_v28, %v4818_v14  ;;  %v8375_v62 = vcombine.low %v8351_v56, %v8367_v35  ;;  %v8376_v36 = vcombine.high %v8351_v56, %v8367_v35  ;;  %v4870_v13 = vrot.slane %v4856_v22, %v10689_v46  ;;  %v3812_v14 = vpop.permute.xlu0 %3811 }
 0x45c   : > { %v8377_v57 = vcombine.low %v8358_v15, %v8374_v8  ;;  %v8378_v59 = vcombine.high %v8358_v15, %v8374_v8  ;;  %v4827_v40 = vrot.slane %v4819_v16, %v10703_v17  ;;  %v4834_v19 = vrot.slane %v4820_v38, %v10703_v17 }
 0x45d   : > { %v4843_v52 = vrot.slane %v4835_v11, %v10703_v17  ;;  %v4850_v33 = vrot.slane %v4836_v4, %v10703_v17  ;;  %v9773_v49 = vpack.c.bf16 %v8375_v62, %v8375_v62  ;;  %v9789_v34 = vpack.c.bf16 %v8376_v36, %v8376_v36 }
 0x45e   : > { %v9805_v54 = vpack.c.bf16 %v8377_v57, %v8377_v57  ;;  %v9821_v60 = vpack.c.bf16 %v8378_v59, %v8378_v59  ;;  %v5875_v47 = vcombine.low %v4827_v40, %v4834_v19  ;;  %v9455_v61 = vcombine.high %v4827_v40, %v4834_v19 }
 0x45f   : > { %v5891_v39 = vcombine.low %v4843_v52, %v4850_v33  ;;  %v9456_v24 = vcombine.high %v4843_v52, %v4850_v33  ;;  %9052 = vst.msk [vmem:[%s11626_s28 + $0x24] sm:$0xf] %vm3490_vm1, %v9773_v49  ;;  %9068 = vst.msk [vmem:[%s11626_s28 + $0x64] sm:$0xf] %vm3490_vm1, %v9789_v34  ;;  %v4871_v6 = vcombine.low %v12234_v58, %v12278_v63 }
 0x460   : > { %9084 = vst.msk [vmem:[%s11626_s28 + $0xa4] sm:$0xf] %vm3490_vm1, %v9805_v54  ;;  %9100 = vst.msk [vmem:[%s11626_s28 + $0xe4] sm:$0xf] %vm3490_vm1, %v9821_v60  ;;  %v4872_v10 = vcombine.high %v12234_v58, %v12278_v63  ;;  %v5882_v50 = vrot.slane %v5875_v47, %v10689_v46  ;;  %v5890_v51 = vrot.slane %v9455_v61, %v10689_v46 }
 0x461   : > { %v5898_v30 = vrot.slane %v5891_v39, %v10689_v46  ;;  %v5906_v3 = vrot.slane %v9456_v24, %v10689_v46  ;;  %v4879_v55 = vrot.slane %v4871_v6, %v10689_v46  ;;  %v7563_v23 = vcombine.low %v10544_v18, %v12280_v44  ;;  %v3766_v39 = vpop.permute.xlu1 %3765  ;;  %v12378_v24 = vpop.permute.xlu0 %6491 }
 0x462   : > { %v4886_v45 = vrot.slane %v4872_v10, %v10689_v46  ;;  %v7564_v43 = vcombine.high %v10544_v18, %v12280_v44  ;;  %v5907_v41 = vcombine.low %v5882_v50, %v5890_v51  ;;  %v5908_v58 = vcombine.high %v5882_v50, %v5890_v51 }
 0x463   : > { %v5923_v63 = vcombine.low %v5898_v30, %v5906_v3  ;;  %v5924_v28 = vcombine.high %v5898_v30, %v5906_v3  ;;  %v4887_v0 = vcombine.low %v4863_v7, %v4879_v55  ;;  %v4888_v27 = vcombine.high %v4863_v7, %v4879_v55 }
 0x464   : > { %v4903_v21 = vcombine.low %v4870_v13, %v4886_v45  ;;  %v4904_v37 = vcombine.high %v4870_v13, %v4886_v45  ;;  %v5915_v9 = vrot.slane %v5907_v41, %v10703_v17  ;;  %v5922_v12 = vrot.slane %v5908_v58, %v10703_v17 }
 0x465   : > { %v5931_v48 = vrot.slane %v5923_v63, %v10703_v17  ;;  %v5938_v22 = vrot.slane %v5924_v28, %v10703_v17  ;;  %v4895_v18 = vrot.slane %v4887_v0, %v10703_v17  ;;  %v4902_v44 = vrot.slane %v4888_v27, %v10703_v17 }
 0x466   : > { %v4911_v56 = vrot.slane %v4903_v21, %v10703_v17  ;;  %v4918_v15 = vrot.slane %v4904_v37, %v10703_v17  ;;  %v12369_v54 = vrot.slane %v7563_v23, %v10689_v46  ;;  %v12372_v60 = vrot.slane %v7564_v43, %v10689_v46 }
 0x467   : > { %v5939_v35 = vcombine.low %v5915_v9, %v5931_v48  ;;  %v5940_v8 = vcombine.high %v5915_v9, %v5931_v48  ;;  %v5941_v16 = vcombine.low %v5922_v12, %v5938_v22  ;;  %v5942_v38 = vcombine.high %v5922_v12, %v5938_v22  ;;  %v3814_v12 = vpop.permute.xlu1 %3813  ;;  %v6540_v48 = vpop.permute.xlu0 %6539 }
 0x468   : > { %v5943_v11 = vcombine.low %v4895_v18, %v4902_v44  ;;  %v9457_v4 = vcombine.high %v4895_v18, %v4902_v44  ;;  %v5959_v62 = vcombine.low %v4911_v56, %v4918_v15  ;;  %v9458_v36 = vcombine.high %v4911_v56, %v4918_v15 }
 0x469   : > { %v9714_v57 = vpack.c.bf16 %v5939_v35, %v5939_v35  ;;  %v9730_v59 = vpack.c.bf16 %v5940_v8, %v5940_v8  ;;  %v9746_v40 = vpack.c.bf16 %v5941_v16, %v5941_v16  ;;  %v9762_v19 = vpack.c.bf16 %v5942_v38, %v5942_v38 }
 0x46a   : > { %v5950_v52 = vrot.slane %v5943_v11, %v10689_v46  ;;  %v5958_v33 = vrot.slane %v9457_v4, %v10689_v46  ;;  %v5966_v49 = vrot.slane %v5959_v62, %v10689_v46  ;;  %v5974_v34 = vrot.slane %v9458_v36, %v10689_v46 }
 0x46b   : > { %6281 = vst.msk [vmem:[%s11560_s25 + $0x38] sm:$0xf] %vm3490_vm1, %v9714_v57  ;;  %6297 = vst.msk [vmem:[%s11560_s25 + $0x78] sm:$0xf] %vm3490_vm1, %v9730_v59  ;;  %v4651_v47 = vcombine.low %v12636_v26, %v12320_v25  ;;  %v4652_v61 = vcombine.high %v12636_v26, %v12320_v25  ;;  %v7631_v50 = vcombine.low %v10550_v31, %v12318_v53 }
 0x46c   : > { %6313 = vst.msk [vmem:[%s11560_s25 + $0xb8] sm:$0xf] %vm3490_vm1, %v9746_v40  ;;  %6329 = vst.msk [vmem:[%s11560_s25 + $0xf8] sm:$0xf] %vm3490_vm1, %v9762_v19  ;;  %v5975_v7 = vcombine.low %v5950_v52, %v5958_v33  ;;  %v5976_v13 = vcombine.high %v5950_v52, %v5958_v33  ;;  %v5991_v6 = vcombine.low %v5966_v49, %v5974_v34 }
 0x46d   : > { %v5992_v10 = vcombine.high %v5966_v49, %v5974_v34  ;;  %v7632_v51 = vcombine.high %v10550_v31, %v12318_v53  ;;  %v4659_v30 = vrot.slane %v4651_v47, %v10689_v46  ;;  %v4666_v3 = vrot.slane %v4652_v61, %v10689_v46 }
 0x46e   : > { %v5983_v55 = vrot.slane %v5975_v7, %v10703_v17  ;;  %v5990_v26 = vrot.slane %v5976_v13, %v10703_v17  ;;  %v5999_v25 = vrot.slane %v5991_v6, %v10703_v17  ;;  %v4719_v23 = vcombine.low %v12637_v42, %v3766_v39 }
 0x46f   : > { %v6006_v45 = vrot.slane %v5992_v10, %v10703_v17  ;;  %v4720_v43 = vcombine.high %v12637_v42, %v3766_v39  ;;  %v4667_v41 = vcombine.low %v12308_v1, %v3812_v14  ;;  %v4668_v58 = vcombine.high %v12308_v1, %v3812_v14 }
 0x470   : > { %v6007_v63 = vcombine.low %v5983_v55, %v5999_v25  ;;  %v6008_v28 = vcombine.high %v5983_v55, %v5999_v25  ;;  %v4727_v21 = vrot.slane %v4719_v23, %v10689_v46  ;;  %v4735_v8 = vcombine.low %v12350_v20, %v3814_v12 }
 0x471   : > { %v6009_v0 = vcombine.low %v5990_v26, %v6006_v45  ;;  %v6010_v27 = vcombine.high %v5990_v26, %v6006_v45  ;;  %v4734_v37 = vrot.slane %v4720_v43, %v10689_v46  ;;  %v4675_v9 = vrot.slane %v4667_v41, %v10689_v46 }
 0x472   : > { %v4682_v42 = vrot.slane %v4668_v58, %v10689_v46  ;;  %v9715_v22 = vpack.c.bf16 %v6007_v63, %v6007_v63  ;;  %v9731_v1 = vpack.c.bf16 %v6008_v28, %v6008_v28  ;;  %v4736_v16 = vcombine.high %v12350_v20, %v3814_v12 }
 0x473   : > { %v9747_v14 = vpack.c.bf16 %v6009_v0, %v6009_v0  ;;  %v9763_v18 = vpack.c.bf16 %v6010_v27, %v6010_v27  ;;  %v4683_v44 = vcombine.low %v4659_v30, %v4675_v9  ;;  %v4684_v56 = vcombine.high %v4659_v30, %v4675_v9  ;;  %v12426_v30 = vpop.permute.xlu1 %6493 }
 0x474   : > { %v4699_v15 = vcombine.low %v4666_v3, %v4682_v42  ;;  %v4700_v35 = vcombine.high %v4666_v3, %v4682_v42  ;;  %6282 = vst.msk [vmem:[%s11560_s25 + $0x3c] sm:$0xf] %vm3490_vm1, %v9715_v22  ;;  %6298 = vst.msk [vmem:[%s11560_s25 + $0x7c] sm:$0xf] %vm3490_vm1, %v9731_v1  ;;  %v7427_v38 = vcombine.low %v12638_v29, %v6540_v48 }
 0x475   : > { %6314 = vst.msk [vmem:[%s11560_s25 + $0xbc] sm:$0xf] %vm3490_vm1, %v9747_v14  ;;  %6330 = vst.msk [vmem:[%s11560_s25 + $0xfc] sm:$0xf] %vm3490_vm1, %v9763_v18  ;;  %v7428_v11 = vcombine.high %v12638_v29, %v6540_v48  ;;  %v4691_v4 = vrot.slane %v4683_v44, %v10703_v17  ;;  %v4698_v62 = vrot.slane %v4684_v56, %v10703_v17 }
 0x476   : > { %v4707_v36 = vrot.slane %v4699_v15, %v10703_v17  ;;  %v4714_v57 = vrot.slane %v4700_v35, %v10703_v17  ;;  %v4743_v59 = vrot.slane %v4735_v8, %v10689_v46  ;;  %v4750_v40 = vrot.slane %v4736_v16, %v10689_v46  ;;  %v6588_v15 = vpop.permute.xlu0 %6587 }
 0x477   : > { %v12417_v19 = vrot.slane %v7427_v38, %v10689_v46  ;;  %v12420_v20 = vrot.slane %v7428_v11, %v10689_v46  ;;  %v5739_v52 = vcombine.low %v4691_v4, %v4698_v62  ;;  %v9451_v29 = vcombine.high %v4691_v4, %v4698_v62  ;;  %v6542_v56 = vpop.permute.xlu1 %6541 }
 0x478   : > { %v5755_v33 = vcombine.low %v4707_v36, %v4714_v57  ;;  %v9452_v49 = vcombine.high %v4707_v36, %v4714_v57  ;;  %v4751_v34 = vcombine.low %v4727_v21, %v4743_v59  ;;  %v4752_v47 = vcombine.high %v4727_v21, %v4743_v59 }
 0x479   : > { %v4767_v61 = vcombine.low %v4734_v37, %v4750_v40  ;;  %v4768_v39 = vcombine.high %v4734_v37, %v4750_v40  ;;  %v5746_v7 = vrot.slane %v5739_v52, %v10689_v46  ;;  %v5754_v13 = vrot.slane %v9451_v29, %v10689_v46 }
 0x47a   : > { %v5762_v6 = vrot.slane %v5755_v33, %v10689_v46  ;;  %v5770_v10 = vrot.slane %v9452_v49, %v10689_v46  ;;  %v4759_v3 = vrot.slane %v4751_v34, %v10703_v17  ;;  %v4766_v55 = vrot.slane %v4752_v47, %v10703_v17 }
 0x47b   : > { %v4775_v26 = vrot.slane %v4767_v61, %v10703_v17  ;;  %v4782_v25 = vrot.slane %v4768_v39, %v10703_v17  ;;  %v5771_v45 = vcombine.low %v5746_v7, %v5754_v13  ;;  %v5772_v23 = vcombine.high %v5746_v7, %v5754_v13 }
 0x47c   : > { %v5787_v43 = vcombine.low %v5762_v6, %v5770_v10  ;;  %v5788_v41 = vcombine.high %v5762_v6, %v5770_v10  ;;  %v5807_v58 = vcombine.low %v4759_v3, %v4766_v55  ;;  %v9453_v63 = vcombine.high %v4759_v3, %v4766_v55  ;;  %v6590_v3 = vpop.permute.xlu1 %6589  ;;  %v6592_v55 = vpop.permute.xlu0 %6591 }
 0x47d   : > { %v5823_v28 = vcombine.low %v4775_v26, %v4782_v25  ;;  %v9454_v0 = vcombine.high %v4775_v26, %v4782_v25  ;;  %v5779_v27 = vrot.slane %v5771_v45, %v10703_v17  ;;  %v5786_v21 = vrot.slane %v5772_v23, %v10703_v17 }
 0x47e   : > { %v5795_v37 = vrot.slane %v5787_v43, %v10703_v17  ;;  %v5802_v9 = vrot.slane %v5788_v41, %v10703_v17  ;;  %v5814_v42 = vrot.slane %v5807_v58, %v10689_v46  ;;  %v5822_v12 = vrot.slane %v9453_v63, %v10689_v46 }
 0x47f   : > { %v5830_v48 = vrot.slane %v5823_v28, %v10689_v46  ;;  %v5838_v22 = vrot.slane %v9454_v0, %v10689_v46  ;;  %v7495_v29 = vcombine.low %v12639_v32, %v6542_v56  ;;  %v7496_v33 = vcombine.high %v12639_v32, %v6542_v56 }
 0x480   : > { %v5803_v1 = vcombine.low %v5779_v27, %v5795_v37  ;;  %v5804_v14 = vcombine.high %v5779_v27, %v5795_v37  ;;  %v5805_v18 = vcombine.low %v5786_v21, %v5802_v9  ;;  %v5806_v44 = vcombine.high %v5786_v21, %v5802_v9 }
 0x481   : > { %v5839_v35 = vcombine.low %v5814_v42, %v5822_v12  ;;  %v5840_v8 = vcombine.high %v5814_v42, %v5822_v12  ;;  %v5855_v16 = vcombine.low %v5830_v48, %v5838_v22  ;;  %v5856_v38 = vcombine.high %v5830_v48, %v5838_v22 }
 0x482   : > { %v9712_v11 = vpack.c.bf16 %v5803_v1, %v5803_v1  ;;  %v9728_v4 = vpack.c.bf16 %v5804_v14, %v5804_v14  ;;  %v9744_v62 = vpack.c.bf16 %v5805_v18, %v5805_v18  ;;  %v9760_v36 = vpack.c.bf16 %v5806_v44, %v5806_v44 }
 0x483   : > { %v5847_v57 = vrot.slane %v5839_v35, %v10703_v17  ;;  %v5854_v59 = vrot.slane %v5840_v8, %v10703_v17  ;;  %v5863_v40 = vrot.slane %v5855_v16, %v10703_v17  ;;  %v5870_v52 = vrot.slane %v5856_v38, %v10703_v17 }
 0x484   : > { %6279 = vst.msk [vmem:[%s11560_s25 + $0x30] sm:$0xf] %vm3490_vm1, %v9712_v11  ;;  %6295 = vst.msk [vmem:[%s11560_s25 + $0x70] sm:$0xf] %vm3490_vm1, %v9728_v4  ;;  %v7443_v49 = vcombine.low %v12378_v24, %v6588_v15  ;;  %v7444_v34 = vcombine.high %v12378_v24, %v6588_v15  ;;  %v7503_v13 = vrot.slane %v7495_v29, %v10689_v46 }
 0x485   : > { %6311 = vst.msk [vmem:[%s11560_s25 + $0xb0] sm:$0xf] %vm3490_vm1, %v9744_v62  ;;  %6327 = vst.msk [vmem:[%s11560_s25 + $0xf0] sm:$0xf] %vm3490_vm1, %v9760_v36  ;;  %v5871_v47 = vcombine.low %v5847_v57, %v5863_v40  ;;  %v5872_v61 = vcombine.high %v5847_v57, %v5863_v40  ;;  %v5873_v39 = vcombine.low %v5854_v59, %v5870_v52 }
 0x486   : > { %v5874_v7 = vcombine.high %v5854_v59, %v5870_v52  ;;  %v7510_v6 = vrot.slane %v7496_v33, %v10689_v46  ;;  %v7451_v10 = vrot.slane %v7443_v49, %v10689_v46  ;;  %v7458_v32 = vrot.slane %v7444_v34, %v10689_v46 }
 0x487   : > { %v9713_v26 = vpack.c.bf16 %v5871_v47, %v5871_v47  ;;  %v9729_v24 = vpack.c.bf16 %v5872_v61, %v5872_v61  ;;  %v9745_v25 = vpack.c.bf16 %v5873_v39, %v5873_v39  ;;  %v7511_v63 = vcombine.low %v12426_v30, %v6590_v3 }
 0x488   : > { %v9761_v45 = vpack.c.bf16 %v5874_v7, %v5874_v7  ;;  %v7459_v23 = vcombine.low %v12417_v19, %v7451_v10  ;;  %v7460_v43 = vcombine.high %v12417_v19, %v7451_v10  ;;  %v7475_v41 = vcombine.low %v12420_v20, %v7458_v32 }
 0x489   : > { %v7476_v58 = vcombine.high %v12420_v20, %v7458_v32  ;;  %6280 = vst.msk [vmem:[%s11560_s25 + $0x34] sm:$0xf] %vm3490_vm1, %v9713_v26  ;;  %6296 = vst.msk [vmem:[%s11560_s25 + $0x74] sm:$0xf] %vm3490_vm1, %v9729_v24  ;;  %v7512_v28 = vcombine.high %v12426_v30, %v6590_v3  ;;  %v7579_v0 = vcombine.low %v12262_v2, %v6592_v55 }
 0x48a   : > { %6312 = vst.msk [vmem:[%s11560_s25 + $0xb4] sm:$0xf] %vm3490_vm1, %v9745_v25  ;;  %6328 = vst.msk [vmem:[%s11560_s25 + $0xf4] sm:$0xf] %vm3490_vm1, %v9761_v45  ;;  %v7580_v19 = vcombine.high %v12262_v2, %v6592_v55  ;;  %v7467_v27 = vrot.slane %v7459_v23, %v10703_v17  ;;  %v7474_v20 = vrot.slane %v7460_v43, %v10703_v17 }
 0x48b   : > { %v7483_v21 = vrot.slane %v7475_v41, %v10703_v17  ;;  %v7490_v37 = vrot.slane %v7476_v58, %v10703_v17  ;;  %v7519_v9 = vrot.slane %v7511_v63, %v10689_v46  ;;  %v7526_v42 = vrot.slane %v7512_v28, %v10689_v46 }
 0x48c   : > { %v12483_v12 = vrot.slane %v7579_v0, %v10689_v46  ;;  %v12486_v30 = vrot.slane %v7580_v19, %v10689_v46  ;;  %v8515_v48 = vcombine.low %v7467_v27, %v7474_v20  ;;  %v9558_v2 = vcombine.high %v7467_v27, %v7474_v20 }
 0x48d   : > { %v8531_v22 = vcombine.low %v7483_v21, %v7490_v37  ;;  %v9559_v1 = vcombine.high %v7483_v21, %v7490_v37  ;;  %v7527_v14 = vcombine.low %v7503_v13, %v7519_v9  ;;  %v7528_v18 = vcombine.high %v7503_v13, %v7519_v9 }
 0x48e   : > { %v7543_v44 = vcombine.low %v7510_v6, %v7526_v42  ;;  %v7544_v56 = vcombine.high %v7510_v6, %v7526_v42  ;;  %v8522_v15 = vrot.slane %v8515_v48, %v10689_v46  ;;  %v8530_v35 = vrot.slane %v9558_v2, %v10689_v46 }
 0x48f   : > { %v8538_v8 = vrot.slane %v8531_v22, %v10689_v46  ;;  %v8546_v16 = vrot.slane %v9559_v1, %v10689_v46  ;;  %v7535_v38 = vrot.slane %v7527_v14, %v10703_v17  ;;  %v7542_v11 = vrot.slane %v7528_v18, %v10703_v17  ;;  %v6594_v18 = vpop.permute.xlu1 %6593 }
 0x490   : > { %v7551_v4 = vrot.slane %v7543_v44, %v10703_v17  ;;  %v7558_v62 = vrot.slane %v7544_v56, %v10703_v17  ;;  %v8547_v36 = vcombine.low %v8522_v15, %v8530_v35  ;;  %v8548_v57 = vcombine.high %v8522_v15, %v8530_v35 }
 0x491   : > { %v8563_v59 = vcombine.low %v8538_v8, %v8546_v16  ;;  %v8564_v40 = vcombine.high %v8538_v8, %v8546_v16  ;;  %v8583_v52 = vcombine.low %v7535_v38, %v7542_v11  ;;  %v9560_v29 = vcombine.high %v7535_v38, %v7542_v11 }
 0x492   : > { %v8599_v33 = vcombine.low %v7551_v4, %v7558_v62  ;;  %v9561_v49 = vcombine.high %v7551_v4, %v7558_v62  ;;  %v8555_v34 = vrot.slane %v8547_v36, %v10703_v17  ;;  %v8562_v47 = vrot.slane %v8548_v57, %v10703_v17 }
 0x493   : > { %v8571_v61 = vrot.slane %v8563_v59, %v10703_v17  ;;  %v8578_v39 = vrot.slane %v8564_v40, %v10703_v17  ;;  %v8590_v7 = vrot.slane %v8583_v52, %v10689_v46  ;;  %v8598_v13 = vrot.slane %v9560_v29, %v10689_v46 }
 0x494   : > { %v8606_v6 = vrot.slane %v8599_v33, %v10689_v46  ;;  %v8614_v10 = vrot.slane %v9561_v49, %v10689_v46  ;;  %v7595_v20 = vcombine.low %v12369_v54, %v12483_v12  ;;  %v7596_v21 = vcombine.high %v12369_v54, %v12483_v12 }
 0x495   : > { %v8579_v32 = vcombine.low %v8555_v34, %v8571_v61  ;;  %v8580_v3 = vcombine.high %v8555_v34, %v8571_v61  ;;  %v8581_v55 = vcombine.low %v8562_v47, %v8578_v39  ;;  %v8582_v26 = vcombine.high %v8562_v47, %v8578_v39 }
 0x496   : > { %v8615_v24 = vcombine.low %v8590_v7, %v8598_v13  ;;  %v8616_v25 = vcombine.high %v8590_v7, %v8598_v13  ;;  %v8631_v45 = vcombine.low %v8606_v6, %v8614_v10  ;;  %v8632_v23 = vcombine.high %v8606_v6, %v8614_v10 }
 0x497   : > { %v9776_v43 = vpack.c.bf16 %v8579_v32, %v8579_v32  ;;  %v9792_v41 = vpack.c.bf16 %v8580_v3, %v8580_v3  ;;  %v9808_v58 = vpack.c.bf16 %v8581_v55, %v8581_v55  ;;  %v9824_v63 = vpack.c.bf16 %v8582_v26, %v8582_v26 }
 0x498   : > { %v8623_v28 = vrot.slane %v8615_v24, %v10703_v17  ;;  %v8630_v0 = vrot.slane %v8616_v25, %v10703_v17  ;;  %v8639_v19 = vrot.slane %v8631_v45, %v10703_v17  ;;  %v8646_v27 = vrot.slane %v8632_v23, %v10703_v17 }
 0x499   : > { %9055 = vst.msk [vmem:[%s11626_s28 + $0x30] sm:$0xf] %vm3490_vm1, %v9776_v43  ;;  %9071 = vst.msk [vmem:[%s11626_s28 + $0x70] sm:$0xf] %vm3490_vm1, %v9792_v41  ;;  %v7611_v37 = vcombine.low %v12372_v60, %v12486_v30  ;;  %v7612_v9 = vcombine.high %v12372_v60, %v12486_v30  ;;  %v7603_v1 = vrot.slane %v7595_v20, %v10703_v17 }
 0x49a   : > { %9087 = vst.msk [vmem:[%s11626_s28 + $0xb0] sm:$0xf] %vm3490_vm1, %v9808_v58  ;;  %9103 = vst.msk [vmem:[%s11626_s28 + $0xf0] sm:$0xf] %vm3490_vm1, %v9824_v63  ;;  %v8647_v42 = vcombine.low %v8623_v28, %v8639_v19  ;;  %v8648_v48 = vcombine.high %v8623_v28, %v8639_v19  ;;  %v8649_v2 = vcombine.low %v8630_v0, %v8646_v27 }
 0x49b   : > { %v8650_v22 = vcombine.high %v8630_v0, %v8646_v27  ;;  %v7610_v14 = vrot.slane %v7596_v21, %v10703_v17  ;;  %v7619_v54 = vrot.slane %v7611_v37, %v10703_v17  ;;  %v7626_v12 = vrot.slane %v7612_v9, %v10703_v17 }
 0x49c   : > { %v9777_v44 = vpack.c.bf16 %v8647_v42, %v8647_v42  ;;  %v9793_v56 = vpack.c.bf16 %v8648_v48, %v8648_v48  ;;  %v9809_v60 = vpack.c.bf16 %v8649_v2, %v8649_v2  ;;  %v7647_v38 = vcombine.low %v12306_v5, %v6594_v18 }
 0x49d   : > { %v9825_v30 = vpack.c.bf16 %v8650_v22, %v8650_v22  ;;  %v8651_v15 = vcombine.low %v7603_v1, %v7610_v14  ;;  %v9562_v35 = vcombine.high %v7603_v1, %v7610_v14  ;;  %v8667_v8 = vcombine.low %v7619_v54, %v7626_v12 }
 0x49e   : > { %v9563_v16 = vcombine.high %v7619_v54, %v7626_v12  ;;  %9056 = vst.msk [vmem:[%s11626_s28 + $0x34] sm:$0xf] %vm3490_vm1, %v9777_v44  ;;  %9072 = vst.msk [vmem:[%s11626_s28 + $0x74] sm:$0xf] %vm3490_vm1, %v9793_v56  ;;  %v7648_v11 = vcombine.high %v12306_v5, %v6594_v18  ;;  %v7639_v59 = vrot.slane %v7631_v50, %v10689_v46 }
 0x49f   : > { %9088 = vst.msk [vmem:[%s11626_s28 + $0xb4] sm:$0xf] %vm3490_vm1, %v9809_v60  ;;  %9104 = vst.msk [vmem:[%s11626_s28 + $0xf4] sm:$0xf] %vm3490_vm1, %v9825_v30  ;;  %v8658_v4 = vrot.slane %v8651_v15, %v10689_v46  ;;  %v8666_v62 = vrot.slane %v9562_v35, %v10689_v46  ;;  %v8674_v36 = vrot.slane %v8667_v8, %v10689_v46 }
 0x4a0   : > { %v8682_v57 = vrot.slane %v9563_v16, %v10689_v46  ;;  %v7646_v40 = vrot.slane %v7632_v51, %v10689_v46  ;;  %v7655_v5 = vrot.slane %v7647_v38, %v10689_v46  ;;  %v7662_v52 = vrot.slane %v7648_v11, %v10689_v46 }
 0x4a1   : > { %v8683_v29 = vcombine.low %v8658_v4, %v8666_v62  ;;  %v8684_v33 = vcombine.high %v8658_v4, %v8666_v62 }
 0x4a2   : > { %v8699_v49 = vcombine.low %v8674_v36, %v8682_v57  ;;  %v8700_v34 = vcombine.high %v8674_v36, %v8682_v57  ;;  %v7663_v47 = vcombine.low %v7639_v59, %v7655_v5  ;;  %v7664_v61 = vcombine.high %v7639_v59, %v7655_v5 }
 0x4a3   : > { %v7679_v39 = vcombine.low %v7646_v40, %v7662_v52  ;;  %v7680_v7 = vcombine.high %v7646_v40, %v7662_v52  ;;  %v8691_v13 = vrot.slane %v8683_v29, %v10703_v17  ;;  %v8698_v50 = vrot.slane %v8684_v33, %v10703_v17 }
 0x4a4   : > { %v8707_v6 = vrot.slane %v8699_v49, %v10703_v17  ;;  %v8714_v31 = vrot.slane %v8700_v34, %v10703_v17  ;;  %v7671_v53 = vrot.slane %v7663_v47, %v10703_v17  ;;  %v7678_v51 = vrot.slane %v7664_v61, %v10703_v17 }
 0x4a5   : > { %v7687_v10 = vrot.slane %v7679_v39, %v10703_v17  ;;  %v7694_v32 = vrot.slane %v7680_v7, %v10703_v17 }
 0x4a6   : > { %v8715_v3 = vcombine.low %v8691_v13, %v8707_v6  ;;  %v8716_v55 = vcombine.high %v8691_v13, %v8707_v6  ;;  %v8717_v26 = vcombine.low %v8698_v50, %v8714_v31  ;;  %v8718_v24 = vcombine.high %v8698_v50, %v8714_v31 }
 0x4a7   : > { %v8719_v25 = vcombine.low %v7671_v53, %v7678_v51  ;;  %v9564_v45 = vcombine.high %v7671_v53, %v7678_v51  ;;  %v8735_v23 = vcombine.low %v7687_v10, %v7694_v32  ;;  %v9565_v43 = vcombine.high %v7687_v10, %v7694_v32 }
 0x4a8   : > { %v9778_v41 = vpack.c.bf16 %v8715_v3, %v8715_v3  ;;  %v9794_v58 = vpack.c.bf16 %v8716_v55, %v8716_v55  ;;  %v9810_v63 = vpack.c.bf16 %v8717_v26, %v8717_v26  ;;  %v9826_v28 = vpack.c.bf16 %v8718_v24, %v8718_v24 }
 0x4a9   : > { %v8726_v0 = vrot.slane %v8719_v25, %v10689_v46  ;;  %v8734_v19 = vrot.slane %v9564_v45, %v10689_v46  ;;  %v8742_v27 = vrot.slane %v8735_v23, %v10689_v46  ;;  %v8750_v20 = vrot.slane %v9565_v43, %v10689_v46 }
 0x4aa   : > { %9057 = vst.msk [vmem:[%s11626_s28 + $0x38] sm:$0xf] %vm3490_vm1, %v9778_v41  ;;  %9073 = vst.msk [vmem:[%s11626_s28 + $0x78] sm:$0xf] %vm3490_vm1, %v9794_v58 }
 0x4ab   : > { %9089 = vst.msk [vmem:[%s11626_s28 + $0xb8] sm:$0xf] %vm3490_vm1, %v9810_v63  ;;  %9105 = vst.msk [vmem:[%s11626_s28 + $0xf8] sm:$0xf] %vm3490_vm1, %v9826_v28  ;;  %v8751_v21 = vcombine.low %v8726_v0, %v8734_v19  ;;  %v8752_v37 = vcombine.high %v8726_v0, %v8734_v19  ;;  %v8767_v9 = vcombine.low %v8742_v27, %v8750_v20 }
 0x4ac   : > { %v8768_v42 = vcombine.high %v8742_v27, %v8750_v20 }
 0x4ad   : > { %v8759_v48 = vrot.slane %v8751_v21, %v10703_v17  ;;  %v8766_v46 = vrot.slane %v8752_v37, %v10703_v17  ;;  %v8775_v2 = vrot.slane %v8767_v9, %v10703_v17 }
 0x4ae   : > { %v8782_v22 = vrot.slane %v8768_v42, %v10703_v17 }
 0x4af   : > { %v8783_v1 = vcombine.low %v8759_v48, %v8775_v2  ;;  %v8784_v14 = vcombine.high %v8759_v48, %v8775_v2 }
 0x4b0   : > { %v8785_v54 = vcombine.low %v8766_v46, %v8782_v22  ;;  %v8786_v12 = vcombine.high %v8766_v46, %v8782_v22 }
 0x4b1   : > { %v9779_v18 = vpack.c.bf16 %v8783_v1, %v8783_v1  ;;  %v9795_v44 = vpack.c.bf16 %v8784_v14, %v8784_v14 }
 0x4b2   : > { %v9811_v56 = vpack.c.bf16 %v8785_v54, %v8785_v54  ;;  %v9827_v60 = vpack.c.bf16 %v8786_v12, %v8786_v12 }
 0x4b3   : > { %9058 = vst.msk [vmem:[%s11626_s28 + $0x3c] sm:$0xf] %vm3490_vm1, %v9779_v18  ;;  %9074 = vst.msk [vmem:[%s11626_s28 + $0x7c] sm:$0xf] %vm3490_vm1, %v9795_v44 }
 0x4b4   : > { %9090 = vst.msk [vmem:[%s11626_s28 + $0xbc] sm:$0xf] %vm3490_vm1, %v9811_v56  ;;  %9106 = vst.msk [vmem:[%s11626_s28 + $0xfc] sm:$0xf] %vm3490_vm1, %v9827_v60 }
 0x4b5 PF: > { %s22_s19 = sadd.s32 1, %s10011_s19   ;;  %s12647_s17 = smov %s10007_s18 }
 0x4b6   : > { %p19_p5 = scmp.ge.s32.totalorder %s22_s19, 4   ;;  %s12648_s18 = smov %s12650_s20 }
 0x4b8   :  { %21 = sbr.rel (!%p19_p5) target bundleno = 2 (0x2), region = 110 }

</bundles_post_ra>
